<compile_context>
chip_gen: v7x
topology: tpu7x:2x2x1
jax: 0.10.0
libtpu: 0.0.40
codegen_flags: <defaults>
</compile_context>

<pallas_src>
import math

import jax
import jax.numpy as jnp
from jax.experimental import pallas as pl
from jax.experimental.pallas import tpu as pltpu

_EPS = 1e-5
_NEG = -1e9

_ATTN_PARAMS = ("gamma", "beta", "wq", "bq", "wk", "bk", "wv", "bv", "wo", "bo")
_DENSE_PARAMS = ("gamma", "beta", "w1", "b1", "w2", "b2")


# ----------------------------- in-kernel helpers ----------------------------

def _layernorm(x, gamma, beta):
    mu = jnp.mean(x, axis=-1, keepdims=True)
    xc = x - mu
    var = jnp.mean(xc * xc, axis=-1, keepdims=True)
    return xc * jax.lax.rsqrt(var + _EPS) * gamma + beta


def _softmax_rows(s):
    s = s - jnp.max(s, axis=-1, keepdims=True)
    p = jnp.exp(s)
    # reciprocal on the EUP slot instead of a VALU divide
    return p * pl.reciprocal(jnp.sum(p, axis=-1, keepdims=True), approx=True)


def _attn_residual(x, src, refs, bias, num_heads, self_attn):
    """x + OutProj(MHA(q=LN(x), k=v=src)) — the Residual(Attention) block.

    Per-head projection weights arrive pre-split along a leading head axis
    ((H, D, dh) for q/k/v, (H, dh, D) for the out-proj), so head handling is
    leading-dim ref indexing + accumulation into a full-width (Lq, D) buffer:
    no lane slicing, no concatenate, only clean 2D MXU matmuls.
    """
    gamma, beta, wq, bq, wk, bk, wv, bv, wo, bo = refs
    xn = _layernorm(x, gamma[...], beta[...])
    src_v = xn if self_attn else src          # Residual only normalizes arg 0
    xn_b = xn.astype(jnp.bfloat16)
    src_b = src_v.astype(jnp.bfloat16)

    dh = wq.shape[-1]
    scale = 1.0 / math.sqrt(dh)

    o = jnp.zeros_like(x)                     # (Lq, D) f32 head-output accumulator
    for h in range(num_heads):                # static unroll, H small
        qh = (jnp.dot(xn_b, wq[h], preferred_element_type=jnp.float32)
              + bq[h]).astype(jnp.bfloat16)                      # (Lq, dh)
        kh = (jnp.dot(src_b, wk[h], preferred_element_type=jnp.float32)
              + bk[h]).astype(jnp.bfloat16)                      # (Lk, dh)
        vh = (jnp.dot(src_b, wv[h], preferred_element_type=jnp.float32)
              + bv[h]).astype(jnp.bfloat16)                      # (Lk, dh)
        # q . k^T without materializing the transpose ("nt" dot_general)
        s = jax.lax.dot_general(qh, kh, (((1,), (1,)), ((), ())),
                                preferred_element_type=jnp.float32) * scale
        if bias is not None:
            s = s + bias
        p = _softmax_rows(s).astype(jnp.bfloat16)                # (Lq, Lk)
        oh = jnp.dot(p, vh, preferred_element_type=jnp.float32)  # (Lq, dh)
        o = o + jnp.dot(oh.astype(jnp.bfloat16), wo[h],
                        preferred_element_type=jnp.float32)      # (Lq, D)
    return x + o + bo[...]


def _dense_residual(x, refs):
    """x + W2 @ gelu(W1 @ LN(x) + b1) + b2."""
    gamma, beta, w1, b1, w2, b2 = refs
    xn = _layernorm(x, gamma[...], beta[...])
    h = jnp.dot(xn.astype(jnp.bfloat16), w1[...],
                preferred_element_type=jnp.float32) + b1[...]
    # TODO(synk): nn.GELU defaults to the exact erf form; the tanh approximation
    # is used here (erf has no guaranteed Mosaic lowering, and the bf16 MXU path
    # already dominates any erf/tanh difference).
    h = jax.nn.gelu(h)
    y = jnp.dot(h.astype(jnp.bfloat16), w2[...],
                preferred_element_type=jnp.float32) + b2[...]
    return x + y


# ------------------------------- fused kernel -------------------------------

def _make_layer_kernel(num_heads, mask_attention, bidirectional_ca):
    na, nd = len(_ATTN_PARAMS), len(_DENSE_PARAMS)

    def kernel(*refs):
        it = iter(refs)
        q_ref = next(it)
        kv_ref = next(it)
        mask_ref = next(it) if mask_attention else None

        def take(n):
            return tuple(next(it) for _ in range(n))

        p_qca = take(na)
        p_qsa = take(na)
        p_qd = take(nd)
        if bidirectional_ca:
            p_kvca = take(na)
            p_kvd = take(nd)
        q_out_ref = next(it)
        kv_out_ref = next(it) if bidirectional_ca else None

        x_q = q_ref[0].astype(jnp.float32)       # (Lq, D)
        x_kv = kv_ref[0].astype(jnp.float32)     # (Lk, D)

        if mask_attention:
            m = mask_ref[0].astype(jnp.int32)    # (Lq, Lk), 1 == "do NOT attend"
            lk = m.shape[-1]
            full_row = jnp.sum(m, axis=-1, keepdims=True) == lk
            masked = jnp.logical_and(m != 0, jnp.logical_not(full_row))
            bias_q = jnp.where(masked, jnp.float32(_NEG), jnp.float32(0.0))
            # transposed mask for kv cross-attention derived in-kernel
            bias_kv = bias_q.T if bidirectional_ca else None
        else:
            bias_q = None
            bias_kv = None

        # q path: cross-attn -> self-attn (no mask, no extra kv DMA) -> MLP
        x_q = _attn_residual(x_q, x_kv, p_qca, bias_q, num_heads, self_attn=False)
        x_q = _attn_residual(x_q, None, p_qsa, None, num_heads, self_attn=True)
        x_q = _dense_residual(x_q, p_qd)
        q_out_ref[0] = x_q.astype(q_out_ref.dtype)

        if bidirectional_ca:
            x_kv = _attn_residual(x_kv, x_q, p_kvca, bias_kv, num_heads,
                                  self_attn=False)
            x_kv = _dense_residual(x_kv, p_kvd)
            kv_out_ref[0] = x_kv.astype(kv_out_ref.dtype)

    return kernel


# ------------------------------ pallas wrapper -------------------------------

def _full_spec(shape):
    n = len(shape)
    return pl.BlockSpec(shape, lambda b: (0,) * n)


def _per_batch_spec(shape):
    rest = tuple(shape[1:])
    n = len(rest)
    return pl.BlockSpec((1,) + rest, lambda b: (b,) + (0,) * n)


def _prep_attn_params(p, num_heads):
    """Split canonical (D,D)/(1,D) attention params per head; weights -> bf16."""
    d = p["wq"].shape[0]
    dh = d // num_heads

    def split_w_in(w):       # (D, D) -> (H, D, dh): columns of head h
        return w.reshape(d, num_heads, dh).transpose(1, 0, 2).astype(jnp.bfloat16)

    def split_b(b):          # (1, D) -> (H, 1, dh)
        return b.reshape(num_heads, 1, dh).astype(jnp.float32)

    wo = p["wo"].reshape(num_heads, dh, d).astype(jnp.bfloat16)   # rows of head h
    return (p["gamma"], p["beta"],
            split_w_in(p["wq"]), split_b(p["bq"]),
            split_w_in(p["wk"]), split_b(p["bk"]),
            split_w_in(p["wv"]), split_b(p["bv"]),
            wo, p["bo"])


def _prep_dense_params(p):
    return (p["gamma"], p["beta"],
            p["w1"].astype(jnp.bfloat16), p["b1"],
            p["w2"].astype(jnp.bfloat16), p["b2"])


def maskformer_decoder_layer(q, kv, attn_mask, params, *, num_heads=4,
                             mask_attention=True, bidirectional_ca=True):
    """Fused forward of hepattn MaskformerDecoderLayer: one pallas_call per layer."""
    B, Lq, D = q.shape
    Lk = kv.shape[1]

    inputs = [q, kv]
    in_specs = [_per_batch_spec(q.shape), _per_batch_spec(kv.shape)]

    if mask_attention:
        assert attn_mask is not None, "attn mask must be provided for mask attention"
        # bool (B, 1, Lq, Lk) -> int8 (B, Lq, Lk): 4x less DMA than an f32 bias;
        # the bool->additive conversion + fully-masked-row fix happen in-kernel.
        mask_i8 = attn_mask[:, 0].astype(jnp.int8)
        inputs.append(mask_i8)
        in_specs.append(_per_batch_spec(mask_i8.shape))

    def add(block_params):
        for arr in block_params:
            inputs.append(arr)
            in_specs.append(_full_spec(arr.shape))

    add(_prep_attn_params(params["q_ca"], num_heads))
    add(_prep_attn_params(params["q_sa"], num_heads))
    add(_prep_dense_params(params["q_dense"]))
    if bidirectional_ca:
        add(_prep_attn_params(params["kv_ca"], num_heads))
        add(_prep_dense_params(params["kv_dense"]))

    out_shape = [jax.ShapeDtypeStruct((B, Lq, D), q.dtype)]
    out_specs = [_per_batch_spec((B, Lq, D))]
    if bidirectional_ca:
        out_shape.append(jax.ShapeDtypeStruct((B, Lk, D), kv.dtype))
        out_specs.append(_per_batch_spec((B, Lk, D)))

    # TODO(synk): kv_mask is asserted to be None in the reference module, so it
    # is not supported here either.
    kernel = _make_layer_kernel(num_heads, mask_attention, bidirectional_ca)
    outs = pl.pallas_call(
        kernel,
        out_shape=tuple(out_shape),
        grid=(B,),
        in_specs=in_specs,
        out_specs=tuple(out_specs),
        compiler_params=pltpu.CompilerParams(
            dimension_semantics=("parallel",)),   # batch rows are independent
    )(*inputs)

    if not isinstance(outs, (tuple, list)):
        outs = (outs,)
    if bidirectional_ca:
        return outs[0], outs[1]
    return outs[0], kv


# ----------------------------- parameter init -------------------------------

def _linear(key, din, dout, scale=0.05):
    kw, kb = jax.random.split(key)
    w = scale * jax.random.normal(kw, (din, dout), jnp.float32)
    b = scale * jax.random.normal(kb, (1, dout), jnp.float32)
    return w, b


def init_attn_params(key, dim):
    ks = jax.random.split(key, 4)
    p = {"gamma": jnp.ones((1, dim), jnp.float32),
         "beta": jnp.zeros((1, dim), jnp.float32)}
    for name, k in zip(("q", "k", "v", "o"), ks):
        w, b = _linear(k, dim, dim)
        p[f"w{name}"] = w
        p[f"b{name}"] = b
    return p


def init_dense_params(key, dim, hidden):
    k1, k2 = jax.random.split(key)
    w1, b1 = _linear(k1, dim, hidden)
    w2, b2 = _linear(k2, hidden, dim)
    return {"gamma": jnp.ones((1, dim), jnp.float32),
            "beta": jnp.zeros((1, dim), jnp.float32),
            "w1": w1, "b1": b1, "w2": w2, "b2": b2}


def init_layer_params(key, dim, hidden):
    ks = jax.random.split(key, 5)
    return {
        "q_ca": init_attn_params(ks[0], dim),
        "q_sa": init_attn_params(ks[1], dim),
        "q_dense": init_dense_params(ks[2], dim, hidden),
        "kv_ca": init_attn_params(ks[3], dim),
        "kv_dense": init_dense_params(ks[4], dim, hidden),
    }


# ------------------------- pure-JAX f32 reference ---------------------------

def _reference_layer(q, kv, attn_mask, params, num_heads, mask_attention,
                     bidirectional_ca):
    def layernorm(x, g, b):
        mu = x.mean(-1, keepdims=True)
        var = ((x - mu) ** 2).mean(-1, keepdims=True)
        return (x - mu) * jax.lax.rsqrt(var + _EPS) * g + b

    def attn_block(x, src, p, bias):
        xn = layernorm(x, p["gamma"], p["beta"])
        s_in = xn if src is None else src
        qp = xn @ p["wq"] + p["bq"]
        kp = s_in @ p["wk"] + p["bk"]
        vp = s_in @ p["wv"] + p["bv"]
        b_, lq_, d_ = qp.shape
        lk_ = kp.shape[1]
        dh = d_ // num_heads
        qh = qp.reshape(b_, lq_, num_heads, dh)
        kh = kp.reshape(b_, lk_, num_heads, dh)
        vh = vp.reshape(b_, lk_, num_heads, dh)
        s = jnp.einsum("bqhd,bkhd->bhqk", qh, kh) / math.sqrt(dh)
        if bias is not None:
            s = s + bias[:, None, :, :]
        pr = jax.nn.softmax(s, axis=-1)
        o = jnp.einsum("bhqk,bkhd->bqhd", pr, vh).reshape(b_, lq_, d_)
        return x + o @ p["wo"] + p["bo"]

    def dense_block(x, p):
        xn = layernorm(x, p["gamma"], p["beta"])
        h = jax.nn.gelu(xn @ p["w1"] + p["b1"])
        return x + h @ p["w2"] + p["b2"]

    if mask_attention:
        m = attn_mask[:, 0]
        full = jnp.sum(m, axis=-1, keepdims=True) == m.shape[-1]
        m = jnp.logical_and(m, jnp.logical_not(full))
        bias_q = jnp.where(m, jnp.float32(_NEG), jnp.float32(0.0))
        bias_kv = jnp.swapaxes(bias_q, 1, 2)
    else:
        bias_q = bias_kv = None

    qx = attn_block(q, kv, params["q_ca"], bias_q)
    qx = attn_block(qx, None, params["q_sa"], None)
    qx = dense_block(qx, params["q_dense"])
    if bidirectional_ca:
        kvx = attn_block(kv, qx, params["kv_ca"], bias_kv)
        kvx = dense_block(kvx, params["kv_dense"])
        return qx, kvx
    return qx, kv


# ----------------------------------- main ------------------------------------

if __name__ == "__main__":
    B, Lq, Lk, D, H = 2, 8, 16, 128, 4   # D = 128 keeps outputs lane-dense
    hidden = 2 * D

    key = jax.random.PRNGKey(0)
    kq, kkv, kmask, kparam = jax.random.split(key, 4)

    q = jax.random.normal(kq, (B, Lq, D), jnp.float32)
    kv = jax.random.normal(kkv, (B, Lk, D), jnp.float32)
    attn_mask = jax.random.bernoulli(kmask, 0.5, (B, 1, Lq, Lk))
    # make one row fully masked to exercise the "all-masked -> attend all" fix
    attn_mask = attn_mask.at[0, 0, 0, :].set(True)

    params = init_layer_params(kparam, D, hidden)

    q_out, kv_out = maskformer_decoder_layer(
        q, kv, attn_mask, params, num_heads=H,
        mask_attention=True, bidirectional_ca=True)
    jax.block_until_ready((q_out, kv_out))

    q_ref, kv_ref = _reference_layer(q, kv, attn_mask, params, H, True, True)

    assert q_out.shape == (B, Lq, D) and kv_out.shape == (B, Lk, D)
    assert bool(jnp.all(jnp.isfinite(q_out))) and bool(jnp.all(jnp.isfinite(kv_out)))
    # bf16 MXU operands + approx reciprocal vs the f32 reference -> loose tolerance
    assert bool(jnp.allclose(q_out, q_ref, atol=1e-1, rtol=1e-1)), "q mismatch"
    assert bool(jnp.allclose(kv_out, kv_ref, atol=1e-1, rtol=1e-1)), "kv mismatch"
    print("KERNEL_OK")
</pallas_src>

<mosaic_0001>
module attributes {stable_mosaic.version = 11 : i64} {
  func.func @kernel(%arg0: i32, %arg1: memref<1x8x128xf32, #tpu.memory_space<vmem>>, %arg2: memref<1x16x128xf32, #tpu.memory_space<vmem>>, %arg3: memref<1x8x16xi8, #tpu.memory_space<vmem>>, %arg4: memref<1x128xf32, #tpu.memory_space<vmem>>, %arg5: memref<1x128xf32, #tpu.memory_space<vmem>>, %arg6: memref<4x128x32xbf16, #tpu.memory_space<vmem>>, %arg7: memref<4x1x32xf32, #tpu.memory_space<vmem>>, %arg8: memref<4x128x32xbf16, #tpu.memory_space<vmem>>, %arg9: memref<4x1x32xf32, #tpu.memory_space<vmem>>, %arg10: memref<4x128x32xbf16, #tpu.memory_space<vmem>>, %arg11: memref<4x1x32xf32, #tpu.memory_space<vmem>>, %arg12: memref<4x32x128xbf16, #tpu.memory_space<vmem>>, %arg13: memref<1x128xf32, #tpu.memory_space<vmem>>, %arg14: memref<1x128xf32, #tpu.memory_space<vmem>>, %arg15: memref<1x128xf32, #tpu.memory_space<vmem>>, %arg16: memref<4x128x32xbf16, #tpu.memory_space<vmem>>, %arg17: memref<4x1x32xf32, #tpu.memory_space<vmem>>, %arg18: memref<4x128x32xbf16, #tpu.memory_space<vmem>>, %arg19: memref<4x1x32xf32, #tpu.memory_space<vmem>>, %arg20: memref<4x128x32xbf16, #tpu.memory_space<vmem>>, %arg21: memref<4x1x32xf32, #tpu.memory_space<vmem>>, %arg22: memref<4x32x128xbf16, #tpu.memory_space<vmem>>, %arg23: memref<1x128xf32, #tpu.memory_space<vmem>>, %arg24: memref<1x128xf32, #tpu.memory_space<vmem>>, %arg25: memref<1x128xf32, #tpu.memory_space<vmem>>, %arg26: memref<128x256xbf16, #tpu.memory_space<vmem>>, %arg27: memref<1x256xf32, #tpu.memory_space<vmem>>, %arg28: memref<256x128xbf16, #tpu.memory_space<vmem>>, %arg29: memref<1x128xf32, #tpu.memory_space<vmem>>, %arg30: memref<1x128xf32, #tpu.memory_space<vmem>>, %arg31: memref<1x128xf32, #tpu.memory_space<vmem>>, %arg32: memref<4x128x32xbf16, #tpu.memory_space<vmem>>, %arg33: memref<4x1x32xf32, #tpu.memory_space<vmem>>, %arg34: memref<4x128x32xbf16, #tpu.memory_space<vmem>>, %arg35: memref<4x1x32xf32, #tpu.memory_space<vmem>>, %arg36: memref<4x128x32xbf16, #tpu.memory_space<vmem>>, %arg37: memref<4x1x32xf32, #tpu.memory_space<vmem>>, %arg38: memref<4x32x128xbf16, #tpu.memory_space<vmem>>, %arg39: memref<1x128xf32, #tpu.memory_space<vmem>>, %arg40: memref<1x128xf32, #tpu.memory_space<vmem>>, %arg41: memref<1x128xf32, #tpu.memory_space<vmem>>, %arg42: memref<128x256xbf16, #tpu.memory_space<vmem>>, %arg43: memref<1x256xf32, #tpu.memory_space<vmem>>, %arg44: memref<256x128xbf16, #tpu.memory_space<vmem>>, %arg45: memref<1x128xf32, #tpu.memory_space<vmem>>, %arg46: memref<1x8x128xf32, #tpu.memory_space<vmem>>, %arg47: memref<1x16x128xf32, #tpu.memory_space<vmem>>) attributes {dimension_semantics = [#tpu.dimension_semantics<parallel>], iteration_bounds = array<i64: 2>, scalar_prefetch = 0 : i64, scratch_operands = 0 : i64, tpu.core_type = #tpu.core_type<tc>, window_params = [{transform_indices = @transform_0, window_bounds = array<i64: 1, 8, 128>}, {transform_indices = @transform_1, window_bounds = array<i64: 1, 16, 128>}, {transform_indices = @transform_2, window_bounds = array<i64: 1, 8, 16>}, {pipeline_mode = #tpu.pipeline_mode<synchronous>, transform_indices = @transform_3, window_bounds = array<i64: 1, 128>}, {pipeline_mode = #tpu.pipeline_mode<synchronous>, transform_indices = @transform_4, window_bounds = array<i64: 1, 128>}, {pipeline_mode = #tpu.pipeline_mode<synchronous>, transform_indices = @transform_5, window_bounds = array<i64: 4, 128, 32>}, {pipeline_mode = #tpu.pipeline_mode<synchronous>, transform_indices = @transform_6, window_bounds = array<i64: 4, 1, 32>}, {pipeline_mode = #tpu.pipeline_mode<synchronous>, transform_indices = @transform_7, window_bounds = array<i64: 4, 128, 32>}, {pipeline_mode = #tpu.pipeline_mode<synchronous>, transform_indices = @transform_8, window_bounds = array<i64: 4, 1, 32>}, {pipeline_mode = #tpu.pipeline_mode<synchronous>, transform_indices = @transform_9, window_bounds = array<i64: 4, 128, 32>}, {pipeline_mode = #tpu.pipeline_mode<synchronous>, transform_indices = @transform_10, window_bounds = array<i64: 4, 1, 32>}, {pipeline_mode = #tpu.pipeline_mode<synchronous>, transform_indices = @transform_11, window_bounds = array<i64: 4, 32, 128>}, {pipeline_mode = #tpu.pipeline_mode<synchronous>, transform_indices = @transform_12, window_bounds = array<i64: 1, 128>}, {pipeline_mode = #tpu.pipeline_mode<synchronous>, transform_indices = @transform_13, window_bounds = array<i64: 1, 128>}, {pipeline_mode = #tpu.pipeline_mode<synchronous>, transform_indices = @transform_14, window_bounds = array<i64: 1, 128>}, {pipeline_mode = #tpu.pipeline_mode<synchronous>, transform_indices = @transform_15, window_bounds = array<i64: 4, 128, 32>}, {pipeline_mode = #tpu.pipeline_mode<synchronous>, transform_indices = @transform_16, window_bounds = array<i64: 4, 1, 32>}, {pipeline_mode = #tpu.pipeline_mode<synchronous>, transform_indices = @transform_17, window_bounds = array<i64: 4, 128, 32>}, {pipeline_mode = #tpu.pipeline_mode<synchronous>, transform_indices = @transform_18, window_bounds = array<i64: 4, 1, 32>}, {pipeline_mode = #tpu.pipeline_mode<synchronous>, transform_indices = @transform_19, window_bounds = array<i64: 4, 128, 32>}, {pipeline_mode = #tpu.pipeline_mode<synchronous>, transform_indices = @transform_20, window_bounds = array<i64: 4, 1, 32>}, {pipeline_mode = #tpu.pipeline_mode<synchronous>, transform_indices = @transform_21, window_bounds = array<i64: 4, 32, 128>}, {pipeline_mode = #tpu.pipeline_mode<synchronous>, transform_indices = @transform_22, window_bounds = array<i64: 1, 128>}, {pipeline_mode = #tpu.pipeline_mode<synchronous>, transform_indices = @transform_23, window_bounds = array<i64: 1, 128>}, {pipeline_mode = #tpu.pipeline_mode<synchronous>, transform_indices = @transform_24, window_bounds = array<i64: 1, 128>}, {pipeline_mode = #tpu.pipeline_mode<synchronous>, transform_indices = @transform_25, window_bounds = array<i64: 128, 256>}, {pipeline_mode = #tpu.pipeline_mode<synchronous>, transform_indices = @transform_26, window_bounds = array<i64: 1, 256>}, {pipeline_mode = #tpu.pipeline_mode<synchronous>, transform_indices = @transform_27, window_bounds = array<i64: 256, 128>}, {pipeline_mode = #tpu.pipeline_mode<synchronous>, transform_indices = @transform_28, window_bounds = array<i64: 1, 128>}, {pipeline_mode = #tpu.pipeline_mode<synchronous>, transform_indices = @transform_29, window_bounds = array<i64: 1, 128>}, {pipeline_mode = #tpu.pipeline_mode<synchronous>, transform_indices = @transform_30, window_bounds = array<i64: 1, 128>}, {pipeline_mode = #tpu.pipeline_mode<synchronous>, transform_indices = @transform_31, window_bounds = array<i64: 4, 128, 32>}, {pipeline_mode = #tpu.pipeline_mode<synchronous>, transform_indices = @transform_32, window_bounds = array<i64: 4, 1, 32>}, {pipeline_mode = #tpu.pipeline_mode<synchronous>, transform_indices = @transform_33, window_bounds = array<i64: 4, 128, 32>}, {pipeline_mode = #tpu.pipeline_mode<synchronous>, transform_indices = @transform_34, window_bounds = array<i64: 4, 1, 32>}, {pipeline_mode = #tpu.pipeline_mode<synchronous>, transform_indices = @transform_35, window_bounds = array<i64: 4, 128, 32>}, {pipeline_mode = #tpu.pipeline_mode<synchronous>, transform_indices = @transform_36, window_bounds = array<i64: 4, 1, 32>}, {pipeline_mode = #tpu.pipeline_mode<synchronous>, transform_indices = @transform_37, window_bounds = array<i64: 4, 32, 128>}, {pipeline_mode = #tpu.pipeline_mode<synchronous>, transform_indices = @transform_38, window_bounds = array<i64: 1, 128>}, {pipeline_mode = #tpu.pipeline_mode<synchronous>, transform_indices = @transform_39, window_bounds = array<i64: 1, 128>}, {pipeline_mode = #tpu.pipeline_mode<synchronous>, transform_indices = @transform_40, window_bounds = array<i64: 1, 128>}, {pipeline_mode = #tpu.pipeline_mode<synchronous>, transform_indices = @transform_41, window_bounds = array<i64: 128, 256>}, {pipeline_mode = #tpu.pipeline_mode<synchronous>, transform_indices = @transform_42, window_bounds = array<i64: 1, 256>}, {pipeline_mode = #tpu.pipeline_mode<synchronous>, transform_indices = @transform_43, window_bounds = array<i64: 256, 128>}, {pipeline_mode = #tpu.pipeline_mode<synchronous>, transform_indices = @transform_44, window_bounds = array<i64: 1, 128>}, {transform_indices = @transform_45, window_bounds = array<i64: 1, 8, 128>}, {transform_indices = @transform_46, window_bounds = array<i64: 1, 16, 128>}]} {
    %c0 = arith.constant 0 : index
    %c0_0 = arith.constant 0 : index
    %c0_1 = arith.constant 0 : index
    %0 = vector.load %arg1[%c0, %c0_0, %c0_1] : memref<1x8x128xf32, #tpu.memory_space<vmem>>, vector<1x8x128xf32>
    %1 = vector.shape_cast %0 : vector<1x8x128xf32> to vector<8x128xf32>
    %c0_2 = arith.constant 0 : index
    %c0_3 = arith.constant 0 : index
    %c0_4 = arith.constant 0 : index
    %2 = vector.load %arg2[%c0_2, %c0_3, %c0_4] : memref<1x16x128xf32, #tpu.memory_space<vmem>>, vector<1x16x128xf32>
    %3 = vector.shape_cast %2 : vector<1x16x128xf32> to vector<16x128xf32>
    %c0_5 = arith.constant 0 : index
    %c0_6 = arith.constant 0 : index
    %c0_7 = arith.constant 0 : index
    %4 = vector.load %arg3[%c0_5, %c0_6, %c0_7] : memref<1x8x16xi8, #tpu.memory_space<vmem>>, vector<1x8x16xi8>
    %5 = vector.shape_cast %4 : vector<1x8x16xi8> to vector<8x16xi8>
    %6 = arith.extsi %5 : vector<8x16xi8> to vector<8x16xi32>
    %cst = arith.constant dense<0> : vector<8xi32>
    %7 = vector.multi_reduction <add>, %6, %cst [1] : vector<8x16xi32> to vector<8xi32>
    %8 = vector.shape_cast %7 : vector<8xi32> to vector<8x1xi32>
    %c16_i32 = arith.constant 16 : i32
    %9 = vector.broadcast %c16_i32 : i32 to vector<8x1xi32>
    %10 = arith.cmpi eq, %8, %9 : vector<8x1xi32>
    %c0_i32 = arith.constant 0 : i32
    %11 = vector.broadcast %c0_i32 : i32 to vector<8x16xi32>
    %12 = arith.cmpi ne, %6, %11 : vector<8x16xi32>
    %cst_8 = arith.constant dense<true> : vector<8x1xi1>
    %13 = arith.xori %10, %cst_8 : vector<8x1xi1>
    %14 = vector.broadcast %13 : vector<8x1xi1> to vector<8x16xi1>
    %15 = arith.andi %12, %14 : vector<8x16xi1>
    %cst_9 = arith.constant -1.000000e+09 : f32
    %cst_10 = arith.constant 0.000000e+00 : f32
    %16 = vector.broadcast %cst_9 : f32 to vector<8x16xf32>
    %17 = vector.broadcast %cst_10 : f32 to vector<8x16xf32>
    %18 = arith.select %15, %16, %17 : vector<8x16xi1>, vector<8x16xf32>
    %19 = tpu.transpose %18, [1, 0] : vector<8x16xf32> -> vector<16x8xf32>
    %c0_11 = arith.constant 0 : index
    %c0_12 = arith.constant 0 : index
    %20 = vector.load %arg4[%c0_11, %c0_12] : memref<1x128xf32, #tpu.memory_space<vmem>>, vector<1x128xf32>
    %c0_13 = arith.constant 0 : index
    %c0_14 = arith.constant 0 : index
    %21 = vector.load %arg5[%c0_13, %c0_14] : memref<1x128xf32, #tpu.memory_space<vmem>>, vector<1x128xf32>
    %cst_15 = arith.constant dense<0.000000e+00> : vector<8xf32>
    %22 = vector.multi_reduction <add>, %1, %cst_15 [1] : vector<8x128xf32> to vector<8xf32>
    %23 = vector.shape_cast %22 : vector<8xf32> to vector<8x1xf32>
    %cst_16 = arith.constant 1.280000e+02 : f32
    %24 = vector.broadcast %cst_16 : f32 to vector<8x1xf32>
    %25 = arith.divf %23, %24 : vector<8x1xf32>
    %26 = vector.broadcast %25 : vector<8x1xf32> to vector<8x128xf32>
    %27 = arith.subf %1, %26 : vector<8x128xf32>
    %28 = arith.mulf %27, %27 : vector<8x128xf32>
    %cst_17 = arith.constant dense<0.000000e+00> : vector<8xf32>
    %29 = vector.multi_reduction <add>, %28, %cst_17 [1] : vector<8x128xf32> to vector<8xf32>
    %30 = vector.shape_cast %29 : vector<8xf32> to vector<8x1xf32>
    %cst_18 = arith.constant 1.280000e+02 : f32
    %31 = vector.broadcast %cst_18 : f32 to vector<8x1xf32>
    %32 = arith.divf %30, %31 : vector<8x1xf32>
    %cst_19 = arith.constant 9.99999974E-6 : f32
    %33 = vector.broadcast %cst_19 : f32 to vector<8x1xf32>
    %34 = arith.addf %32, %33 : vector<8x1xf32>
    %35 = math.rsqrt %34 : vector<8x1xf32>
    %36 = vector.broadcast %35 : vector<8x1xf32> to vector<8x128xf32>
    %37 = arith.mulf %27, %36 : vector<8x128xf32>
    %38 = vector.broadcast %20 : vector<1x128xf32> to vector<8x128xf32>
    %39 = arith.mulf %37, %38 : vector<8x128xf32>
    %40 = vector.broadcast %21 : vector<1x128xf32> to vector<8x128xf32>
    %41 = arith.addf %39, %40 : vector<8x128xf32>
    %42 = arith.truncf %41 : vector<8x128xf32> to vector<8x128xbf16>
    %43 = arith.truncf %3 : vector<16x128xf32> to vector<16x128xbf16>
    %cst_20 = arith.constant 0.000000e+00 : f32
    %44 = vector.broadcast %cst_20 : f32 to vector<8x128xf32>
    %c0_21 = arith.constant 0 : index
    %c0_22 = arith.constant 0 : index
    %c0_23 = arith.constant 0 : index
    %45 = vector.load %arg6[%c0_21, %c0_22, %c0_23] : memref<4x128x32xbf16, #tpu.memory_space<vmem>>, vector<1x128x32xbf16>
    %46 = vector.shape_cast %45 : vector<1x128x32xbf16> to vector<128x32xbf16>
    %cst_24 = arith.constant dense<0.000000e+00> : vector<8x32xf32>
    %47 = tpu.matmul %42, %46, %cst_24 {dimension_numbers = #tpu.dot_dimension_numbers<[1], [0], [0], [1], [0, 0, 1, 1], [], []>} : vector<8x128xbf16>, vector<128x32xbf16>, vector<8x32xf32> -> vector<8x32xf32>
    %c0_25 = arith.constant 0 : index
    %c0_26 = arith.constant 0 : index
    %c0_27 = arith.constant 0 : index
    %48 = vector.load %arg7[%c0_25, %c0_26, %c0_27] : memref<4x1x32xf32, #tpu.memory_space<vmem>>, vector<1x1x32xf32>
    %49 = vector.shape_cast %48 : vector<1x1x32xf32> to vector<1x32xf32>
    %50 = vector.broadcast %49 : vector<1x32xf32> to vector<8x32xf32>
    %51 = arith.addf %47, %50 : vector<8x32xf32>
    %52 = arith.truncf %51 : vector<8x32xf32> to vector<8x32xbf16>
    %c0_28 = arith.constant 0 : index
    %c0_29 = arith.constant 0 : index
    %c0_30 = arith.constant 0 : index
    %53 = vector.load %arg8[%c0_28, %c0_29, %c0_30] : memref<4x128x32xbf16, #tpu.memory_space<vmem>>, vector<1x128x32xbf16>
    %54 = vector.shape_cast %53 : vector<1x128x32xbf16> to vector<128x32xbf16>
    %cst_31 = arith.constant dense<0.000000e+00> : vector<16x32xf32>
    %55 = tpu.matmul %43, %54, %cst_31 {dimension_numbers = #tpu.dot_dimension_numbers<[1], [0], [0], [1], [0, 0, 1, 1], [], []>} : vector<16x128xbf16>, vector<128x32xbf16>, vector<16x32xf32> -> vector<16x32xf32>
    %c0_32 = arith.constant 0 : index
    %c0_33 = arith.constant 0 : index
    %c0_34 = arith.constant 0 : index
    %56 = vector.load %arg9[%c0_32, %c0_33, %c0_34] : memref<4x1x32xf32, #tpu.memory_space<vmem>>, vector<1x1x32xf32>
    %57 = vector.shape_cast %56 : vector<1x1x32xf32> to vector<1x32xf32>
    %58 = vector.broadcast %57 : vector<1x32xf32> to vector<16x32xf32>
    %59 = arith.addf %55, %58 : vector<16x32xf32>
    %60 = arith.truncf %59 : vector<16x32xf32> to vector<16x32xbf16>
    %c0_35 = arith.constant 0 : index
    %c0_36 = arith.constant 0 : index
    %c0_37 = arith.constant 0 : index
    %61 = vector.load %arg10[%c0_35, %c0_36, %c0_37] : memref<4x128x32xbf16, #tpu.memory_space<vmem>>, vector<1x128x32xbf16>
    %62 = vector.shape_cast %61 : vector<1x128x32xbf16> to vector<128x32xbf16>
    %cst_38 = arith.constant dense<0.000000e+00> : vector<16x32xf32>
    %63 = tpu.matmul %43, %62, %cst_38 {dimension_numbers = #tpu.dot_dimension_numbers<[1], [0], [0], [1], [0, 0, 1, 1], [], []>} : vector<16x128xbf16>, vector<128x32xbf16>, vector<16x32xf32> -> vector<16x32xf32>
    %c0_39 = arith.constant 0 : index
    %c0_40 = arith.constant 0 : index
    %c0_41 = arith.constant 0 : index
    %64 = vector.load %arg11[%c0_39, %c0_40, %c0_41] : memref<4x1x32xf32, #tpu.memory_space<vmem>>, vector<1x1x32xf32>
    %65 = vector.shape_cast %64 : vector<1x1x32xf32> to vector<1x32xf32>
    %66 = vector.broadcast %65 : vector<1x32xf32> to vector<16x32xf32>
    %67 = arith.addf %63, %66 : vector<16x32xf32>
    %68 = arith.truncf %67 : vector<16x32xf32> to vector<16x32xbf16>
    %cst_42 = arith.constant dense<0.000000e+00> : vector<8x16xf32>
    %69 = tpu.matmul %52, %60, %cst_42 {dimension_numbers = #tpu.dot_dimension_numbers<[1], [1], [0], [0], [0, 0, 1, 0], [], []>} : vector<8x32xbf16>, vector<16x32xbf16>, vector<8x16xf32> -> vector<8x16xf32>
    %cst_43 = arith.constant 0.176776692 : f32
    %70 = vector.broadcast %cst_43 : f32 to vector<8x16xf32>
    %71 = arith.mulf %69, %70 : vector<8x16xf32>
    %72 = arith.addf %71, %18 : vector<8x16xf32>
    %cst_44 = arith.constant dense<0xFF800000> : vector<8xf32>
    %73 = vector.multi_reduction <maximumf>, %72, %cst_44 [1] : vector<8x16xf32> to vector<8xf32>
    %74 = vector.shape_cast %73 : vector<8xf32> to vector<8x1xf32>
    %75 = vector.broadcast %74 : vector<8x1xf32> to vector<8x16xf32>
    %76 = arith.subf %72, %75 : vector<8x16xf32>
    %77 = math.exp %76 : vector<8x16xf32>
    %cst_45 = arith.constant dense<0.000000e+00> : vector<8xf32>
    %78 = vector.multi_reduction <add>, %77, %cst_45 [1] : vector<8x16xf32> to vector<8xf32>
    %79 = vector.shape_cast %78 : vector<8xf32> to vector<8x1xf32>
    %80 = tpu.reciprocal %79 {approx = true} : vector<8x1xf32> -> vector<8x1xf32>
    %81 = vector.broadcast %80 : vector<8x1xf32> to vector<8x16xf32>
    %82 = arith.mulf %77, %81 : vector<8x16xf32>
    %83 = arith.truncf %82 : vector<8x16xf32> to vector<8x16xbf16>
    %cst_46 = arith.constant dense<0.000000e+00> : vector<8x32xf32>
    %84 = tpu.matmul %83, %68, %cst_46 {dimension_numbers = #tpu.dot_dimension_numbers<[1], [0], [0], [1], [0, 0, 1, 1], [], []>} : vector<8x16xbf16>, vector<16x32xbf16>, vector<8x32xf32> -> vector<8x32xf32>
    %85 = arith.truncf %84 : vector<8x32xf32> to vector<8x32xbf16>
    %c0_47 = arith.constant 0 : index
    %c0_48 = arith.constant 0 : index
    %c0_49 = arith.constant 0 : index
    %86 = vector.load %arg12[%c0_47, %c0_48, %c0_49] : memref<4x32x128xbf16, #tpu.memory_space<vmem>>, vector<1x32x128xbf16>
    %87 = vector.shape_cast %86 : vector<1x32x128xbf16> to vector<32x128xbf16>
    %cst_50 = arith.constant dense<0.000000e+00> : vector<8x128xf32>
    %88 = tpu.matmul %85, %87, %cst_50 {dimension_numbers = #tpu.dot_dimension_numbers<[1], [0], [0], [1], [0, 0, 1, 1], [], []>} : vector<8x32xbf16>, vector<32x128xbf16>, vector<8x128xf32> -> vector<8x128xf32>
    %89 = arith.addf %44, %88 : vector<8x128xf32>
    %c1 = arith.constant 1 : index
    %c0_51 = arith.constant 0 : index
    %c0_52 = arith.constant 0 : index
    %90 = vector.load %arg6[%c1, %c0_51, %c0_52] : memref<4x128x32xbf16, #tpu.memory_space<vmem>>, vector<1x128x32xbf16>
    %91 = vector.shape_cast %90 : vector<1x128x32xbf16> to vector<128x32xbf16>
    %cst_53 = arith.constant dense<0.000000e+00> : vector<8x32xf32>
    %92 = tpu.matmul %42, %91, %cst_53 {dimension_numbers = #tpu.dot_dimension_numbers<[1], [0], [0], [1], [0, 0, 1, 1], [], []>} : vector<8x128xbf16>, vector<128x32xbf16>, vector<8x32xf32> -> vector<8x32xf32>
    %c1_54 = arith.constant 1 : index
    %c0_55 = arith.constant 0 : index
    %c0_56 = arith.constant 0 : index
    %93 = vector.load %arg7[%c1_54, %c0_55, %c0_56] : memref<4x1x32xf32, #tpu.memory_space<vmem>>, vector<1x1x32xf32>
    %94 = vector.shape_cast %93 : vector<1x1x32xf32> to vector<1x32xf32>
    %95 = vector.broadcast %94 : vector<1x32xf32> to vector<8x32xf32>
    %96 = arith.addf %92, %95 : vector<8x32xf32>
    %97 = arith.truncf %96 : vector<8x32xf32> to vector<8x32xbf16>
    %c1_57 = arith.constant 1 : index
    %c0_58 = arith.constant 0 : index
    %c0_59 = arith.constant 0 : index
    %98 = vector.load %arg8[%c1_57, %c0_58, %c0_59] : memref<4x128x32xbf16, #tpu.memory_space<vmem>>, vector<1x128x32xbf16>
    %99 = vector.shape_cast %98 : vector<1x128x32xbf16> to vector<128x32xbf16>
    %cst_60 = arith.constant dense<0.000000e+00> : vector<16x32xf32>
    %100 = tpu.matmul %43, %99, %cst_60 {dimension_numbers = #tpu.dot_dimension_numbers<[1], [0], [0], [1], [0, 0, 1, 1], [], []>} : vector<16x128xbf16>, vector<128x32xbf16>, vector<16x32xf32> -> vector<16x32xf32>
    %c1_61 = arith.constant 1 : index
    %c0_62 = arith.constant 0 : index
    %c0_63 = arith.constant 0 : index
    %101 = vector.load %arg9[%c1_61, %c0_62, %c0_63] : memref<4x1x32xf32, #tpu.memory_space<vmem>>, vector<1x1x32xf32>
    %102 = vector.shape_cast %101 : vector<1x1x32xf32> to vector<1x32xf32>
    %103 = vector.broadcast %102 : vector<1x32xf32> to vector<16x32xf32>
    %104 = arith.addf %100, %103 : vector<16x32xf32>
    %105 = arith.truncf %104 : vector<16x32xf32> to vector<16x32xbf16>
    %c1_64 = arith.constant 1 : index
    %c0_65 = arith.constant 0 : index
    %c0_66 = arith.constant 0 : index
    %106 = vector.load %arg10[%c1_64, %c0_65, %c0_66] : memref<4x128x32xbf16, #tpu.memory_space<vmem>>, vector<1x128x32xbf16>
    %107 = vector.shape_cast %106 : vector<1x128x32xbf16> to vector<128x32xbf16>
    %cst_67 = arith.constant dense<0.000000e+00> : vector<16x32xf32>
    %108 = tpu.matmul %43, %107, %cst_67 {dimension_numbers = #tpu.dot_dimension_numbers<[1], [0], [0], [1], [0, 0, 1, 1], [], []>} : vector<16x128xbf16>, vector<128x32xbf16>, vector<16x32xf32> -> vector<16x32xf32>
    %c1_68 = arith.constant 1 : index
    %c0_69 = arith.constant 0 : index
    %c0_70 = arith.constant 0 : index
    %109 = vector.load %arg11[%c1_68, %c0_69, %c0_70] : memref<4x1x32xf32, #tpu.memory_space<vmem>>, vector<1x1x32xf32>
    %110 = vector.shape_cast %109 : vector<1x1x32xf32> to vector<1x32xf32>
    %111 = vector.broadcast %110 : vector<1x32xf32> to vector<16x32xf32>
    %112 = arith.addf %108, %111 : vector<16x32xf32>
    %113 = arith.truncf %112 : vector<16x32xf32> to vector<16x32xbf16>
    %cst_71 = arith.constant dense<0.000000e+00> : vector<8x16xf32>
    %114 = tpu.matmul %97, %105, %cst_71 {dimension_numbers = #tpu.dot_dimension_numbers<[1], [1], [0], [0], [0, 0, 1, 0], [], []>} : vector<8x32xbf16>, vector<16x32xbf16>, vector<8x16xf32> -> vector<8x16xf32>
    %cst_72 = arith.constant 0.176776692 : f32
    %115 = vector.broadcast %cst_72 : f32 to vector<8x16xf32>
    %116 = arith.mulf %114, %115 : vector<8x16xf32>
    %117 = arith.addf %116, %18 : vector<8x16xf32>
    %cst_73 = arith.constant dense<0xFF800000> : vector<8xf32>
    %118 = vector.multi_reduction <maximumf>, %117, %cst_73 [1] : vector<8x16xf32> to vector<8xf32>
    %119 = vector.shape_cast %118 : vector<8xf32> to vector<8x1xf32>
    %120 = vector.broadcast %119 : vector<8x1xf32> to vector<8x16xf32>
    %121 = arith.subf %117, %120 : vector<8x16xf32>
    %122 = math.exp %121 : vector<8x16xf32>
    %cst_74 = arith.constant dense<0.000000e+00> : vector<8xf32>
    %123 = vector.multi_reduction <add>, %122, %cst_74 [1] : vector<8x16xf32> to vector<8xf32>
    %124 = vector.shape_cast %123 : vector<8xf32> to vector<8x1xf32>
    %125 = tpu.reciprocal %124 {approx = true} : vector<8x1xf32> -> vector<8x1xf32>
    %126 = vector.broadcast %125 : vector<8x1xf32> to vector<8x16xf32>
    %127 = arith.mulf %122, %126 : vector<8x16xf32>
    %128 = arith.truncf %127 : vector<8x16xf32> to vector<8x16xbf16>
    %cst_75 = arith.constant dense<0.000000e+00> : vector<8x32xf32>
    %129 = tpu.matmul %128, %113, %cst_75 {dimension_numbers = #tpu.dot_dimension_numbers<[1], [0], [0], [1], [0, 0, 1, 1], [], []>} : vector<8x16xbf16>, vector<16x32xbf16>, vector<8x32xf32> -> vector<8x32xf32>
    %130 = arith.truncf %129 : vector<8x32xf32> to vector<8x32xbf16>
    %c1_76 = arith.constant 1 : index
    %c0_77 = arith.constant 0 : index
    %c0_78 = arith.constant 0 : index
    %131 = vector.load %arg12[%c1_76, %c0_77, %c0_78] : memref<4x32x128xbf16, #tpu.memory_space<vmem>>, vector<1x32x128xbf16>
    %132 = vector.shape_cast %131 : vector<1x32x128xbf16> to vector<32x128xbf16>
    %cst_79 = arith.constant dense<0.000000e+00> : vector<8x128xf32>
    %133 = tpu.matmul %130, %132, %cst_79 {dimension_numbers = #tpu.dot_dimension_numbers<[1], [0], [0], [1], [0, 0, 1, 1], [], []>} : vector<8x32xbf16>, vector<32x128xbf16>, vector<8x128xf32> -> vector<8x128xf32>
    %134 = arith.addf %89, %133 : vector<8x128xf32>
    %c2 = arith.constant 2 : index
    %c0_80 = arith.constant 0 : index
    %c0_81 = arith.constant 0 : index
    %135 = vector.load %arg6[%c2, %c0_80, %c0_81] : memref<4x128x32xbf16, #tpu.memory_space<vmem>>, vector<1x128x32xbf16>
    %136 = vector.shape_cast %135 : vector<1x128x32xbf16> to vector<128x32xbf16>
    %cst_82 = arith.constant dense<0.000000e+00> : vector<8x32xf32>
    %137 = tpu.matmul %42, %136, %cst_82 {dimension_numbers = #tpu.dot_dimension_numbers<[1], [0], [0], [1], [0, 0, 1, 1], [], []>} : vector<8x128xbf16>, vector<128x32xbf16>, vector<8x32xf32> -> vector<8x32xf32>
    %c2_83 = arith.constant 2 : index
    %c0_84 = arith.constant 0 : index
    %c0_85 = arith.constant 0 : index
    %138 = vector.load %arg7[%c2_83, %c0_84, %c0_85] : memref<4x1x32xf32, #tpu.memory_space<vmem>>, vector<1x1x32xf32>
    %139 = vector.shape_cast %138 : vector<1x1x32xf32> to vector<1x32xf32>
    %140 = vector.broadcast %139 : vector<1x32xf32> to vector<8x32xf32>
    %141 = arith.addf %137, %140 : vector<8x32xf32>
    %142 = arith.truncf %141 : vector<8x32xf32> to vector<8x32xbf16>
    %c2_86 = arith.constant 2 : index
    %c0_87 = arith.constant 0 : index
    %c0_88 = arith.constant 0 : index
    %143 = vector.load %arg8[%c2_86, %c0_87, %c0_88] : memref<4x128x32xbf16, #tpu.memory_space<vmem>>, vector<1x128x32xbf16>
    %144 = vector.shape_cast %143 : vector<1x128x32xbf16> to vector<128x32xbf16>
    %cst_89 = arith.constant dense<0.000000e+00> : vector<16x32xf32>
    %145 = tpu.matmul %43, %144, %cst_89 {dimension_numbers = #tpu.dot_dimension_numbers<[1], [0], [0], [1], [0, 0, 1, 1], [], []>} : vector<16x128xbf16>, vector<128x32xbf16>, vector<16x32xf32> -> vector<16x32xf32>
    %c2_90 = arith.constant 2 : index
    %c0_91 = arith.constant 0 : index
    %c0_92 = arith.constant 0 : index
    %146 = vector.load %arg9[%c2_90, %c0_91, %c0_92] : memref<4x1x32xf32, #tpu.memory_space<vmem>>, vector<1x1x32xf32>
    %147 = vector.shape_cast %146 : vector<1x1x32xf32> to vector<1x32xf32>
    %148 = vector.broadcast %147 : vector<1x32xf32> to vector<16x32xf32>
    %149 = arith.addf %145, %148 : vector<16x32xf32>
    %150 = arith.truncf %149 : vector<16x32xf32> to vector<16x32xbf16>
    %c2_93 = arith.constant 2 : index
    %c0_94 = arith.constant 0 : index
    %c0_95 = arith.constant 0 : index
    %151 = vector.load %arg10[%c2_93, %c0_94, %c0_95] : memref<4x128x32xbf16, #tpu.memory_space<vmem>>, vector<1x128x32xbf16>
    %152 = vector.shape_cast %151 : vector<1x128x32xbf16> to vector<128x32xbf16>
    %cst_96 = arith.constant dense<0.000000e+00> : vector<16x32xf32>
    %153 = tpu.matmul %43, %152, %cst_96 {dimension_numbers = #tpu.dot_dimension_numbers<[1], [0], [0], [1], [0, 0, 1, 1], [], []>} : vector<16x128xbf16>, vector<128x32xbf16>, vector<16x32xf32> -> vector<16x32xf32>
    %c2_97 = arith.constant 2 : index
    %c0_98 = arith.constant 0 : index
    %c0_99 = arith.constant 0 : index
    %154 = vector.load %arg11[%c2_97, %c0_98, %c0_99] : memref<4x1x32xf32, #tpu.memory_space<vmem>>, vector<1x1x32xf32>
    %155 = vector.shape_cast %154 : vector<1x1x32xf32> to vector<1x32xf32>
    %156 = vector.broadcast %155 : vector<1x32xf32> to vector<16x32xf32>
    %157 = arith.addf %153, %156 : vector<16x32xf32>
    %158 = arith.truncf %157 : vector<16x32xf32> to vector<16x32xbf16>
    %cst_100 = arith.constant dense<0.000000e+00> : vector<8x16xf32>
    %159 = tpu.matmul %142, %150, %cst_100 {dimension_numbers = #tpu.dot_dimension_numbers<[1], [1], [0], [0], [0, 0, 1, 0], [], []>} : vector<8x32xbf16>, vector<16x32xbf16>, vector<8x16xf32> -> vector<8x16xf32>
    %cst_101 = arith.constant 0.176776692 : f32
    %160 = vector.broadcast %cst_101 : f32 to vector<8x16xf32>
    %161 = arith.mulf %159, %160 : vector<8x16xf32>
    %162 = arith.addf %161, %18 : vector<8x16xf32>
    %cst_102 = arith.constant dense<0xFF800000> : vector<8xf32>
    %163 = vector.multi_reduction <maximumf>, %162, %cst_102 [1] : vector<8x16xf32> to vector<8xf32>
    %164 = vector.shape_cast %163 : vector<8xf32> to vector<8x1xf32>
    %165 = vector.broadcast %164 : vector<8x1xf32> to vector<8x16xf32>
    %166 = arith.subf %162, %165 : vector<8x16xf32>
    %167 = math.exp %166 : vector<8x16xf32>
    %cst_103 = arith.constant dense<0.000000e+00> : vector<8xf32>
    %168 = vector.multi_reduction <add>, %167, %cst_103 [1] : vector<8x16xf32> to vector<8xf32>
    %169 = vector.shape_cast %168 : vector<8xf32> to vector<8x1xf32>
    %170 = tpu.reciprocal %169 {approx = true} : vector<8x1xf32> -> vector<8x1xf32>
    %171 = vector.broadcast %170 : vector<8x1xf32> to vector<8x16xf32>
    %172 = arith.mulf %167, %171 : vector<8x16xf32>
    %173 = arith.truncf %172 : vector<8x16xf32> to vector<8x16xbf16>
    %cst_104 = arith.constant dense<0.000000e+00> : vector<8x32xf32>
    %174 = tpu.matmul %173, %158, %cst_104 {dimension_numbers = #tpu.dot_dimension_numbers<[1], [0], [0], [1], [0, 0, 1, 1], [], []>} : vector<8x16xbf16>, vector<16x32xbf16>, vector<8x32xf32> -> vector<8x32xf32>
    %175 = arith.truncf %174 : vector<8x32xf32> to vector<8x32xbf16>
    %c2_105 = arith.constant 2 : index
    %c0_106 = arith.constant 0 : index
    %c0_107 = arith.constant 0 : index
    %176 = vector.load %arg12[%c2_105, %c0_106, %c0_107] : memref<4x32x128xbf16, #tpu.memory_space<vmem>>, vector<1x32x128xbf16>
    %177 = vector.shape_cast %176 : vector<1x32x128xbf16> to vector<32x128xbf16>
    %cst_108 = arith.constant dense<0.000000e+00> : vector<8x128xf32>
    %178 = tpu.matmul %175, %177, %cst_108 {dimension_numbers = #tpu.dot_dimension_numbers<[1], [0], [0], [1], [0, 0, 1, 1], [], []>} : vector<8x32xbf16>, vector<32x128xbf16>, vector<8x128xf32> -> vector<8x128xf32>
    %179 = arith.addf %134, %178 : vector<8x128xf32>
    %c3 = arith.constant 3 : index
    %c0_109 = arith.constant 0 : index
    %c0_110 = arith.constant 0 : index
    %180 = vector.load %arg6[%c3, %c0_109, %c0_110] : memref<4x128x32xbf16, #tpu.memory_space<vmem>>, vector<1x128x32xbf16>
    %181 = vector.shape_cast %180 : vector<1x128x32xbf16> to vector<128x32xbf16>
    %cst_111 = arith.constant dense<0.000000e+00> : vector<8x32xf32>
    %182 = tpu.matmul %42, %181, %cst_111 {dimension_numbers = #tpu.dot_dimension_numbers<[1], [0], [0], [1], [0, 0, 1, 1], [], []>} : vector<8x128xbf16>, vector<128x32xbf16>, vector<8x32xf32> -> vector<8x32xf32>
    %c3_112 = arith.constant 3 : index
    %c0_113 = arith.constant 0 : index
    %c0_114 = arith.constant 0 : index
    %183 = vector.load %arg7[%c3_112, %c0_113, %c0_114] : memref<4x1x32xf32, #tpu.memory_space<vmem>>, vector<1x1x32xf32>
    %184 = vector.shape_cast %183 : vector<1x1x32xf32> to vector<1x32xf32>
    %185 = vector.broadcast %184 : vector<1x32xf32> to vector<8x32xf32>
    %186 = arith.addf %182, %185 : vector<8x32xf32>
    %187 = arith.truncf %186 : vector<8x32xf32> to vector<8x32xbf16>
    %c3_115 = arith.constant 3 : index
    %c0_116 = arith.constant 0 : index
    %c0_117 = arith.constant 0 : index
    %188 = vector.load %arg8[%c3_115, %c0_116, %c0_117] : memref<4x128x32xbf16, #tpu.memory_space<vmem>>, vector<1x128x32xbf16>
    %189 = vector.shape_cast %188 : vector<1x128x32xbf16> to vector<128x32xbf16>
    %cst_118 = arith.constant dense<0.000000e+00> : vector<16x32xf32>
    %190 = tpu.matmul %43, %189, %cst_118 {dimension_numbers = #tpu.dot_dimension_numbers<[1], [0], [0], [1], [0, 0, 1, 1], [], []>} : vector<16x128xbf16>, vector<128x32xbf16>, vector<16x32xf32> -> vector<16x32xf32>
    %c3_119 = arith.constant 3 : index
    %c0_120 = arith.constant 0 : index
    %c0_121 = arith.constant 0 : index
    %191 = vector.load %arg9[%c3_119, %c0_120, %c0_121] : memref<4x1x32xf32, #tpu.memory_space<vmem>>, vector<1x1x32xf32>
    %192 = vector.shape_cast %191 : vector<1x1x32xf32> to vector<1x32xf32>
    %193 = vector.broadcast %192 : vector<1x32xf32> to vector<16x32xf32>
    %194 = arith.addf %190, %193 : vector<16x32xf32>
    %195 = arith.truncf %194 : vector<16x32xf32> to vector<16x32xbf16>
    %c3_122 = arith.constant 3 : index
    %c0_123 = arith.constant 0 : index
    %c0_124 = arith.constant 0 : index
    %196 = vector.load %arg10[%c3_122, %c0_123, %c0_124] : memref<4x128x32xbf16, #tpu.memory_space<vmem>>, vector<1x128x32xbf16>
    %197 = vector.shape_cast %196 : vector<1x128x32xbf16> to vector<128x32xbf16>
    %cst_125 = arith.constant dense<0.000000e+00> : vector<16x32xf32>
    %198 = tpu.matmul %43, %197, %cst_125 {dimension_numbers = #tpu.dot_dimension_numbers<[1], [0], [0], [1], [0, 0, 1, 1], [], []>} : vector<16x128xbf16>, vector<128x32xbf16>, vector<16x32xf32> -> vector<16x32xf32>
    %c3_126 = arith.constant 3 : index
    %c0_127 = arith.constant 0 : index
    %c0_128 = arith.constant 0 : index
    %199 = vector.load %arg11[%c3_126, %c0_127, %c0_128] : memref<4x1x32xf32, #tpu.memory_space<vmem>>, vector<1x1x32xf32>
    %200 = vector.shape_cast %199 : vector<1x1x32xf32> to vector<1x32xf32>
    %201 = vector.broadcast %200 : vector<1x32xf32> to vector<16x32xf32>
    %202 = arith.addf %198, %201 : vector<16x32xf32>
    %203 = arith.truncf %202 : vector<16x32xf32> to vector<16x32xbf16>
    %cst_129 = arith.constant dense<0.000000e+00> : vector<8x16xf32>
    %204 = tpu.matmul %187, %195, %cst_129 {dimension_numbers = #tpu.dot_dimension_numbers<[1], [1], [0], [0], [0, 0, 1, 0], [], []>} : vector<8x32xbf16>, vector<16x32xbf16>, vector<8x16xf32> -> vector<8x16xf32>
    %cst_130 = arith.constant 0.176776692 : f32
    %205 = vector.broadcast %cst_130 : f32 to vector<8x16xf32>
    %206 = arith.mulf %204, %205 : vector<8x16xf32>
    %207 = arith.addf %206, %18 : vector<8x16xf32>
    %cst_131 = arith.constant dense<0xFF800000> : vector<8xf32>
    %208 = vector.multi_reduction <maximumf>, %207, %cst_131 [1] : vector<8x16xf32> to vector<8xf32>
    %209 = vector.shape_cast %208 : vector<8xf32> to vector<8x1xf32>
    %210 = vector.broadcast %209 : vector<8x1xf32> to vector<8x16xf32>
    %211 = arith.subf %207, %210 : vector<8x16xf32>
    %212 = math.exp %211 : vector<8x16xf32>
    %cst_132 = arith.constant dense<0.000000e+00> : vector<8xf32>
    %213 = vector.multi_reduction <add>, %212, %cst_132 [1] : vector<8x16xf32> to vector<8xf32>
    %214 = vector.shape_cast %213 : vector<8xf32> to vector<8x1xf32>
    %215 = tpu.reciprocal %214 {approx = true} : vector<8x1xf32> -> vector<8x1xf32>
    %216 = vector.broadcast %215 : vector<8x1xf32> to vector<8x16xf32>
    %217 = arith.mulf %212, %216 : vector<8x16xf32>
    %218 = arith.truncf %217 : vector<8x16xf32> to vector<8x16xbf16>
    %cst_133 = arith.constant dense<0.000000e+00> : vector<8x32xf32>
    %219 = tpu.matmul %218, %203, %cst_133 {dimension_numbers = #tpu.dot_dimension_numbers<[1], [0], [0], [1], [0, 0, 1, 1], [], []>} : vector<8x16xbf16>, vector<16x32xbf16>, vector<8x32xf32> -> vector<8x32xf32>
    %220 = arith.truncf %219 : vector<8x32xf32> to vector<8x32xbf16>
    %c3_134 = arith.constant 3 : index
    %c0_135 = arith.constant 0 : index
    %c0_136 = arith.constant 0 : index
    %221 = vector.load %arg12[%c3_134, %c0_135, %c0_136] : memref<4x32x128xbf16, #tpu.memory_space<vmem>>, vector<1x32x128xbf16>
    %222 = vector.shape_cast %221 : vector<1x32x128xbf16> to vector<32x128xbf16>
    %cst_137 = arith.constant dense<0.000000e+00> : vector<8x128xf32>
    %223 = tpu.matmul %220, %222, %cst_137 {dimension_numbers = #tpu.dot_dimension_numbers<[1], [0], [0], [1], [0, 0, 1, 1], [], []>} : vector<8x32xbf16>, vector<32x128xbf16>, vector<8x128xf32> -> vector<8x128xf32>
    %224 = arith.addf %179, %223 : vector<8x128xf32>
    %225 = arith.addf %1, %224 : vector<8x128xf32>
    %c0_138 = arith.constant 0 : index
    %c0_139 = arith.constant 0 : index
    %226 = vector.load %arg13[%c0_138, %c0_139] : memref<1x128xf32, #tpu.memory_space<vmem>>, vector<1x128xf32>
    %227 = vector.broadcast %226 : vector<1x128xf32> to vector<8x128xf32>
    %228 = arith.addf %225, %227 : vector<8x128xf32>
    %c0_140 = arith.constant 0 : index
    %c0_141 = arith.constant 0 : index
    %229 = vector.load %arg14[%c0_140, %c0_141] : memref<1x128xf32, #tpu.memory_space<vmem>>, vector<1x128xf32>
    %c0_142 = arith.constant 0 : index
    %c0_143 = arith.constant 0 : index
    %230 = vector.load %arg15[%c0_142, %c0_143] : memref<1x128xf32, #tpu.memory_space<vmem>>, vector<1x128xf32>
    %cst_144 = arith.constant dense<0.000000e+00> : vector<8xf32>
    %231 = vector.multi_reduction <add>, %228, %cst_144 [1] : vector<8x128xf32> to vector<8xf32>
    %232 = vector.shape_cast %231 : vector<8xf32> to vector<8x1xf32>
    %cst_145 = arith.constant 1.280000e+02 : f32
    %233 = vector.broadcast %cst_145 : f32 to vector<8x1xf32>
    %234 = arith.divf %232, %233 : vector<8x1xf32>
    %235 = vector.broadcast %234 : vector<8x1xf32> to vector<8x128xf32>
    %236 = arith.subf %228, %235 : vector<8x128xf32>
    %237 = arith.mulf %236, %236 : vector<8x128xf32>
    %cst_146 = arith.constant dense<0.000000e+00> : vector<8xf32>
    %238 = vector.multi_reduction <add>, %237, %cst_146 [1] : vector<8x128xf32> to vector<8xf32>
    %239 = vector.shape_cast %238 : vector<8xf32> to vector<8x1xf32>
    %cst_147 = arith.constant 1.280000e+02 : f32
    %240 = vector.broadcast %cst_147 : f32 to vector<8x1xf32>
    %241 = arith.divf %239, %240 : vector<8x1xf32>
    %cst_148 = arith.constant 9.99999974E-6 : f32
    %242 = vector.broadcast %cst_148 : f32 to vector<8x1xf32>
    %243 = arith.addf %241, %242 : vector<8x1xf32>
    %244 = math.rsqrt %243 : vector<8x1xf32>
    %245 = vector.broadcast %244 : vector<8x1xf32> to vector<8x128xf32>
    %246 = arith.mulf %236, %245 : vector<8x128xf32>
    %247 = vector.broadcast %229 : vector<1x128xf32> to vector<8x128xf32>
    %248 = arith.mulf %246, %247 : vector<8x128xf32>
    %249 = vector.broadcast %230 : vector<1x128xf32> to vector<8x128xf32>
    %250 = arith.addf %248, %249 : vector<8x128xf32>
    %251 = arith.truncf %250 : vector<8x128xf32> to vector<8x128xbf16>
    %252 = arith.truncf %250 : vector<8x128xf32> to vector<8x128xbf16>
    %cst_149 = arith.constant 0.000000e+00 : f32
    %253 = vector.broadcast %cst_149 : f32 to vector<8x128xf32>
    %c0_150 = arith.constant 0 : index
    %c0_151 = arith.constant 0 : index
    %c0_152 = arith.constant 0 : index
    %254 = vector.load %arg16[%c0_150, %c0_151, %c0_152] : memref<4x128x32xbf16, #tpu.memory_space<vmem>>, vector<1x128x32xbf16>
    %255 = vector.shape_cast %254 : vector<1x128x32xbf16> to vector<128x32xbf16>
    %cst_153 = arith.constant dense<0.000000e+00> : vector<8x32xf32>
    %256 = tpu.matmul %251, %255, %cst_153 {dimension_numbers = #tpu.dot_dimension_numbers<[1], [0], [0], [1], [0, 0, 1, 1], [], []>} : vector<8x128xbf16>, vector<128x32xbf16>, vector<8x32xf32> -> vector<8x32xf32>
    %c0_154 = arith.constant 0 : index
    %c0_155 = arith.constant 0 : index
    %c0_156 = arith.constant 0 : index
    %257 = vector.load %arg17[%c0_154, %c0_155, %c0_156] : memref<4x1x32xf32, #tpu.memory_space<vmem>>, vector<1x1x32xf32>
    %258 = vector.shape_cast %257 : vector<1x1x32xf32> to vector<1x32xf32>
    %259 = vector.broadcast %258 : vector<1x32xf32> to vector<8x32xf32>
    %260 = arith.addf %256, %259 : vector<8x32xf32>
    %261 = arith.truncf %260 : vector<8x32xf32> to vector<8x32xbf16>
    %c0_157 = arith.constant 0 : index
    %c0_158 = arith.constant 0 : index
    %c0_159 = arith.constant 0 : index
    %262 = vector.load %arg18[%c0_157, %c0_158, %c0_159] : memref<4x128x32xbf16, #tpu.memory_space<vmem>>, vector<1x128x32xbf16>
    %263 = vector.shape_cast %262 : vector<1x128x32xbf16> to vector<128x32xbf16>
    %cst_160 = arith.constant dense<0.000000e+00> : vector<8x32xf32>
    %264 = tpu.matmul %252, %263, %cst_160 {dimension_numbers = #tpu.dot_dimension_numbers<[1], [0], [0], [1], [0, 0, 1, 1], [], []>} : vector<8x128xbf16>, vector<128x32xbf16>, vector<8x32xf32> -> vector<8x32xf32>
    %c0_161 = arith.constant 0 : index
    %c0_162 = arith.constant 0 : index
    %c0_163 = arith.constant 0 : index
    %265 = vector.load %arg19[%c0_161, %c0_162, %c0_163] : memref<4x1x32xf32, #tpu.memory_space<vmem>>, vector<1x1x32xf32>
    %266 = vector.shape_cast %265 : vector<1x1x32xf32> to vector<1x32xf32>
    %267 = vector.broadcast %266 : vector<1x32xf32> to vector<8x32xf32>
    %268 = arith.addf %264, %267 : vector<8x32xf32>
    %269 = arith.truncf %268 : vector<8x32xf32> to vector<8x32xbf16>
    %c0_164 = arith.constant 0 : index
    %c0_165 = arith.constant 0 : index
    %c0_166 = arith.constant 0 : index
    %270 = vector.load %arg20[%c0_164, %c0_165, %c0_166] : memref<4x128x32xbf16, #tpu.memory_space<vmem>>, vector<1x128x32xbf16>
    %271 = vector.shape_cast %270 : vector<1x128x32xbf16> to vector<128x32xbf16>
    %cst_167 = arith.constant dense<0.000000e+00> : vector<8x32xf32>
    %272 = tpu.matmul %252, %271, %cst_167 {dimension_numbers = #tpu.dot_dimension_numbers<[1], [0], [0], [1], [0, 0, 1, 1], [], []>} : vector<8x128xbf16>, vector<128x32xbf16>, vector<8x32xf32> -> vector<8x32xf32>
    %c0_168 = arith.constant 0 : index
    %c0_169 = arith.constant 0 : index
    %c0_170 = arith.constant 0 : index
    %273 = vector.load %arg21[%c0_168, %c0_169, %c0_170] : memref<4x1x32xf32, #tpu.memory_space<vmem>>, vector<1x1x32xf32>
    %274 = vector.shape_cast %273 : vector<1x1x32xf32> to vector<1x32xf32>
    %275 = vector.broadcast %274 : vector<1x32xf32> to vector<8x32xf32>
    %276 = arith.addf %272, %275 : vector<8x32xf32>
    %277 = arith.truncf %276 : vector<8x32xf32> to vector<8x32xbf16>
    %cst_171 = arith.constant dense<0.000000e+00> : vector<8x8xf32>
    %278 = tpu.matmul %261, %269, %cst_171 {dimension_numbers = #tpu.dot_dimension_numbers<[1], [1], [0], [0], [0, 0, 1, 0], [], []>} : vector<8x32xbf16>, vector<8x32xbf16>, vector<8x8xf32> -> vector<8x8xf32>
    %cst_172 = arith.constant 0.176776692 : f32
    %279 = vector.broadcast %cst_172 : f32 to vector<8x8xf32>
    %280 = arith.mulf %278, %279 : vector<8x8xf32>
    %cst_173 = arith.constant dense<0xFF800000> : vector<8xf32>
    %281 = vector.multi_reduction <maximumf>, %280, %cst_173 [1] : vector<8x8xf32> to vector<8xf32>
    %282 = vector.shape_cast %281 : vector<8xf32> to vector<8x1xf32>
    %283 = vector.broadcast %282 : vector<8x1xf32> to vector<8x8xf32>
    %284 = arith.subf %280, %283 : vector<8x8xf32>
    %285 = math.exp %284 : vector<8x8xf32>
    %cst_174 = arith.constant dense<0.000000e+00> : vector<8xf32>
    %286 = vector.multi_reduction <add>, %285, %cst_174 [1] : vector<8x8xf32> to vector<8xf32>
    %287 = vector.shape_cast %286 : vector<8xf32> to vector<8x1xf32>
    %288 = tpu.reciprocal %287 {approx = true} : vector<8x1xf32> -> vector<8x1xf32>
    %289 = vector.broadcast %288 : vector<8x1xf32> to vector<8x8xf32>
    %290 = arith.mulf %285, %289 : vector<8x8xf32>
    %291 = arith.truncf %290 : vector<8x8xf32> to vector<8x8xbf16>
    %cst_175 = arith.constant dense<0.000000e+00> : vector<8x32xf32>
    %292 = tpu.matmul %291, %277, %cst_175 {dimension_numbers = #tpu.dot_dimension_numbers<[1], [0], [0], [1], [0, 0, 1, 1], [], []>} : vector<8x8xbf16>, vector<8x32xbf16>, vector<8x32xf32> -> vector<8x32xf32>
    %293 = arith.truncf %292 : vector<8x32xf32> to vector<8x32xbf16>
    %c0_176 = arith.constant 0 : index
    %c0_177 = arith.constant 0 : index
    %c0_178 = arith.constant 0 : index
    %294 = vector.load %arg22[%c0_176, %c0_177, %c0_178] : memref<4x32x128xbf16, #tpu.memory_space<vmem>>, vector<1x32x128xbf16>
    %295 = vector.shape_cast %294 : vector<1x32x128xbf16> to vector<32x128xbf16>
    %cst_179 = arith.constant dense<0.000000e+00> : vector<8x128xf32>
    %296 = tpu.matmul %293, %295, %cst_179 {dimension_numbers = #tpu.dot_dimension_numbers<[1], [0], [0], [1], [0, 0, 1, 1], [], []>} : vector<8x32xbf16>, vector<32x128xbf16>, vector<8x128xf32> -> vector<8x128xf32>
    %297 = arith.addf %253, %296 : vector<8x128xf32>
    %c1_180 = arith.constant 1 : index
    %c0_181 = arith.constant 0 : index
    %c0_182 = arith.constant 0 : index
    %298 = vector.load %arg16[%c1_180, %c0_181, %c0_182] : memref<4x128x32xbf16, #tpu.memory_space<vmem>>, vector<1x128x32xbf16>
    %299 = vector.shape_cast %298 : vector<1x128x32xbf16> to vector<128x32xbf16>
    %cst_183 = arith.constant dense<0.000000e+00> : vector<8x32xf32>
    %300 = tpu.matmul %251, %299, %cst_183 {dimension_numbers = #tpu.dot_dimension_numbers<[1], [0], [0], [1], [0, 0, 1, 1], [], []>} : vector<8x128xbf16>, vector<128x32xbf16>, vector<8x32xf32> -> vector<8x32xf32>
    %c1_184 = arith.constant 1 : index
    %c0_185 = arith.constant 0 : index
    %c0_186 = arith.constant 0 : index
    %301 = vector.load %arg17[%c1_184, %c0_185, %c0_186] : memref<4x1x32xf32, #tpu.memory_space<vmem>>, vector<1x1x32xf32>
    %302 = vector.shape_cast %301 : vector<1x1x32xf32> to vector<1x32xf32>
    %303 = vector.broadcast %302 : vector<1x32xf32> to vector<8x32xf32>
    %304 = arith.addf %300, %303 : vector<8x32xf32>
    %305 = arith.truncf %304 : vector<8x32xf32> to vector<8x32xbf16>
    %c1_187 = arith.constant 1 : index
    %c0_188 = arith.constant 0 : index
    %c0_189 = arith.constant 0 : index
    %306 = vector.load %arg18[%c1_187, %c0_188, %c0_189] : memref<4x128x32xbf16, #tpu.memory_space<vmem>>, vector<1x128x32xbf16>
    %307 = vector.shape_cast %306 : vector<1x128x32xbf16> to vector<128x32xbf16>
    %cst_190 = arith.constant dense<0.000000e+00> : vector<8x32xf32>
    %308 = tpu.matmul %252, %307, %cst_190 {dimension_numbers = #tpu.dot_dimension_numbers<[1], [0], [0], [1], [0, 0, 1, 1], [], []>} : vector<8x128xbf16>, vector<128x32xbf16>, vector<8x32xf32> -> vector<8x32xf32>
    %c1_191 = arith.constant 1 : index
    %c0_192 = arith.constant 0 : index
    %c0_193 = arith.constant 0 : index
    %309 = vector.load %arg19[%c1_191, %c0_192, %c0_193] : memref<4x1x32xf32, #tpu.memory_space<vmem>>, vector<1x1x32xf32>
    %310 = vector.shape_cast %309 : vector<1x1x32xf32> to vector<1x32xf32>
    %311 = vector.broadcast %310 : vector<1x32xf32> to vector<8x32xf32>
    %312 = arith.addf %308, %311 : vector<8x32xf32>
    %313 = arith.truncf %312 : vector<8x32xf32> to vector<8x32xbf16>
    %c1_194 = arith.constant 1 : index
    %c0_195 = arith.constant 0 : index
    %c0_196 = arith.constant 0 : index
    %314 = vector.load %arg20[%c1_194, %c0_195, %c0_196] : memref<4x128x32xbf16, #tpu.memory_space<vmem>>, vector<1x128x32xbf16>
    %315 = vector.shape_cast %314 : vector<1x128x32xbf16> to vector<128x32xbf16>
    %cst_197 = arith.constant dense<0.000000e+00> : vector<8x32xf32>
    %316 = tpu.matmul %252, %315, %cst_197 {dimension_numbers = #tpu.dot_dimension_numbers<[1], [0], [0], [1], [0, 0, 1, 1], [], []>} : vector<8x128xbf16>, vector<128x32xbf16>, vector<8x32xf32> -> vector<8x32xf32>
    %c1_198 = arith.constant 1 : index
    %c0_199 = arith.constant 0 : index
    %c0_200 = arith.constant 0 : index
    %317 = vector.load %arg21[%c1_198, %c0_199, %c0_200] : memref<4x1x32xf32, #tpu.memory_space<vmem>>, vector<1x1x32xf32>
    %318 = vector.shape_cast %317 : vector<1x1x32xf32> to vector<1x32xf32>
    %319 = vector.broadcast %318 : vector<1x32xf32> to vector<8x32xf32>
    %320 = arith.addf %316, %319 : vector<8x32xf32>
    %321 = arith.truncf %320 : vector<8x32xf32> to vector<8x32xbf16>
    %cst_201 = arith.constant dense<0.000000e+00> : vector<8x8xf32>
    %322 = tpu.matmul %305, %313, %cst_201 {dimension_numbers = #tpu.dot_dimension_numbers<[1], [1], [0], [0], [0, 0, 1, 0], [], []>} : vector<8x32xbf16>, vector<8x32xbf16>, vector<8x8xf32> -> vector<8x8xf32>
    %cst_202 = arith.constant 0.176776692 : f32
    %323 = vector.broadcast %cst_202 : f32 to vector<8x8xf32>
    %324 = arith.mulf %322, %323 : vector<8x8xf32>
    %cst_203 = arith.constant dense<0xFF800000> : vector<8xf32>
    %325 = vector.multi_reduction <maximumf>, %324, %cst_203 [1] : vector<8x8xf32> to vector<8xf32>
    %326 = vector.shape_cast %325 : vector<8xf32> to vector<8x1xf32>
    %327 = vector.broadcast %326 : vector<8x1xf32> to vector<8x8xf32>
    %328 = arith.subf %324, %327 : vector<8x8xf32>
    %329 = math.exp %328 : vector<8x8xf32>
    %cst_204 = arith.constant dense<0.000000e+00> : vector<8xf32>
    %330 = vector.multi_reduction <add>, %329, %cst_204 [1] : vector<8x8xf32> to vector<8xf32>
    %331 = vector.shape_cast %330 : vector<8xf32> to vector<8x1xf32>
    %332 = tpu.reciprocal %331 {approx = true} : vector<8x1xf32> -> vector<8x1xf32>
    %333 = vector.broadcast %332 : vector<8x1xf32> to vector<8x8xf32>
    %334 = arith.mulf %329, %333 : vector<8x8xf32>
    %335 = arith.truncf %334 : vector<8x8xf32> to vector<8x8xbf16>
    %cst_205 = arith.constant dense<0.000000e+00> : vector<8x32xf32>
    %336 = tpu.matmul %335, %321, %cst_205 {dimension_numbers = #tpu.dot_dimension_numbers<[1], [0], [0], [1], [0, 0, 1, 1], [], []>} : vector<8x8xbf16>, vector<8x32xbf16>, vector<8x32xf32> -> vector<8x32xf32>
    %337 = arith.truncf %336 : vector<8x32xf32> to vector<8x32xbf16>
    %c1_206 = arith.constant 1 : index
    %c0_207 = arith.constant 0 : index
    %c0_208 = arith.constant 0 : index
    %338 = vector.load %arg22[%c1_206, %c0_207, %c0_208] : memref<4x32x128xbf16, #tpu.memory_space<vmem>>, vector<1x32x128xbf16>
    %339 = vector.shape_cast %338 : vector<1x32x128xbf16> to vector<32x128xbf16>
    %cst_209 = arith.constant dense<0.000000e+00> : vector<8x128xf32>
    %340 = tpu.matmul %337, %339, %cst_209 {dimension_numbers = #tpu.dot_dimension_numbers<[1], [0], [0], [1], [0, 0, 1, 1], [], []>} : vector<8x32xbf16>, vector<32x128xbf16>, vector<8x128xf32> -> vector<8x128xf32>
    %341 = arith.addf %297, %340 : vector<8x128xf32>
    %c2_210 = arith.constant 2 : index
    %c0_211 = arith.constant 0 : index
    %c0_212 = arith.constant 0 : index
    %342 = vector.load %arg16[%c2_210, %c0_211, %c0_212] : memref<4x128x32xbf16, #tpu.memory_space<vmem>>, vector<1x128x32xbf16>
    %343 = vector.shape_cast %342 : vector<1x128x32xbf16> to vector<128x32xbf16>
    %cst_213 = arith.constant dense<0.000000e+00> : vector<8x32xf32>
    %344 = tpu.matmul %251, %343, %cst_213 {dimension_numbers = #tpu.dot_dimension_numbers<[1], [0], [0], [1], [0, 0, 1, 1], [], []>} : vector<8x128xbf16>, vector<128x32xbf16>, vector<8x32xf32> -> vector<8x32xf32>
    %c2_214 = arith.constant 2 : index
    %c0_215 = arith.constant 0 : index
    %c0_216 = arith.constant 0 : index
    %345 = vector.load %arg17[%c2_214, %c0_215, %c0_216] : memref<4x1x32xf32, #tpu.memory_space<vmem>>, vector<1x1x32xf32>
    %346 = vector.shape_cast %345 : vector<1x1x32xf32> to vector<1x32xf32>
    %347 = vector.broadcast %346 : vector<1x32xf32> to vector<8x32xf32>
    %348 = arith.addf %344, %347 : vector<8x32xf32>
    %349 = arith.truncf %348 : vector<8x32xf32> to vector<8x32xbf16>
    %c2_217 = arith.constant 2 : index
    %c0_218 = arith.constant 0 : index
    %c0_219 = arith.constant 0 : index
    %350 = vector.load %arg18[%c2_217, %c0_218, %c0_219] : memref<4x128x32xbf16, #tpu.memory_space<vmem>>, vector<1x128x32xbf16>
    %351 = vector.shape_cast %350 : vector<1x128x32xbf16> to vector<128x32xbf16>
    %cst_220 = arith.constant dense<0.000000e+00> : vector<8x32xf32>
    %352 = tpu.matmul %252, %351, %cst_220 {dimension_numbers = #tpu.dot_dimension_numbers<[1], [0], [0], [1], [0, 0, 1, 1], [], []>} : vector<8x128xbf16>, vector<128x32xbf16>, vector<8x32xf32> -> vector<8x32xf32>
    %c2_221 = arith.constant 2 : index
    %c0_222 = arith.constant 0 : index
    %c0_223 = arith.constant 0 : index
    %353 = vector.load %arg19[%c2_221, %c0_222, %c0_223] : memref<4x1x32xf32, #tpu.memory_space<vmem>>, vector<1x1x32xf32>
    %354 = vector.shape_cast %353 : vector<1x1x32xf32> to vector<1x32xf32>
    %355 = vector.broadcast %354 : vector<1x32xf32> to vector<8x32xf32>
    %356 = arith.addf %352, %355 : vector<8x32xf32>
    %357 = arith.truncf %356 : vector<8x32xf32> to vector<8x32xbf16>
    %c2_224 = arith.constant 2 : index
    %c0_225 = arith.constant 0 : index
    %c0_226 = arith.constant 0 : index
    %358 = vector.load %arg20[%c2_224, %c0_225, %c0_226] : memref<4x128x32xbf16, #tpu.memory_space<vmem>>, vector<1x128x32xbf16>
    %359 = vector.shape_cast %358 : vector<1x128x32xbf16> to vector<128x32xbf16>
    %cst_227 = arith.constant dense<0.000000e+00> : vector<8x32xf32>
    %360 = tpu.matmul %252, %359, %cst_227 {dimension_numbers = #tpu.dot_dimension_numbers<[1], [0], [0], [1], [0, 0, 1, 1], [], []>} : vector<8x128xbf16>, vector<128x32xbf16>, vector<8x32xf32> -> vector<8x32xf32>
    %c2_228 = arith.constant 2 : index
    %c0_229 = arith.constant 0 : index
    %c0_230 = arith.constant 0 : index
    %361 = vector.load %arg21[%c2_228, %c0_229, %c0_230] : memref<4x1x32xf32, #tpu.memory_space<vmem>>, vector<1x1x32xf32>
    %362 = vector.shape_cast %361 : vector<1x1x32xf32> to vector<1x32xf32>
    %363 = vector.broadcast %362 : vector<1x32xf32> to vector<8x32xf32>
    %364 = arith.addf %360, %363 : vector<8x32xf32>
    %365 = arith.truncf %364 : vector<8x32xf32> to vector<8x32xbf16>
    %cst_231 = arith.constant dense<0.000000e+00> : vector<8x8xf32>
    %366 = tpu.matmul %349, %357, %cst_231 {dimension_numbers = #tpu.dot_dimension_numbers<[1], [1], [0], [0], [0, 0, 1, 0], [], []>} : vector<8x32xbf16>, vector<8x32xbf16>, vector<8x8xf32> -> vector<8x8xf32>
    %cst_232 = arith.constant 0.176776692 : f32
    %367 = vector.broadcast %cst_232 : f32 to vector<8x8xf32>
    %368 = arith.mulf %366, %367 : vector<8x8xf32>
    %cst_233 = arith.constant dense<0xFF800000> : vector<8xf32>
    %369 = vector.multi_reduction <maximumf>, %368, %cst_233 [1] : vector<8x8xf32> to vector<8xf32>
    %370 = vector.shape_cast %369 : vector<8xf32> to vector<8x1xf32>
    %371 = vector.broadcast %370 : vector<8x1xf32> to vector<8x8xf32>
    %372 = arith.subf %368, %371 : vector<8x8xf32>
    %373 = math.exp %372 : vector<8x8xf32>
    %cst_234 = arith.constant dense<0.000000e+00> : vector<8xf32>
    %374 = vector.multi_reduction <add>, %373, %cst_234 [1] : vector<8x8xf32> to vector<8xf32>
    %375 = vector.shape_cast %374 : vector<8xf32> to vector<8x1xf32>
    %376 = tpu.reciprocal %375 {approx = true} : vector<8x1xf32> -> vector<8x1xf32>
    %377 = vector.broadcast %376 : vector<8x1xf32> to vector<8x8xf32>
    %378 = arith.mulf %373, %377 : vector<8x8xf32>
    %379 = arith.truncf %378 : vector<8x8xf32> to vector<8x8xbf16>
    %cst_235 = arith.constant dense<0.000000e+00> : vector<8x32xf32>
    %380 = tpu.matmul %379, %365, %cst_235 {dimension_numbers = #tpu.dot_dimension_numbers<[1], [0], [0], [1], [0, 0, 1, 1], [], []>} : vector<8x8xbf16>, vector<8x32xbf16>, vector<8x32xf32> -> vector<8x32xf32>
    %381 = arith.truncf %380 : vector<8x32xf32> to vector<8x32xbf16>
    %c2_236 = arith.constant 2 : index
    %c0_237 = arith.constant 0 : index
    %c0_238 = arith.constant 0 : index
    %382 = vector.load %arg22[%c2_236, %c0_237, %c0_238] : memref<4x32x128xbf16, #tpu.memory_space<vmem>>, vector<1x32x128xbf16>
    %383 = vector.shape_cast %382 : vector<1x32x128xbf16> to vector<32x128xbf16>
    %cst_239 = arith.constant dense<0.000000e+00> : vector<8x128xf32>
    %384 = tpu.matmul %381, %383, %cst_239 {dimension_numbers = #tpu.dot_dimension_numbers<[1], [0], [0], [1], [0, 0, 1, 1], [], []>} : vector<8x32xbf16>, vector<32x128xbf16>, vector<8x128xf32> -> vector<8x128xf32>
    %385 = arith.addf %341, %384 : vector<8x128xf32>
    %c3_240 = arith.constant 3 : index
    %c0_241 = arith.constant 0 : index
    %c0_242 = arith.constant 0 : index
    %386 = vector.load %arg16[%c3_240, %c0_241, %c0_242] : memref<4x128x32xbf16, #tpu.memory_space<vmem>>, vector<1x128x32xbf16>
    %387 = vector.shape_cast %386 : vector<1x128x32xbf16> to vector<128x32xbf16>
    %cst_243 = arith.constant dense<0.000000e+00> : vector<8x32xf32>
    %388 = tpu.matmul %251, %387, %cst_243 {dimension_numbers = #tpu.dot_dimension_numbers<[1], [0], [0], [1], [0, 0, 1, 1], [], []>} : vector<8x128xbf16>, vector<128x32xbf16>, vector<8x32xf32> -> vector<8x32xf32>
    %c3_244 = arith.constant 3 : index
    %c0_245 = arith.constant 0 : index
    %c0_246 = arith.constant 0 : index
    %389 = vector.load %arg17[%c3_244, %c0_245, %c0_246] : memref<4x1x32xf32, #tpu.memory_space<vmem>>, vector<1x1x32xf32>
    %390 = vector.shape_cast %389 : vector<1x1x32xf32> to vector<1x32xf32>
    %391 = vector.broadcast %390 : vector<1x32xf32> to vector<8x32xf32>
    %392 = arith.addf %388, %391 : vector<8x32xf32>
    %393 = arith.truncf %392 : vector<8x32xf32> to vector<8x32xbf16>
    %c3_247 = arith.constant 3 : index
    %c0_248 = arith.constant 0 : index
    %c0_249 = arith.constant 0 : index
    %394 = vector.load %arg18[%c3_247, %c0_248, %c0_249] : memref<4x128x32xbf16, #tpu.memory_space<vmem>>, vector<1x128x32xbf16>
    %395 = vector.shape_cast %394 : vector<1x128x32xbf16> to vector<128x32xbf16>
    %cst_250 = arith.constant dense<0.000000e+00> : vector<8x32xf32>
    %396 = tpu.matmul %252, %395, %cst_250 {dimension_numbers = #tpu.dot_dimension_numbers<[1], [0], [0], [1], [0, 0, 1, 1], [], []>} : vector<8x128xbf16>, vector<128x32xbf16>, vector<8x32xf32> -> vector<8x32xf32>
    %c3_251 = arith.constant 3 : index
    %c0_252 = arith.constant 0 : index
    %c0_253 = arith.constant 0 : index
    %397 = vector.load %arg19[%c3_251, %c0_252, %c0_253] : memref<4x1x32xf32, #tpu.memory_space<vmem>>, vector<1x1x32xf32>
    %398 = vector.shape_cast %397 : vector<1x1x32xf32> to vector<1x32xf32>
    %399 = vector.broadcast %398 : vector<1x32xf32> to vector<8x32xf32>
    %400 = arith.addf %396, %399 : vector<8x32xf32>
    %401 = arith.truncf %400 : vector<8x32xf32> to vector<8x32xbf16>
    %c3_254 = arith.constant 3 : index
    %c0_255 = arith.constant 0 : index
    %c0_256 = arith.constant 0 : index
    %402 = vector.load %arg20[%c3_254, %c0_255, %c0_256] : memref<4x128x32xbf16, #tpu.memory_space<vmem>>, vector<1x128x32xbf16>
    %403 = vector.shape_cast %402 : vector<1x128x32xbf16> to vector<128x32xbf16>
    %cst_257 = arith.constant dense<0.000000e+00> : vector<8x32xf32>
    %404 = tpu.matmul %252, %403, %cst_257 {dimension_numbers = #tpu.dot_dimension_numbers<[1], [0], [0], [1], [0, 0, 1, 1], [], []>} : vector<8x128xbf16>, vector<128x32xbf16>, vector<8x32xf32> -> vector<8x32xf32>
    %c3_258 = arith.constant 3 : index
    %c0_259 = arith.constant 0 : index
    %c0_260 = arith.constant 0 : index
    %405 = vector.load %arg21[%c3_258, %c0_259, %c0_260] : memref<4x1x32xf32, #tpu.memory_space<vmem>>, vector<1x1x32xf32>
    %406 = vector.shape_cast %405 : vector<1x1x32xf32> to vector<1x32xf32>
    %407 = vector.broadcast %406 : vector<1x32xf32> to vector<8x32xf32>
    %408 = arith.addf %404, %407 : vector<8x32xf32>
    %409 = arith.truncf %408 : vector<8x32xf32> to vector<8x32xbf16>
    %cst_261 = arith.constant dense<0.000000e+00> : vector<8x8xf32>
    %410 = tpu.matmul %393, %401, %cst_261 {dimension_numbers = #tpu.dot_dimension_numbers<[1], [1], [0], [0], [0, 0, 1, 0], [], []>} : vector<8x32xbf16>, vector<8x32xbf16>, vector<8x8xf32> -> vector<8x8xf32>
    %cst_262 = arith.constant 0.176776692 : f32
    %411 = vector.broadcast %cst_262 : f32 to vector<8x8xf32>
    %412 = arith.mulf %410, %411 : vector<8x8xf32>
    %cst_263 = arith.constant dense<0xFF800000> : vector<8xf32>
    %413 = vector.multi_reduction <maximumf>, %412, %cst_263 [1] : vector<8x8xf32> to vector<8xf32>
    %414 = vector.shape_cast %413 : vector<8xf32> to vector<8x1xf32>
    %415 = vector.broadcast %414 : vector<8x1xf32> to vector<8x8xf32>
    %416 = arith.subf %412, %415 : vector<8x8xf32>
    %417 = math.exp %416 : vector<8x8xf32>
    %cst_264 = arith.constant dense<0.000000e+00> : vector<8xf32>
    %418 = vector.multi_reduction <add>, %417, %cst_264 [1] : vector<8x8xf32> to vector<8xf32>
    %419 = vector.shape_cast %418 : vector<8xf32> to vector<8x1xf32>
    %420 = tpu.reciprocal %419 {approx = true} : vector<8x1xf32> -> vector<8x1xf32>
    %421 = vector.broadcast %420 : vector<8x1xf32> to vector<8x8xf32>
    %422 = arith.mulf %417, %421 : vector<8x8xf32>
    %423 = arith.truncf %422 : vector<8x8xf32> to vector<8x8xbf16>
    %cst_265 = arith.constant dense<0.000000e+00> : vector<8x32xf32>
    %424 = tpu.matmul %423, %409, %cst_265 {dimension_numbers = #tpu.dot_dimension_numbers<[1], [0], [0], [1], [0, 0, 1, 1], [], []>} : vector<8x8xbf16>, vector<8x32xbf16>, vector<8x32xf32> -> vector<8x32xf32>
    %425 = arith.truncf %424 : vector<8x32xf32> to vector<8x32xbf16>
    %c3_266 = arith.constant 3 : index
    %c0_267 = arith.constant 0 : index
    %c0_268 = arith.constant 0 : index
    %426 = vector.load %arg22[%c3_266, %c0_267, %c0_268] : memref<4x32x128xbf16, #tpu.memory_space<vmem>>, vector<1x32x128xbf16>
    %427 = vector.shape_cast %426 : vector<1x32x128xbf16> to vector<32x128xbf16>
    %cst_269 = arith.constant dense<0.000000e+00> : vector<8x128xf32>
    %428 = tpu.matmul %425, %427, %cst_269 {dimension_numbers = #tpu.dot_dimension_numbers<[1], [0], [0], [1], [0, 0, 1, 1], [], []>} : vector<8x32xbf16>, vector<32x128xbf16>, vector<8x128xf32> -> vector<8x128xf32>
    %429 = arith.addf %385, %428 : vector<8x128xf32>
    %430 = arith.addf %228, %429 : vector<8x128xf32>
    %c0_270 = arith.constant 0 : index
    %c0_271 = arith.constant 0 : index
    %431 = vector.load %arg23[%c0_270, %c0_271] : memref<1x128xf32, #tpu.memory_space<vmem>>, vector<1x128xf32>
    %432 = vector.broadcast %431 : vector<1x128xf32> to vector<8x128xf32>
    %433 = arith.addf %430, %432 : vector<8x128xf32>
    %c0_272 = arith.constant 0 : index
    %c0_273 = arith.constant 0 : index
    %434 = vector.load %arg24[%c0_272, %c0_273] : memref<1x128xf32, #tpu.memory_space<vmem>>, vector<1x128xf32>
    %c0_274 = arith.constant 0 : index
    %c0_275 = arith.constant 0 : index
    %435 = vector.load %arg25[%c0_274, %c0_275] : memref<1x128xf32, #tpu.memory_space<vmem>>, vector<1x128xf32>
    %cst_276 = arith.constant dense<0.000000e+00> : vector<8xf32>
    %436 = vector.multi_reduction <add>, %433, %cst_276 [1] : vector<8x128xf32> to vector<8xf32>
    %437 = vector.shape_cast %436 : vector<8xf32> to vector<8x1xf32>
    %cst_277 = arith.constant 1.280000e+02 : f32
    %438 = vector.broadcast %cst_277 : f32 to vector<8x1xf32>
    %439 = arith.divf %437, %438 : vector<8x1xf32>
    %440 = vector.broadcast %439 : vector<8x1xf32> to vector<8x128xf32>
    %441 = arith.subf %433, %440 : vector<8x128xf32>
    %442 = arith.mulf %441, %441 : vector<8x128xf32>
    %cst_278 = arith.constant dense<0.000000e+00> : vector<8xf32>
    %443 = vector.multi_reduction <add>, %442, %cst_278 [1] : vector<8x128xf32> to vector<8xf32>
    %444 = vector.shape_cast %443 : vector<8xf32> to vector<8x1xf32>
    %cst_279 = arith.constant 1.280000e+02 : f32
    %445 = vector.broadcast %cst_279 : f32 to vector<8x1xf32>
    %446 = arith.divf %444, %445 : vector<8x1xf32>
    %cst_280 = arith.constant 9.99999974E-6 : f32
    %447 = vector.broadcast %cst_280 : f32 to vector<8x1xf32>
    %448 = arith.addf %446, %447 : vector<8x1xf32>
    %449 = math.rsqrt %448 : vector<8x1xf32>
    %450 = vector.broadcast %449 : vector<8x1xf32> to vector<8x128xf32>
    %451 = arith.mulf %441, %450 : vector<8x128xf32>
    %452 = vector.broadcast %434 : vector<1x128xf32> to vector<8x128xf32>
    %453 = arith.mulf %451, %452 : vector<8x128xf32>
    %454 = vector.broadcast %435 : vector<1x128xf32> to vector<8x128xf32>
    %455 = arith.addf %453, %454 : vector<8x128xf32>
    %456 = arith.truncf %455 : vector<8x128xf32> to vector<8x128xbf16>
    %c0_281 = arith.constant 0 : index
    %c0_282 = arith.constant 0 : index
    %457 = vector.load %arg26[%c0_281, %c0_282] : memref<128x256xbf16, #tpu.memory_space<vmem>>, vector<128x256xbf16>
    %cst_283 = arith.constant dense<0.000000e+00> : vector<8x256xf32>
    %458 = tpu.matmul %456, %457, %cst_283 {dimension_numbers = #tpu.dot_dimension_numbers<[1], [0], [0], [1], [0, 0, 1, 1], [], []>} : vector<8x128xbf16>, vector<128x256xbf16>, vector<8x256xf32> -> vector<8x256xf32>
    %c0_284 = arith.constant 0 : index
    %c0_285 = arith.constant 0 : index
    %459 = vector.load %arg27[%c0_284, %c0_285] : memref<1x256xf32, #tpu.memory_space<vmem>>, vector<1x256xf32>
    %460 = vector.broadcast %459 : vector<1x256xf32> to vector<8x256xf32>
    %461 = arith.addf %458, %460 : vector<8x256xf32>
    %462 = arith.mulf %461, %461 : vector<8x256xf32>
    %463 = arith.mulf %461, %462 : vector<8x256xf32>
    %cst_286 = arith.constant 4.471500e-02 : f32
    %464 = vector.broadcast %cst_286 : f32 to vector<8x256xf32>
    %465 = arith.mulf %464, %463 : vector<8x256xf32>
    %466 = arith.addf %461, %465 : vector<8x256xf32>
    %cst_287 = arith.constant 0.797884583 : f32
    %467 = vector.broadcast %cst_287 : f32 to vector<8x256xf32>
    %468 = arith.mulf %467, %466 : vector<8x256xf32>
    %469 = math.tanh %468 : vector<8x256xf32>
    %cst_288 = arith.constant 1.000000e+00 : f32
    %470 = vector.broadcast %cst_288 : f32 to vector<8x256xf32>
    %471 = arith.addf %470, %469 : vector<8x256xf32>
    %cst_289 = arith.constant 5.000000e-01 : f32
    %472 = vector.broadcast %cst_289 : f32 to vector<8x256xf32>
    %473 = arith.mulf %472, %471 : vector<8x256xf32>
    %474 = arith.mulf %461, %473 : vector<8x256xf32>
    %475 = arith.truncf %474 : vector<8x256xf32> to vector<8x256xbf16>
    %c0_290 = arith.constant 0 : index
    %c0_291 = arith.constant 0 : index
    %476 = vector.load %arg28[%c0_290, %c0_291] : memref<256x128xbf16, #tpu.memory_space<vmem>>, vector<256x128xbf16>
    %cst_292 = arith.constant dense<0.000000e+00> : vector<8x128xf32>
    %477 = tpu.matmul %475, %476, %cst_292 {dimension_numbers = #tpu.dot_dimension_numbers<[1], [0], [0], [1], [0, 0, 1, 1], [], []>} : vector<8x256xbf16>, vector<256x128xbf16>, vector<8x128xf32> -> vector<8x128xf32>
    %c0_293 = arith.constant 0 : index
    %c0_294 = arith.constant 0 : index
    %478 = vector.load %arg29[%c0_293, %c0_294] : memref<1x128xf32, #tpu.memory_space<vmem>>, vector<1x128xf32>
    %479 = vector.broadcast %478 : vector<1x128xf32> to vector<8x128xf32>
    %480 = arith.addf %477, %479 : vector<8x128xf32>
    %481 = arith.addf %433, %480 : vector<8x128xf32>
    %c0_295 = arith.constant 0 : index
    %c0_296 = arith.constant 0 : index
    %c0_297 = arith.constant 0 : index
    %482 = vector.load %arg46[%c0_295, %c0_296, %c0_297] : memref<1x8x128xf32, #tpu.memory_space<vmem>>, vector<1x8x128xf32>
    %483 = vector.shape_cast %482 : vector<1x8x128xf32> to vector<8x128xf32>
    %484 = vector.shape_cast %481 : vector<8x128xf32> to vector<1x8x128xf32>
    tpu.vector_store %arg46[%c0_295, %c0_296, %c0_297], %484 {strides = array<i32>} : memref<1x8x128xf32, #tpu.memory_space<vmem>>, vector<1x8x128xf32>,
    %c0_298 = arith.constant 0 : index
    %c0_299 = arith.constant 0 : index
    %485 = vector.load %arg30[%c0_298, %c0_299] : memref<1x128xf32, #tpu.memory_space<vmem>>, vector<1x128xf32>
    %c0_300 = arith.constant 0 : index
    %c0_301 = arith.constant 0 : index
    %486 = vector.load %arg31[%c0_300, %c0_301] : memref<1x128xf32, #tpu.memory_space<vmem>>, vector<1x128xf32>
    %cst_302 = arith.constant dense<0.000000e+00> : vector<16xf32>
    %487 = vector.multi_reduction <add>, %3, %cst_302 [1] : vector<16x128xf32> to vector<16xf32>
    %488 = vector.shape_cast %487 : vector<16xf32> to vector<16x1xf32>
    %cst_303 = arith.constant 1.280000e+02 : f32
    %489 = vector.broadcast %cst_303 : f32 to vector<16x1xf32>
    %490 = arith.divf %488, %489 : vector<16x1xf32>
    %491 = vector.broadcast %490 : vector<16x1xf32> to vector<16x128xf32>
    %492 = arith.subf %3, %491 : vector<16x128xf32>
    %493 = arith.mulf %492, %492 : vector<16x128xf32>
    %cst_304 = arith.constant dense<0.000000e+00> : vector<16xf32>
    %494 = vector.multi_reduction <add>, %493, %cst_304 [1] : vector<16x128xf32> to vector<16xf32>
    %495 = vector.shape_cast %494 : vector<16xf32> to vector<16x1xf32>
    %cst_305 = arith.constant 1.280000e+02 : f32
    %496 = vector.broadcast %cst_305 : f32 to vector<16x1xf32>
    %497 = arith.divf %495, %496 : vector<16x1xf32>
    %cst_306 = arith.constant 9.99999974E-6 : f32
    %498 = vector.broadcast %cst_306 : f32 to vector<16x1xf32>
    %499 = arith.addf %497, %498 : vector<16x1xf32>
    %500 = math.rsqrt %499 : vector<16x1xf32>
    %501 = vector.broadcast %500 : vector<16x1xf32> to vector<16x128xf32>
    %502 = arith.mulf %492, %501 : vector<16x128xf32>
    %503 = vector.broadcast %485 : vector<1x128xf32> to vector<16x128xf32>
    %504 = arith.mulf %502, %503 : vector<16x128xf32>
    %505 = vector.broadcast %486 : vector<1x128xf32> to vector<16x128xf32>
    %506 = arith.addf %504, %505 : vector<16x128xf32>
    %507 = arith.truncf %506 : vector<16x128xf32> to vector<16x128xbf16>
    %508 = arith.truncf %481 : vector<8x128xf32> to vector<8x128xbf16>
    %cst_307 = arith.constant 0.000000e+00 : f32
    %509 = vector.broadcast %cst_307 : f32 to vector<16x128xf32>
    %c0_308 = arith.constant 0 : index
    %c0_309 = arith.constant 0 : index
    %c0_310 = arith.constant 0 : index
    %510 = vector.load %arg32[%c0_308, %c0_309, %c0_310] : memref<4x128x32xbf16, #tpu.memory_space<vmem>>, vector<1x128x32xbf16>
    %511 = vector.shape_cast %510 : vector<1x128x32xbf16> to vector<128x32xbf16>
    %cst_311 = arith.constant dense<0.000000e+00> : vector<16x32xf32>
    %512 = tpu.matmul %507, %511, %cst_311 {dimension_numbers = #tpu.dot_dimension_numbers<[1], [0], [0], [1], [0, 0, 1, 1], [], []>} : vector<16x128xbf16>, vector<128x32xbf16>, vector<16x32xf32> -> vector<16x32xf32>
    %c0_312 = arith.constant 0 : index
    %c0_313 = arith.constant 0 : index
    %c0_314 = arith.constant 0 : index
    %513 = vector.load %arg33[%c0_312, %c0_313, %c0_314] : memref<4x1x32xf32, #tpu.memory_space<vmem>>, vector<1x1x32xf32>
    %514 = vector.shape_cast %513 : vector<1x1x32xf32> to vector<1x32xf32>
    %515 = vector.broadcast %514 : vector<1x32xf32> to vector<16x32xf32>
    %516 = arith.addf %512, %515 : vector<16x32xf32>
    %517 = arith.truncf %516 : vector<16x32xf32> to vector<16x32xbf16>
    %c0_315 = arith.constant 0 : index
    %c0_316 = arith.constant 0 : index
    %c0_317 = arith.constant 0 : index
    %518 = vector.load %arg34[%c0_315, %c0_316, %c0_317] : memref<4x128x32xbf16, #tpu.memory_space<vmem>>, vector<1x128x32xbf16>
    %519 = vector.shape_cast %518 : vector<1x128x32xbf16> to vector<128x32xbf16>
    %cst_318 = arith.constant dense<0.000000e+00> : vector<8x32xf32>
    %520 = tpu.matmul %508, %519, %cst_318 {dimension_numbers = #tpu.dot_dimension_numbers<[1], [0], [0], [1], [0, 0, 1, 1], [], []>} : vector<8x128xbf16>, vector<128x32xbf16>, vector<8x32xf32> -> vector<8x32xf32>
    %c0_319 = arith.constant 0 : index
    %c0_320 = arith.constant 0 : index
    %c0_321 = arith.constant 0 : index
    %521 = vector.load %arg35[%c0_319, %c0_320, %c0_321] : memref<4x1x32xf32, #tpu.memory_space<vmem>>, vector<1x1x32xf32>
    %522 = vector.shape_cast %521 : vector<1x1x32xf32> to vector<1x32xf32>
    %523 = vector.broadcast %522 : vector<1x32xf32> to vector<8x32xf32>
    %524 = arith.addf %520, %523 : vector<8x32xf32>
    %525 = arith.truncf %524 : vector<8x32xf32> to vector<8x32xbf16>
    %c0_322 = arith.constant 0 : index
    %c0_323 = arith.constant 0 : index
    %c0_324 = arith.constant 0 : index
    %526 = vector.load %arg36[%c0_322, %c0_323, %c0_324] : memref<4x128x32xbf16, #tpu.memory_space<vmem>>, vector<1x128x32xbf16>
    %527 = vector.shape_cast %526 : vector<1x128x32xbf16> to vector<128x32xbf16>
    %cst_325 = arith.constant dense<0.000000e+00> : vector<8x32xf32>
    %528 = tpu.matmul %508, %527, %cst_325 {dimension_numbers = #tpu.dot_dimension_numbers<[1], [0], [0], [1], [0, 0, 1, 1], [], []>} : vector<8x128xbf16>, vector<128x32xbf16>, vector<8x32xf32> -> vector<8x32xf32>
    %c0_326 = arith.constant 0 : index
    %c0_327 = arith.constant 0 : index
    %c0_328 = arith.constant 0 : index
    %529 = vector.load %arg37[%c0_326, %c0_327, %c0_328] : memref<4x1x32xf32, #tpu.memory_space<vmem>>, vector<1x1x32xf32>
    %530 = vector.shape_cast %529 : vector<1x1x32xf32> to vector<1x32xf32>
    %531 = vector.broadcast %530 : vector<1x32xf32> to vector<8x32xf32>
    %532 = arith.addf %528, %531 : vector<8x32xf32>
    %533 = arith.truncf %532 : vector<8x32xf32> to vector<8x32xbf16>
    %cst_329 = arith.constant dense<0.000000e+00> : vector<16x8xf32>
    %534 = tpu.matmul %517, %525, %cst_329 {dimension_numbers = #tpu.dot_dimension_numbers<[1], [1], [0], [0], [0, 0, 1, 0], [], []>} : vector<16x32xbf16>, vector<8x32xbf16>, vector<16x8xf32> -> vector<16x8xf32>
    %cst_330 = arith.constant 0.176776692 : f32
    %535 = vector.broadcast %cst_330 : f32 to vector<16x8xf32>
    %536 = arith.mulf %534, %535 : vector<16x8xf32>
    %537 = arith.addf %536, %19 : vector<16x8xf32>
    %cst_331 = arith.constant dense<0xFF800000> : vector<16xf32>
    %538 = vector.multi_reduction <maximumf>, %537, %cst_331 [1] : vector<16x8xf32> to vector<16xf32>
    %539 = vector.shape_cast %538 : vector<16xf32> to vector<16x1xf32>
    %540 = vector.broadcast %539 : vector<16x1xf32> to vector<16x8xf32>
    %541 = arith.subf %537, %540 : vector<16x8xf32>
    %542 = math.exp %541 : vector<16x8xf32>
    %cst_332 = arith.constant dense<0.000000e+00> : vector<16xf32>
    %543 = vector.multi_reduction <add>, %542, %cst_332 [1] : vector<16x8xf32> to vector<16xf32>
    %544 = vector.shape_cast %543 : vector<16xf32> to vector<16x1xf32>
    %545 = tpu.reciprocal %544 {approx = true} : vector<16x1xf32> -> vector<16x1xf32>
    %546 = vector.broadcast %545 : vector<16x1xf32> to vector<16x8xf32>
    %547 = arith.mulf %542, %546 : vector<16x8xf32>
    %548 = arith.truncf %547 : vector<16x8xf32> to vector<16x8xbf16>
    %cst_333 = arith.constant dense<0.000000e+00> : vector<16x32xf32>
    %549 = tpu.matmul %548, %533, %cst_333 {dimension_numbers = #tpu.dot_dimension_numbers<[1], [0], [0], [1], [0, 0, 1, 1], [], []>} : vector<16x8xbf16>, vector<8x32xbf16>, vector<16x32xf32> -> vector<16x32xf32>
    %550 = arith.truncf %549 : vector<16x32xf32> to vector<16x32xbf16>
    %c0_334 = arith.constant 0 : index
    %c0_335 = arith.constant 0 : index
    %c0_336 = arith.constant 0 : index
    %551 = vector.load %arg38[%c0_334, %c0_335, %c0_336] : memref<4x32x128xbf16, #tpu.memory_space<vmem>>, vector<1x32x128xbf16>
    %552 = vector.shape_cast %551 : vector<1x32x128xbf16> to vector<32x128xbf16>
    %cst_337 = arith.constant dense<0.000000e+00> : vector<16x128xf32>
    %553 = tpu.matmul %550, %552, %cst_337 {dimension_numbers = #tpu.dot_dimension_numbers<[1], [0], [0], [1], [0, 0, 1, 1], [], []>} : vector<16x32xbf16>, vector<32x128xbf16>, vector<16x128xf32> -> vector<16x128xf32>
    %554 = arith.addf %509, %553 : vector<16x128xf32>
    %c1_338 = arith.constant 1 : index
    %c0_339 = arith.constant 0 : index
    %c0_340 = arith.constant 0 : index
    %555 = vector.load %arg32[%c1_338, %c0_339, %c0_340] : memref<4x128x32xbf16, #tpu.memory_space<vmem>>, vector<1x128x32xbf16>
    %556 = vector.shape_cast %555 : vector<1x128x32xbf16> to vector<128x32xbf16>
    %cst_341 = arith.constant dense<0.000000e+00> : vector<16x32xf32>
    %557 = tpu.matmul %507, %556, %cst_341 {dimension_numbers = #tpu.dot_dimension_numbers<[1], [0], [0], [1], [0, 0, 1, 1], [], []>} : vector<16x128xbf16>, vector<128x32xbf16>, vector<16x32xf32> -> vector<16x32xf32>
    %c1_342 = arith.constant 1 : index
    %c0_343 = arith.constant 0 : index
    %c0_344 = arith.constant 0 : index
    %558 = vector.load %arg33[%c1_342, %c0_343, %c0_344] : memref<4x1x32xf32, #tpu.memory_space<vmem>>, vector<1x1x32xf32>
    %559 = vector.shape_cast %558 : vector<1x1x32xf32> to vector<1x32xf32>
    %560 = vector.broadcast %559 : vector<1x32xf32> to vector<16x32xf32>
    %561 = arith.addf %557, %560 : vector<16x32xf32>
    %562 = arith.truncf %561 : vector<16x32xf32> to vector<16x32xbf16>
    %c1_345 = arith.constant 1 : index
    %c0_346 = arith.constant 0 : index
    %c0_347 = arith.constant 0 : index
    %563 = vector.load %arg34[%c1_345, %c0_346, %c0_347] : memref<4x128x32xbf16, #tpu.memory_space<vmem>>, vector<1x128x32xbf16>
    %564 = vector.shape_cast %563 : vector<1x128x32xbf16> to vector<128x32xbf16>
    %cst_348 = arith.constant dense<0.000000e+00> : vector<8x32xf32>
    %565 = tpu.matmul %508, %564, %cst_348 {dimension_numbers = #tpu.dot_dimension_numbers<[1], [0], [0], [1], [0, 0, 1, 1], [], []>} : vector<8x128xbf16>, vector<128x32xbf16>, vector<8x32xf32> -> vector<8x32xf32>
    %c1_349 = arith.constant 1 : index
    %c0_350 = arith.constant 0 : index
    %c0_351 = arith.constant 0 : index
    %566 = vector.load %arg35[%c1_349, %c0_350, %c0_351] : memref<4x1x32xf32, #tpu.memory_space<vmem>>, vector<1x1x32xf32>
    %567 = vector.shape_cast %566 : vector<1x1x32xf32> to vector<1x32xf32>
    %568 = vector.broadcast %567 : vector<1x32xf32> to vector<8x32xf32>
    %569 = arith.addf %565, %568 : vector<8x32xf32>
    %570 = arith.truncf %569 : vector<8x32xf32> to vector<8x32xbf16>
    %c1_352 = arith.constant 1 : index
    %c0_353 = arith.constant 0 : index
    %c0_354 = arith.constant 0 : index
    %571 = vector.load %arg36[%c1_352, %c0_353, %c0_354] : memref<4x128x32xbf16, #tpu.memory_space<vmem>>, vector<1x128x32xbf16>
    %572 = vector.shape_cast %571 : vector<1x128x32xbf16> to vector<128x32xbf16>
    %cst_355 = arith.constant dense<0.000000e+00> : vector<8x32xf32>
    %573 = tpu.matmul %508, %572, %cst_355 {dimension_numbers = #tpu.dot_dimension_numbers<[1], [0], [0], [1], [0, 0, 1, 1], [], []>} : vector<8x128xbf16>, vector<128x32xbf16>, vector<8x32xf32> -> vector<8x32xf32>
    %c1_356 = arith.constant 1 : index
    %c0_357 = arith.constant 0 : index
    %c0_358 = arith.constant 0 : index
    %574 = vector.load %arg37[%c1_356, %c0_357, %c0_358] : memref<4x1x32xf32, #tpu.memory_space<vmem>>, vector<1x1x32xf32>
    %575 = vector.shape_cast %574 : vector<1x1x32xf32> to vector<1x32xf32>
    %576 = vector.broadcast %575 : vector<1x32xf32> to vector<8x32xf32>
    %577 = arith.addf %573, %576 : vector<8x32xf32>
    %578 = arith.truncf %577 : vector<8x32xf32> to vector<8x32xbf16>
    %cst_359 = arith.constant dense<0.000000e+00> : vector<16x8xf32>
    %579 = tpu.matmul %562, %570, %cst_359 {dimension_numbers = #tpu.dot_dimension_numbers<[1], [1], [0], [0], [0, 0, 1, 0], [], []>} : vector<16x32xbf16>, vector<8x32xbf16>, vector<16x8xf32> -> vector<16x8xf32>
    %cst_360 = arith.constant 0.176776692 : f32
    %580 = vector.broadcast %cst_360 : f32 to vector<16x8xf32>
    %581 = arith.mulf %579, %580 : vector<16x8xf32>
    %582 = arith.addf %581, %19 : vector<16x8xf32>
    %cst_361 = arith.constant dense<0xFF800000> : vector<16xf32>
    %583 = vector.multi_reduction <maximumf>, %582, %cst_361 [1] : vector<16x8xf32> to vector<16xf32>
    %584 = vector.shape_cast %583 : vector<16xf32> to vector<16x1xf32>
    %585 = vector.broadcast %584 : vector<16x1xf32> to vector<16x8xf32>
    %586 = arith.subf %582, %585 : vector<16x8xf32>
    %587 = math.exp %586 : vector<16x8xf32>
    %cst_362 = arith.constant dense<0.000000e+00> : vector<16xf32>
    %588 = vector.multi_reduction <add>, %587, %cst_362 [1] : vector<16x8xf32> to vector<16xf32>
    %589 = vector.shape_cast %588 : vector<16xf32> to vector<16x1xf32>
    %590 = tpu.reciprocal %589 {approx = true} : vector<16x1xf32> -> vector<16x1xf32>
    %591 = vector.broadcast %590 : vector<16x1xf32> to vector<16x8xf32>
    %592 = arith.mulf %587, %591 : vector<16x8xf32>
    %593 = arith.truncf %592 : vector<16x8xf32> to vector<16x8xbf16>
    %cst_363 = arith.constant dense<0.000000e+00> : vector<16x32xf32>
    %594 = tpu.matmul %593, %578, %cst_363 {dimension_numbers = #tpu.dot_dimension_numbers<[1], [0], [0], [1], [0, 0, 1, 1], [], []>} : vector<16x8xbf16>, vector<8x32xbf16>, vector<16x32xf32> -> vector<16x32xf32>
    %595 = arith.truncf %594 : vector<16x32xf32> to vector<16x32xbf16>
    %c1_364 = arith.constant 1 : index
    %c0_365 = arith.constant 0 : index
    %c0_366 = arith.constant 0 : index
    %596 = vector.load %arg38[%c1_364, %c0_365, %c0_366] : memref<4x32x128xbf16, #tpu.memory_space<vmem>>, vector<1x32x128xbf16>
    %597 = vector.shape_cast %596 : vector<1x32x128xbf16> to vector<32x128xbf16>
    %cst_367 = arith.constant dense<0.000000e+00> : vector<16x128xf32>
    %598 = tpu.matmul %595, %597, %cst_367 {dimension_numbers = #tpu.dot_dimension_numbers<[1], [0], [0], [1], [0, 0, 1, 1], [], []>} : vector<16x32xbf16>, vector<32x128xbf16>, vector<16x128xf32> -> vector<16x128xf32>
    %599 = arith.addf %554, %598 : vector<16x128xf32>
    %c2_368 = arith.constant 2 : index
    %c0_369 = arith.constant 0 : index
    %c0_370 = arith.constant 0 : index
    %600 = vector.load %arg32[%c2_368, %c0_369, %c0_370] : memref<4x128x32xbf16, #tpu.memory_space<vmem>>, vector<1x128x32xbf16>
    %601 = vector.shape_cast %600 : vector<1x128x32xbf16> to vector<128x32xbf16>
    %cst_371 = arith.constant dense<0.000000e+00> : vector<16x32xf32>
    %602 = tpu.matmul %507, %601, %cst_371 {dimension_numbers = #tpu.dot_dimension_numbers<[1], [0], [0], [1], [0, 0, 1, 1], [], []>} : vector<16x128xbf16>, vector<128x32xbf16>, vector<16x32xf32> -> vector<16x32xf32>
    %c2_372 = arith.constant 2 : index
    %c0_373 = arith.constant 0 : index
    %c0_374 = arith.constant 0 : index
    %603 = vector.load %arg33[%c2_372, %c0_373, %c0_374] : memref<4x1x32xf32, #tpu.memory_space<vmem>>, vector<1x1x32xf32>
    %604 = vector.shape_cast %603 : vector<1x1x32xf32> to vector<1x32xf32>
    %605 = vector.broadcast %604 : vector<1x32xf32> to vector<16x32xf32>
    %606 = arith.addf %602, %605 : vector<16x32xf32>
    %607 = arith.truncf %606 : vector<16x32xf32> to vector<16x32xbf16>
    %c2_375 = arith.constant 2 : index
    %c0_376 = arith.constant 0 : index
    %c0_377 = arith.constant 0 : index
    %608 = vector.load %arg34[%c2_375, %c0_376, %c0_377] : memref<4x128x32xbf16, #tpu.memory_space<vmem>>, vector<1x128x32xbf16>
    %609 = vector.shape_cast %608 : vector<1x128x32xbf16> to vector<128x32xbf16>
    %cst_378 = arith.constant dense<0.000000e+00> : vector<8x32xf32>
    %610 = tpu.matmul %508, %609, %cst_378 {dimension_numbers = #tpu.dot_dimension_numbers<[1], [0], [0], [1], [0, 0, 1, 1], [], []>} : vector<8x128xbf16>, vector<128x32xbf16>, vector<8x32xf32> -> vector<8x32xf32>
    %c2_379 = arith.constant 2 : index
    %c0_380 = arith.constant 0 : index
    %c0_381 = arith.constant 0 : index
    %611 = vector.load %arg35[%c2_379, %c0_380, %c0_381] : memref<4x1x32xf32, #tpu.memory_space<vmem>>, vector<1x1x32xf32>
    %612 = vector.shape_cast %611 : vector<1x1x32xf32> to vector<1x32xf32>
    %613 = vector.broadcast %612 : vector<1x32xf32> to vector<8x32xf32>
    %614 = arith.addf %610, %613 : vector<8x32xf32>
    %615 = arith.truncf %614 : vector<8x32xf32> to vector<8x32xbf16>
    %c2_382 = arith.constant 2 : index
    %c0_383 = arith.constant 0 : index
    %c0_384 = arith.constant 0 : index
    %616 = vector.load %arg36[%c2_382, %c0_383, %c0_384] : memref<4x128x32xbf16, #tpu.memory_space<vmem>>, vector<1x128x32xbf16>
    %617 = vector.shape_cast %616 : vector<1x128x32xbf16> to vector<128x32xbf16>
    %cst_385 = arith.constant dense<0.000000e+00> : vector<8x32xf32>
    %618 = tpu.matmul %508, %617, %cst_385 {dimension_numbers = #tpu.dot_dimension_numbers<[1], [0], [0], [1], [0, 0, 1, 1], [], []>} : vector<8x128xbf16>, vector<128x32xbf16>, vector<8x32xf32> -> vector<8x32xf32>
    %c2_386 = arith.constant 2 : index
    %c0_387 = arith.constant 0 : index
    %c0_388 = arith.constant 0 : index
    %619 = vector.load %arg37[%c2_386, %c0_387, %c0_388] : memref<4x1x32xf32, #tpu.memory_space<vmem>>, vector<1x1x32xf32>
    %620 = vector.shape_cast %619 : vector<1x1x32xf32> to vector<1x32xf32>
    %621 = vector.broadcast %620 : vector<1x32xf32> to vector<8x32xf32>
    %622 = arith.addf %618, %621 : vector<8x32xf32>
    %623 = arith.truncf %622 : vector<8x32xf32> to vector<8x32xbf16>
    %cst_389 = arith.constant dense<0.000000e+00> : vector<16x8xf32>
    %624 = tpu.matmul %607, %615, %cst_389 {dimension_numbers = #tpu.dot_dimension_numbers<[1], [1], [0], [0], [0, 0, 1, 0], [], []>} : vector<16x32xbf16>, vector<8x32xbf16>, vector<16x8xf32> -> vector<16x8xf32>
    %cst_390 = arith.constant 0.176776692 : f32
    %625 = vector.broadcast %cst_390 : f32 to vector<16x8xf32>
    %626 = arith.mulf %624, %625 : vector<16x8xf32>
    %627 = arith.addf %626, %19 : vector<16x8xf32>
    %cst_391 = arith.constant dense<0xFF800000> : vector<16xf32>
    %628 = vector.multi_reduction <maximumf>, %627, %cst_391 [1] : vector<16x8xf32> to vector<16xf32>
    %629 = vector.shape_cast %628 : vector<16xf32> to vector<16x1xf32>
    %630 = vector.broadcast %629 : vector<16x1xf32> to vector<16x8xf32>
    %631 = arith.subf %627, %630 : vector<16x8xf32>
    %632 = math.exp %631 : vector<16x8xf32>
    %cst_392 = arith.constant dense<0.000000e+00> : vector<16xf32>
    %633 = vector.multi_reduction <add>, %632, %cst_392 [1] : vector<16x8xf32> to vector<16xf32>
    %634 = vector.shape_cast %633 : vector<16xf32> to vector<16x1xf32>
    %635 = tpu.reciprocal %634 {approx = true} : vector<16x1xf32> -> vector<16x1xf32>
    %636 = vector.broadcast %635 : vector<16x1xf32> to vector<16x8xf32>
    %637 = arith.mulf %632, %636 : vector<16x8xf32>
    %638 = arith.truncf %637 : vector<16x8xf32> to vector<16x8xbf16>
    %cst_393 = arith.constant dense<0.000000e+00> : vector<16x32xf32>
    %639 = tpu.matmul %638, %623, %cst_393 {dimension_numbers = #tpu.dot_dimension_numbers<[1], [0], [0], [1], [0, 0, 1, 1], [], []>} : vector<16x8xbf16>, vector<8x32xbf16>, vector<16x32xf32> -> vector<16x32xf32>
    %640 = arith.truncf %639 : vector<16x32xf32> to vector<16x32xbf16>
    %c2_394 = arith.constant 2 : index
    %c0_395 = arith.constant 0 : index
    %c0_396 = arith.constant 0 : index
    %641 = vector.load %arg38[%c2_394, %c0_395, %c0_396] : memref<4x32x128xbf16, #tpu.memory_space<vmem>>, vector<1x32x128xbf16>
    %642 = vector.shape_cast %641 : vector<1x32x128xbf16> to vector<32x128xbf16>
    %cst_397 = arith.constant dense<0.000000e+00> : vector<16x128xf32>
    %643 = tpu.matmul %640, %642, %cst_397 {dimension_numbers = #tpu.dot_dimension_numbers<[1], [0], [0], [1], [0, 0, 1, 1], [], []>} : vector<16x32xbf16>, vector<32x128xbf16>, vector<16x128xf32> -> vector<16x128xf32>
    %644 = arith.addf %599, %643 : vector<16x128xf32>
    %c3_398 = arith.constant 3 : index
    %c0_399 = arith.constant 0 : index
    %c0_400 = arith.constant 0 : index
    %645 = vector.load %arg32[%c3_398, %c0_399, %c0_400] : memref<4x128x32xbf16, #tpu.memory_space<vmem>>, vector<1x128x32xbf16>
    %646 = vector.shape_cast %645 : vector<1x128x32xbf16> to vector<128x32xbf16>
    %cst_401 = arith.constant dense<0.000000e+00> : vector<16x32xf32>
    %647 = tpu.matmul %507, %646, %cst_401 {dimension_numbers = #tpu.dot_dimension_numbers<[1], [0], [0], [1], [0, 0, 1, 1], [], []>} : vector<16x128xbf16>, vector<128x32xbf16>, vector<16x32xf32> -> vector<16x32xf32>
    %c3_402 = arith.constant 3 : index
    %c0_403 = arith.constant 0 : index
    %c0_404 = arith.constant 0 : index
    %648 = vector.load %arg33[%c3_402, %c0_403, %c0_404] : memref<4x1x32xf32, #tpu.memory_space<vmem>>, vector<1x1x32xf32>
    %649 = vector.shape_cast %648 : vector<1x1x32xf32> to vector<1x32xf32>
    %650 = vector.broadcast %649 : vector<1x32xf32> to vector<16x32xf32>
    %651 = arith.addf %647, %650 : vector<16x32xf32>
    %652 = arith.truncf %651 : vector<16x32xf32> to vector<16x32xbf16>
    %c3_405 = arith.constant 3 : index
    %c0_406 = arith.constant 0 : index
    %c0_407 = arith.constant 0 : index
    %653 = vector.load %arg34[%c3_405, %c0_406, %c0_407] : memref<4x128x32xbf16, #tpu.memory_space<vmem>>, vector<1x128x32xbf16>
    %654 = vector.shape_cast %653 : vector<1x128x32xbf16> to vector<128x32xbf16>
    %cst_408 = arith.constant dense<0.000000e+00> : vector<8x32xf32>
    %655 = tpu.matmul %508, %654, %cst_408 {dimension_numbers = #tpu.dot_dimension_numbers<[1], [0], [0], [1], [0, 0, 1, 1], [], []>} : vector<8x128xbf16>, vector<128x32xbf16>, vector<8x32xf32> -> vector<8x32xf32>
    %c3_409 = arith.constant 3 : index
    %c0_410 = arith.constant 0 : index
    %c0_411 = arith.constant 0 : index
    %656 = vector.load %arg35[%c3_409, %c0_410, %c0_411] : memref<4x1x32xf32, #tpu.memory_space<vmem>>, vector<1x1x32xf32>
    %657 = vector.shape_cast %656 : vector<1x1x32xf32> to vector<1x32xf32>
    %658 = vector.broadcast %657 : vector<1x32xf32> to vector<8x32xf32>
    %659 = arith.addf %655, %658 : vector<8x32xf32>
    %660 = arith.truncf %659 : vector<8x32xf32> to vector<8x32xbf16>
    %c3_412 = arith.constant 3 : index
    %c0_413 = arith.constant 0 : index
    %c0_414 = arith.constant 0 : index
    %661 = vector.load %arg36[%c3_412, %c0_413, %c0_414] : memref<4x128x32xbf16, #tpu.memory_space<vmem>>, vector<1x128x32xbf16>
    %662 = vector.shape_cast %661 : vector<1x128x32xbf16> to vector<128x32xbf16>
    %cst_415 = arith.constant dense<0.000000e+00> : vector<8x32xf32>
    %663 = tpu.matmul %508, %662, %cst_415 {dimension_numbers = #tpu.dot_dimension_numbers<[1], [0], [0], [1], [0, 0, 1, 1], [], []>} : vector<8x128xbf16>, vector<128x32xbf16>, vector<8x32xf32> -> vector<8x32xf32>
    %c3_416 = arith.constant 3 : index
    %c0_417 = arith.constant 0 : index
    %c0_418 = arith.constant 0 : index
    %664 = vector.load %arg37[%c3_416, %c0_417, %c0_418] : memref<4x1x32xf32, #tpu.memory_space<vmem>>, vector<1x1x32xf32>
    %665 = vector.shape_cast %664 : vector<1x1x32xf32> to vector<1x32xf32>
    %666 = vector.broadcast %665 : vector<1x32xf32> to vector<8x32xf32>
    %667 = arith.addf %663, %666 : vector<8x32xf32>
    %668 = arith.truncf %667 : vector<8x32xf32> to vector<8x32xbf16>
    %cst_419 = arith.constant dense<0.000000e+00> : vector<16x8xf32>
    %669 = tpu.matmul %652, %660, %cst_419 {dimension_numbers = #tpu.dot_dimension_numbers<[1], [1], [0], [0], [0, 0, 1, 0], [], []>} : vector<16x32xbf16>, vector<8x32xbf16>, vector<16x8xf32> -> vector<16x8xf32>
    %cst_420 = arith.constant 0.176776692 : f32
    %670 = vector.broadcast %cst_420 : f32 to vector<16x8xf32>
    %671 = arith.mulf %669, %670 : vector<16x8xf32>
    %672 = arith.addf %671, %19 : vector<16x8xf32>
    %cst_421 = arith.constant dense<0xFF800000> : vector<16xf32>
    %673 = vector.multi_reduction <maximumf>, %672, %cst_421 [1] : vector<16x8xf32> to vector<16xf32>
    %674 = vector.shape_cast %673 : vector<16xf32> to vector<16x1xf32>
    %675 = vector.broadcast %674 : vector<16x1xf32> to vector<16x8xf32>
    %676 = arith.subf %672, %675 : vector<16x8xf32>
    %677 = math.exp %676 : vector<16x8xf32>
    %cst_422 = arith.constant dense<0.000000e+00> : vector<16xf32>
    %678 = vector.multi_reduction <add>, %677, %cst_422 [1] : vector<16x8xf32> to vector<16xf32>
    %679 = vector.shape_cast %678 : vector<16xf32> to vector<16x1xf32>
    %680 = tpu.reciprocal %679 {approx = true} : vector<16x1xf32> -> vector<16x1xf32>
    %681 = vector.broadcast %680 : vector<16x1xf32> to vector<16x8xf32>
    %682 = arith.mulf %677, %681 : vector<16x8xf32>
    %683 = arith.truncf %682 : vector<16x8xf32> to vector<16x8xbf16>
    %cst_423 = arith.constant dense<0.000000e+00> : vector<16x32xf32>
    %684 = tpu.matmul %683, %668, %cst_423 {dimension_numbers = #tpu.dot_dimension_numbers<[1], [0], [0], [1], [0, 0, 1, 1], [], []>} : vector<16x8xbf16>, vector<8x32xbf16>, vector<16x32xf32> -> vector<16x32xf32>
    %685 = arith.truncf %684 : vector<16x32xf32> to vector<16x32xbf16>
    %c3_424 = arith.constant 3 : index
    %c0_425 = arith.constant 0 : index
    %c0_426 = arith.constant 0 : index
    %686 = vector.load %arg38[%c3_424, %c0_425, %c0_426] : memref<4x32x128xbf16, #tpu.memory_space<vmem>>, vector<1x32x128xbf16>
    %687 = vector.shape_cast %686 : vector<1x32x128xbf16> to vector<32x128xbf16>
    %cst_427 = arith.constant dense<0.000000e+00> : vector<16x128xf32>
    %688 = tpu.matmul %685, %687, %cst_427 {dimension_numbers = #tpu.dot_dimension_numbers<[1], [0], [0], [1], [0, 0, 1, 1], [], []>} : vector<16x32xbf16>, vector<32x128xbf16>, vector<16x128xf32> -> vector<16x128xf32>
    %689 = arith.addf %644, %688 : vector<16x128xf32>
    %690 = arith.addf %3, %689 : vector<16x128xf32>
    %c0_428 = arith.constant 0 : index
    %c0_429 = arith.constant 0 : index
    %691 = vector.load %arg39[%c0_428, %c0_429] : memref<1x128xf32, #tpu.memory_space<vmem>>, vector<1x128xf32>
    %692 = vector.broadcast %691 : vector<1x128xf32> to vector<16x128xf32>
    %693 = arith.addf %690, %692 : vector<16x128xf32>
    %c0_430 = arith.constant 0 : index
    %c0_431 = arith.constant 0 : index
    %694 = vector.load %arg40[%c0_430, %c0_431] : memref<1x128xf32, #tpu.memory_space<vmem>>, vector<1x128xf32>
    %c0_432 = arith.constant 0 : index
    %c0_433 = arith.constant 0 : index
    %695 = vector.load %arg41[%c0_432, %c0_433] : memref<1x128xf32, #tpu.memory_space<vmem>>, vector<1x128xf32>
    %cst_434 = arith.constant dense<0.000000e+00> : vector<16xf32>
    %696 = vector.multi_reduction <add>, %693, %cst_434 [1] : vector<16x128xf32> to vector<16xf32>
    %697 = vector.shape_cast %696 : vector<16xf32> to vector<16x1xf32>
    %cst_435 = arith.constant 1.280000e+02 : f32
    %698 = vector.broadcast %cst_435 : f32 to vector<16x1xf32>
    %699 = arith.divf %697, %698 : vector<16x1xf32>
    %700 = vector.broadcast %699 : vector<16x1xf32> to vector<16x128xf32>
    %701 = arith.subf %693, %700 : vector<16x128xf32>
    %702 = arith.mulf %701, %701 : vector<16x128xf32>
    %cst_436 = arith.constant dense<0.000000e+00> : vector<16xf32>
    %703 = vector.multi_reduction <add>, %702, %cst_436 [1] : vector<16x128xf32> to vector<16xf32>
    %704 = vector.shape_cast %703 : vector<16xf32> to vector<16x1xf32>
    %cst_437 = arith.constant 1.280000e+02 : f32
    %705 = vector.broadcast %cst_437 : f32 to vector<16x1xf32>
    %706 = arith.divf %704, %705 : vector<16x1xf32>
    %cst_438 = arith.constant 9.99999974E-6 : f32
    %707 = vector.broadcast %cst_438 : f32 to vector<16x1xf32>
    %708 = arith.addf %706, %707 : vector<16x1xf32>
    %709 = math.rsqrt %708 : vector<16x1xf32>
    %710 = vector.broadcast %709 : vector<16x1xf32> to vector<16x128xf32>
    %711 = arith.mulf %701, %710 : vector<16x128xf32>
    %712 = vector.broadcast %694 : vector<1x128xf32> to vector<16x128xf32>
    %713 = arith.mulf %711, %712 : vector<16x128xf32>
    %714 = vector.broadcast %695 : vector<1x128xf32> to vector<16x128xf32>
    %715 = arith.addf %713, %714 : vector<16x128xf32>
    %716 = arith.truncf %715 : vector<16x128xf32> to vector<16x128xbf16>
    %c0_439 = arith.constant 0 : index
    %c0_440 = arith.constant 0 : index
    %717 = vector.load %arg42[%c0_439, %c0_440] : memref<128x256xbf16, #tpu.memory_space<vmem>>, vector<128x256xbf16>
    %cst_441 = arith.constant dense<0.000000e+00> : vector<16x256xf32>
    %718 = tpu.matmul %716, %717, %cst_441 {dimension_numbers = #tpu.dot_dimension_numbers<[1], [0], [0], [1], [0, 0, 1, 1], [], []>} : vector<16x128xbf16>, vector<128x256xbf16>, vector<16x256xf32> -> vector<16x256xf32>
    %c0_442 = arith.constant 0 : index
    %c0_443 = arith.constant 0 : index
    %719 = vector.load %arg43[%c0_442, %c0_443] : memref<1x256xf32, #tpu.memory_space<vmem>>, vector<1x256xf32>
    %720 = vector.broadcast %719 : vector<1x256xf32> to vector<16x256xf32>
    %721 = arith.addf %718, %720 : vector<16x256xf32>
    %722 = arith.mulf %721, %721 : vector<16x256xf32>
    %723 = arith.mulf %721, %722 : vector<16x256xf32>
    %cst_444 = arith.constant 4.471500e-02 : f32
    %724 = vector.broadcast %cst_444 : f32 to vector<16x256xf32>
    %725 = arith.mulf %724, %723 : vector<16x256xf32>
    %726 = arith.addf %721, %725 : vector<16x256xf32>
    %cst_445 = arith.constant 0.797884583 : f32
    %727 = vector.broadcast %cst_445 : f32 to vector<16x256xf32>
    %728 = arith.mulf %727, %726 : vector<16x256xf32>
    %729 = math.tanh %728 : vector<16x256xf32>
    %cst_446 = arith.constant 1.000000e+00 : f32
    %730 = vector.broadcast %cst_446 : f32 to vector<16x256xf32>
    %731 = arith.addf %730, %729 : vector<16x256xf32>
    %cst_447 = arith.constant 5.000000e-01 : f32
    %732 = vector.broadcast %cst_447 : f32 to vector<16x256xf32>
    %733 = arith.mulf %732, %731 : vector<16x256xf32>
    %734 = arith.mulf %721, %733 : vector<16x256xf32>
    %735 = arith.truncf %734 : vector<16x256xf32> to vector<16x256xbf16>
    %c0_448 = arith.constant 0 : index
    %c0_449 = arith.constant 0 : index
    %736 = vector.load %arg44[%c0_448, %c0_449] : memref<256x128xbf16, #tpu.memory_space<vmem>>, vector<256x128xbf16>
    %cst_450 = arith.constant dense<0.000000e+00> : vector<16x128xf32>
    %737 = tpu.matmul %735, %736, %cst_450 {dimension_numbers = #tpu.dot_dimension_numbers<[1], [0], [0], [1], [0, 0, 1, 1], [], []>} : vector<16x256xbf16>, vector<256x128xbf16>, vector<16x128xf32> -> vector<16x128xf32>
    %c0_451 = arith.constant 0 : index
    %c0_452 = arith.constant 0 : index
    %738 = vector.load %arg45[%c0_451, %c0_452] : memref<1x128xf32, #tpu.memory_space<vmem>>, vector<1x128xf32>
    %739 = vector.broadcast %738 : vector<1x128xf32> to vector<16x128xf32>
    %740 = arith.addf %737, %739 : vector<16x128xf32>
    %741 = arith.addf %693, %740 : vector<16x128xf32>
    %c0_453 = arith.constant 0 : index
    %c0_454 = arith.constant 0 : index
    %c0_455 = arith.constant 0 : index
    %742 = vector.load %arg47[%c0_453, %c0_454, %c0_455] : memref<1x16x128xf32, #tpu.memory_space<vmem>>, vector<1x16x128xf32>
    %743 = vector.shape_cast %742 : vector<1x16x128xf32> to vector<16x128xf32>
    %744 = vector.shape_cast %741 : vector<16x128xf32> to vector<1x16x128xf32>
    tpu.vector_store %arg47[%c0_453, %c0_454, %c0_455], %744 {strides = array<i32>} : memref<1x16x128xf32, #tpu.memory_space<vmem>>, vector<1x16x128xf32>,
    return
  }
  func.func @transform_0(%arg0: i32) -> (i32, i32, i32) {
    %c0_i32 = arith.constant 0 : i32
    %c0_i32_0 = arith.constant 0 : i32
    %c0_i32_1 = arith.constant 0 : i32
    return %arg0, %c0_i32, %c0_i32_0 : i32, i32, i32
  }
  func.func @transform_1(%arg0: i32) -> (i32, i32, i32) {
    %c0_i32 = arith.constant 0 : i32
    %c0_i32_0 = arith.constant 0 : i32
    %c0_i32_1 = arith.constant 0 : i32
    return %arg0, %c0_i32, %c0_i32_0 : i32, i32, i32
  }
  func.func @transform_2(%arg0: i32) -> (i32, i32, i32) {
    %c0_i32 = arith.constant 0 : i32
    %c0_i32_0 = arith.constant 0 : i32
    %c0_i32_1 = arith.constant 0 : i32
    return %arg0, %c0_i32, %c0_i32_0 : i32, i32, i32
  }
  func.func @transform_3(%arg0: i32) -> (i32, i32) {
    %c0_i32 = arith.constant 0 : i32
    %c0_i32_0 = arith.constant 0 : i32
    %c0_i32_1 = arith.constant 0 : i32
    return %c0_i32, %c0_i32_0 : i32, i32
  }
  func.func @transform_4(%arg0: i32) -> (i32, i32) {
    %c0_i32 = arith.constant 0 : i32
    %c0_i32_0 = arith.constant 0 : i32
    %c0_i32_1 = arith.constant 0 : i32
    return %c0_i32, %c0_i32_0 : i32, i32
  }
  func.func @transform_5(%arg0: i32) -> (i32, i32, i32) {
    %c0_i32 = arith.constant 0 : i32
    %c0_i32_0 = arith.constant 0 : i32
    %c0_i32_1 = arith.constant 0 : i32
    %c0_i32_2 = arith.constant 0 : i32
    return %c0_i32, %c0_i32_0, %c0_i32_1 : i32, i32, i32
  }
  func.func @transform_6(%arg0: i32) -> (i32, i32, i32) {
    %c0_i32 = arith.constant 0 : i32
    %c0_i32_0 = arith.constant 0 : i32
    %c0_i32_1 = arith.constant 0 : i32
    %c0_i32_2 = arith.constant 0 : i32
    return %c0_i32, %c0_i32_0, %c0_i32_1 : i32, i32, i32
  }
  func.func @transform_7(%arg0: i32) -> (i32, i32, i32) {
    %c0_i32 = arith.constant 0 : i32
    %c0_i32_0 = arith.constant 0 : i32
    %c0_i32_1 = arith.constant 0 : i32
    %c0_i32_2 = arith.constant 0 : i32
    return %c0_i32, %c0_i32_0, %c0_i32_1 : i32, i32, i32
  }
  func.func @transform_8(%arg0: i32) -> (i32, i32, i32) {
    %c0_i32 = arith.constant 0 : i32
    %c0_i32_0 = arith.constant 0 : i32
    %c0_i32_1 = arith.constant 0 : i32
    %c0_i32_2 = arith.constant 0 : i32
    return %c0_i32, %c0_i32_0, %c0_i32_1 : i32, i32, i32
  }
  func.func @transform_9(%arg0: i32) -> (i32, i32, i32) {
    %c0_i32 = arith.constant 0 : i32
    %c0_i32_0 = arith.constant 0 : i32
    %c0_i32_1 = arith.constant 0 : i32
    %c0_i32_2 = arith.constant 0 : i32
    return %c0_i32, %c0_i32_0, %c0_i32_1 : i32, i32, i32
  }
  func.func @transform_10(%arg0: i32) -> (i32, i32, i32) {
    %c0_i32 = arith.constant 0 : i32
    %c0_i32_0 = arith.constant 0 : i32
    %c0_i32_1 = arith.constant 0 : i32
    %c0_i32_2 = arith.constant 0 : i32
    return %c0_i32, %c0_i32_0, %c0_i32_1 : i32, i32, i32
  }
  func.func @transform_11(%arg0: i32) -> (i32, i32, i32) {
    %c0_i32 = arith.constant 0 : i32
    %c0_i32_0 = arith.constant 0 : i32
    %c0_i32_1 = arith.constant 0 : i32
    %c0_i32_2 = arith.constant 0 : i32
    return %c0_i32, %c0_i32_0, %c0_i32_1 : i32, i32, i32
  }
  func.func @transform_12(%arg0: i32) -> (i32, i32) {
    %c0_i32 = arith.constant 0 : i32
    %c0_i32_0 = arith.constant 0 : i32
    %c0_i32_1 = arith.constant 0 : i32
    return %c0_i32, %c0_i32_0 : i32, i32
  }
  func.func @transform_13(%arg0: i32) -> (i32, i32) {
    %c0_i32 = arith.constant 0 : i32
    %c0_i32_0 = arith.constant 0 : i32
    %c0_i32_1 = arith.constant 0 : i32
    return %c0_i32, %c0_i32_0 : i32, i32
  }
  func.func @transform_14(%arg0: i32) -> (i32, i32) {
    %c0_i32 = arith.constant 0 : i32
    %c0_i32_0 = arith.constant 0 : i32
    %c0_i32_1 = arith.constant 0 : i32
    return %c0_i32, %c0_i32_0 : i32, i32
  }
  func.func @transform_15(%arg0: i32) -> (i32, i32, i32) {
    %c0_i32 = arith.constant 0 : i32
    %c0_i32_0 = arith.constant 0 : i32
    %c0_i32_1 = arith.constant 0 : i32
    %c0_i32_2 = arith.constant 0 : i32
    return %c0_i32, %c0_i32_0, %c0_i32_1 : i32, i32, i32
  }
  func.func @transform_16(%arg0: i32) -> (i32, i32, i32) {
    %c0_i32 = arith.constant 0 : i32
    %c0_i32_0 = arith.constant 0 : i32
    %c0_i32_1 = arith.constant 0 : i32
    %c0_i32_2 = arith.constant 0 : i32
    return %c0_i32, %c0_i32_0, %c0_i32_1 : i32, i32, i32
  }
  func.func @transform_17(%arg0: i32) -> (i32, i32, i32) {
    %c0_i32 = arith.constant 0 : i32
    %c0_i32_0 = arith.constant 0 : i32
    %c0_i32_1 = arith.constant 0 : i32
    %c0_i32_2 = arith.constant 0 : i32
    return %c0_i32, %c0_i32_0, %c0_i32_1 : i32, i32, i32
  }
  func.func @transform_18(%arg0: i32) -> (i32, i32, i32) {
    %c0_i32 = arith.constant 0 : i32
    %c0_i32_0 = arith.constant 0 : i32
    %c0_i32_1 = arith.constant 0 : i32
    %c0_i32_2 = arith.constant 0 : i32
    return %c0_i32, %c0_i32_0, %c0_i32_1 : i32, i32, i32
  }
  func.func @transform_19(%arg0: i32) -> (i32, i32, i32) {
    %c0_i32 = arith.constant 0 : i32
    %c0_i32_0 = arith.constant 0 : i32
    %c0_i32_1 = arith.constant 0 : i32
    %c0_i32_2 = arith.constant 0 : i32
    return %c0_i32, %c0_i32_0, %c0_i32_1 : i32, i32, i32
  }
  func.func @transform_20(%arg0: i32) -> (i32, i32, i32) {
    %c0_i32 = arith.constant 0 : i32
    %c0_i32_0 = arith.constant 0 : i32
    %c0_i32_1 = arith.constant 0 : i32
    %c0_i32_2 = arith.constant 0 : i32
    return %c0_i32, %c0_i32_0, %c0_i32_1 : i32, i32, i32
  }
  func.func @transform_21(%arg0: i32) -> (i32, i32, i32) {
    %c0_i32 = arith.constant 0 : i32
    %c0_i32_0 = arith.constant 0 : i32
    %c0_i32_1 = arith.constant 0 : i32
    %c0_i32_2 = arith.constant 0 : i32
    return %c0_i32, %c0_i32_0, %c0_i32_1 : i32, i32, i32
  }
  func.func @transform_22(%arg0: i32) -> (i32, i32) {
    %c0_i32 = arith.constant 0 : i32
    %c0_i32_0 = arith.constant 0 : i32
    %c0_i32_1 = arith.constant 0 : i32
    return %c0_i32, %c0_i32_0 : i32, i32
  }
  func.func @transform_23(%arg0: i32) -> (i32, i32) {
    %c0_i32 = arith.constant 0 : i32
    %c0_i32_0 = arith.constant 0 : i32
    %c0_i32_1 = arith.constant 0 : i32
    return %c0_i32, %c0_i32_0 : i32, i32
  }
  func.func @transform_24(%arg0: i32) -> (i32, i32) {
    %c0_i32 = arith.constant 0 : i32
    %c0_i32_0 = arith.constant 0 : i32
    %c0_i32_1 = arith.constant 0 : i32
    return %c0_i32, %c0_i32_0 : i32, i32
  }
  func.func @transform_25(%arg0: i32) -> (i32, i32) {
    %c0_i32 = arith.constant 0 : i32
    %c0_i32_0 = arith.constant 0 : i32
    %c0_i32_1 = arith.constant 0 : i32
    return %c0_i32, %c0_i32_0 : i32, i32
  }
  func.func @transform_26(%arg0: i32) -> (i32, i32) {
    %c0_i32 = arith.constant 0 : i32
    %c0_i32_0 = arith.constant 0 : i32
    %c0_i32_1 = arith.constant 0 : i32
    return %c0_i32, %c0_i32_0 : i32, i32
  }
  func.func @transform_27(%arg0: i32) -> (i32, i32) {
    %c0_i32 = arith.constant 0 : i32
    %c0_i32_0 = arith.constant 0 : i32
    %c0_i32_1 = arith.constant 0 : i32
    return %c0_i32, %c0_i32_0 : i32, i32
  }
  func.func @transform_28(%arg0: i32) -> (i32, i32) {
    %c0_i32 = arith.constant 0 : i32
    %c0_i32_0 = arith.constant 0 : i32
    %c0_i32_1 = arith.constant 0 : i32
    return %c0_i32, %c0_i32_0 : i32, i32
  }
  func.func @transform_29(%arg0: i32) -> (i32, i32) {
    %c0_i32 = arith.constant 0 : i32
    %c0_i32_0 = arith.constant 0 : i32
    %c0_i32_1 = arith.constant 0 : i32
    return %c0_i32, %c0_i32_0 : i32, i32
  }
  func.func @transform_30(%arg0: i32) -> (i32, i32) {
    %c0_i32 = arith.constant 0 : i32
    %c0_i32_0 = arith.constant 0 : i32
    %c0_i32_1 = arith.constant 0 : i32
    return %c0_i32, %c0_i32_0 : i32, i32
  }
  func.func @transform_31(%arg0: i32) -> (i32, i32, i32) {
    %c0_i32 = arith.constant 0 : i32
    %c0_i32_0 = arith.constant 0 : i32
    %c0_i32_1 = arith.constant 0 : i32
    %c0_i32_2 = arith.constant 0 : i32
    return %c0_i32, %c0_i32_0, %c0_i32_1 : i32, i32, i32
  }
  func.func @transform_32(%arg0: i32) -> (i32, i32, i32) {
    %c0_i32 = arith.constant 0 : i32
    %c0_i32_0 = arith.constant 0 : i32
    %c0_i32_1 = arith.constant 0 : i32
    %c0_i32_2 = arith.constant 0 : i32
    return %c0_i32, %c0_i32_0, %c0_i32_1 : i32, i32, i32
  }
  func.func @transform_33(%arg0: i32) -> (i32, i32, i32) {
    %c0_i32 = arith.constant 0 : i32
    %c0_i32_0 = arith.constant 0 : i32
    %c0_i32_1 = arith.constant 0 : i32
    %c0_i32_2 = arith.constant 0 : i32
    return %c0_i32, %c0_i32_0, %c0_i32_1 : i32, i32, i32
  }
  func.func @transform_34(%arg0: i32) -> (i32, i32, i32) {
    %c0_i32 = arith.constant 0 : i32
    %c0_i32_0 = arith.constant 0 : i32
    %c0_i32_1 = arith.constant 0 : i32
    %c0_i32_2 = arith.constant 0 : i32
    return %c0_i32, %c0_i32_0, %c0_i32_1 : i32, i32, i32
  }
  func.func @transform_35(%arg0: i32) -> (i32, i32, i32) {
    %c0_i32 = arith.constant 0 : i32
    %c0_i32_0 = arith.constant 0 : i32
    %c0_i32_1 = arith.constant 0 : i32
    %c0_i32_2 = arith.constant 0 : i32
    return %c0_i32, %c0_i32_0, %c0_i32_1 : i32, i32, i32
  }
  func.func @transform_36(%arg0: i32) -> (i32, i32, i32) {
    %c0_i32 = arith.constant 0 : i32
    %c0_i32_0 = arith.constant 0 : i32
    %c0_i32_1 = arith.constant 0 : i32
    %c0_i32_2 = arith.constant 0 : i32
    return %c0_i32, %c0_i32_0, %c0_i32_1 : i32, i32, i32
  }
  func.func @transform_37(%arg0: i32) -> (i32, i32, i32) {
    %c0_i32 = arith.constant 0 : i32
    %c0_i32_0 = arith.constant 0 : i32
    %c0_i32_1 = arith.constant 0 : i32
    %c0_i32_2 = arith.constant 0 : i32
    return %c0_i32, %c0_i32_0, %c0_i32_1 : i32, i32, i32
  }
  func.func @transform_38(%arg0: i32) -> (i32, i32) {
    %c0_i32 = arith.constant 0 : i32
    %c0_i32_0 = arith.constant 0 : i32
    %c0_i32_1 = arith.constant 0 : i32
    return %c0_i32, %c0_i32_0 : i32, i32
  }
  func.func @transform_39(%arg0: i32) -> (i32, i32) {
    %c0_i32 = arith.constant 0 : i32
    %c0_i32_0 = arith.constant 0 : i32
    %c0_i32_1 = arith.constant 0 : i32
    return %c0_i32, %c0_i32_0 : i32, i32
  }
  func.func @transform_40(%arg0: i32) -> (i32, i32) {
    %c0_i32 = arith.constant 0 : i32
    %c0_i32_0 = arith.constant 0 : i32
    %c0_i32_1 = arith.constant 0 : i32
    return %c0_i32, %c0_i32_0 : i32, i32
  }
  func.func @transform_41(%arg0: i32) -> (i32, i32) {
    %c0_i32 = arith.constant 0 : i32
    %c0_i32_0 = arith.constant 0 : i32
    %c0_i32_1 = arith.constant 0 : i32
    return %c0_i32, %c0_i32_0 : i32, i32
  }
  func.func @transform_42(%arg0: i32) -> (i32, i32) {
    %c0_i32 = arith.constant 0 : i32
    %c0_i32_0 = arith.constant 0 : i32
    %c0_i32_1 = arith.constant 0 : i32
    return %c0_i32, %c0_i32_0 : i32, i32
  }
  func.func @transform_43(%arg0: i32) -> (i32, i32) {
    %c0_i32 = arith.constant 0 : i32
    %c0_i32_0 = arith.constant 0 : i32
    %c0_i32_1 = arith.constant 0 : i32
    return %c0_i32, %c0_i32_0 : i32, i32
  }
  func.func @transform_44(%arg0: i32) -> (i32, i32) {
    %c0_i32 = arith.constant 0 : i32
    %c0_i32_0 = arith.constant 0 : i32
    %c0_i32_1 = arith.constant 0 : i32
    return %c0_i32, %c0_i32_0 : i32, i32
  }
  func.func @transform_45(%arg0: i32) -> (i32, i32, i32) {
    %c0_i32 = arith.constant 0 : i32
    %c0_i32_0 = arith.constant 0 : i32
    %c0_i32_1 = arith.constant 0 : i32
    return %arg0, %c0_i32, %c0_i32_0 : i32, i32, i32
  }
  func.func @transform_46(%arg0: i32) -> (i32, i32, i32) {
    %c0_i32 = arith.constant 0 : i32
    %c0_i32_0 = arith.constant 0 : i32
    %c0_i32_1 = arith.constant 0 : i32
    return %arg0, %c0_i32, %c0_i32_0 : i32, i32, i32
  }
}

</mosaic_0001>

<bundles_post_ra>
// kernel: tpu_custom_call.1
= control target key start
LH: loop header
LB: loop body
LE: loop exit
PB: predicated region body
PF: predicated region fallthrough
CT: control target
= control target key end

     0   :  { %s11816_s6 = smov 1   ;;  %s11817_s10 = smov 2   ;;  %s13397_s0 = inlined_call_operand.smem [shape: u32[47], index: -1, kind: input, shape index: {}] }
   0x1   :  { %s11878_s5 = sld [smem:[%s13397_s0]]   ;;  %s11818_s14 = smov 3  }
   0x2   :  { %s11883_s9 = sld [smem:[%s13397_s0 + %s11816_s6]]   ;;  %s11819_s18 = smov 4  }
   0x3   :  { %s11888_s13 = sld [smem:[%s13397_s0 + %s11817_s10]]   ;;  %s11820_s22 = smov 5  }
   0x4   :  { %s11893_s17 = sld [smem:[%s13397_s0 + %s11818_s14]]   ;;  %s11821_s26 = smov 6  }
   0x5   :  { %s11898_s21 = sld [smem:[%s13397_s0 + %s11819_s18]]   ;;  %s11822_s30 = smov 7  }
   0x6   :  { %s11903_s25 = sld [smem:[%s13397_s0 + %s11820_s22]]   ;;  %s11823_s4 = smov 8  }
   0x7   :  { %13432 = sst [smem:[#allocation8_spill]] %s11878_s5  ;;  %s11824_s10 = smov 9  }
   0x8   :  { %13433 = sst [smem:[#allocation9_spill]] %s11883_s9  ;;  %s11825_s15 = smov 10  }
   0x9   :  { %13434 = sst [smem:[#allocation10_spill]] %s11888_s13  ;;  %s11826_s20 = smov 11  }
   0xa   :  { %13435 = sst [smem:[#allocation11_spill]] %s11893_s17  ;;  %s11828_s1 = smov 13  }
   0xb   :  { %s11908_s29 = sld [smem:[%s13397_s0 + %s11821_s26]]   ;;  %s11827_s26 = smov 12  }
   0xc   :  { %s11913_s3 = sld [smem:[%s13397_s0 + %s11822_s30]]   ;;  %s11829_s7 = smov 14  }
   0xd   :  { %s11918_s8 = sld [smem:[%s13397_s0 + %s11823_s4]]   ;;  %s11831_s22 = smov 16  }
   0xe   :  { %s11923_s14 = sld [smem:[%s13397_s0 + %s11824_s10]]   ;;  %s11832_s28 = smov 17  }
   0xf   :  { %s11928_s19 = sld [smem:[%s13397_s0 + %s11825_s15]]   ;;  %s11830_s15 = smov 15  }
  0x10   :  { %s11933_s24 = sld [smem:[%s13397_s0 + %s11826_s20]]  }
  0x11   :  { %s11938_s30 = sld [smem:[%s13397_s0 + %s11827_s26]]  }
  0x12   :  { %13436 = sst [smem:[#allocation12_spill]] %s11913_s3 }
  0x13   :  { %13437 = sst [smem:[#allocation13_spill]] %s11918_s8 }
  0x14   :  { %13438 = sst [smem:[#allocation14_spill]] %s11923_s14 }
  0x15   :  { %s11943_s6 = sld [smem:[%s13397_s0 + %s11828_s1]]  }
  0x16   :  { %s11948_s12 = sld [smem:[%s13397_s0 + %s11829_s7]]   ;;  %s11833_s7 = smov 18  }
  0x17   :  { %s11953_s20 = sld [smem:[%s13397_s0 + %s11830_s15]]   ;;  %s11834_s15 = smov 19  }
  0x18   :  { %s11958_s27 = sld [smem:[%s13397_s0 + %s11831_s22]]   ;;  %s11835_s22 = smov 20  }
  0x19   :  { %s11963_s4 = sld [smem:[%s13397_s0 + %s11832_s28]]   ;;  %s11836_s28 = smov 21  }
  0x1b   :  { %13439 = sst [smem:[#allocation15_spill]] %s11943_s6 }
  0x1c   :  { %13440 = sst [smem:[#allocation16_spill]] %s11948_s12 }
  0x1d   :  { %s11968_s12 = sld [smem:[%s13397_s0 + %s11833_s7]]   ;;  %s11837_s7 = smov 22  }
  0x1e   :  { %13441 = sst [smem:[#allocation17_spill]] %s11958_s27 }
  0x1f   :  { %13442 = sst [smem:[#allocation18_spill]] %s11963_s4 }
  0x20   :  { %s11973_s6 = sld [smem:[%s13397_s0 + %s11834_s15]]   ;;  %s11838_s15 = smov 23  }
  0x21   :  { %s11978_s27 = sld [smem:[%s13397_s0 + %s11835_s22]]   ;;  %s11839_s22 = smov 24  }
  0x22   :  { %s11983_s4 = sld [smem:[%s13397_s0 + %s11836_s28]]   ;;  %s11840_s28 = smov 25  }
  0x23   :  { %13443 = sst [smem:[#allocation19_spill]] %s11968_s12 }
  0x24   :  { %s11988_s12 = sld [smem:[%s13397_s0 + %s11837_s7]]   ;;  %s11841_s7 = smov 26  }
  0x26   :  { %13444 = sst [smem:[#allocation20_spill]] %s11973_s6 }
  0x27   :  { %13445 = sst [smem:[#allocation21_spill]] %s11978_s27 }
  0x28   :  { %13446 = sst [smem:[#allocation22_spill]] %s11983_s4 }
  0x29   :  { %s11993_s6 = sld [smem:[%s13397_s0 + %s11838_s15]]   ;;  %s11842_s15 = smov 27  }
  0x2a   :  { %13447 = sst [smem:[#allocation23_spill]] %s11988_s12 }
  0x2b   :  { %s11998_s27 = sld [smem:[%s13397_s0 + %s11839_s22]]   ;;  %s11843_s22 = smov 28  }
  0x2c   :  { %s12003_s4 = sld [smem:[%s13397_s0 + %s11840_s28]]   ;;  %s11844_s28 = smov 29  }
  0x2d   :  { %s12008_s12 = sld [smem:[%s13397_s0 + %s11841_s7]]   ;;  %s11845_s7 = smov 30  }
  0x2f   :  { %13448 = sst [smem:[#allocation24_spill]] %s11993_s6 }
  0x30   :  { %s12013_s6 = sld [smem:[%s13397_s0 + %s11842_s15]]   ;;  %s11846_s15 = smov 31  }
  0x31   :  { %13449 = sst [smem:[#allocation25_spill]] %s11998_s27 }
  0x32   :  { %13450 = sst [smem:[#allocation26_spill]] %s12003_s4 }
  0x33   :  { %13451 = sst [smem:[#allocation27_spill]] %s12008_s12 }
  0x34   :  { %s12018_s27 = sld [smem:[%s13397_s0 + %s11843_s22]]   ;;  %s11847_s22 = smov 32  }
  0x35   :  { %s12023_s4 = sld [smem:[%s13397_s0 + %s11844_s28]]   ;;  %s11848_s28 = smov 33  }
  0x36   :  { %13452 = sst [smem:[#allocation28_spill]] %s12013_s6 }
  0x37   :  { %s12028_s12 = sld [smem:[%s13397_s0 + %s11845_s7]]   ;;  %s11849_s7 = smov 34  }
  0x38   :  { %s12033_s6 = sld [smem:[%s13397_s0 + %s11846_s15]]   ;;  %s11850_s15 = smov 35  }
  0x3a   :  { %13453 = sst [smem:[#allocation29_spill]] %s12018_s27 }
  0x3b   :  { %13454 = sst [smem:[#allocation30_spill]] %s12023_s4 }
  0x3c   :  { %s12038_s27 = sld [smem:[%s13397_s0 + %s11847_s22]]   ;;  %s11851_s22 = smov 36  }
  0x3d   :  { %13455 = sst [smem:[#allocation31_spill]] %s12028_s12 }
  0x3e   :  { %13456 = sst [smem:[#allocation32_spill]] %s12033_s6 }
  0x3f   :  { %s12043_s4 = sld [smem:[%s13397_s0 + %s11848_s28]]   ;;  %s11852_s28 = smov 37  }
  0x40   :  { %s12048_s12 = sld [smem:[%s13397_s0 + %s11849_s7]]   ;;  %s11853_s7 = smov 38  }
  0x41   :  { %s12053_s6 = sld [smem:[%s13397_s0 + %s11850_s15]]   ;;  %s11854_s15 = smov 39  }
  0x42   :  { %13457 = sst [smem:[#allocation33_spill]] %s12038_s27 }
  0x43   :  { %s12058_s27 = sld [smem:[%s13397_s0 + %s11851_s22]]   ;;  %s11855_s22 = smov 40  }
  0x45   :  { %13458 = sst [smem:[#allocation34_spill]] %s12043_s4 }
  0x46   :  { %13459 = sst [smem:[#allocation35_spill]] %s12048_s12 }
  0x47   :  { %13460 = sst [smem:[#allocation36_spill]] %s12053_s6 }
  0x48   :  { %s12063_s4 = sld [smem:[%s13397_s0 + %s11852_s28]]   ;;  %s11856_s28 = smov 41  }
  0x49   :  { %13461 = sst [smem:[#allocation37_spill]] %s12058_s27 }
  0x4a   :  { %s12068_s12 = sld [smem:[%s13397_s0 + %s11853_s7]]   ;;  %s11857_s7 = smov 42  }
  0x4b   :  { %s12073_s6 = sld [smem:[%s13397_s0 + %s11854_s15]]   ;;  %s11858_s15 = smov 43  }
  0x4c   :  { %s12078_s27 = sld [smem:[%s13397_s0 + %s11855_s22]]   ;;  %s11859_s22 = smov 44  }
  0x4e   :  { %13462 = sst [smem:[#allocation38_spill]] %s12063_s4 }
  0x4f   :  { %s12083_s4 = sld [smem:[%s13397_s0 + %s11856_s28]]   ;;  %s11860_s28 = smov 45  }
  0x50   :  { %13463 = sst [smem:[#allocation39_spill]] %s12068_s12 }
  0x51   :  { %13464 = sst [smem:[#allocation40_spill]] %s12073_s6 }
  0x52   :  { %13465 = sst [smem:[#allocation41_spill]] %s12078_s27 }
  0x53   :  { %s12088_s12 = sld [smem:[%s13397_s0 + %s11857_s7]]   ;;  %s11861_s7 = smov 46  }
  0x54   :  { %s12093_s6 = sld [smem:[%s13397_s0 + %s11858_s15]]  }
  0x55   :  { %13466 = sst [smem:[#allocation42_spill]] %s12083_s4 }
  0x56   :  { %s12098_s27 = sld [smem:[%s13397_s0 + %s11859_s22]]  }
  0x57   :  { %s12103_s4 = sld [smem:[%s13397_s0 + %s11860_s28]]  }
  0x59   :  { %13467 = sst [smem:[#allocation43_spill]] %s12088_s12 }
  0x5a   :  { %13468 = sst [smem:[#allocation44_spill]] %s12093_s6 }
  0x5b   :  { %s12108_s12 = sld [smem:[%s13397_s0 + %s11861_s7]]  }
  0x5c   :  { %99 = vsyncpa [#allocation3], 0 }
  0x5d   :  { %101 = vsyncpa [#allocation3 + $0x1], 0 }
  0x5e   :  { %102 = vsyncpa [#allocation5], 0 }
  0x5f   :  { %104 = vsyncpa [#allocation5 + $0x1], 0  ;;  %s12110_s15 = smov 0   ;;  %s12112_s16 = smov 0  }
  0x60   :  { %s12114_s18 = smov 0   ;;  %s12116_s22 = smov 0  }
  0x61 LB: > { %s13469_s6 = sld [smem:[#allocation44_spill]]  ;;  %s13470_s14 = sld [smem:[#allocation14_spill]]  ;;  %s11814_s22 = sphi %s12116_s22, %s13511_s22   ;;  %s11810_s18 = sphi %s12114_s18, %s13510_s18   ;;  %s11806_s16 = sphi %s12112_s16, %s13509_s16   ;;  %s11802_s15 = sphi %s12110_s15, %s13508_s15  }
  0x62   : > { %s13471_s8 = sld [smem:[#allocation13_spill]]  ;;  %s13472_s3 = sld [smem:[#allocation12_spill]] }
  0x63   : > { %s12131_s0 = sadd.s32 4294967295, %s11814_s22   ;;  %s8748_s23 = sadd.s32 4294967294, %s11814_s22  }
  0x64   : > { %s12135_s26 = sadd.s32 1, %s11814_s22   ;;  %s1077_s28 = sadd.s32 1, %s11810_s18 }
  0x65   : > { %s1074_s1 = ssub.s32 %s11814_s22, %s12135_s26  ;;  %p1087_p0 = scmp.ne.s32.totalorder %s11810_s18, %s11806_s16 }
  0x66   : > { %p1075_p1 = scmp.eq.s32.totalorder %s1074_s1, 0  ;;  %p1088_p2 = scmp.eq.s32.totalorder %s12131_s0, 1 }
  0x67   : > { %p1093_p3 = scmp.ne.s32.totalorder %s11806_s16, %s11802_s15  ;;  %p1094_p4 = scmp.eq.s32.totalorder %s8748_s23, 1 }
  0x68   : > { %s12146_s2 = scalar_select %p1075_p1, %s11810_s18, %s1077_s28  }
  0x69   : > { %p12148_p5 = por %p1088_p2, %p1087_p0  ;;  %p12152_p6 = por %p1094_p4, %p1093_p3 }
  0x6a   : > { %p8751_p7 = scmp.ge.s32.totalorder %s11814_s22, 1  ;;  %p1286_p8 = scmp.lt.s32.totalorder %s11814_s22, 3 }
  0x6c   : > { %p1287_p9 = pnand %p8751_p7, %p1286_p8 }
  0x6d   : > { %s13475_s5 = sld [smem:[#allocation8_spill]] (!%p1287_p9)  ;;  %p1409_p10 = scmp.lt.s32.totalorder (!%p1287_p9), %s12131_s0, 1  ;;  %v11233_v1 = vld [vmem:[%s13472_s3] sm:$0xff] (!%p1287_p9)   ;;  %v11862_v2 = vmov (!%p1287_p9), 0.0   ;;  %v11234_v4 = vld [vmem:[%s13472_s3 + $0x8] sm:$0xff] (!%p1287_p9)   ;;  %v11235_v6 = vld [vmem:[%s13472_s3 + $0x10] sm:$0xff] (!%p1287_p9)  }
  0x6e   : > { %1290 = sbr.rel (%p1287_p9) target bundleno = 14207 (0x377f), region = 200  ;;  %10197 = vmatprep.subr.bf16.mxu1 (!%p1287_p9), %v11862_v2  ;;  %10177 = vmatprep.subr.bf16.mxu0 (!%p1287_p9), %v11862_v2  ;;  %v11237_v3 = vld [vmem:[%s11903_s25] sm:$0xff] (!%p1287_p9)   ;;  %v11239_v5 = vld [vmem:[%s11903_s25 + $0x8] sm:$0xff] (!%p1287_p9)   ;;  %v11236_v7 = vld [vmem:[%s13472_s3 + $0x18] sm:$0xff] (!%p1287_p9)   ;;  %s13476_s9 = sld [smem:[#allocation9_spill]] (!%p1287_p9)  ;;  %vm11863_vm0 = vmmov (!%p1287_p9), 0  }
  0x6f   : > { %10198 = vmatpush3.bf16.msra.mxu1 (!%p1287_p9), %v11233_v1  ;;  %10178 = vmatpush3.bf16.msra.mxu0 (!%p1287_p9), %v11237_v3  ;;  %v11238_v8 = vld [vmem:[%s13472_s3 + $0x20] sm:$0xff] (!%p1287_p9)   ;;  %v11240_v9 = vld [vmem:[%s13472_s3 + $0x28] sm:$0xff] (!%p1287_p9)   ;;  %v11241_v14 = vld [vmem:[%s11903_s25 + $0x10] sm:$0xff] (!%p1287_p9)   ;;  %s13477_s17 = sld [smem:[#allocation11_spill]] (!%p1287_p9)  ;;  %s13478_s13 = sld [smem:[#allocation10_spill]] (!%p1287_p9)  ;;  %vm1849_vm1 = vcmask (!%p1287_p9), 261120  }
  0x70   : > { %10199 = vmatprep.subr.bf16.mxu1 (!%p1287_p9), %v11862_v2  ;;  %10179 = vmatprep.subr.bf16.mxu0 (!%p1287_p9), %v11862_v2  ;;  %v11242_v17 = vld [vmem:[%s13472_s3 + $0x30] sm:$0xff] (!%p1287_p9)   ;;  %v11243_v18 = vld [vmem:[%s11903_s25 + $0x18] sm:$0xff] (!%p1287_p9)   ;;  %v11245_v20 = vld [vmem:[%s11903_s25 + $0x20] sm:$0xff] (!%p1287_p9)   ;;  %vm1428_vm2 = vcmask (!%p1287_p9), 130048   ;;  %vm11864_vm5 = vmmov (!%p1287_p9), 1   ;;  %vm3975_vm8 = vcmask (!%p1287_p9), 1043456  }
  0x71   : > { %v11244_v19 = vld [vmem:[%s13472_s3 + $0x38] sm:$0xff] (!%p1287_p9)   ;;  %10213 = vmatprep.mubr.msk.bf16.mxu1 (!%p1287_p9), %vm11863_vm0, %v11862_v2  ;;  %v11246_v22 = vld [vmem:[%s11903_s25 + $0x28] sm:$0xff] (!%p1287_p9)   ;;  %10193 = vmatprep.mubr.msk.bf16.mxu0 (!%p1287_p9), %vm11863_vm0, %v11862_v2  ;;  %v11247_v23 = vld [vmem:[%s11903_s25 + $0x30] sm:$0xff] (!%p1287_p9)   ;;  %vm3959_vm9 = vcmask (!%p1287_p9), 64512  }
  0x72   : > { %v11248_v24 = vld [vmem:[%s11903_s25 + $0x38] sm:$0xff] (!%p1287_p9)   ;;  %v8759_v31 = vld [vmem:[%s11898_s21] ss:$0 sm:$0xff] (!%p1287_p9)  ;;  %v11250_v59 = vld [vmem:[%s13470_s14 + $0x8] sm:$0xff] (!%p1287_p9)  }
  0x73   : > { %10200 = vmatpush3.bf16.msra.mxu1 (!%p1287_p9), %v11234_v4  ;;  %10180 = vmatpush3.bf16.msra.mxu0 (!%p1287_p9), %v11239_v5  ;;  %v8769_v35 = vld [vmem:[%s13471_s8] ss:$0 sm:$0xff] (!%p1287_p9)  ;;  %v11251_v60 = vld [vmem:[%s13470_s14 + $0x10] sm:$0xff] (!%p1287_p9)   ;;  %v11252_v61 = vld [vmem:[%s13470_s14 + $0x18] sm:$0xff] (!%p1287_p9)  }
  0x74   : > { %10201 = vmatprep.subr.bf16.mxu1 (!%p1287_p9), %v11862_v2  ;;  %10181 = vmatprep.subr.bf16.mxu0 (!%p1287_p9), %v11862_v2  ;;  %v8760_v51 = vld [vmem:[%s11908_s29] ss:$0 sm:$0xff] (!%p1287_p9)  ;;  %v11254_v63 = vld [vmem:[%s13470_s14 + $0x28] sm:$0xff] (!%p1287_p9)   ;;  %v11256_v1 = vld [vmem:[%s13470_s14 + $0x38] sm:$0xff] (!%p1287_p9)  }
  0x75   : > { %s12160_s11 = scalar_select %p1409_p10, %s12131_s0, 1  ;;  %v8758_v29 = vld [vmem:[%s13477_s17] ss:$0 sm:$0xff] }
  0x76   : > { %v11249_v58 = vld [vmem:[%s13470_s14] sm:$0xff]   ;;  %s13502_s17 = sld [smem:[#allocation38_spill]] }
  0x77   : > { %s8754_s23 = sshll.u32 %s12160_s11, 3  ;;  %10202 = vmatpush3.bf16.msra.mxu1 %v11235_v6  ;;  %s9723_s1 = sshll.u32 %s12160_s11, 4  ;;  %10182 = vmatpush3.bf16.msra.mxu0 %v11241_v14  ;;  %v11253_v62 = vld [vmem:[%s13470_s14 + $0x20] sm:$0xff]  }
  0x78   : > { %s12164_s28 = scalar_lea.vmem %s13475_s5, %s8754_s23  ;;  %10203 = vmatprep.subr.bf16.mxu1 %v11862_v2  ;;  %s12187_s23 = scalar_lea.vmem %s13476_s9, %s9723_s1  ;;  %10183 = vmatprep.subr.bf16.mxu0 %v11862_v2 }
  0x79   : > { %v1423_v0 = vld [vmem:[%s12164_s28] sm:$0xff]  ;;  %v1425_v16 = vld [vmem:[%s12187_s23 + $0x8] sm:$0xff]  ;;  %s8757_s1 = sshll.u32 %s12160_s11, 1  ;;  %s13480_s11 = sld [smem:[#allocation15_spill]] }
  0x7a   : > { %1483 = vadd.xlane.f32.xlu0 %v1423_v0  ;;  %v1424_v15 = vld [vmem:[%s12187_s23] sm:$0xff]  ;;  %s1421_s5 = scalar_lea.vmem %s13478_s13, %s8757_s1  ;;  %s13482_s1 = sld [smem:[#allocation20_spill]] }
  0x7b   : > { %10204 = vmatpush3.bf16.msra.mxu1 %v11236_v7  ;;  %10184 = vmatpush3.bf16.msra.mxu0 %v11243_v18  ;;  %v12201_v21 = vpack.c.bf16 %v1425_v16, %v1424_v15  ;;  %v1426_v44 = vld [vmem:[%s1421_s5] sm:$0x3]  ;;  %s13479_s5 = sld [smem:[#allocation18_spill]]  ;;  %s13499_s9 = sld [smem:[#allocation29_spill]] }
  0x7c   : > { %10205 = vmatprep.subr.bf16.mxu1 %v11862_v2  ;;  %10185 = vmatprep.subr.bf16.mxu0 %v11862_v2  ;;  %v1427_v45 = vunpack.c.0.s8 %v1426_v44 }
  0x7e   : > { %v1429_v46 = vsel %vm1428_vm2, %v1427_v45, 0  ;;  %vm1443_vm4 = vcmp.ne.s32.totalorder %v1427_v45, 0  ;;  %v11263_v45 = vld [vmem:[%s11903_s25 + $0x48] sm:$0xff]  }
  0x7f   : > { %10206 = vmatpush3.bf16.msra.mxu1 %v11238_v8  ;;  %10186 = vmatpush3.bf16.msra.mxu0 %v11245_v20  ;;  %v1431_v47 = vshrl.u32 %v1429_v46, 16  ;;  %v1430_v48 = vand.u32 65535, %v1429_v46  ;;  %v11265_v46 = vld [vmem:[%s11903_s25 + $0x50] sm:$0xff]  }
  0x80   : > { %10207 = vmatprep.subr.bf16.mxu1 %v11862_v2  ;;  %10187 = vmatprep.subr.bf16.mxu0 %v11862_v2 }
  0x81   : > { %v1433_v49 = vcvt.s32.f32 %v1431_v47  ;;  %v1432_v50 = vcvt.s32.f32 %v1430_v48  ;;  %v11267_v47 = vld [vmem:[%s11903_s25 + $0x58] sm:$0xff]   ;;  %v11269_v48 = vld [vmem:[%s11903_s25 + $0x60] sm:$0xff]  }
  0x83   : > { %10208 = vmatpush3.bf16.msra.mxu1 %v11240_v9  ;;  %10188 = vmatpush3.bf16.msra.mxu0 %v11246_v22 }
  0x84   : > { %10209 = vmatprep.subr.bf16.mxu1 %v11862_v2  ;;  %10189 = vmatprep.subr.bf16.mxu0 %v11862_v2 }
  0x85   : > { %1436 = vadd.xlane.f32.xlu1 %v1433_v49  ;;  %v11270_v49 = vld [vmem:[%s11903_s25 + $0x68] sm:$0xff]  }
  0x87   : > { %10210 = vmatpush3.bf16.msra.mxu1 %v11242_v17  ;;  %10190 = vmatpush3.bf16.msra.mxu0 %v11247_v23 }
  0x88   : > { %10211 = vmatprep.subr.bf16.mxu1 %v11862_v2  ;;  %10191 = vmatprep.subr.bf16.mxu0 %v11862_v2 }
  0x89   : > { %1434 = vadd.xlane.f32.xlu1 %v1432_v50  ;;  %v11271_v50 = vld [vmem:[%s11903_s25 + $0x70] sm:$0xff]  }
  0x8b   : > { %10212 = vmatpush3.bf16.msra.mxu1 %v11244_v19  ;;  %10192 = vmatpush3.bf16.msra.mxu0 %v11248_v24 }
  0x8c   : > { %10237 = vmatprep.subr.bf16.mxu1 %v11862_v2  ;;  %10217 = vmatprep.subr.bf16.mxu0 %v11862_v2 }
  0x8e   : > { %10214 = vmatmul.mubr.bf16.vlgmr.msra.gmra.mrb[0].mxu1 %v12201_v21 }
  0x8f   : > { %10239 = vmatprep.mubr.msk.bf16.mxu1 %vm11863_vm0, %v11862_v2 }
 0x107   : > { %v1484_v10 = vpop.xlane.xlu0 %1483 }
 0x108   : > { %v1486_v11 = vmul.f32 0.0078125, %v1484_v10 }
 0x10a   : > { %v1487_v12 = vsub.f32 %v1423_v0, %v1486_v11  ;;  %v11255_v0 = vld [vmem:[%s13470_s14 + $0x30] sm:$0xff]  }
 0x10c   : > { %v1488_v13 = vmul.f32 %v1487_v12, %v1487_v12 }
 0x10e   : > { %1489 = vadd.xlane.f32.xlu0 %v1488_v13 }
 0x112   : > { %v1437_v3 = vpop.xlane.xlu1 %1436 }
 0x113   : > { %v1439_v4 = vcvt.f32.s32 %v1437_v3 }
 0x115   : > { %v1440_v6 = vshll.u32 %v1439_v4, 16 }
 0x116   : > { %v1435_v5 = vpop.xlane.xlu1 %1434 }
 0x117   : > { %v1438_v7 = vcvt.f32.s32 %v1435_v5 }
 0x119   : > { %v1441_v8 = vadd.s32 %v1440_v6, %v1438_v7 }
 0x11b   : > { %vm1442_vm3 = vcmp.eq.s32.totalorder %v1441_v8, 16 }
 0x11c   : > { %vm1444_vm6 = vmxor %vm1442_vm3, %vm11864_vm5 }
 0x11d   : > { %vm1447_vm7 = vmand %vm1443_vm4, %vm1444_vm6 }
 0x161   : > { %v1728_v36 = vpop.f32.mrb[0].mxu1 }
 0x162   : > { %v1729_v37 = vadd.f32 %v8769_v35, %v1728_v36  ;;  %v10215_v38 = vpop.f32.mrb[1].mxu1  ;;  %v11262_v36 = vld [vmem:[%s13472_s3 + $0x60] sm:$0xff]  }
 0x163   : > { %v1731_v39 = vpop.f32.mrb[2].mxu1  ;;  %v11266_v38 = vld [vmem:[%s13472_s3 + $0x70] sm:$0xff]  }
 0x164   : > { %v1732_v40 = vadd.f32 %v8769_v35, %v1731_v39  ;;  %v10216_v41 = vpop.f32.mrb[3].mxu1  ;;  %v11260_v35 = vld [vmem:[%s13472_s3 + $0x58] sm:$0xff]  }
 0x165   : > { %v11268_v39 = vld [vmem:[%s13472_s3 + $0x78] sm:$0xff]  }
 0x166   : > { %v1735_v42 = vpack.c.bf16 %v1732_v40, %v1729_v37  ;;  %v11264_v37 = vld [vmem:[%s13472_s3 + $0x68] sm:$0xff]  }
 0x168   : > { %v1854_v43 = vsel %vm1849_vm1, %v1735_v42, 0 }
 0x169   : > { %10238 = vmatpush3.bf16.xpose.msra.mxu1 %v1854_v43  ;;  %v11261_v43 = vld [vmem:[%s11903_s25 + $0x40] sm:$0xff]  }
 0x16a   : > { %10243 = vmatprep.subr.bf16.mxu1 %v11862_v2 }
 0x19b   : > { %v1490_v25 = vpop.xlane.xlu0 %1489 }
 0x19c   : > { %v1491_v26 = vmul.f32 0.0078125, %v1490_v25  ;;  %v8778_v25 = vld [vmem:[%s11928_s19] ss:$0 sm:$0xff] }
 0x19e   : > { %v1492_v27 = vadd.f32 1e-05, %v1491_v26  ;;  %v11257_v26 = vld [vmem:[%s13472_s3 + $0x40] sm:$0xff]  }
 0x1a0   : > { %11625 = vrsqrt.f32 %v1492_v27 }
 0x1aa   : > { %v11626_v28 = vpop.eup %11625 }
 0x1ab   : > { %v1494_v30 = vmul.f32 %v11626_v28, %v1487_v12  ;;  %v12253_v12 = vsel %vm1447_vm7, -1e+09, %v11862_v2 }
 0x1ad   : > { %v1501_v32 = vmul.f32 %v8758_v29, %v1494_v30  ;;  %v11258_v30 = vld [vmem:[%s13472_s3 + $0x48] sm:$0xff]  }
 0x1af   : > { %v1508_v33 = vadd.f32 %v8759_v31, %v1501_v32 }
 0x1b1   : > { %v12218_v34 = vpack.c.bf16 %v1508_v33, %v1508_v33  ;;  %v11259_v33 = vld [vmem:[%s13472_s3 + $0x50] sm:$0xff]  }
 0x1b3   : > { %10194 = vmatmul.mubr.bf16.vlgmr.msra.gmra.mrb[0].mxu0 %v12218_v34 }
 0x1b4   : > { %10233 = vmatprep.mubr.msk.bf16.mxu0 %vm11863_vm0, %v11862_v2  ;;  %10218 = vmatpush3.bf16.msra.mxu0 %v11249_v58  ;;  %v11279_v58 = vld [vmem:[%s13470_s14 + $0x70] sm:$0xff]  }
 0x1b5   : > { %10219 = vmatprep.subr.bf16.mxu0 %v11862_v2 }
 0x1b8   : > { %10220 = vmatpush3.bf16.msra.mxu0 %v11250_v59  ;;  %v11280_v59 = vld [vmem:[%s13470_s14 + $0x78] sm:$0xff]  }
 0x1b9   : > { %10221 = vmatprep.subr.bf16.mxu0 %v11862_v2 }
 0x1bc   : > { %10222 = vmatpush3.bf16.msra.mxu0 %v11251_v60  ;;  %v11281_v60 = vld [vmem:[%s11933_s24] sm:$0xff]  }
 0x1bd   : > { %10223 = vmatprep.subr.bf16.mxu0 %v11862_v2 }
 0x1c0   : > { %10224 = vmatpush3.bf16.msra.mxu0 %v11252_v61  ;;  %v11282_v61 = vld [vmem:[%s11933_s24 + $0x8] sm:$0xff]  }
 0x1c1   : > { %10225 = vmatprep.subr.bf16.mxu0 %v11862_v2 }
 0x1c4   : > { %10226 = vmatpush3.bf16.msra.mxu0 %v11253_v62  ;;  %v8832_v62 = vld [vmem:[%s13471_s8 + $0x1] ss:$0 sm:$0xff] }
 0x1c5   : > { %10227 = vmatprep.subr.bf16.mxu0 %v11862_v2 }
 0x1c8   : > { %10228 = vmatpush3.bf16.msra.mxu0 %v11254_v63 }
 0x1c9   : > { %10229 = vmatprep.subr.bf16.mxu0 %v11862_v2 }
 0x1cc   : > { %10230 = vmatpush3.bf16.msra.mxu0 %v11255_v0 }
 0x1cd   : > { %10231 = vmatprep.subr.bf16.mxu0 %v11862_v2 }
 0x1d0   : > { %10232 = vmatpush3.bf16.msra.mxu0 %v11256_v1 }
 0x1d1   : > { %10269 = vmatprep.subr.bf16.mxu0 %v11862_v2 }
 0x1d3   : > { %10234 = vmatmul.mubr.bf16.vlgmr.msra.gmra.mrb[4].mxu0 %v12201_v21 }
 0x1d4   : > { %10285 = vmatprep.mubr.msk.bf16.mxu0 %vm11863_vm0, %v11862_v2  ;;  %10270 = vmatpush3.bf16.msra.mxu0 %v11257_v26 }
 0x1d5   : > { %10271 = vmatprep.subr.bf16.mxu0 %v11862_v2 }
 0x1d8   : > { %10272 = vmatpush3.bf16.msra.mxu0 %v11258_v30 }
 0x1d9   : > { %10273 = vmatprep.subr.bf16.mxu0 %v11862_v2 }
 0x1dc   : > { %10274 = vmatpush3.bf16.msra.mxu0 %v11259_v33 }
 0x1dd   : > { %10275 = vmatprep.subr.bf16.mxu0 %v11862_v2 }
 0x1e0   : > { %10276 = vmatpush3.bf16.msra.mxu0 %v11260_v35 }
 0x1e1   : > { %10277 = vmatprep.subr.bf16.mxu0 %v11862_v2 }
 0x1e4   : > { %10278 = vmatpush3.bf16.msra.mxu0 %v11262_v36 }
 0x1e5   : > { %10279 = vmatprep.subr.bf16.mxu0 %v11862_v2 }
 0x1e8   : > { %10280 = vmatpush3.bf16.msra.mxu0 %v11264_v37 }
 0x1e9   : > { %10281 = vmatprep.subr.bf16.mxu0 %v11862_v2 }
 0x1ec   : > { %10282 = vmatpush3.bf16.msra.mxu0 %v11266_v38 }
 0x1ed   : > { %10283 = vmatprep.subr.bf16.mxu0 %v11862_v2 }
 0x1f0   : > { %10284 = vmatpush3.bf16.msra.mxu0 %v11268_v39 }
 0x1f1   : > { %10309 = vmatprep.subr.bf16.mxu0 %v11862_v2 }
 0x1f3   : > { %10286 = vmatmul.mubr.bf16.vlgmr.msra.gmra.mrb[8].mxu0 %v12201_v21 }
 0x1f4   : > { %10311 = vmatprep.mubr.msk.bf16.mxu0 %vm11863_vm0, %v11862_v2 }
 0x286   : > { %v1616_v52 = vpop.f32.mrb[0].mxu0 }
 0x287   : > { %v1617_v53 = vadd.f32 %v8760_v51, %v1616_v52  ;;  %v10195_v54 = vpop.f32.mrb[1].mxu0  ;;  %v11272_v51 = vld [vmem:[%s11903_s25 + $0x78] sm:$0xff]   ;;  %v11273_v52 = vld [vmem:[%s13470_s14 + $0x40] sm:$0xff]  }
 0x288   : > { %v1619_v55 = vpop.f32.mrb[2].mxu0  ;;  %v11275_v54 = vld [vmem:[%s13470_s14 + $0x50] sm:$0xff]  }
 0x289   : > { %v1622_v56 = vpack.c.bf16 %v1617_v53, %v1617_v53  ;;  %v10196_v57 = vpop.f32.mrb[3].mxu0  ;;  %v11274_v53 = vld [vmem:[%s13470_s14 + $0x48] sm:$0xff]   ;;  %v11276_v55 = vld [vmem:[%s13470_s14 + $0x58] sm:$0xff]  }
 0x28a   : > { %v11278_v57 = vld [vmem:[%s13470_s14 + $0x68] sm:$0xff]  }
 0x28b   : > { %10240 = vmatmul.mubr.msk.bf16.vlgmr.msra.gmra.mrb[4].mxu1 %vm1849_vm1, %v1622_v56  ;;  %v11277_v56 = vld [vmem:[%s13470_s14 + $0x60] sm:$0xff]  }
 0x28c   : > { %10245 = vmatprep.mubr.msk.bf16.mxu1 %vm11863_vm0, %v11862_v2 }
 0x2a6   : > { %v1841_v17 = vpop.f32.mrb[4].mxu0 }
 0x2a7   : > { %v10235_v18 = vpop.f32.mrb[5].mxu0  ;;  %v1842_v27 = vadd.f32 %v8778_v25, %v1841_v17 }
 0x2a8   : > { %v1844_v28 = vpop.f32.mrb[6].mxu0 }
 0x2a9   : > { %v10236_v29 = vpop.f32.mrb[7].mxu0  ;;  %v1845_v31 = vadd.f32 %v8778_v25, %v1844_v28 }
 0x2ab   : > { %v1848_v32 = vpack.c.bf16 %v1845_v31, %v1842_v27 }
 0x2ad   : > { %10244 = vmatpush3.bf16.msra.mxu1 %v1848_v32 }
 0x2ae   : > { %10249 = vmatprep.subr.bf16.mxu1 %v11862_v2 }
 0x2c6   : > { %v2179_v63 = vpop.f32.mrb[8].mxu0 }
 0x2c7   : > { %v2180_v0 = vadd.f32 %v8832_v62, %v2179_v63  ;;  %v10287_v1 = vpop.f32.mrb[9].mxu0 }
 0x2c8   : > { %v2182_v3 = vpop.f32.mrb[10].mxu0 }
 0x2c9   : > { %v2183_v4 = vadd.f32 %v8832_v62, %v2182_v3  ;;  %v10288_v5 = vpop.f32.mrb[11].mxu0  ;;  %v11289_v62 = vld [vmem:[%s11903_s25 + $0x80] sm:$0xff]  }
 0x2ca   : > { %v11293_v5 = vld [vmem:[%s11903_s25 + $0x90] sm:$0xff]  }
 0x2cb   : > { %v2186_v6 = vpack.c.bf16 %v2183_v4, %v2180_v0  ;;  %v11291_v4 = vld [vmem:[%s11903_s25 + $0x88] sm:$0xff]  }
 0x2cd   : > { %v2306_v7 = vsel %vm1849_vm1, %v2186_v6, 0  ;;  %v11295_v6 = vld [vmem:[%s11903_s25 + $0x98] sm:$0xff]  }
 0x2ce   : > { %10310 = vmatpush3.bf16.xpose.msra.mxu0 %v2306_v7  ;;  %v11297_v7 = vld [vmem:[%s11903_s25 + $0xa0] sm:$0xff]  }
 0x2cf   : > { %10315 = vmatprep.subr.bf16.mxu0 %v11862_v2 }
 0x35e   : > { %v1890_v9 = vpop.f32.mrb[4].mxu1 }
 0x35f   : > { %v1896_v10 = vmul.f32 0.17677669, %v1890_v9  ;;  %v10241_v11 = vpop.f32.mrb[5].mxu1 }
 0x360   : > { %v1893_v13 = vpop.f32.mrb[6].mxu1 }
 0x361   : > { %v10242_v14 = vpop.f32.mrb[7].mxu1  ;;  %v1897_v15 = vadd.f32 %v1896_v10, %v12253_v12 }
 0x362   : > { %v8806_v14 = vld [vmem:[%s11908_s29 + $0x1] ss:$0 sm:$0xff] }
 0x363   : > { %v1898_v16 = vsel %vm1428_vm2, %v1897_v15, -inf }
 0x364   : > { %1899 = vmax.xlane.f32.xlu0 %v1898_v16 }
 0x3f1   : > { %v1900_v19 = vpop.xlane.xlu0 %1899 }
 0x3f2   : > { %v1901_v20 = vsub.f32 %v1897_v15, %v1900_v19 }
 0x3f4   : > { %v1902_v22 = vmul.f32 1.442695, %v1901_v20 }
 0x3f6   : > { %11627 = vpow2.f32 %v1902_v22  ;;  %v8858_v22 = vld [vmem:[%s11928_s19 + $0x1] ss:$0 sm:$0xff] }
 0x400   : > { %v11628_v23 = vpop.eup %11627 }
 0x401   : > { %v1904_v24 = vsel %vm1428_vm2, %v11628_v23, 0.0 }
 0x402   : > { %1905 = vadd.xlane.f32.xlu1 %v1904_v24 }
 0x48f   : > { %v1906_v40 = vpop.xlane.xlu1 %1905 }
 0x490   : > { %11629 = vrcp.f32 %v1906_v40 }
 0x49a   : > { %v11630_v41 = vpop.eup %11629 }
 0x49b   : > { %v1908_v42 = vmul.f32 %v11630_v41, %v11628_v23 }
 0x49d   : > { %v1909_v44 = vpack.c.bf16 %v1908_v42, %v1908_v42 }
 0x49f   : > { %10246 = vmatmul.mubr.msk.bf16.vlgmr.msra.gmra.mrb[8].mxu1 %vm1428_vm2, %v1909_v44 }
 0x4a0   : > { %10250 = vmatpush3.bf16.msra.mxu1 %v11261_v43  ;;  %10265 = vmatprep.mubr.msk.bf16.mxu1 %vm11863_vm0, %v11862_v2 }
 0x4a1   : > { %10251 = vmatprep.subr.bf16.mxu1 %v11862_v2 }
 0x4a4   : > { %10252 = vmatpush3.bf16.msra.mxu1 %v11263_v45 }
 0x4a5   : > { %10253 = vmatprep.subr.bf16.mxu1 %v11862_v2 }
 0x4a8   : > { %10254 = vmatpush3.bf16.msra.mxu1 %v11265_v46 }
 0x4a9   : > { %10255 = vmatprep.subr.bf16.mxu1 %v11862_v2 }
 0x4ac   : > { %10256 = vmatpush3.bf16.msra.mxu1 %v11267_v47  ;;  %v11283_v47 = vld [vmem:[%s13472_s3 + $0x80] sm:$0xff]  }
 0x4ad   : > { %10257 = vmatprep.subr.bf16.mxu1 %v11862_v2 }
 0x4b0   : > { %10258 = vmatpush3.bf16.msra.mxu1 %v11269_v48  ;;  %v11284_v48 = vld [vmem:[%s13472_s3 + $0x88] sm:$0xff]  }
 0x4b1   : > { %10259 = vmatprep.subr.bf16.mxu1 %v11862_v2 }
 0x4b4   : > { %10260 = vmatpush3.bf16.msra.mxu1 %v11270_v49  ;;  %v11286_v49 = vld [vmem:[%s13472_s3 + $0x90] sm:$0xff]  }
 0x4b5   : > { %10261 = vmatprep.subr.bf16.mxu1 %v11862_v2 }
 0x4b8   : > { %10262 = vmatpush3.bf16.msra.mxu1 %v11271_v50 }
 0x4b9   : > { %10263 = vmatprep.subr.bf16.mxu1 %v11862_v2 }
 0x4bc   : > { %10264 = vmatpush3.bf16.msra.mxu1 %v11272_v51 }
 0x4bd   : > { %10289 = vmatprep.subr.bf16.mxu1 %v11862_v2 }
 0x4bf   : > { %10266 = vmatmul.mubr.bf16.vlgmr.msra.gmra.mrb[12].mxu1 %v12218_v34 }
 0x4c0   : > { %10290 = vmatpush3.bf16.msra.mxu1 %v11273_v52  ;;  %10305 = vmatprep.mubr.msk.bf16.mxu1 %vm11863_vm0, %v11862_v2 }
 0x4c1   : > { %10291 = vmatprep.subr.bf16.mxu1 %v11862_v2 }
 0x4c4   : > { %10292 = vmatpush3.bf16.msra.mxu1 %v11274_v53  ;;  %v11285_v53 = vld [vmem:[%s11933_s24 + $0x10] sm:$0xff]  }
 0x4c5   : > { %10293 = vmatprep.subr.bf16.mxu1 %v11862_v2 }
 0x4c8   : > { %10294 = vmatpush3.bf16.msra.mxu1 %v11275_v54 }
 0x4c9   : > { %10295 = vmatprep.subr.bf16.mxu1 %v11862_v2 }
 0x4cc   : > { %10296 = vmatpush3.bf16.msra.mxu1 %v11276_v55  ;;  %v11287_v55 = vld [vmem:[%s11933_s24 + $0x18] sm:$0xff]  }
 0x4cd   : > { %10297 = vmatprep.subr.bf16.mxu1 %v11862_v2 }
 0x4d0   : > { %10298 = vmatpush3.bf16.msra.mxu1 %v11277_v56  ;;  %v11288_v56 = vld [vmem:[%s13472_s3 + $0x98] sm:$0xff]  }
 0x4d1   : > { %10299 = vmatprep.subr.bf16.mxu1 %v11862_v2 }
 0x4d4   : > { %10300 = vmatpush3.bf16.msra.mxu1 %v11278_v57  ;;  %v11290_v57 = vld [vmem:[%s13472_s3 + $0xa0] sm:$0xff]  }
 0x4d5   : > { %10301 = vmatprep.subr.bf16.mxu1 %v11862_v2 }
 0x4d8   : > { %10302 = vmatpush3.bf16.msra.mxu1 %v11279_v58  ;;  %v11292_v58 = vld [vmem:[%s13472_s3 + $0xa8] sm:$0xff]  }
 0x4d9   : > { %10303 = vmatprep.subr.bf16.mxu1 %v11862_v2 }
 0x4dc   : > { %10304 = vmatpush3.bf16.msra.mxu1 %v11280_v59  ;;  %v11294_v59 = vld [vmem:[%s13472_s3 + $0xb0] sm:$0xff]  }
 0x4dd   : > { %10329 = vmatprep.subr.bf16.mxu1 %v11862_v2 }
 0x4df   : > { %10306 = vmatmul.mubr.bf16.vlgmr.msra.gmra.mrb[16].mxu1 %v12201_v21 }
 0x4e0   : > { %10330 = vmatpush3.bf16.msra.mxu1 %v11281_v60  ;;  %10333 = vmatprep.mubr.msk.bf16.mxu1 %vm11863_vm0, %v11862_v2  ;;  %v11296_v60 = vld [vmem:[%s13472_s3 + $0xb8] sm:$0xff]  }
 0x4e1   : > { %10331 = vmatprep.subr.bf16.mxu1 %v11862_v2 }
 0x4e4   : > { %10332 = vmatpush3.bf16.msra.mxu1 %v11282_v61 }
 0x4e5   : > { %10357 = vmatprep.subr.bf16.mxu1 %v11862_v2 }
 0x572   : > { %v1947_v8 = vpop.f32.mrb[8].mxu1 }
 0x573   : > { %v1953_v9 = vpack.c.bf16 %v1947_v8, %v1947_v8  ;;  %v10247_v10 = vpop.f32.mrb[9].mxu1  ;;  %v11298_v8 = vld [vmem:[%s11903_s25 + $0xa8] sm:$0xff]  }
 0x574   : > { %v1950_v11 = vpop.f32.mrb[10].mxu1  ;;  %v11300_v10 = vld [vmem:[%s11903_s25 + $0xb8] sm:$0xff]  }
 0x575   : > { %v10248_v13 = vpop.f32.mrb[11].mxu1  ;;  %10334 = vmatmul.mubr.msk.bf16.vlgmr.msra.gmra.mrb[20].mxu1 %vm1849_vm1, %v1953_v9  ;;  %v11299_v9 = vld [vmem:[%s11903_s25 + $0xb0] sm:$0xff]   ;;  %v8922_v11 = vld [vmem:[%s13471_s8 + $0x2] ss:$0 sm:$0xff] }
 0x576   : > { %10373 = vmatprep.mubr.msk.bf16.mxu1 %vm11863_vm0, %v11862_v2  ;;  %10358 = vmatpush3.bf16.msra.mxu1 %v11283_v47 }
 0x577   : > { %10359 = vmatprep.subr.bf16.mxu1 %v11862_v2 }
 0x57a   : > { %10360 = vmatpush3.bf16.msra.mxu1 %v11284_v48 }
 0x57b   : > { %10361 = vmatprep.subr.bf16.mxu1 %v11862_v2 }
 0x57e   : > { %10362 = vmatpush3.bf16.msra.mxu1 %v11286_v49 }
 0x57f   : > { %10363 = vmatprep.subr.bf16.mxu1 %v11862_v2 }
 0x582   : > { %10364 = vmatpush3.bf16.msra.mxu1 %v11288_v56 }
 0x583   : > { %10365 = vmatprep.subr.bf16.mxu1 %v11862_v2 }
 0x586   : > { %10366 = vmatpush3.bf16.msra.mxu1 %v11290_v57  ;;  %v8948_v57 = vld [vmem:[%s11928_s19 + $0x2] ss:$0 sm:$0xff] }
 0x587   : > { %10367 = vmatprep.subr.bf16.mxu1 %v11862_v2 }
 0x58a   : > { %10368 = vmatpush3.bf16.msra.mxu1 %v11292_v58 }
 0x58b   : > { %10369 = vmatprep.subr.bf16.mxu1 %v11862_v2 }
 0x58e   : > { %10370 = vmatpush3.bf16.msra.mxu1 %v11294_v59 }
 0x58f   : > { %10371 = vmatprep.subr.bf16.mxu1 %v11862_v2 }
 0x592   : > { %v2065_v15 = vpop.f32.mrb[12].mxu1  ;;  %10372 = vmatpush3.bf16.msra.mxu1 %v11296_v60 }
 0x593   : > { %v2066_v16 = vadd.f32 %v8806_v14, %v2065_v15  ;;  %v10267_v17 = vpop.f32.mrb[13].mxu1  ;;  %10397 = vmatprep.subr.bf16.mxu1 %v11862_v2 }
 0x594   : > { %v2068_v18 = vpop.f32.mrb[14].mxu1 }
 0x595   : > { %v2071_v19 = vpack.c.bf16 %v2066_v16, %v2066_v16  ;;  %v10268_v20 = vpop.f32.mrb[15].mxu1  ;;  %10374 = vmatmul.mubr.bf16.vlgmr.msra.gmra.mrb[24].mxu1 %v12201_v21 }
 0x596   : > { %10399 = vmatprep.mubr.msk.bf16.mxu1 %vm11863_vm0, %v11862_v2 }
 0x597   : > { %10312 = vmatmul.mubr.msk.bf16.vlgmr.msra.gmra.mrb[12].mxu0 %vm1849_vm1, %v2071_v19 }
 0x598   : > { %10317 = vmatprep.mubr.msk.bf16.mxu0 %vm11863_vm0, %v11862_v2 }
 0x5b2   : > { %v2294_v23 = vpop.f32.mrb[16].mxu1 }
 0x5b3   : > { %v2295_v24 = vadd.f32 %v8858_v22, %v2294_v23  ;;  %v10307_v25 = vpop.f32.mrb[17].mxu1 }
 0x5b4   : > { %v2297_v26 = vpop.f32.mrb[18].mxu1 }
 0x5b5   : > { %v2298_v27 = vadd.f32 %v8858_v22, %v2297_v26  ;;  %v10308_v28 = vpop.f32.mrb[19].mxu1 }
 0x5b7   : > { %v2301_v29 = vpack.c.bf16 %v2298_v27, %v2295_v24  ;;  %v8896_v27 = vld [vmem:[%s11908_s29 + $0x2] ss:$0 sm:$0xff] }
 0x5b9   : > { %10316 = vmatpush3.bf16.msra.mxu0 %v2301_v29 }
 0x5ba   : > { %10321 = vmatprep.subr.bf16.mxu0 %v11862_v2 }
 0x648   : > { %v12336_v30 = vpop.f32.mrb[20].mxu1 }
 0x649   : > { %v10335_v31 = vpop.f32.mrb[21].mxu1 }
 0x64a   : > { %v2518_v32 = vpop.f32.mrb[22].mxu1 }
 0x64b   : > { %v10336_v33 = vpop.f32.mrb[23].mxu1 }
 0x668   : > { %v2742_v13 = vpop.f32.mrb[24].mxu1 }
 0x669   : > { %v2743_v14 = vadd.f32 %v8922_v11, %v2742_v13  ;;  %v10375_v15 = vpop.f32.mrb[25].mxu1  ;;  %v11320_v13 = vld [vmem:[%s13472_s3 + $0xf0] sm:$0xff]  }
 0x66a   : > { %v2342_v35 = vpop.f32.mrb[12].mxu0  ;;  %v2745_v16 = vpop.f32.mrb[26].mxu1 }
 0x66b   : > { %v2348_v36 = vmul.f32 0.17677669, %v2342_v35  ;;  %v10313_v37 = vpop.f32.mrb[13].mxu0  ;;  %v2746_v17 = vadd.f32 %v8922_v11, %v2745_v16  ;;  %v10376_v18 = vpop.f32.mrb[27].mxu1  ;;  %v11318_v11 = vld [vmem:[%s13472_s3 + $0xe8] sm:$0xff]   ;;  %v11315_v16 = vld [vmem:[%s11903_s25 + $0xc0] sm:$0xff]  }
 0x66c   : > { %v2345_v38 = vpop.f32.mrb[14].mxu0  ;;  %v11303_v37 = vld [vmem:[%s13470_s14 + $0x90] sm:$0xff]  }
 0x66d   : > { %v10314_v39 = vpop.f32.mrb[15].mxu0  ;;  %v2349_v40 = vadd.f32 %v2348_v36, %v12253_v12  ;;  %v2749_v19 = vpack.c.bf16 %v2746_v17, %v2743_v14  ;;  %v11302_v36 = vld [vmem:[%s13470_s14 + $0x88] sm:$0xff]   ;;  %v11304_v38 = vld [vmem:[%s13470_s14 + $0x98] sm:$0xff]  }
 0x66e   : > { %v11305_v39 = vld [vmem:[%s13470_s14 + $0xa0] sm:$0xff]   ;;  %v11322_v14 = vld [vmem:[%s13472_s3 + $0xf8] sm:$0xff]  }
 0x66f   : > { %v2350_v41 = vsel %vm1428_vm2, %v2349_v40, -inf  ;;  %v2869_v20 = vsel %vm1849_vm1, %v2749_v19, 0 }
 0x670   : > { %2351 = vmax.xlane.f32.xlu0 %v2350_v41  ;;  %10398 = vmatpush3.bf16.xpose.msra.mxu1 %v2869_v20  ;;  %v11307_v41 = vld [vmem:[%s13470_s14 + $0xb0] sm:$0xff]  }
 0x671   : > { %10403 = vmatprep.subr.bf16.mxu1 %v11862_v2 }
 0x6fd   : > { %v2352_v42 = vpop.xlane.xlu0 %2351 }
 0x6fe   : > { %v2353_v43 = vsub.f32 %v2349_v40, %v2352_v42  ;;  %v11306_v40 = vld [vmem:[%s13470_s14 + $0xa8] sm:$0xff]   ;;  %v11308_v42 = vld [vmem:[%s13470_s14 + $0xb8] sm:$0xff]  }
 0x700   : > { %v2354_v44 = vmul.f32 1.442695, %v2353_v43 }
 0x702   : > { %11631 = vpow2.f32 %v2354_v44 }
 0x70c   : > { %v11632_v45 = vpop.eup %11631 }
 0x70d   : > { %v2356_v46 = vsel %vm1428_vm2, %v11632_v45, 0.0 }
 0x70e   : > { %2357 = vadd.xlane.f32.xlu1 %v2356_v46 }
 0x79b   : > { %v2358_v50 = vpop.xlane.xlu1 %2357 }
 0x79c   : > { %11633 = vrcp.f32 %v2358_v50 }
 0x7a6   : > { %v11634_v51 = vpop.eup %11633 }
 0x7a7   : > { %v2360_v52 = vmul.f32 %v11634_v51, %v11632_v45 }
 0x7a9   : > { %v2361_v54 = vpack.c.bf16 %v2360_v52, %v2360_v52 }
 0x7ab   : > { %10318 = vmatmul.mubr.msk.bf16.vlgmr.msra.gmra.mrb[16].mxu0 %vm1428_vm2, %v2361_v54 }
 0x7ac   : > { %10322 = vmatpush3.bf16.msra.mxu0 %v11285_v53  ;;  %10325 = vmatprep.mubr.msk.bf16.mxu0 %vm11863_vm0, %v11862_v2 }
 0x7ad   : > { %10323 = vmatprep.subr.bf16.mxu0 %v11862_v2 }
 0x7b0   : > { %10324 = vmatpush3.bf16.msra.mxu0 %v11287_v55 }
 0x7b1   : > { %10337 = vmatprep.subr.bf16.mxu0 %v11862_v2 }
 0x87e   : > { %v2399_v61 = vpop.f32.mrb[16].mxu0 }
 0x87f   : > { %v2405_v63 = vpack.c.bf16 %v2399_v61, %v2399_v61  ;;  %v10319_v0 = vpop.f32.mrb[17].mxu0 }
 0x880   : > { %v2402_v1 = vpop.f32.mrb[18].mxu0  ;;  %v11310_v0 = vld [vmem:[%s13472_s3 + $0xc8] sm:$0xff]  }
 0x881   : > { %v10320_v3 = vpop.f32.mrb[19].mxu0  ;;  %10326 = vmatmul.mubr.msk.bf16.vlgmr.msra.gmra.mrb[20].mxu0 %vm1849_vm1, %v2405_v63  ;;  %v11309_v63 = vld [vmem:[%s13472_s3 + $0xc0] sm:$0xff]   ;;  %v11312_v1 = vld [vmem:[%s13472_s3 + $0xd0] sm:$0xff]  }
 0x882   : > { %10338 = vmatpush3.bf16.msra.mxu0 %v11289_v62  ;;  %10353 = vmatprep.mubr.msk.bf16.mxu0 %vm11863_vm0, %v11862_v2 }
 0x883   : > { %10339 = vmatprep.subr.bf16.mxu0 %v11862_v2 }
 0x886   : > { %10340 = vmatpush3.bf16.msra.mxu0 %v11291_v4 }
 0x887   : > { %10341 = vmatprep.subr.bf16.mxu0 %v11862_v2 }
 0x88a   : > { %10342 = vmatpush3.bf16.msra.mxu0 %v11293_v5 }
 0x88b   : > { %10343 = vmatprep.subr.bf16.mxu0 %v11862_v2 }
 0x88e   : > { %10344 = vmatpush3.bf16.msra.mxu0 %v11295_v6  ;;  %v11311_v6 = vld [vmem:[%s11933_s24 + $0x20] sm:$0xff]  }
 0x88f   : > { %10345 = vmatprep.subr.bf16.mxu0 %v11862_v2 }
 0x892   : > { %10346 = vmatpush3.bf16.msra.mxu0 %v11297_v7 }
 0x893   : > { %10347 = vmatprep.subr.bf16.mxu0 %v11862_v2 }
 0x896   : > { %10348 = vmatpush3.bf16.msra.mxu0 %v11298_v8  ;;  %v11313_v8 = vld [vmem:[%s11933_s24 + $0x28] sm:$0xff]  }
 0x897   : > { %10349 = vmatprep.subr.bf16.mxu0 %v11862_v2 }
 0x89a   : > { %10350 = vmatpush3.bf16.msra.mxu0 %v11299_v9  ;;  %v11314_v9 = vld [vmem:[%s13472_s3 + $0xd8] sm:$0xff]  }
 0x89b   : > { %10351 = vmatprep.subr.bf16.mxu0 %v11862_v2 }
 0x89e   : > { %10352 = vmatpush3.bf16.msra.mxu0 %v11300_v10  ;;  %v11316_v10 = vld [vmem:[%s13472_s3 + $0xe0] sm:$0xff]   ;;  %s13485_s3 = sld [smem:[#allocation21_spill]] }
 0x89f   : > { %10377 = vmatprep.subr.bf16.mxu0 %v11862_v2 }
 0x8a1   : > { %10354 = vmatmul.mubr.bf16.vlgmr.msra.gmra.mrb[24].mxu0 %v12218_v34 }
 0x8a2   : > { %10393 = vmatprep.mubr.msk.bf16.mxu0 %vm11863_vm0, %v11862_v2 }
 0x954   : > { %v2460_v22 = vpop.f32.mrb[20].mxu0 }
 0x955   : > { %v12393_v23 = vadd.f32 %v12336_v30, %v2460_v22  ;;  %v10327_v24 = vpop.f32.mrb[21].mxu0  ;;  %v11301_v30 = vld [vmem:[%s13470_s14 + $0x80] sm:$0xff]   ;;  %v11317_v22 = vld [vmem:[%s11903_s25 + $0xc8] sm:$0xff]  }
 0x956   : > { %v2463_v25 = vpop.f32.mrb[22].mxu0  ;;  %10378 = vmatpush3.bf16.msra.mxu0 %v11301_v30  ;;  %v11319_v24 = vld [vmem:[%s11903_s25 + $0xd0] sm:$0xff]  }
 0x957   : > { %v10328_v26 = vpop.f32.mrb[23].mxu0  ;;  %10379 = vmatprep.subr.bf16.mxu0 %v11862_v2  ;;  %v11321_v25 = vld [vmem:[%s11903_s25 + $0xd8] sm:$0xff]  }
 0x958   : > { %v11323_v26 = vld [vmem:[%s11903_s25 + $0xe0] sm:$0xff]  }
 0x95a   : > { %10380 = vmatpush3.bf16.msra.mxu0 %v11302_v36 }
 0x95b   : > { %10381 = vmatprep.subr.bf16.mxu0 %v11862_v2 }
 0x95e   : > { %10382 = vmatpush3.bf16.msra.mxu0 %v11303_v37 }
 0x95f   : > { %10383 = vmatprep.subr.bf16.mxu0 %v11862_v2 }
 0x962   : > { %10384 = vmatpush3.bf16.msra.mxu0 %v11304_v38 }
 0x963   : > { %10385 = vmatprep.subr.bf16.mxu0 %v11862_v2 }
 0x966   : > { %10386 = vmatpush3.bf16.msra.mxu0 %v11305_v39 }
 0x967   : > { %10387 = vmatprep.subr.bf16.mxu0 %v11862_v2 }
 0x96a   : > { %10388 = vmatpush3.bf16.msra.mxu0 %v11306_v40 }
 0x96b   : > { %10389 = vmatprep.subr.bf16.mxu0 %v11862_v2 }
 0x96e   : > { %10390 = vmatpush3.bf16.msra.mxu0 %v11307_v41 }
 0x96f   : > { %10391 = vmatprep.subr.bf16.mxu0 %v11862_v2 }
 0x972   : > { %10392 = vmatpush3.bf16.msra.mxu0 %v11308_v42 }
 0x973   : > { %10437 = vmatprep.subr.bf16.mxu0 %v11862_v2 }
 0x974   : > { %v2628_v28 = vpop.f32.mrb[24].mxu0 }
 0x975   : > { %v2629_v29 = vadd.f32 %v8896_v27, %v2628_v28  ;;  %v10355_v31 = vpop.f32.mrb[25].mxu0  ;;  %10394 = vmatmul.mubr.bf16.vlgmr.msra.gmra.mrb[28].mxu0 %v12201_v21  ;;  %v11324_v27 = vld [vmem:[%s11903_s25 + $0xe8] sm:$0xff]   ;;  %v11325_v28 = vld [vmem:[%s11903_s25 + $0xf0] sm:$0xff]  }
 0x976   : > { %v2631_v32 = vpop.f32.mrb[26].mxu0  ;;  %10453 = vmatprep.mubr.msk.bf16.mxu0 %vm11863_vm0, %v11862_v2  ;;  %10438 = vmatpush3.bf16.msra.mxu0 %v11309_v63  ;;  %v9009_v31 = vld [vmem:[%s13471_s8 + $0x3] ss:$0 sm:$0xff]  ;;  %s13486_s8 = sld [smem:[#allocation22_spill]] }
 0x977   : > { %v2634_v33 = vpack.c.bf16 %v2629_v29, %v2629_v29  ;;  %v10356_v35 = vpop.f32.mrb[27].mxu0  ;;  %10439 = vmatprep.subr.bf16.mxu0 %v11862_v2  ;;  %v11326_v29 = vld [vmem:[%s11903_s25 + $0xf8] sm:$0xff]  }
 0x979   : > { %10400 = vmatmul.mubr.msk.bf16.vlgmr.msra.gmra.mrb[28].mxu1 %vm1849_vm1, %v2634_v33 }
 0x97a   : > { %10405 = vmatprep.mubr.msk.bf16.mxu1 %vm11863_vm0, %v11862_v2  ;;  %10440 = vmatpush3.bf16.msra.mxu0 %v11310_v0 }
 0x97b   : > { %10441 = vmatprep.subr.bf16.mxu0 %v11862_v2 }
 0x97e   : > { %10442 = vmatpush3.bf16.msra.mxu0 %v11312_v1 }
 0x97f   : > { %10443 = vmatprep.subr.bf16.mxu0 %v11862_v2 }
 0x982   : > { %10444 = vmatpush3.bf16.msra.mxu0 %v11314_v9 }
 0x983   : > { %10445 = vmatprep.subr.bf16.mxu0 %v11862_v2 }
 0x986   : > { %10446 = vmatpush3.bf16.msra.mxu0 %v11316_v10 }
 0x987   : > { %10447 = vmatprep.subr.bf16.mxu0 %v11862_v2 }
 0x98a   : > { %10448 = vmatpush3.bf16.msra.mxu0 %v11318_v11 }
 0x98b   : > { %10449 = vmatprep.subr.bf16.mxu0 %v11862_v2 }
 0x98e   : > { %10450 = vmatpush3.bf16.msra.mxu0 %v11320_v13 }
 0x98f   : > { %10451 = vmatprep.subr.bf16.mxu0 %v11862_v2 }
 0x992   : > { %10452 = vmatpush3.bf16.msra.mxu0 %v11322_v14 }
 0x993   : > { %10477 = vmatprep.subr.bf16.mxu0 %v11862_v2 }
 0x995   : > { %10454 = vmatmul.mubr.bf16.vlgmr.msra.gmra.mrb[32].mxu0 %v12201_v21 }
 0x996   : > { %10479 = vmatprep.mubr.msk.bf16.mxu0 %vm11863_vm0, %v11862_v2 }
 0xa48   : > { %v2857_v50 = vpop.f32.mrb[28].mxu0 }
 0xa49   : > { %v10395_v51 = vpop.f32.mrb[29].mxu0  ;;  %v2858_v58 = vadd.f32 %v8948_v57, %v2857_v50 }
 0xa4a   : > { %v2860_v59 = vpop.f32.mrb[30].mxu0  ;;  %v11328_v51 = vld [vmem:[%s13470_s14 + $0xc8] sm:$0xff]  }
 0xa4b   : > { %v10396_v60 = vpop.f32.mrb[31].mxu0  ;;  %v2861_v61 = vadd.f32 %v8948_v57, %v2860_v59  ;;  %v11334_v57 = vld [vmem:[%s13470_s14 + $0xf8] sm:$0xff]  }
 0xa4c   : > { %v2905_v43 = vpop.f32.mrb[28].mxu1 }
 0xa4d   : > { %v2911_v44 = vmul.f32 0.17677669, %v2905_v43  ;;  %v10401_v45 = vpop.f32.mrb[29].mxu1  ;;  %v2864_v62 = vpack.c.bf16 %v2861_v61, %v2858_v58 }
 0xa4e   : > { %v2908_v46 = vpop.f32.mrb[30].mxu1 }
 0xa4f   : > { %v10402_v47 = vpop.f32.mrb[31].mxu1  ;;  %v2912_v48 = vadd.f32 %v2911_v44, %v12253_v12  ;;  %10404 = vmatpush3.bf16.msra.mxu1 %v2864_v62  ;;  %v8983_v44 = vld [vmem:[%s11908_s29 + $0x3] ss:$0 sm:$0xff] }
 0xa50   : > { %10409 = vmatprep.subr.bf16.mxu1 %v11862_v2 }
 0xa51   : > { %v2913_v49 = vsel %vm1428_vm2, %v2912_v48, -inf }
 0xa52   : > { %2914 = vmax.xlane.f32.xlu0 %v2913_v49 }
 0xa68   : > { %v3251_v32 = vpop.f32.mrb[32].mxu0 }
 0xa69   : > { %v3252_v33 = vadd.f32 %v9009_v31, %v3251_v32  ;;  %v10455_v35 = vpop.f32.mrb[33].mxu0 }
 0xa6a   : > { %v3254_v30 = vpop.f32.mrb[34].mxu0  ;;  %v11715_v35 = vld [vmem:[%s12164_s28] sm:$0xff]  ;;  %s13481_s28 = sld [smem:[#allocation16_spill]] }
 0xa6b   : > { %v3255_v36 = vadd.f32 %v9009_v31, %v3254_v30  ;;  %v10456_v37 = vpop.f32.mrb[35].mxu0 }
 0xa6d   : > { %v3258_v38 = vpack.c.bf16 %v3255_v36, %v3252_v33  ;;  %v9053_v33 = vld [vmem:[%s11938_s30] ss:$0 sm:$0xff] }
 0xa6f   : > { %v3378_v39 = vsel %vm1849_vm1, %v3258_v38, 0  ;;  %v11337_v38 = vld [vmem:[%s11953_s20] sm:$0xff]  }
 0xa70   : > { %10478 = vmatpush3.bf16.xpose.msra.mxu0 %v3378_v39  ;;  %v11338_v39 = vld [vmem:[%s13479_s5] sm:$0xff]  }
 0xa71   : > { %10483 = vmatprep.subr.bf16.mxu0 %v11862_v2 }
 0xadf   : > { %v2915_v52 = vpop.xlane.xlu0 %2914 }
 0xae0   : > { %v2916_v53 = vsub.f32 %v2912_v48, %v2915_v52  ;;  %v11329_v52 = vld [vmem:[%s13470_s14 + $0xd0] sm:$0xff]  }
 0xae2   : > { %v2917_v54 = vmul.f32 1.442695, %v2916_v53  ;;  %v11330_v53 = vld [vmem:[%s13470_s14 + $0xd8] sm:$0xff]  }
 0xae4   : > { %11635 = vpow2.f32 %v2917_v54  ;;  %v11331_v54 = vld [vmem:[%s13470_s14 + $0xe0] sm:$0xff]  }
 0xaee   : > { %v11636_v55 = vpop.eup %11635 }
 0xaef   : > { %v2919_v56 = vsel %vm1428_vm2, %v11636_v55, 0.0 }
 0xaf0   : > { %2920 = vadd.xlane.f32.xlu1 %v2919_v56  ;;  %v11333_v56 = vld [vmem:[%s13470_s14 + $0xf0] sm:$0xff]  }
 0xb7d   : > { %v2921_v3 = vpop.xlane.xlu1 %2920 }
 0xb7e   : > { %11637 = vrcp.f32 %v2921_v3 }
 0xb88   : > { %v11638_v4 = vpop.eup %11637 }
 0xb89   : > { %v2923_v5 = vmul.f32 %v11638_v4, %v11636_v55  ;;  %v11332_v55 = vld [vmem:[%s13470_s14 + $0xe8] sm:$0xff]  }
 0xb8b   : > { %v2924_v7 = vpack.c.bf16 %v2923_v5, %v2923_v5 }
 0xb8d   : > { %10406 = vmatmul.mubr.msk.bf16.vlgmr.msra.gmra.mrb[32].mxu1 %vm1428_vm2, %v2924_v7 }
 0xb8e   : > { %10410 = vmatpush3.bf16.msra.mxu1 %v11311_v6  ;;  %10413 = vmatprep.mubr.msk.bf16.mxu1 %vm11863_vm0, %v11862_v2 }
 0xb8f   : > { %10411 = vmatprep.subr.bf16.mxu1 %v11862_v2 }
 0xb92   : > { %10412 = vmatpush3.bf16.msra.mxu1 %v11313_v8  ;;  %v9035_v8 = vld [vmem:[%s11928_s19 + $0x3] ss:$0 sm:$0xff] }
 0xb93   : > { %10417 = vmatprep.subr.bf16.mxu1 %v11862_v2 }
 0xc60   : > { %v2962_v15 = vpop.f32.mrb[32].mxu1 }
 0xc61   : > { %v2968_v17 = vpack.c.bf16 %v2962_v15, %v2962_v15  ;;  %v10407_v18 = vpop.f32.mrb[33].mxu1 }
 0xc62   : > { %v2965_v19 = vpop.f32.mrb[34].mxu1  ;;  %v11335_v18 = vld [vmem:[%s11933_s24 + $0x30] sm:$0xff]  }
 0xc63   : > { %v10408_v20 = vpop.f32.mrb[35].mxu1  ;;  %10414 = vmatmul.mubr.msk.bf16.vlgmr.msra.gmra.mrb[36].mxu1 %vm1849_vm1, %v2968_v17 }
 0xc64   : > { %10418 = vmatpush3.bf16.msra.mxu1 %v11315_v16  ;;  %10433 = vmatprep.mubr.msk.bf16.mxu1 %vm11863_vm0, %v11862_v2  ;;  %v11336_v20 = vld [vmem:[%s11933_s24 + $0x38] sm:$0xff]  }
 0xc65   : > { %10419 = vmatprep.subr.bf16.mxu1 %v11862_v2 }
 0xc68   : > { %10420 = vmatpush3.bf16.msra.mxu1 %v11317_v22 }
 0xc69   : > { %10421 = vmatprep.subr.bf16.mxu1 %v11862_v2 }
 0xc6c   : > { %10422 = vmatpush3.bf16.msra.mxu1 %v11319_v24 }
 0xc6d   : > { %10423 = vmatprep.subr.bf16.mxu1 %v11862_v2 }
 0xc70   : > { %10424 = vmatpush3.bf16.msra.mxu1 %v11321_v25 }
 0xc71   : > { %10425 = vmatprep.subr.bf16.mxu1 %v11862_v2 }
 0xc74   : > { %10426 = vmatpush3.bf16.msra.mxu1 %v11323_v26 }
 0xc75   : > { %10427 = vmatprep.subr.bf16.mxu1 %v11862_v2 }
 0xc78   : > { %10428 = vmatpush3.bf16.msra.mxu1 %v11324_v27 }
 0xc79   : > { %10429 = vmatprep.subr.bf16.mxu1 %v11862_v2 }
 0xc7c   : > { %10430 = vmatpush3.bf16.msra.mxu1 %v11325_v28 }
 0xc7d   : > { %10431 = vmatprep.subr.bf16.mxu1 %v11862_v2 }
 0xc80   : > { %10432 = vmatpush3.bf16.msra.mxu1 %v11326_v29 }
 0xc81   : > { %10457 = vmatprep.subr.bf16.mxu1 %v11862_v2 }
 0xc83   : > { %10434 = vmatmul.mubr.bf16.vlgmr.msra.gmra.mrb[40].mxu1 %v12218_v34 }
 0xc84   : > { %10473 = vmatprep.mubr.msk.bf16.mxu1 %vm11863_vm0, %v11862_v2 }
 0xd36   : > { %v3023_v40 = vpop.f32.mrb[36].mxu1 }
 0xd37   : > { %v12475_v34 = vadd.f32 %v3023_v40, %v12393_v23  ;;  %v10415_v41 = vpop.f32.mrb[37].mxu1  ;;  %v11327_v23 = vld [vmem:[%s13470_s14 + $0xc0] sm:$0xff]   ;;  %v11339_v40 = vld [vmem:[%s11953_s20 + $0x8] sm:$0xff]  }
 0xd38   : > { %v3026_v42 = vpop.f32.mrb[38].mxu1  ;;  %10458 = vmatpush3.bf16.msra.mxu1 %v11327_v23  ;;  %v11340_v41 = vld [vmem:[%s13479_s5 + $0x8] sm:$0xff]  }
 0xd39   : > { %v10416_v43 = vpop.f32.mrb[39].mxu1  ;;  %10459 = vmatprep.subr.bf16.mxu1 %v11862_v2  ;;  %v11347_v23 = vld [vmem:[%s11953_s20 + $0x28] sm:$0xff]  }
 0xd3c   : > { %10460 = vmatpush3.bf16.msra.mxu1 %v11328_v51  ;;  %v11348_v51 = vld [vmem:[%s13479_s5 + $0x28] sm:$0xff]  }
 0xd3d   : > { %10461 = vmatprep.subr.bf16.mxu1 %v11862_v2 }
 0xd40   : > { %10462 = vmatpush3.bf16.msra.mxu1 %v11329_v52  ;;  %v11349_v52 = vld [vmem:[%s11953_s20 + $0x30] sm:$0xff]  }
 0xd41   : > { %10463 = vmatprep.subr.bf16.mxu1 %v11862_v2 }
 0xd44   : > { %10464 = vmatpush3.bf16.msra.mxu1 %v11330_v53  ;;  %v11350_v53 = vld [vmem:[%s13479_s5 + $0x30] sm:$0xff]  }
 0xd45   : > { %10465 = vmatprep.subr.bf16.mxu1 %v11862_v2 }
 0xd48   : > { %10466 = vmatpush3.bf16.msra.mxu1 %v11331_v54  ;;  %v11351_v54 = vld [vmem:[%s11953_s20 + $0x38] sm:$0xff]  }
 0xd49   : > { %10467 = vmatprep.subr.bf16.mxu1 %v11862_v2 }
 0xd4c   : > { %10468 = vmatpush3.bf16.msra.mxu1 %v11332_v55  ;;  %v11352_v55 = vld [vmem:[%s13479_s5 + $0x38] sm:$0xff]  }
 0xd4d   : > { %10469 = vmatprep.subr.bf16.mxu1 %v11862_v2 }
 0xd50   : > { %10470 = vmatpush3.bf16.msra.mxu1 %v11333_v56 }
 0xd51   : > { %10471 = vmatprep.subr.bf16.mxu1 %v11862_v2 }
 0xd54   : > { %10472 = vmatpush3.bf16.msra.mxu1 %v11334_v57 }
 0xd55   : > { %10517 = vmatprep.subr.bf16.mxu1 %v11862_v2 }
 0xd56   : > { %v3137_v45 = vpop.f32.mrb[40].mxu1 }
 0xd57   : > { %v3138_v46 = vadd.f32 %v8983_v44, %v3137_v45  ;;  %v10435_v47 = vpop.f32.mrb[41].mxu1  ;;  %10474 = vmatmul.mubr.bf16.vlgmr.msra.gmra.mrb[44].mxu1 %v12201_v21 }
 0xd58   : > { %v3140_v48 = vpop.f32.mrb[42].mxu1  ;;  %10533 = vmatprep.mubr.msk.bf16.mxu1 %vm11863_vm0, %v11862_v2  ;;  %10518 = vmatpush3.bf16.msra.mxu1 %v11338_v39  ;;  %v11343_v47 = vld [vmem:[%s11953_s20 + $0x18] sm:$0xff]  }
 0xd59   : > { %v3143_v49 = vpack.c.bf16 %v3138_v46, %v3138_v46  ;;  %v10436_v50 = vpop.f32.mrb[43].mxu1  ;;  %10519 = vmatprep.subr.bf16.mxu1 %v11862_v2  ;;  %v11342_v46 = vld [vmem:[%s13479_s5 + $0x10] sm:$0xff]   ;;  %v11344_v48 = vld [vmem:[%s13479_s5 + $0x18] sm:$0xff]  }
 0xd5a   : > { %v11346_v50 = vld [vmem:[%s13479_s5 + $0x20] sm:$0xff]  }
 0xd5b   : > { %10480 = vmatmul.mubr.msk.bf16.vlgmr.msra.gmra.mrb[36].mxu0 %vm1849_vm1, %v3143_v49  ;;  %v11345_v49 = vld [vmem:[%s11953_s20 + $0x20] sm:$0xff]  }
 0xd5c   : > { %10485 = vmatprep.mubr.msk.bf16.mxu0 %vm11863_vm0, %v11862_v2  ;;  %10520 = vmatpush3.bf16.msra.mxu1 %v11340_v41 }
 0xd5d   : > { %10521 = vmatprep.subr.bf16.mxu1 %v11862_v2 }
 0xd60   : > { %10522 = vmatpush3.bf16.msra.mxu1 %v11342_v46 }
 0xd61   : > { %10523 = vmatprep.subr.bf16.mxu1 %v11862_v2 }
 0xd64   : > { %10524 = vmatpush3.bf16.msra.mxu1 %v11344_v48 }
 0xd65   : > { %10525 = vmatprep.subr.bf16.mxu1 %v11862_v2 }
 0xd68   : > { %10526 = vmatpush3.bf16.msra.mxu1 %v11346_v50 }
 0xd69   : > { %10527 = vmatprep.subr.bf16.mxu1 %v11862_v2 }
 0xd6c   : > { %10528 = vmatpush3.bf16.msra.mxu1 %v11348_v51 }
 0xd6d   : > { %10529 = vmatprep.subr.bf16.mxu1 %v11862_v2 }
 0xd70   : > { %10530 = vmatpush3.bf16.msra.mxu1 %v11350_v53 }
 0xd71   : > { %10531 = vmatprep.subr.bf16.mxu1 %v11862_v2 }
 0xd74   : > { %10532 = vmatpush3.bf16.msra.mxu1 %v11352_v55 }
 0xd75   : > { %10557 = vmatprep.subr.bf16.mxu1 %v11862_v2 }
 0xe2a   : > { %v3366_v1 = vpop.f32.mrb[44].mxu1 }
 0xe2b   : > { %v10475_v3 = vpop.f32.mrb[45].mxu1  ;;  %v3367_v9 = vadd.f32 %v9035_v8, %v3366_v1  ;;  %v11353_v1 = vld [vmem:[%s13482_s1] sm:$0xff]  }
 0xe2c   : > { %v3369_v10 = vpop.f32.mrb[46].mxu1 }
 0xe2d   : > { %v10476_v11 = vpop.f32.mrb[47].mxu1  ;;  %v3370_v13 = vadd.f32 %v9035_v8, %v3369_v10  ;;  %v11359_v8 = vld [vmem:[%s13482_s1 + $0x30] sm:$0xff]   ;;  %v11361_v10 = vld [vmem:[%s13479_s5 + $0x40] sm:$0xff]  }
 0xe2e   : > { %v3414_v58 = vpop.f32.mrb[36].mxu0  ;;  %v11362_v11 = vld [vmem:[%s13479_s5 + $0x48] sm:$0xff]  }
 0xe2f   : > { %v3420_v59 = vmul.f32 0.17677669, %v3414_v58  ;;  %v10481_v60 = vpop.f32.mrb[37].mxu0  ;;  %v3373_v14 = vpack.c.bf16 %v3370_v13, %v3367_v9  ;;  %v11360_v9 = vld [vmem:[%s13482_s1 + $0x38] sm:$0xff]   ;;  %v11363_v13 = vld [vmem:[%s13479_s5 + $0x50] sm:$0xff]  }
 0xe30   : > { %v3417_v61 = vpop.f32.mrb[38].mxu0  ;;  %v9054_v60 = vld [vmem:[%s13480_s11] ss:$0 sm:$0xff]  ;;  %s13483_s11 = sld [smem:[#allocation19_spill]] }
 0xe31   : > { %v10482_v62 = vpop.f32.mrb[39].mxu0  ;;  %v3421_v63 = vadd.f32 %v3420_v59, %v12253_v12  ;;  %10484 = vmatpush3.bf16.msra.mxu0 %v3373_v14  ;;  %v11364_v14 = vld [vmem:[%s13479_s5 + $0x58] sm:$0xff]  }
 0xe32   : > { %10489 = vmatprep.subr.bf16.mxu0 %v11862_v2  ;;  %v9055_v62 = vld [vmem:[%s13481_s28] ss:$0 sm:$0xff]  ;;  %s13484_s28 = sld [smem:[#allocation17_spill]] }
 0xe33   : > { %v3422_v0 = vsel %vm1428_vm2, %v3421_v63, -inf }
 0xe34   : > { %3423 = vmax.xlane.f32.xlu0 %v3422_v0 }
 0xec1   : > { %v3424_v4 = vpop.xlane.xlu0 %3423 }
 0xec2   : > { %v3425_v5 = vsub.f32 %v3421_v63, %v3424_v4  ;;  %v11354_v4 = vld [vmem:[%s13482_s1 + $0x8] sm:$0xff]  }
 0xec4   : > { %v3426_v6 = vmul.f32 1.442695, %v3425_v5  ;;  %v11355_v5 = vld [vmem:[%s13482_s1 + $0x10] sm:$0xff]  }
 0xec6   : > { %11639 = vpow2.f32 %v3426_v6  ;;  %v11356_v6 = vld [vmem:[%s13482_s1 + $0x18] sm:$0xff]  }
 0xed0   : > { %v11640_v21 = vpop.eup %11639 }
 0xed1   : > { %v3428_v7 = vsel %vm1428_vm2, %v11640_v21, 0.0 }
 0xed2   : > { %3429 = vadd.xlane.f32.xlu1 %v3428_v7  ;;  %v11358_v7 = vld [vmem:[%s13482_s1 + $0x28] sm:$0xff]  }
 0xf5f   : > { %v3430_v15 = vpop.xlane.xlu1 %3429 }
 0xf60   : > { %11641 = vrcp.f32 %v3430_v15  ;;  %v11365_v15 = vld [vmem:[%s13479_s5 + $0x60] sm:$0xff]  }
 0xf6a   : > { %v11642_v16 = vpop.eup %11641 }
 0xf6b   : > { %v3432_v17 = vmul.f32 %v11642_v16, %v11640_v21  ;;  %v11357_v21 = vld [vmem:[%s13482_s1 + $0x20] sm:$0xff]   ;;  %v11366_v16 = vld [vmem:[%s13479_s5 + $0x68] sm:$0xff]  }
 0xf6d   : > { %v3433_v19 = vpack.c.bf16 %v3432_v17, %v3432_v17  ;;  %v11367_v17 = vld [vmem:[%s13479_s5 + $0x70] sm:$0xff]  }
 0xf6f   : > { %10486 = vmatmul.mubr.msk.bf16.vlgmr.msra.gmra.mrb[40].mxu0 %vm1428_vm2, %v3433_v19  ;;  %v9065_v19 = vld [vmem:[%s13483_s11] ss:$0 sm:$0xff] }
 0xf70   : > { %10490 = vmatpush3.bf16.msra.mxu0 %v11335_v18  ;;  %10493 = vmatprep.mubr.msk.bf16.mxu0 %vm11863_vm0, %v11862_v2  ;;  %v11368_v18 = vld [vmem:[%s13479_s5 + $0x78] sm:$0xff]  }
 0xf71   : > { %10491 = vmatprep.subr.bf16.mxu0 %v11862_v2 }
 0xf74   : > { %10492 = vmatpush3.bf16.msra.mxu0 %v11336_v20 }
 0xf75   : > { %10497 = vmatprep.subr.bf16.mxu0 %v11862_v2 }
0x1042   : > { %v3471_v22 = vpop.f32.mrb[40].mxu0 }
0x1043   : > { %v3477_v24 = vpack.c.bf16 %v3471_v22, %v3471_v22  ;;  %v10487_v25 = vpop.f32.mrb[41].mxu0 }
0x1044   : > { %v3474_v26 = vpop.f32.mrb[42].mxu0 }
0x1045   : > { %v10488_v27 = vpop.f32.mrb[43].mxu0  ;;  %10494 = vmatmul.mubr.msk.bf16.vlgmr.msra.gmra.mrb[44].mxu0 %vm1849_vm1, %v3477_v24 }
0x1046   : > { %10513 = vmatprep.mubr.msk.bf16.mxu0 %vm11863_vm0, %v11862_v2  ;;  %10498 = vmatpush3.bf16.msra.mxu0 %v11337_v38  ;;  %v9074_v38 = vld [vmem:[%s13485_s3] ss:$0 sm:$0xff] }
0x1047   : > { %10499 = vmatprep.subr.bf16.mxu0 %v11862_v2 }
0x104a   : > { %10500 = vmatpush3.bf16.msra.mxu0 %v11339_v40 }
0x104b   : > { %10501 = vmatprep.subr.bf16.mxu0 %v11862_v2 }
0x1118   : > { %v3532_v28 = vpop.f32.mrb[44].mxu0 }
0x1119   : > { %v3538_v29 = vadd.f32 %v3532_v28, %v12475_v34  ;;  %v10495_v31 = vpop.f32.mrb[45].mxu0  ;;  %v11341_v34 = vld [vmem:[%s11953_s20 + $0x10] sm:$0xff]  }
0x111a   : > { %v3535_v32 = vpop.f32.mrb[46].mxu0  ;;  %10502 = vmatpush3.bf16.msra.mxu0 %v11341_v34 }
0x111b   : > { %v3539_v30 = vadd.f32 %v11715_v35, %v3538_v29  ;;  %v10496_v36 = vpop.f32.mrb[47].mxu0  ;;  %10503 = vmatprep.subr.bf16.mxu0 %v11862_v2 }
0x111d   : > { %v12518_v37 = vadd.f32 %v9053_v33, %v3539_v30  ;;  %v9056_v33 = vld [vmem:[%s13484_s28] ss:$0 sm:$0xff] }
0x111e   : > { %10504 = vmatpush3.bf16.msra.mxu0 %v11343_v47 }
0x111f   : > { %3550 = vadd.xlane.f32.xlu0 %v12518_v37  ;;  %10505 = vmatprep.subr.bf16.mxu0 %v11862_v2 }
0x1122   : > { %10506 = vmatpush3.bf16.msra.mxu0 %v11345_v49 }
0x1123   : > { %10507 = vmatprep.subr.bf16.mxu0 %v11862_v2 }
0x1126   : > { %10508 = vmatpush3.bf16.msra.mxu0 %v11347_v23 }
0x1127   : > { %10509 = vmatprep.subr.bf16.mxu0 %v11862_v2 }
0x112a   : > { %10510 = vmatpush3.bf16.msra.mxu0 %v11349_v52 }
0x112b   : > { %10511 = vmatprep.subr.bf16.mxu0 %v11862_v2 }
0x112e   : > { %10512 = vmatpush3.bf16.msra.mxu0 %v11351_v54 }
0x112f   : > { %10537 = vmatprep.subr.bf16.mxu0 %v11862_v2 }
0x11ac   : > { %v3551_v42 = vpop.xlane.xlu0 %3550 }
0x11ad   : > { %v3552_v43 = vmul.f32 0.0078125, %v3551_v42 }
0x11af   : > { %v3553_v44 = vsub.f32 %v12518_v37, %v3552_v43 }
0x11b1   : > { %v3554_v45 = vmul.f32 %v3553_v44, %v3553_v44 }
0x11b3   : > { %3555 = vadd.xlane.f32.xlu1 %v3554_v45  ;;  %v9128_v45 = vld [vmem:[%s13483_s11 + $0x1] ss:$0 sm:$0xff] }
0x1240   : > { %v3556_v56 = vpop.xlane.xlu1 %3555 }
0x1241   : > { %v3557_v57 = vmul.f32 0.0078125, %v3556_v56 }
0x1243   : > { %v3558_v58 = vadd.f32 1e-05, %v3557_v57 }
0x1245   : > { %11643 = vrsqrt.f32 %v3558_v58 }
0x124f   : > { %v11644_v59 = vpop.eup %11643 }
0x1250   : > { %v3560_v61 = vmul.f32 %v11644_v59, %v3553_v44 }
0x1252   : > { %v3567_v63 = vmul.f32 %v9054_v60, %v3560_v61 }
0x1254   : > { %v3574_v0 = vadd.f32 %v9055_v62, %v3567_v63 }
0x1256   : > { %v12557_v3 = vpack.c.bf16 %v3574_v0, %v3574_v0 }
0x1258   : > { %10514 = vmatmul.mubr.bf16.vlgmr.msra.gmra.mrb[48].mxu0 %v12557_v3  ;;  %10534 = vmatmul.mubr.bf16.vlgmr.msra.gmra.mrb[48].mxu1 %v12557_v3 }
0x1259   : > { %10538 = vmatpush3.bf16.msra.mxu0 %v11353_v1  ;;  %10553 = vmatprep.mubr.msk.bf16.mxu0 %vm11863_vm0, %v11862_v2 }
0x125a   : > { %10539 = vmatprep.subr.bf16.mxu0 %v11862_v2  ;;  %10559 = vmatprep.mubr.msk.bf16.mxu1 %vm11863_vm0, %v11862_v2 }
0x125d   : > { %10540 = vmatpush3.bf16.msra.mxu0 %v11354_v4  ;;  %v11369_v4 = vld [vmem:[%s11953_s20 + $0x40] sm:$0xff]  }
0x125e   : > { %10541 = vmatprep.subr.bf16.mxu0 %v11862_v2 }
0x1261   : > { %10542 = vmatpush3.bf16.msra.mxu0 %v11355_v5 }
0x1262   : > { %10543 = vmatprep.subr.bf16.mxu0 %v11862_v2 }
0x1265   : > { %10544 = vmatpush3.bf16.msra.mxu0 %v11356_v6  ;;  %v11370_v6 = vld [vmem:[%s11953_s20 + $0x48] sm:$0xff]  }
0x1266   : > { %10545 = vmatprep.subr.bf16.mxu0 %v11862_v2 }
0x1269   : > { %10546 = vmatpush3.bf16.msra.mxu0 %v11357_v21  ;;  %v11371_v21 = vld [vmem:[%s11953_s20 + $0x50] sm:$0xff]  }
0x126a   : > { %10547 = vmatprep.subr.bf16.mxu0 %v11862_v2 }
0x126d   : > { %10548 = vmatpush3.bf16.msra.mxu0 %v11358_v7  ;;  %v11372_v7 = vld [vmem:[%s11953_s20 + $0x58] sm:$0xff]  }
0x126e   : > { %10549 = vmatprep.subr.bf16.mxu0 %v11862_v2 }
0x1271   : > { %10550 = vmatpush3.bf16.msra.mxu0 %v11359_v8  ;;  %v11373_v8 = vld [vmem:[%s11953_s20 + $0x60] sm:$0xff]  }
0x1272   : > { %10551 = vmatprep.subr.bf16.mxu0 %v11862_v2 }
0x1275   : > { %10552 = vmatpush3.bf16.msra.mxu0 %v11360_v9  ;;  %v11374_v9 = vld [vmem:[%s11953_s20 + $0x68] sm:$0xff]  }
0x1276   : > { %10589 = vmatprep.subr.bf16.mxu0 %v11862_v2 }
0x1278   : > { %10554 = vmatmul.mubr.bf16.vlgmr.msra.gmra.mrb[52].mxu0 %v12557_v3 }
0x1279   : > { %10590 = vmatpush3.bf16.msra.mxu0 %v11361_v10  ;;  %10605 = vmatprep.mubr.msk.bf16.mxu0 %vm11863_vm0, %v11862_v2  ;;  %v11375_v10 = vld [vmem:[%s11953_s20 + $0x70] sm:$0xff]  }
0x127a   : > { %10591 = vmatprep.subr.bf16.mxu0 %v11862_v2 }
0x127d   : > { %10592 = vmatpush3.bf16.msra.mxu0 %v11362_v11  ;;  %v11376_v11 = vld [vmem:[%s11953_s20 + $0x78] sm:$0xff]  }
0x127e   : > { %10593 = vmatprep.subr.bf16.mxu0 %v11862_v2 }
0x1281   : > { %10594 = vmatpush3.bf16.msra.mxu0 %v11363_v13  ;;  %v11377_v13 = vld [vmem:[%s13482_s1 + $0x40] sm:$0xff]  }
0x1282   : > { %10595 = vmatprep.subr.bf16.mxu0 %v11862_v2 }
0x1285   : > { %10596 = vmatpush3.bf16.msra.mxu0 %v11364_v14  ;;  %v11378_v14 = vld [vmem:[%s13482_s1 + $0x48] sm:$0xff]  }
0x1286   : > { %10597 = vmatprep.subr.bf16.mxu0 %v11862_v2 }
0x1289   : > { %10598 = vmatpush3.bf16.msra.mxu0 %v11365_v15  ;;  %v11379_v15 = vld [vmem:[%s13482_s1 + $0x50] sm:$0xff]  }
0x128a   : > { %10599 = vmatprep.subr.bf16.mxu0 %v11862_v2 }
0x128d   : > { %10600 = vmatpush3.bf16.msra.mxu0 %v11366_v16  ;;  %v11380_v16 = vld [vmem:[%s13482_s1 + $0x58] sm:$0xff]  }
0x128e   : > { %10601 = vmatprep.subr.bf16.mxu0 %v11862_v2 }
0x1291   : > { %10602 = vmatpush3.bf16.msra.mxu0 %v11367_v17  ;;  %v11381_v17 = vld [vmem:[%s13482_s1 + $0x60] sm:$0xff]  }
0x1292   : > { %10603 = vmatprep.subr.bf16.mxu0 %v11862_v2 }
0x1295   : > { %10604 = vmatpush3.bf16.msra.mxu0 %v11368_v18  ;;  %v11382_v18 = vld [vmem:[%s13482_s1 + $0x68] sm:$0xff]  }
0x1296   : > { %10629 = vmatprep.subr.bf16.mxu0 %v11862_v2 }
0x1298   : > { %10606 = vmatmul.mubr.bf16.vlgmr.msra.gmra.mrb[56].mxu0 %v12557_v3 }
0x1299   : > { %10631 = vmatprep.mubr.msk.bf16.mxu0 %vm11863_vm0, %v11862_v2 }
0x132b   : > { %v3681_v20 = vpop.f32.mrb[48].mxu0  ;;  %v3793_v22 = vpop.f32.mrb[48].mxu1 }
0x132c   : > { %v3794_v24 = vadd.f32 %v9065_v19, %v3793_v22  ;;  %v10515_v25 = vpop.f32.mrb[49].mxu0  ;;  %v10535_v26 = vpop.f32.mrb[49].mxu1  ;;  %v3682_v30 = vadd.f32 %v9056_v33, %v3681_v20  ;;  %v11383_v19 = vld [vmem:[%s13482_s1 + $0x70] sm:$0xff]   ;;  %v11384_v20 = vld [vmem:[%s13482_s1 + $0x78] sm:$0xff]   ;;  %v11385_v22 = vld [vmem:[%s13486_s8] sm:$0xff]  }
0x132d   : > { %v3684_v27 = vpop.f32.mrb[50].mxu0  ;;  %v3796_v28 = vpop.f32.mrb[50].mxu1  ;;  %v11387_v26 = vld [vmem:[%s13479_s5 + $0x80] sm:$0xff]   ;;  %v11389_v33 = vld [vmem:[%s13479_s5 + $0x90] sm:$0xff]  }
0x132e   : > { %v3799_v29 = vpack.c.bf16 %v3794_v24, %v3794_v24  ;;  %v10516_v31 = vpop.f32.mrb[51].mxu0  ;;  %v10536_v32 = vpop.f32.mrb[51].mxu1  ;;  %v3687_v36 = vpack.c.bf16 %v3682_v30, %v3682_v30  ;;  %v11386_v24 = vld [vmem:[%s13486_s8 + $0x8] sm:$0xff]   ;;  %v11391_v30 = vld [vmem:[%s13479_s5 + $0xa0] sm:$0xff]  }
0x132f   : > { %v11388_v32 = vld [vmem:[%s13479_s5 + $0x88] sm:$0xff]  }
0x1330   : > { %v3916_v35 = vsel %vm1849_vm1, %v3799_v29, 0 }
0x1331   : > { %10558 = vmatpush3.bf16.xpose.msra.mxu1 %v3916_v35  ;;  %v11390_v35 = vld [vmem:[%s13479_s5 + $0x98] sm:$0xff]  }
0x1332   : > { %10563 = vmatprep.subr.bf16.mxu1 %v11862_v2 }
0x1338   : > { %10560 = vmatmul.mubr.msk.bf16.vlgmr.msra.gmra.mrb[52].mxu1 %vm1849_vm1, %v3687_v36  ;;  %v11392_v36 = vld [vmem:[%s13479_s5 + $0xa8] sm:$0xff]  }
0x1339   : > { %10565 = vmatprep.mubr.msk.bf16.mxu1 %vm11863_vm0, %v11862_v2 }
0x134b   : > { %v3905_v39 = vpop.f32.mrb[52].mxu0 }
0x134c   : > { %v3906_v40 = vadd.f32 %v9074_v38, %v3905_v39  ;;  %v10555_v41 = vpop.f32.mrb[53].mxu0  ;;  %v11393_v38 = vld [vmem:[%s13479_s5 + $0xb0] sm:$0xff]   ;;  %v11394_v39 = vld [vmem:[%s13479_s5 + $0xb8] sm:$0xff]  }
0x134d   : > { %v3908_v34 = vpop.f32.mrb[54].mxu0 }
0x134e   : > { %v3911_v42 = vpack.c.bf16 %v3906_v40, %v3906_v40  ;;  %v10556_v43 = vpop.f32.mrb[55].mxu0  ;;  %v9102_v40 = vld [vmem:[%s13484_s28 + $0x1] ss:$0 sm:$0xff] }
0x1350   : > { %v3977_v44 = vsel %vm3975_vm8, %v3911_v42, 0 }
0x1351   : > { %10564 = vmatpush3.bf16.msra.mxu1 %v3977_v44 }
0x1352   : > { %10569 = vmatprep.subr.bf16.mxu1 %v11862_v2 }
0x136b   : > { %v4245_v46 = vpop.f32.mrb[56].mxu0 }
0x136c   : > { %v4246_v47 = vadd.f32 %v9128_v45, %v4245_v46  ;;  %v10607_v48 = vpop.f32.mrb[57].mxu0  ;;  %v9154_v46 = vld [vmem:[%s13485_s3 + $0x1] ss:$0 sm:$0xff] }
0x136d   : > { %v4248_v49 = vpop.f32.mrb[58].mxu0 }
0x136e   : > { %v4251_v50 = vpack.c.bf16 %v4246_v47, %v4246_v47  ;;  %v10608_v23 = vpop.f32.mrb[59].mxu0 }
0x1370   : > { %v4370_v51 = vsel %vm1849_vm1, %v4251_v50, 0 }
0x1371   : > { %10630 = vmatpush3.bf16.xpose.msra.mxu0 %v4370_v51 }
0x1372   : > { %10635 = vmatprep.subr.bf16.mxu0 %v11862_v2 }
0x140b   : > { %v3952_v52 = vpop.f32.mrb[52].mxu1 }
0x140c   : > { %v3958_v53 = vmul.f32 0.17677669, %v3952_v52  ;;  %v10561_v54 = vpop.f32.mrb[53].mxu1 }
0x140d   : > { %v3955_v55 = vpop.f32.mrb[54].mxu1 }
0x140e   : > { %v10562_v56 = vpop.f32.mrb[55].mxu1  ;;  %v3960_v57 = vsel %vm3959_vm9, %v3958_v53, -inf }
0x140f   : > { %3961 = vmax.xlane.f32.xlu0 %v3960_v57  ;;  %v9218_v57 = vld [vmem:[%s13483_s11 + $0x2] ss:$0 sm:$0xff] }
0x149c   : > { %v3962_v58 = vpop.xlane.xlu0 %3961 }
0x149d   : > { %v3963_v59 = vsub.f32 %v3958_v53, %v3962_v58 }
0x149f   : > { %v3964_v60 = vmul.f32 1.442695, %v3963_v59 }
0x14a1   : > { %11645 = vpow2.f32 %v3964_v60 }
0x14ab   : > { %v11646_v61 = vpop.eup %11645 }
0x14ac   : > { %v3966_v62 = vsel %vm3959_vm9, %v11646_v61, 0.0 }
0x14ad   : > { %3967 = vadd.xlane.f32.xlu1 %v3966_v62 }
0x153a   : > { %v3968_v63 = vpop.xlane.xlu1 %3967 }
0x153b   : > { %11647 = vrcp.f32 %v3968_v63 }
0x1545   : > { %v11648_v0 = vpop.eup %11647 }
0x1546   : > { %v3970_v1 = vmul.f32 %v11648_v0, %v11646_v61 }
0x1548   : > { %v3971_v5 = vpack.c.bf16 %v3970_v1, %v3970_v1 }
0x154a   : > { %10566 = vmatmul.mubr.msk.bf16.vlgmr.msra.gmra.mrb[56].mxu1 %vm3959_vm9, %v3971_v5 }
0x154b   : > { %10570 = vmatpush3.bf16.msra.mxu1 %v11369_v4  ;;  %10585 = vmatprep.mubr.msk.bf16.mxu1 %vm11863_vm0, %v11862_v2 }
0x154c   : > { %10571 = vmatprep.subr.bf16.mxu1 %v11862_v2 }
0x154f   : > { %10572 = vmatpush3.bf16.msra.mxu1 %v11370_v6 }
0x1550   : > { %10573 = vmatprep.subr.bf16.mxu1 %v11862_v2 }
0x1553   : > { %10574 = vmatpush3.bf16.msra.mxu1 %v11371_v21 }
0x1554   : > { %10575 = vmatprep.subr.bf16.mxu1 %v11862_v2 }
0x1557   : > { %10576 = vmatpush3.bf16.msra.mxu1 %v11372_v7 }
0x1558   : > { %10577 = vmatprep.subr.bf16.mxu1 %v11862_v2 }
0x155b   : > { %10578 = vmatpush3.bf16.msra.mxu1 %v11373_v8 }
0x155c   : > { %10579 = vmatprep.subr.bf16.mxu1 %v11862_v2 }
0x155f   : > { %10580 = vmatpush3.bf16.msra.mxu1 %v11374_v9 }
0x1560   : > { %10581 = vmatprep.subr.bf16.mxu1 %v11862_v2 }
0x1563   : > { %10582 = vmatpush3.bf16.msra.mxu1 %v11375_v10 }
0x1564   : > { %10583 = vmatprep.subr.bf16.mxu1 %v11862_v2 }
0x1567   : > { %10584 = vmatpush3.bf16.msra.mxu1 %v11376_v11 }
0x1568   : > { %10609 = vmatprep.subr.bf16.mxu1 %v11862_v2 }
0x156a   : > { %10586 = vmatmul.mubr.bf16.vlgmr.msra.gmra.mrb[60].mxu1 %v12557_v3 }
0x156b   : > { %10610 = vmatpush3.bf16.msra.mxu1 %v11377_v13  ;;  %10625 = vmatprep.mubr.msk.bf16.mxu1 %vm11863_vm0, %v11862_v2 }
0x156c   : > { %10611 = vmatprep.subr.bf16.mxu1 %v11862_v2 }
0x156f   : > { %10612 = vmatpush3.bf16.msra.mxu1 %v11378_v14 }
0x1570   : > { %10613 = vmatprep.subr.bf16.mxu1 %v11862_v2 }
0x1573   : > { %10614 = vmatpush3.bf16.msra.mxu1 %v11379_v15 }
0x1574   : > { %10615 = vmatprep.subr.bf16.mxu1 %v11862_v2 }
0x1577   : > { %10616 = vmatpush3.bf16.msra.mxu1 %v11380_v16 }
0x1578   : > { %10617 = vmatprep.subr.bf16.mxu1 %v11862_v2 }
0x157b   : > { %10618 = vmatpush3.bf16.msra.mxu1 %v11381_v17  ;;  %v11395_v17 = vld [vmem:[%s13486_s8 + $0x10] sm:$0xff]  }
0x157c   : > { %10619 = vmatprep.subr.bf16.mxu1 %v11862_v2 }
0x157f   : > { %10620 = vmatpush3.bf16.msra.mxu1 %v11382_v18 }
0x1580   : > { %10621 = vmatprep.subr.bf16.mxu1 %v11862_v2 }
0x1583   : > { %10622 = vmatpush3.bf16.msra.mxu1 %v11383_v19  ;;  %v11396_v19 = vld [vmem:[%s13486_s8 + $0x18] sm:$0xff]  }
0x1584   : > { %10623 = vmatprep.subr.bf16.mxu1 %v11862_v2 }
0x1587   : > { %10624 = vmatpush3.bf16.msra.mxu1 %v11384_v20 }
0x1588   : > { %10649 = vmatprep.subr.bf16.mxu1 %v11862_v2 }
0x158a   : > { %10626 = vmatmul.mubr.bf16.vlgmr.msra.gmra.mrb[64].mxu1 %v12557_v3 }
0x158b   : > { %10650 = vmatpush3.bf16.msra.mxu1 %v11385_v22  ;;  %10653 = vmatprep.mubr.msk.bf16.mxu1 %vm11863_vm0, %v11862_v2  ;;  %v11397_v22 = vld [vmem:[%s11953_s20 + $0x80] sm:$0xff]  }
0x158c   : > { %10651 = vmatprep.subr.bf16.mxu1 %v11862_v2 }
0x158f   : > { %10652 = vmatpush3.bf16.msra.mxu1 %v11386_v24 }
0x1590   : > { %10677 = vmatprep.subr.bf16.mxu1 %v11862_v2 }
0x161d   : > { %v4013_v25 = vpop.f32.mrb[56].mxu1 }
0x161e   : > { %v4019_v27 = vpack.c.bf16 %v4013_v25, %v4013_v25  ;;  %v10567_v28 = vpop.f32.mrb[57].mxu1 }
0x161f   : > { %v4016_v29 = vpop.f32.mrb[58].mxu1  ;;  %v11398_v28 = vld [vmem:[%s11953_s20 + $0x88] sm:$0xff]  }
0x1620   : > { %v10568_v31 = vpop.f32.mrb[59].mxu1  ;;  %10654 = vmatmul.mubr.msk.bf16.vlgmr.msra.gmra.mrb[68].mxu1 %vm1849_vm1, %v4019_v27  ;;  %v11399_v29 = vld [vmem:[%s11953_s20 + $0x90] sm:$0xff]  }
0x1621   : > { %10678 = vmatpush3.bf16.msra.mxu1 %v11387_v26  ;;  %10693 = vmatprep.mubr.msk.bf16.mxu1 %vm11863_vm0, %v11862_v2  ;;  %v11400_v31 = vld [vmem:[%s11953_s20 + $0x98] sm:$0xff]  }
0x1622   : > { %10679 = vmatprep.subr.bf16.mxu1 %v11862_v2 }
0x1625   : > { %10680 = vmatpush3.bf16.msra.mxu1 %v11388_v32  ;;  %v11401_v32 = vld [vmem:[%s11953_s20 + $0xa0] sm:$0xff]  }
0x1626   : > { %10681 = vmatprep.subr.bf16.mxu1 %v11862_v2 }
0x1629   : > { %10682 = vmatpush3.bf16.msra.mxu1 %v11389_v33  ;;  %v11402_v33 = vld [vmem:[%s11953_s20 + $0xa8] sm:$0xff]  }
0x162a   : > { %10683 = vmatprep.subr.bf16.mxu1 %v11862_v2 }
0x162d   : > { %10684 = vmatpush3.bf16.msra.mxu1 %v11390_v35  ;;  %v11403_v35 = vld [vmem:[%s11953_s20 + $0xb0] sm:$0xff]  }
0x162e   : > { %10685 = vmatprep.subr.bf16.mxu1 %v11862_v2 }
0x1631   : > { %10686 = vmatpush3.bf16.msra.mxu1 %v11391_v30  ;;  %v11404_v30 = vld [vmem:[%s11953_s20 + $0xb8] sm:$0xff]  }
0x1632   : > { %10687 = vmatprep.subr.bf16.mxu1 %v11862_v2 }
0x1635   : > { %10688 = vmatpush3.bf16.msra.mxu1 %v11392_v36  ;;  %v11405_v36 = vld [vmem:[%s13482_s1 + $0x80] sm:$0xff]  }
0x1636   : > { %10689 = vmatprep.subr.bf16.mxu1 %v11862_v2 }
0x1639   : > { %10690 = vmatpush3.bf16.msra.mxu1 %v11393_v38  ;;  %v11406_v38 = vld [vmem:[%s13482_s1 + $0x88] sm:$0xff]  }
0x163a   : > { %10691 = vmatprep.subr.bf16.mxu1 %v11862_v2 }
0x163d   : > { %v4131_v41 = vpop.f32.mrb[60].mxu1  ;;  %10692 = vmatpush3.bf16.msra.mxu1 %v11394_v39  ;;  %v11407_v39 = vld [vmem:[%s13482_s1 + $0x90] sm:$0xff]  }
0x163e   : > { %v4132_v34 = vadd.f32 %v9102_v40, %v4131_v41  ;;  %v10587_v42 = vpop.f32.mrb[61].mxu1  ;;  %10717 = vmatprep.subr.bf16.mxu1 %v11862_v2  ;;  %v11408_v40 = vld [vmem:[%s13482_s1 + $0x98] sm:$0xff]   ;;  %v11409_v41 = vld [vmem:[%s13482_s1 + $0xa0] sm:$0xff]  }
0x163f   : > { %v4134_v43 = vpop.f32.mrb[62].mxu1  ;;  %v11411_v42 = vld [vmem:[%s13482_s1 + $0xb0] sm:$0xff]  }
0x1640   : > { %v4137_v44 = vpack.c.bf16 %v4132_v34, %v4132_v34  ;;  %v10588_v45 = vpop.f32.mrb[63].mxu1  ;;  %10694 = vmatmul.mubr.bf16.vlgmr.msra.gmra.mrb[72].mxu1 %v12557_v3  ;;  %v11410_v34 = vld [vmem:[%s13482_s1 + $0xa8] sm:$0xff]   ;;  %v11412_v43 = vld [vmem:[%s13482_s1 + $0xb8] sm:$0xff]  }
0x1641   : > { %10719 = vmatprep.mubr.msk.bf16.mxu1 %vm11863_vm0, %v11862_v2  ;;  %v11414_v45 = vld [vmem:[%s13479_s5 + $0xc8] sm:$0xff]  }
0x1642   : > { %10632 = vmatmul.mubr.msk.bf16.vlgmr.msra.gmra.mrb[60].mxu0 %vm1849_vm1, %v4137_v44  ;;  %v11413_v44 = vld [vmem:[%s13479_s5 + $0xc0] sm:$0xff]  }
0x1643   : > { %10637 = vmatprep.mubr.msk.bf16.mxu0 %vm11863_vm0, %v11862_v2 }
0x165d   : > { %v4359_v47 = vpop.f32.mrb[64].mxu1 }
0x165e   : > { %v4360_v48 = vadd.f32 %v9154_v46, %v4359_v47  ;;  %v10627_v49 = vpop.f32.mrb[65].mxu1  ;;  %v11415_v46 = vld [vmem:[%s13479_s5 + $0xd0] sm:$0xff]   ;;  %v11416_v47 = vld [vmem:[%s13479_s5 + $0xd8] sm:$0xff]  }
0x165f   : > { %v4362_v50 = vpop.f32.mrb[66].mxu1  ;;  %v11418_v49 = vld [vmem:[%s13479_s5 + $0xe8] sm:$0xff]  }
0x1660   : > { %v4365_v23 = vpack.c.bf16 %v4360_v48, %v4360_v48  ;;  %v10628_v51 = vpop.f32.mrb[67].mxu1  ;;  %v11417_v48 = vld [vmem:[%s13479_s5 + $0xe0] sm:$0xff]   ;;  %v11419_v50 = vld [vmem:[%s13479_s5 + $0xf0] sm:$0xff]  }
0x1662   : > { %v4429_v52 = vsel %vm3975_vm8, %v4365_v23, 0  ;;  %v11420_v23 = vld [vmem:[%s13479_s5 + $0xf8] sm:$0xff]   ;;  %s13490_s5 = sld [smem:[#allocation25_spill]] }
0x1663   : > { %10636 = vmatpush3.bf16.msra.mxu0 %v4429_v52 }
0x1664   : > { %10641 = vmatprep.subr.bf16.mxu0 %v11862_v2 }
0x16f3   : > { %v12691_v53 = vpop.f32.mrb[68].mxu1 }
0x16f4   : > { %v10655_v54 = vpop.f32.mrb[69].mxu1 }
0x16f5   : > { %v4584_v55 = vpop.f32.mrb[70].mxu1 }
0x16f6   : > { %v10656_v56 = vpop.f32.mrb[71].mxu1 }
0x1713   : > { %v4808_v58 = vpop.f32.mrb[72].mxu1 }
0x1714   : > { %v4809_v59 = vadd.f32 %v9218_v57, %v4808_v58  ;;  %v10695_v60 = vpop.f32.mrb[73].mxu1  ;;  %v9192_v57 = vld [vmem:[%s13484_s28 + $0x2] ss:$0 sm:$0xff] }
0x1715   : > { %v4406_v61 = vpop.f32.mrb[60].mxu0  ;;  %v4811_v62 = vpop.f32.mrb[74].mxu1 }
0x1716   : > { %v4814_v63 = vpack.c.bf16 %v4809_v59, %v4809_v59  ;;  %v4412_v0 = vmul.f32 0.17677669, %v4406_v61  ;;  %v10633_v1 = vpop.f32.mrb[61].mxu0  ;;  %v10696_v4 = vpop.f32.mrb[75].mxu1 }
0x1717   : > { %v4409_v5 = vpop.f32.mrb[62].mxu0 }
0x1718   : > { %v4933_v6 = vsel %vm1849_vm1, %v4814_v63, 0  ;;  %v10634_v21 = vpop.f32.mrb[63].mxu0  ;;  %v4413_v7 = vsel %vm3959_vm9, %v4412_v0, -inf }
0x1719   : > { %10718 = vmatpush3.bf16.xpose.msra.mxu1 %v4933_v6  ;;  %4414 = vmax.xlane.f32.xlu0 %v4413_v7 }
0x171a   : > { %10723 = vmatprep.subr.bf16.mxu1 %v11862_v2 }
0x17a6   : > { %v4415_v8 = vpop.xlane.xlu0 %4414 }
0x17a7   : > { %v4416_v9 = vsub.f32 %v4412_v0, %v4415_v8  ;;  %v9244_v0 = vld [vmem:[%s13485_s3 + $0x2] ss:$0 sm:$0xff]  ;;  %v9305_v8 = vld [vmem:[%s13483_s11 + $0x3] ss:$0 sm:$0xff]  ;;  %s12974_s11 = sand.u32 1, %s11806_s16  }
0x17a8   : > { %s8752_s13 = sshll.u32 %s12974_s11, 3 }
0x17a9   : > { %v4417_v10 = vmul.f32 1.442695, %v4416_v9  ;;  %s12982_s14 = scalar_lea.vmem [#allocation2], %s8752_s13  ;;  %s13501_s13 = sld [smem:[#allocation37_spill]] }
0x17ab   : > { %11649 = vpow2.f32 %v4417_v10 }
0x17b5   : > { %v11650_v11 = vpop.eup %11649 }
0x17b6   : > { %v4419_v13 = vsel %vm3959_vm9, %v11650_v11, 0.0 }
0x17b7   : > { %4420 = vadd.xlane.f32.xlu1 %v4419_v13 }
0x1844   : > { %v4421_v14 = vpop.xlane.xlu1 %4420 }
0x1845   : > { %11651 = vrcp.f32 %v4421_v14 }
0x184f   : > { %v11652_v15 = vpop.eup %11651 }
0x1850   : > { %v4423_v16 = vmul.f32 %v11652_v15, %v11650_v11 }
0x1852   : > { %v4424_v18 = vpack.c.bf16 %v4423_v16, %v4423_v16 }
0x1854   : > { %10638 = vmatmul.mubr.msk.bf16.vlgmr.msra.gmra.mrb[64].mxu0 %vm3959_vm9, %v4424_v18 }
0x1855   : > { %10642 = vmatpush3.bf16.msra.mxu0 %v11395_v17  ;;  %10645 = vmatprep.mubr.msk.bf16.mxu0 %vm11863_vm0, %v11862_v2 }
0x1856   : > { %10643 = vmatprep.subr.bf16.mxu0 %v11862_v2 }
0x1859   : > { %10644 = vmatpush3.bf16.msra.mxu0 %v11396_v19 }
0x185a   : > { %10657 = vmatprep.subr.bf16.mxu0 %v11862_v2 }
0x1927   : > { %v4465_v20 = vpop.f32.mrb[64].mxu0 }
0x1928   : > { %v4471_v24 = vpack.c.bf16 %v4465_v20, %v4465_v20  ;;  %v10639_v25 = vpop.f32.mrb[65].mxu0 }
0x1929   : > { %v4468_v26 = vpop.f32.mrb[66].mxu0 }
0x192a   : > { %v10640_v27 = vpop.f32.mrb[67].mxu0  ;;  %10646 = vmatmul.mubr.msk.bf16.vlgmr.msra.gmra.mrb[68].mxu0 %vm1849_vm1, %v4471_v24 }
0x192b   : > { %10658 = vmatpush3.bf16.msra.mxu0 %v11397_v22  ;;  %10673 = vmatprep.mubr.msk.bf16.mxu0 %vm11863_vm0, %v11862_v2 }
0x192c   : > { %10659 = vmatprep.subr.bf16.mxu0 %v11862_v2 }
0x192f   : > { %10660 = vmatpush3.bf16.msra.mxu0 %v11398_v28 }
0x1930   : > { %10661 = vmatprep.subr.bf16.mxu0 %v11862_v2 }
0x1933   : > { %10662 = vmatpush3.bf16.msra.mxu0 %v11399_v29 }
0x1934   : > { %10663 = vmatprep.subr.bf16.mxu0 %v11862_v2 }
0x1937   : > { %10664 = vmatpush3.bf16.msra.mxu0 %v11400_v31 }
0x1938   : > { %10665 = vmatprep.subr.bf16.mxu0 %v11862_v2 }
0x193b   : > { %10666 = vmatpush3.bf16.msra.mxu0 %v11401_v32 }
0x193c   : > { %10667 = vmatprep.subr.bf16.mxu0 %v11862_v2 }
0x193f   : > { %10668 = vmatpush3.bf16.msra.mxu0 %v11402_v33 }
0x1940   : > { %10669 = vmatprep.subr.bf16.mxu0 %v11862_v2 }
0x1943   : > { %10670 = vmatpush3.bf16.msra.mxu0 %v11403_v35  ;;  %v11421_v35 = vld [vmem:[%s13486_s8 + $0x20] sm:$0xff]  }
0x1944   : > { %10671 = vmatprep.subr.bf16.mxu0 %v11862_v2 }
0x1947   : > { %10672 = vmatpush3.bf16.msra.mxu0 %v11404_v30 }
0x1948   : > { %10697 = vmatprep.subr.bf16.mxu0 %v11862_v2 }
0x194a   : > { %10674 = vmatmul.mubr.bf16.vlgmr.msra.gmra.mrb[72].mxu0 %v12557_v3 }
0x194b   : > { %10698 = vmatpush3.bf16.msra.mxu0 %v11405_v36  ;;  %10713 = vmatprep.mubr.msk.bf16.mxu0 %vm11863_vm0, %v11862_v2  ;;  %v11422_v36 = vld [vmem:[%s13486_s8 + $0x28] sm:$0xff]  }
0x194c   : > { %10699 = vmatprep.subr.bf16.mxu0 %v11862_v2 }
0x194f   : > { %10700 = vmatpush3.bf16.msra.mxu0 %v11406_v38 }
0x1950   : > { %10701 = vmatprep.subr.bf16.mxu0 %v11862_v2 }
0x1953   : > { %10702 = vmatpush3.bf16.msra.mxu0 %v11407_v39  ;;  %v11423_v39 = vld [vmem:[%s11953_s20 + $0xc0] sm:$0xff]  }
0x1954   : > { %10703 = vmatprep.subr.bf16.mxu0 %v11862_v2 }
0x1957   : > { %10704 = vmatpush3.bf16.msra.mxu0 %v11408_v40 }
0x1958   : > { %10705 = vmatprep.subr.bf16.mxu0 %v11862_v2 }
0x195b   : > { %10706 = vmatpush3.bf16.msra.mxu0 %v11409_v41 }
0x195c   : > { %10707 = vmatprep.subr.bf16.mxu0 %v11862_v2 }
0x195f   : > { %10708 = vmatpush3.bf16.msra.mxu0 %v11410_v34 }
0x1960   : > { %10709 = vmatprep.subr.bf16.mxu0 %v11862_v2 }
0x1963   : > { %10710 = vmatpush3.bf16.msra.mxu0 %v11411_v42 }
0x1964   : > { %10711 = vmatprep.subr.bf16.mxu0 %v11862_v2 }
0x1967   : > { %10712 = vmatpush3.bf16.msra.mxu0 %v11412_v43  ;;  %v11424_v43 = vld [vmem:[%s11953_s20 + $0xc8] sm:$0xff]  }
0x1968   : > { %10757 = vmatprep.subr.bf16.mxu0 %v11862_v2 }
0x196a   : > { %10714 = vmatmul.mubr.bf16.vlgmr.msra.gmra.mrb[76].mxu0 %v12557_v3 }
0x196b   : > { %10758 = vmatpush3.bf16.msra.mxu0 %v11413_v44  ;;  %10773 = vmatprep.mubr.msk.bf16.mxu0 %vm11863_vm0, %v11862_v2  ;;  %v11425_v44 = vld [vmem:[%s11953_s20 + $0xd0] sm:$0xff]  }
0x196c   : > { %10759 = vmatprep.subr.bf16.mxu0 %v11862_v2 }
0x196f   : > { %10760 = vmatpush3.bf16.msra.mxu0 %v11414_v45  ;;  %v11426_v45 = vld [vmem:[%s11953_s20 + $0xd8] sm:$0xff]  }
0x1970   : > { %10761 = vmatprep.subr.bf16.mxu0 %v11862_v2 }
0x1973   : > { %10762 = vmatpush3.bf16.msra.mxu0 %v11415_v46  ;;  %v11427_v46 = vld [vmem:[%s11953_s20 + $0xe0] sm:$0xff]  }
0x1974   : > { %10763 = vmatprep.subr.bf16.mxu0 %v11862_v2 }
0x1977   : > { %10764 = vmatpush3.bf16.msra.mxu0 %v11416_v47  ;;  %v11428_v47 = vld [vmem:[%s11953_s20 + $0xe8] sm:$0xff]  }
0x1978   : > { %10765 = vmatprep.subr.bf16.mxu0 %v11862_v2 }
0x197b   : > { %10766 = vmatpush3.bf16.msra.mxu0 %v11417_v48  ;;  %v11429_v48 = vld [vmem:[%s11953_s20 + $0xf0] sm:$0xff]  }
0x197c   : > { %10767 = vmatprep.subr.bf16.mxu0 %v11862_v2 }
0x197f   : > { %10768 = vmatpush3.bf16.msra.mxu0 %v11418_v49  ;;  %v11430_v49 = vld [vmem:[%s11953_s20 + $0xf8] sm:$0xff]  }
0x1980   : > { %10769 = vmatprep.subr.bf16.mxu0 %v11862_v2 }
0x1983   : > { %10770 = vmatpush3.bf16.msra.mxu0 %v11419_v50  ;;  %v11431_v50 = vld [vmem:[%s13482_s1 + $0xc0] sm:$0xff]  }
0x1984   : > { %10771 = vmatprep.subr.bf16.mxu0 %v11862_v2 }
0x1987   : > { %10772 = vmatpush3.bf16.msra.mxu0 %v11420_v23  ;;  %v11432_v23 = vld [vmem:[%s13482_s1 + $0xc8] sm:$0xff]  }
0x1988   : > { %10797 = vmatprep.subr.bf16.mxu0 %v11862_v2 }
0x198a   : > { %10774 = vmatmul.mubr.bf16.vlgmr.msra.gmra.mrb[80].mxu0 %v12557_v3 }
0x198b   : > { %10799 = vmatprep.mubr.msk.bf16.mxu0 %vm11863_vm0, %v11862_v2 }
0x19fd   : > { %v4526_v51 = vpop.f32.mrb[68].mxu0 }
0x19fe   : > { %v12766_v52 = vadd.f32 %v12691_v53, %v4526_v51  ;;  %v10647_v54 = vpop.f32.mrb[69].mxu0  ;;  %v11433_v51 = vld [vmem:[%s13482_s1 + $0xd0] sm:$0xff]  }
0x19ff   : > { %v4529_v55 = vpop.f32.mrb[70].mxu0  ;;  %v11434_v54 = vld [vmem:[%s13482_s1 + $0xd8] sm:$0xff]  }
0x1a00   : > { %v10648_v56 = vpop.f32.mrb[71].mxu0  ;;  %v11435_v55 = vld [vmem:[%s13482_s1 + $0xe0] sm:$0xff]  }
0x1a01   : > { %v11436_v56 = vld [vmem:[%s13482_s1 + $0xe8] sm:$0xff]  }
0x1a1d   : > { %v4694_v58 = vpop.f32.mrb[72].mxu0 }
0x1a1e   : > { %v4695_v59 = vadd.f32 %v9192_v57, %v4694_v58  ;;  %v10675_v60 = vpop.f32.mrb[73].mxu0  ;;  %v11437_v57 = vld [vmem:[%s13482_s1 + $0xf0] sm:$0xff]   ;;  %v11438_v58 = vld [vmem:[%s13482_s1 + $0xf8] sm:$0xff]   ;;  %s13487_s1 = sld [smem:[#allocation23_spill]] }
0x1a1f   : > { %v4697_v61 = vpop.f32.mrb[74].mxu0 }
0x1a20   : > { %v4700_v62 = vpack.c.bf16 %v4695_v59, %v4695_v59  ;;  %v10676_v63 = vpop.f32.mrb[75].mxu0 }
0x1a22   : > { %10720 = vmatmul.mubr.msk.bf16.vlgmr.msra.gmra.mrb[76].mxu1 %vm1849_vm1, %v4700_v62 }
0x1a23   : > { %10725 = vmatprep.mubr.msk.bf16.mxu1 %vm11863_vm0, %v11862_v2 }
0x1a3d   : > { %v4922_v1 = vpop.f32.mrb[76].mxu0 }
0x1a3e   : > { %v4923_v53 = vadd.f32 %v9244_v0, %v4922_v1  ;;  %v10715_v4 = vpop.f32.mrb[77].mxu0  ;;  %v9279_v0 = vld [vmem:[%s13484_s28 + $0x3] ss:$0 sm:$0xff] }
0x1a3f   : > { %v4925_v5 = vpop.f32.mrb[78].mxu0 }
0x1a40   : > { %v4928_v6 = vpack.c.bf16 %v4923_v53, %v4923_v53  ;;  %v10716_v21 = vpop.f32.mrb[79].mxu0 }
0x1a42   : > { %v4992_v7 = vsel %vm3975_vm8, %v4928_v6, 0 }
0x1a43   : > { %10724 = vmatpush3.bf16.msra.mxu1 %v4992_v7  ;;  %v9331_v7 = vld [vmem:[%s13485_s3 + $0x3] ss:$0 sm:$0xff]  ;;  %s13488_s3 = sld [smem:[#allocation26_spill]] }
0x1a44   : > { %10729 = vmatprep.subr.bf16.mxu1 %v11862_v2 }
0x1a5d   : > { %v5317_v9 = vpop.f32.mrb[80].mxu0 }
0x1a5e   : > { %v5318_v10 = vadd.f32 %v9305_v8, %v5317_v9  ;;  %v10775_v11 = vpop.f32.mrb[81].mxu0 }
0x1a5f   : > { %v5320_v13 = vpop.f32.mrb[82].mxu0 }
0x1a60   : > { %v5323_v14 = vpack.c.bf16 %v5318_v10, %v5318_v10  ;;  %v10776_v15 = vpop.f32.mrb[83].mxu0 }
0x1a62   : > { %v5442_v16 = vsel %vm1849_vm1, %v5323_v14, 0 }
0x1a63   : > { %10798 = vmatpush3.bf16.xpose.msra.mxu0 %v5442_v16 }
0x1a64   : > { %10803 = vmatprep.subr.bf16.mxu0 %v11862_v2 }
0x1af5   : > { %v4969_v17 = vpop.f32.mrb[76].mxu1 }
0x1af6   : > { %v4975_v18 = vmul.f32 0.17677669, %v4969_v17  ;;  %v10721_v19 = vpop.f32.mrb[77].mxu1 }
0x1af7   : > { %v4972_v20 = vpop.f32.mrb[78].mxu1 }
0x1af8   : > { %v10722_v22 = vpop.f32.mrb[79].mxu1  ;;  %v4976_v24 = vsel %vm3959_vm9, %v4975_v18, -inf }
0x1af9   : > { %4977 = vmax.xlane.f32.xlu0 %v4976_v24 }
0x1b86   : > { %v4978_v25 = vpop.xlane.xlu0 %4977 }
0x1b87   : > { %v4979_v26 = vsub.f32 %v4975_v18, %v4978_v25 }
0x1b89   : > { %v4980_v27 = vmul.f32 1.442695, %v4979_v26 }
0x1b8b   : > { %11653 = vpow2.f32 %v4980_v27 }
0x1b95   : > { %v11654_v28 = vpop.eup %11653 }
0x1b96   : > { %v4982_v29 = vsel %vm3959_vm9, %v11654_v28, 0.0 }
0x1b97   : > { %4983 = vadd.xlane.f32.xlu1 %v4982_v29 }
0x1c24   : > { %v4984_v31 = vpop.xlane.xlu1 %4983 }
0x1c25   : > { %11655 = vrcp.f32 %v4984_v31  ;;  %v11439_v31 = vld [vmem:[%s13486_s8 + $0x30] sm:$0xff]  }
0x1c2f   : > { %v11656_v32 = vpop.eup %11655 }
0x1c30   : > { %v4986_v33 = vmul.f32 %v11656_v32, %v11654_v28 }
0x1c32   : > { %v4987_v30 = vpack.c.bf16 %v4986_v33, %v4986_v33  ;;  %v11440_v33 = vld [vmem:[%s13486_s8 + $0x38] sm:$0xff]   ;;  %s13491_s8 = sld [smem:[#allocation28_spill]] }
0x1c34   : > { %10726 = vmatmul.mubr.msk.bf16.vlgmr.msra.gmra.mrb[80].mxu1 %vm3959_vm9, %v4987_v30 }
0x1c35   : > { %10730 = vmatpush3.bf16.msra.mxu1 %v11421_v35  ;;  %10733 = vmatprep.mubr.msk.bf16.mxu1 %vm11863_vm0, %v11862_v2 }
0x1c36   : > { %10731 = vmatprep.subr.bf16.mxu1 %v11862_v2 }
0x1c39   : > { %10732 = vmatpush3.bf16.msra.mxu1 %v11422_v36 }
0x1c3a   : > { %10737 = vmatprep.subr.bf16.mxu1 %v11862_v2 }
0x1d07   : > { %v5028_v38 = vpop.f32.mrb[80].mxu1 }
0x1d08   : > { %v5034_v40 = vpack.c.bf16 %v5028_v38, %v5028_v38  ;;  %v10727_v41 = vpop.f32.mrb[81].mxu1 }
0x1d09   : > { %v5031_v34 = vpop.f32.mrb[82].mxu1 }
0x1d0a   : > { %v10728_v42 = vpop.f32.mrb[83].mxu1  ;;  %10734 = vmatmul.mubr.msk.bf16.vlgmr.msra.gmra.mrb[84].mxu1 %vm1849_vm1, %v5034_v40 }
0x1d0b   : > { %10738 = vmatpush3.bf16.msra.mxu1 %v11423_v39  ;;  %10753 = vmatprep.mubr.msk.bf16.mxu1 %vm11863_vm0, %v11862_v2 }
0x1d0c   : > { %10739 = vmatprep.subr.bf16.mxu1 %v11862_v2 }
0x1d0f   : > { %10740 = vmatpush3.bf16.msra.mxu1 %v11424_v43  ;;  %v9349_v43 = vld [vmem:[%s13487_s1] ss:$0 sm:$0xff]  ;;  %s13489_s1 = sld [smem:[#allocation24_spill]] }
0x1d10   : > { %10741 = vmatprep.subr.bf16.mxu1 %v11862_v2 }
0x1d13   : > { %10742 = vmatpush3.bf16.msra.mxu1 %v11425_v44 }
0x1d14   : > { %10743 = vmatprep.subr.bf16.mxu1 %v11862_v2 }
0x1d17   : > { %10744 = vmatpush3.bf16.msra.mxu1 %v11426_v45 }
0x1d18   : > { %10745 = vmatprep.subr.bf16.mxu1 %v11862_v2 }
0x1d1b   : > { %10746 = vmatpush3.bf16.msra.mxu1 %v11427_v46 }
0x1d1c   : > { %10747 = vmatprep.subr.bf16.mxu1 %v11862_v2 }
0x1d1f   : > { %10748 = vmatpush3.bf16.msra.mxu1 %v11428_v47  ;;  %v11716_v47 = vld [vmem:[%s12187_s23] sm:$0xff] }
0x1d20   : > { %10749 = vmatprep.subr.bf16.mxu1 %v11862_v2 }
0x1d23   : > { %10750 = vmatpush3.bf16.msra.mxu1 %v11429_v48  ;;  %v11441_v48 = vld [vmem:[%s13488_s3] ss:$8 sps:$4 sm:$0xff]  }
0x1d24   : > { %10751 = vmatprep.subr.bf16.mxu1 %v11862_v2 }
0x1d27   : > { %10752 = vmatpush3.bf16.msra.mxu1 %v11430_v49  ;;  %v11443_v49 = vld [vmem:[%s13488_s3 + $0x4] ss:$8 sps:$4 sm:$0xff]  }
0x1d28   : > { %10777 = vmatprep.subr.bf16.mxu1 %v11862_v2 }
0x1d2a   : > { %10754 = vmatmul.mubr.bf16.vlgmr.msra.gmra.mrb[88].mxu1 %v12557_v3 }
0x1d2b   : > { %10778 = vmatpush3.bf16.msra.mxu1 %v11431_v50  ;;  %10793 = vmatprep.mubr.msk.bf16.mxu1 %vm11863_vm0, %v11862_v2  ;;  %v11446_v50 = vld [vmem:[%s13488_s3 + $0x14] ss:$8 sps:$4 sm:$0xff]  }
0x1d2c   : > { %10779 = vmatprep.subr.bf16.mxu1 %v11862_v2 }
0x1d2f   : > { %10780 = vmatpush3.bf16.msra.mxu1 %v11432_v23  ;;  %v11444_v23 = vld [vmem:[%s13488_s3 + $0x10] ss:$8 sps:$4 sm:$0xff]  }
0x1d30   : > { %10781 = vmatprep.subr.bf16.mxu1 %v11862_v2 }
0x1d33   : > { %10782 = vmatpush3.bf16.msra.mxu1 %v11433_v51  ;;  %v11449_v51 = vld [vmem:[%s13488_s3 + $0x24] ss:$8 sps:$4 sm:$0xff]  }
0x1d34   : > { %10783 = vmatprep.subr.bf16.mxu1 %v11862_v2 }
0x1d37   : > { %10784 = vmatpush3.bf16.msra.mxu1 %v11434_v54  ;;  %v11447_v54 = vld [vmem:[%s13488_s3 + $0x20] ss:$8 sps:$4 sm:$0xff]  }
0x1d38   : > { %10785 = vmatprep.subr.bf16.mxu1 %v11862_v2 }
0x1d3b   : > { %10786 = vmatpush3.bf16.msra.mxu1 %v11435_v55 }
0x1d3c   : > { %10787 = vmatprep.subr.bf16.mxu1 %v11862_v2 }
0x1d3f   : > { %10788 = vmatpush3.bf16.msra.mxu1 %v11436_v56 }
0x1d40   : > { %10789 = vmatprep.subr.bf16.mxu1 %v11862_v2 }
0x1d43   : > { %10790 = vmatpush3.bf16.msra.mxu1 %v11437_v57 }
0x1d44   : > { %10791 = vmatprep.subr.bf16.mxu1 %v11862_v2 }
0x1d47   : > { %10792 = vmatpush3.bf16.msra.mxu1 %v11438_v58 }
0x1d4a   : > { %10794 = vmatmul.mubr.bf16.vlgmr.msra.gmra.mrb[92].mxu1 %v12557_v3 }
0x1ddd   : > { %v5089_v59 = vpop.f32.mrb[84].mxu1 }
0x1dde   : > { %v5095_v60 = vadd.f32 %v5089_v59, %v12766_v52  ;;  %v10735_v61 = vpop.f32.mrb[85].mxu1 }
0x1ddf   : > { %v5092_v62 = vpop.f32.mrb[86].mxu1 }
0x1de0   : > { %v10736_v63 = vpop.f32.mrb[87].mxu1  ;;  %v11717_v62 = vld [vmem:[%s12187_s23 + $0x8] sm:$0xff] }
0x1de1   : > { %v11452_v63 = vld [vmem:[%s13488_s3 + $0x34] ss:$8 sps:$4 sm:$0xff]  }
0x1dfd   : > { %v5203_v1 = vpop.f32.mrb[88].mxu1 }
0x1dfe   : > { %v5204_v53 = vadd.f32 %v9279_v0, %v5203_v1  ;;  %v10755_v4 = vpop.f32.mrb[89].mxu1  ;;  %v11450_v0 = vld [vmem:[%s13488_s3 + $0x30] ss:$8 sps:$4 sm:$0xff]   ;;  %v11453_v1 = vld [vmem:[%s13488_s3 + $0x40] ss:$8 sps:$4 sm:$0xff]  }
0x1dff   : > { %v5206_v5 = vpop.f32.mrb[90].mxu1  ;;  %v11458_v4 = vld [vmem:[%s13488_s3 + $0x54] ss:$8 sps:$4 sm:$0xff]  }
0x1e00   : > { %v5209_v6 = vpack.c.bf16 %v5204_v53, %v5204_v53  ;;  %v10756_v21 = vpop.f32.mrb[91].mxu1  ;;  %v11455_v53 = vld [vmem:[%s13488_s3 + $0x44] ss:$8 sps:$4 sm:$0xff]   ;;  %v11865_v5 = vmov 0  }
0x1e01   : > { %v11461_v21 = vld [vmem:[%s13488_s3 + $0x64] ss:$8 sps:$4 sm:$0xff]  }
0x1e02   : > { %10800 = vmatmul.mubr.msk.bf16.vlgmr.msra.gmra.mrb[84].mxu0 %vm1849_vm1, %v5209_v6  ;;  %v11456_v6 = vld [vmem:[%s13488_s3 + $0x50] ss:$8 sps:$4 sm:$0xff]  }
0x1e03   : > { %10805 = vmatprep.mubr.msk.bf16.mxu0 %vm11863_vm0, %v11862_v2 }
0x1e1d   : > { %v5431_v3 = vpop.f32.mrb[92].mxu1 }
0x1e1e   : > { %v5432_v8 = vadd.f32 %v9331_v7, %v5431_v3  ;;  %v10795_v9 = vpop.f32.mrb[93].mxu1  ;;  %v11459_v7 = vld [vmem:[%s13488_s3 + $0x60] ss:$8 sps:$4 sm:$0xff]   ;;  %v11464_v3 = vld [vmem:[%s13488_s3 + $0x74] ss:$8 sps:$4 sm:$0xff]  }
0x1e1f   : > { %v5434_v52 = vpop.f32.mrb[94].mxu1 }
0x1e20   : > { %v5437_v10 = vpack.c.bf16 %v5432_v8, %v5432_v8  ;;  %v10796_v11 = vpop.f32.mrb[95].mxu1  ;;  %v11462_v8 = vld [vmem:[%s13488_s3 + $0x70] ss:$8 sps:$4 sm:$0xff]   ;;  %s13494_s3 = sld [smem:[#allocation31_spill]] }
0x1e22   : > { %v5501_v13 = vsel %vm3975_vm8, %v5437_v10, 0 }
0x1e23   : > { %10804 = vmatpush3.bf16.msra.mxu0 %v5501_v13 }
0x1e24   : > { %10809 = vmatprep.subr.bf16.mxu0 %v11862_v2 }
0x1ed5   : > { %v5478_v14 = vpop.f32.mrb[84].mxu0 }
0x1ed6   : > { %v5484_v15 = vmul.f32 0.17677669, %v5478_v14  ;;  %v10801_v16 = vpop.f32.mrb[85].mxu0 }
0x1ed7   : > { %v5481_v17 = vpop.f32.mrb[86].mxu0 }
0x1ed8   : > { %v10802_v18 = vpop.f32.mrb[87].mxu0  ;;  %v5485_v19 = vsel %vm3959_vm9, %v5484_v15, -inf  ;;  %v9350_v17 = vld [vmem:[%s13489_s1] ss:$0 sm:$0xff]  ;;  %s13493_s1 = sld [smem:[#allocation30_spill]] }
0x1ed9   : > { %5486 = vmax.xlane.f32.xlu0 %v5485_v19  ;;  %v9351_v18 = vld [vmem:[%s13490_s5] ss:$0 sm:$0xff]  ;;  %s13492_s5 = sld [smem:[#allocation32_spill]] }
0x1f66   : > { %v5487_v20 = vpop.xlane.xlu0 %5486 }
0x1f67   : > { %v5488_v22 = vsub.f32 %v5484_v15, %v5487_v20 }
0x1f69   : > { %v5489_v24 = vmul.f32 1.442695, %v5488_v22 }
0x1f6b   : > { %11657 = vpow2.f32 %v5489_v24  ;;  %v11465_v24 = vld [vmem:[%s13491_s8 + $0x40] sm:$0xff]  }
0x1f6c   : > { %9997 = vmatprep.subr.bf16.mxu1 %v11465_v24 }
0x1f75   : > { %v11658_v25 = vpop.eup %11657 }
0x1f76   : > { %v5491_v26 = vsel %vm3959_vm9, %v11658_v25, 0.0 }
0x1f77   : > { %5492 = vadd.xlane.f32.xlu1 %v5491_v26  ;;  %v11467_v26 = vld [vmem:[%s13491_s8 + $0x48] sm:$0xff]  }
0x2004   : > { %v5493_v27 = vpop.xlane.xlu1 %5492 }
0x2005   : > { %11659 = vrcp.f32 %v5493_v27  ;;  %v11468_v27 = vld [vmem:[%s13491_s8 + $0x8] sm:$0xff]  }
0x200f   : > { %v11660_v28 = vpop.eup %11659 }
0x2010   : > { %v5495_v29 = vmul.f32 %v11660_v28, %v11658_v25  ;;  %v11466_v25 = vld [vmem:[%s13491_s8] sm:$0xff]   ;;  %v11469_v28 = vld [vmem:[%s13491_s8 + $0x50] sm:$0xff]  }
0x2011   : > { %9998 = vmatpush3.bf16.msra.mxu1 %v11466_v25 }
0x2012   : > { %v5496_v32 = vpack.c.bf16 %v5495_v29, %v5495_v29  ;;  %9999 = vmatprep.subr.bf16.mxu1 %v11467_v26  ;;  %v11470_v29 = vld [vmem:[%s13491_s8 + $0x10] sm:$0xff]  }
0x2014   : > { %10806 = vmatmul.mubr.msk.bf16.vlgmr.msra.gmra.mrb[88].mxu0 %vm3959_vm9, %v5496_v32  ;;  %v11472_v32 = vld [vmem:[%s13491_s8 + $0x18] sm:$0xff]  }
0x2015   : > { %10810 = vmatpush3.bf16.msra.mxu0 %v11439_v31  ;;  %10813 = vmatprep.mubr.msk.bf16.mxu0 %vm11863_vm0, %v11862_v2  ;;  %v11471_v31 = vld [vmem:[%s13491_s8 + $0x58] sm:$0xff]  }
0x2016   : > { %10811 = vmatprep.subr.bf16.mxu0 %v11862_v2  ;;  %10000 = vmatpush3.bf16.msra.mxu1 %v11468_v27 }
0x2017   : > { %10001 = vmatprep.subr.bf16.mxu1 %v11469_v28 }
0x2019   : > { %10812 = vmatpush3.bf16.msra.mxu0 %v11440_v33  ;;  %v11473_v33 = vld [vmem:[%s13491_s8 + $0x60] sm:$0xff]  }
0x201a   : > { %5750 = vmatprep.subr.bf16.mxu0 %v11443_v49  ;;  %10002 = vmatpush3.bf16.msra.mxu1 %v11470_v29 }
0x201b   : > { %10003 = vmatprep.subr.bf16.mxu1 %v11471_v31 }
0x201e   : > { %10004 = vmatpush3.bf16.msra.mxu1 %v11472_v32 }
0x201f   : > { %10005 = vmatprep.subr.bf16.mxu1 %v11473_v33 }
0x20e7   : > { %v5537_v35 = vpop.f32.mrb[88].mxu0 }
0x20e8   : > { %v5543_v30 = vpack.c.bf16 %v5537_v35, %v5537_v35  ;;  %v10807_v36 = vpop.f32.mrb[89].mxu0  ;;  %v11474_v35 = vld [vmem:[%s13491_s8 + $0x20] sm:$0xff]  }
0x20e9   : > { %v5540_v38 = vpop.f32.mrb[90].mxu0  ;;  %10006 = vmatpush3.bf16.msra.mxu1 %v11474_v35  ;;  %v11476_v36 = vld [vmem:[%s13491_s8 + $0x28] sm:$0xff]  }
0x20ea   : > { %v10808_v39 = vpop.f32.mrb[91].mxu0  ;;  %10814 = vmatmul.mubr.msk.bf16.vlgmr.msra.gmra.mrb[92].mxu0 %vm1849_vm1, %v5543_v30  ;;  %v11475_v30 = vld [vmem:[%s13491_s8 + $0x68] sm:$0xff]   ;;  %v11477_v38 = vld [vmem:[%s13491_s8 + $0x70] sm:$0xff]  }
0x20eb   : > { %5751 = vmatpush1.bf16.msra.mxu0 %v11441_v48  ;;  %5782 = vmatprep.mubr.bf16.mxu0 %v11865_v5  ;;  %v11478_v39 = vld [vmem:[%s13491_s8 + $0x30] sm:$0xff]   ;;  %v11484_v48 = vld [vmem:[%s13492_s5 + $0x18] sm:$0xff]  }
0x20ec   : > { %5752 = vmatprep.subr.bf16.mxu0 %v11446_v50  ;;  %10007 = vmatprep.subr.bf16.mxu1 %v11475_v30 }
0x20ed   : > { %10008 = vmatpush3.bf16.msra.mxu1 %v11476_v36 }
0x20ee   : > { %10009 = vmatprep.subr.bf16.mxu1 %v11477_v38 }
0x20ef   : > { %5753 = vmatpush1.bf16.msra.mxu0 %v11444_v23 }
0x20f0   : > { %5754 = vmatprep.subr.bf16.mxu0 %v11449_v51  ;;  %v11485_v51 = vld [vmem:[%s13492_s5 + $0x20] sm:$0xff]  }
0x20f1   : > { %10010 = vmatpush3.bf16.msra.mxu1 %v11478_v39 }
0x20f3   : > { %5755 = vmatpush1.bf16.msra.mxu0 %v11447_v54 }
0x20f4   : > { %5756 = vmatprep.subr.bf16.mxu0 %v11452_v63 }
0x20f7   : > { %5757 = vmatpush1.bf16.msra.mxu0 %v11450_v0 }
0x20f8   : > { %5758 = vmatprep.subr.bf16.mxu0 %v11455_v53 }
0x20fb   : > { %5759 = vmatpush1.bf16.msra.mxu0 %v11453_v1 }
0x20fc   : > { %5760 = vmatprep.subr.bf16.mxu0 %v11458_v4 }
0x20ff   : > { %5761 = vmatpush1.bf16.msra.mxu0 %v11456_v6 }
0x2100   : > { %5762 = vmatprep.subr.bf16.mxu0 %v11461_v21 }
0x2103   : > { %5763 = vmatpush1.bf16.msra.mxu0 %v11459_v7 }
0x2104   : > { %5764 = vmatprep.subr.bf16.mxu0 %v11464_v3 }
0x2107   : > { %5765 = vmatpush1.bf16.msra.mxu0 %v11462_v8 }
0x2108   : > { %10817 = vmatprep.subr.bf16.mxu0 %v11862_v2 }
0x21bd   : > { %v5598_v40 = vpop.f32.mrb[92].mxu0 }
0x21be   : > { %v5604_v41 = vadd.f32 %v5598_v40, %v5095_v60  ;;  %v10815_v34 = vpop.f32.mrb[93].mxu0  ;;  %v11479_v40 = vld [vmem:[%s13491_s8 + $0x78] sm:$0xff]  }
0x21bf   : > { %v5601_v42 = vpop.f32.mrb[94].mxu0  ;;  %10011 = vmatprep.subr.bf16.mxu1 %v11479_v40  ;;  %v11481_v34 = vld [vmem:[%s13492_s5] sm:$0xff]  }
0x21c0   : > { %v5605_v44 = vadd.f32 %v5604_v41, %v12518_v37  ;;  %v10816_v45 = vpop.f32.mrb[95].mxu0  ;;  %v11480_v41 = vld [vmem:[%s13491_s8 + $0x38] sm:$0xff]   ;;  %s13495_s8 = sld [smem:[#allocation36_spill]] }
0x21c1   : > { %10012 = vmatpush3.bf16.msra.mxu1 %v11480_v41 }
0x21c2   : > { %v12844_v46 = vadd.f32 %v9349_v43, %v5605_v44  ;;  %10837 = vmatprep.subr.bf16.mxu1 %v11862_v2  ;;  %v11482_v44 = vld [vmem:[%s13492_s5 + $0x8] sm:$0xff]  }
0x21c4   : > { %5616 = vadd.xlane.f32.xlu0 %v12844_v46 }
0x21c6   : > { %v11489_v53 = vld [vmem:[%s13495_s8] sm:$0xff]   ;;  %v11491_v6 = vld [vmem:[%s13495_s8 + $0x8] sm:$0xff]   ;;  %v11493_v21 = vld [vmem:[%s13495_s8 + $0x10] sm:$0xff]  }
0x21c7   : > { %v11495_v7 = vld [vmem:[%s13495_s8 + $0x18] sm:$0xff]   ;;  %v11497_v3 = vld [vmem:[%s13495_s8 + $0x20] sm:$0xff]   ;;  %v11499_v8 = vld [vmem:[%s13495_s8 + $0x28] sm:$0xff]  }
0x21c8   : > { %5990 = vadd.xlane.f32.xlu0 %v11716_v47 }
0x2251   : > { %v5617_v37 = vpop.xlane.xlu0 %5616 }
0x2252   : > { %v5618_v55 = vmul.f32 0.0078125, %v5617_v37  ;;  %v11486_v37 = vld [vmem:[%s13492_s5 + $0x28] sm:$0xff]  }
0x2254   : > { %v5619_v56 = vsub.f32 %v12844_v46, %v5618_v55 }
0x2255   : > { %v5991_v57 = vpop.xlane.xlu0 %5990 }
0x2256   : > { %v5994_v58 = vmul.f32 0.0078125, %v5991_v57  ;;  %v5620_v59 = vmul.f32 %v5619_v56, %v5619_v56  ;;  %v9385_v57 = vld [vmem:[%s13493_s1] ss:$0 sm:$0xff]  ;;  %s13497_s1 = sld [smem:[#allocation34_spill]] }
0x2258   : > { %v12855_v60 = vsub.f32 %v11716_v47, %v5994_v58  ;;  %5621 = vadd.xlane.f32.xlu1 %v5620_v59  ;;  %v11483_v47 = vld [vmem:[%s13492_s5 + $0x10] sm:$0xff]  }
0x225a   : > { %v5998_v61 = vmul.f32 %v12855_v60, %v12855_v60 }
0x225c   : > { %6000 = vadd.xlane.f32.xlu0 %v5998_v61  ;;  %5992 = vadd.xlane.f32.xlu1 %v11717_v62  ;;  %v11488_v61 = vld [vmem:[%s13492_s5 + $0x38] sm:$0xff]  }
0x2289   : > { %1449 = vxpose.xlu0.b32.start.end [1/1] (short) (narrow) %v12253_v12, 16 }
0x22e5   : > { %v5622_v9 = vpop.xlane.xlu1 %5621 }
0x22e6   : > { %v5623_v52 = vmul.f32 0.0078125, %v5622_v9  ;;  %v5660_v9 = vlaneseq }
0x22e8   : > { %v5624_v10 = vadd.f32 1e-05, %v5623_v52  ;;  %v12935_v52 = vshrl.u32 %v5660_v9, 7 }
0x22e9   : > { %v5993_v11 = vpop.xlane.xlu1 %5992  ;;  %v6001_v42 = vpop.xlane.xlu0 %6000 }
0x22ea   : > { %11661 = vrsqrt.f32 %v5624_v10  ;;  %v5995_v13 = vmul.f32 0.0078125, %v5993_v11  ;;  %v6004_v43 = vmul.f32 0.0078125, %v6001_v42  ;;  %v5662_v10 = vsub.s32 0, %v12935_v52 }
0x22ec   : > { %v12873_v14 = vsub.f32 %v11717_v62, %v5995_v13  ;;  %v6006_v45 = vadd.f32 1e-05, %v6004_v43  ;;  %v9386_v62 = vld [vmem:[%s13494_s3] ss:$0 sm:$0xff]  ;;  %s13496_s3 = sld [smem:[#allocation27_spill]]  ;;  %v5666_v13 = vsub.s32 1, %v12935_v52 }
0x22ed   : > { %v11490_v43 = vld [vmem:[%s13497_s1] sm:$0xff]  }
0x22ee   : > { %v5999_v15 = vmul.f32 %v12873_v14, %v12873_v14  ;;  %11663 = vrsqrt.f32 %v6006_v45  ;;  %v11492_v45 = vld [vmem:[%s13497_s1 + $0x8] sm:$0xff]  }
0x22f0   : > { %6002 = vadd.xlane.f32.xlu1 %v5999_v15 }
0x22f2   : > { %v5658_v11 = vld [vmem:[%s13496_s3] sm:$0x3]  ;;  %s13498_s3 = sld [smem:[#allocation33_spill]] }
0x22f3   : > { %v5667_v15 = vrot.slane %v5658_v11, %v5666_v13 }
0x22f4   : > { %v11662_v16 = vpop.eup %11661 }
0x22f5   : > { %v5626_v12 = vmul.f32 %v11662_v16, %v5619_v56  ;;  %v11487_v56 = vld [vmem:[%s13492_s5 + $0x30] sm:$0xff]  }
0x22f7   : > { %v5633_v19 = vmul.f32 %v9350_v17, %v5626_v12 }
0x22f8   : > { %v11664_v54 = vpop.eup %11663 }
0x22f9   : > { %v5640_v20 = vadd.f32 %v9351_v18, %v5633_v19  ;;  %v6010_v55 = vmul.f32 %v11664_v54, %v12855_v60  ;;  %v11503_v54 = vld [vmem:[%s13495_s8 + $0x38] sm:$0xff]  }
0x22fb   : > { %v5641_v22 = vpack.c.bf16 %v5640_v20, %v5640_v20  ;;  %v6018_v58 = vmul.f32 %v9385_v57, %v6010_v55  ;;  %v9387_v55 = vld [vmem:[%s13498_s3] ss:$0 sm:$0xff] }
0x22fd   : > { %5783 = vmatmul.mubr.bf16.vlgmr.msra.gmra.mrb[96].mxu0 %v5641_v22  ;;  %v6026_v60 = vadd.f32 %v9386_v62, %v6018_v58 }
0x22fe   : > { %10833 = vmatprep.mubr.msk.bf16.mxu0 %vm11863_vm0, %v11862_v2  ;;  %10818 = vmatpush3.bf16.msra.mxu0 %v11481_v34 }
0x22ff   : > { %10819 = vmatprep.subr.bf16.mxu0 %v11862_v2 }
0x2302   : > { %10820 = vmatpush3.bf16.msra.mxu0 %v11482_v44 }
0x2303   : > { %10821 = vmatprep.subr.bf16.mxu0 %v11862_v2 }
0x2306   : > { %10822 = vmatpush3.bf16.msra.mxu0 %v11483_v47  ;;  %v11494_v47 = vld [vmem:[%s13497_s1 + $0x10] sm:$0xff]  }
0x2307   : > { %10823 = vmatprep.subr.bf16.mxu0 %v11862_v2 }
0x230a   : > { %10824 = vmatpush3.bf16.msra.mxu0 %v11484_v48  ;;  %v11496_v48 = vld [vmem:[%s13497_s1 + $0x18] sm:$0xff]  }
0x230b   : > { %10825 = vmatprep.subr.bf16.mxu0 %v11862_v2 }
0x230e   : > { %10826 = vmatpush3.bf16.msra.mxu0 %v11485_v51  ;;  %v11502_v51 = vld [vmem:[%s13497_s1 + $0x30] sm:$0xff]  }
0x230f   : > { %10827 = vmatprep.subr.bf16.mxu0 %v11862_v2 }
0x2312   : > { %10828 = vmatpush3.bf16.msra.mxu0 %v11486_v37  ;;  %v11504_v37 = vld [vmem:[%s13497_s1 + $0x38] sm:$0xff]  }
0x2313   : > { %10829 = vmatprep.subr.bf16.mxu0 %v11862_v2 }
0x2316   : > { %10830 = vmatpush3.bf16.msra.mxu0 %v11487_v56 }
0x2317   : > { %10831 = vmatprep.subr.bf16.mxu0 %v11862_v2 }
0x231a   : > { %10832 = vmatpush3.bf16.msra.mxu0 %v11488_v61 }
0x231b   : > { %10857 = vmatprep.subr.bf16.mxu0 %v11862_v2 }
0x237d   : > { %v6003_v49 = vpop.xlane.xlu1 %6002 }
0x237e   : > { %v6005_v50 = vmul.f32 0.0078125, %v6003_v49  ;;  %v11498_v49 = vld [vmem:[%s13497_s1 + $0x20] sm:$0xff]  }
0x2380   : > { %v6007_v23 = vadd.f32 1e-05, %v6005_v50  ;;  %v11500_v50 = vld [vmem:[%s13497_s1 + $0x28] sm:$0xff]  }
0x2382   : > { %11665 = vrsqrt.f32 %v6007_v23  ;;  %v11501_v23 = vld [vmem:[%s13495_s8 + $0x30] sm:$0xff]  }
0x238c   : > { %v11666_v59 = vpop.eup %11665 }
0x238d   : > { %v6011_v63 = vmul.f32 %v11666_v59, %v12873_v14  ;;  %v5663_v14 = vrot.slane %v5658_v11, %v5662_v10  ;;  %v11506_v11 = vld [vmem:[%s13497_s1 + $0x48] sm:$0xff]  }
0x238f   : > { %v6019_v0 = vmul.f32 %v9385_v57, %v6011_v63 }
0x2391   : > { %v6027_v1 = vadd.f32 %v9386_v62, %v6019_v0 }
0x2393   : > { %v12919_v4 = vpack.c.bf16 %v6027_v1, %v6026_v60  ;;  %v9368_v60 = vld [vmem:[%s13499_s9] ss:$0 sm:$0xff]  ;;  %s13500_s9 = sld [smem:[#allocation35_spill]] }
0x2395   : > { %10834 = vmatmul.mubr.bf16.vlgmr.msra.gmra.mrb[100].mxu0 %v12919_v4 }
0x2396   : > { %10858 = vmatpush3.bf16.msra.mxu0 %v11489_v53  ;;  %10873 = vmatprep.mubr.msk.bf16.mxu0 %vm11863_vm0, %v11862_v2 }
0x2397   : > { %10859 = vmatprep.subr.bf16.mxu0 %v11862_v2 }
0x239a   : > { %10860 = vmatpush3.bf16.msra.mxu0 %v11491_v6 }
0x239b   : > { %10861 = vmatprep.subr.bf16.mxu0 %v11862_v2 }
0x239e   : > { %10862 = vmatpush3.bf16.msra.mxu0 %v11493_v21 }
0x239f   : > { %10863 = vmatprep.subr.bf16.mxu0 %v11862_v2 }
0x23a2   : > { %10864 = vmatpush3.bf16.msra.mxu0 %v11495_v7 }
0x23a3   : > { %10865 = vmatprep.subr.bf16.mxu0 %v11862_v2 }
0x23a6   : > { %10866 = vmatpush3.bf16.msra.mxu0 %v11497_v3 }
0x23a7   : > { %10867 = vmatprep.subr.bf16.mxu0 %v11862_v2 }
0x23aa   : > { %10868 = vmatpush3.bf16.msra.mxu0 %v11499_v8  ;;  %v11505_v8 = vld [vmem:[%s13497_s1 + $0x40] sm:$0xff]  }
0x23ab   : > { %10869 = vmatprep.subr.bf16.mxu0 %v11862_v2 }
0x23ae   : > { %10870 = vmatpush3.bf16.msra.mxu0 %v11501_v23 }
0x23af   : > { %10871 = vmatprep.subr.bf16.mxu0 %v11862_v2 }
0x23b2   : > { %10872 = vmatpush3.bf16.msra.mxu0 %v11503_v54 }
0x23b3   : > { %10909 = vmatprep.subr.bf16.mxu0 %v11862_v2 }
0x23d0   : > { %v5784_v16 = vpop.f32.mrb[96].mxu0 }
0x23d1   : > { %v5785_v17 = vadd.f32 %v5784_v16, %v5663_v14  ;;  %v5786_v12 = vpop.f32.mrb[97].mxu0  ;;  %v11508_v14 = vld [vmem:[%s13497_s1 + $0x58] sm:$0xff]   ;;  %v11510_v16 = vld [vmem:[%s13497_s1 + $0x68] sm:$0xff]  }
0x23d2   : > { %v5787_v18 = vadd.f32 %v5786_v12, %v5667_v15  ;;  %v5788_v19 = vpop.f32.mrb[98].mxu0  ;;  %v11509_v15 = vld [vmem:[%s13497_s1 + $0x60] sm:$0xff]   ;;  %v11512_v12 = vld [vmem:[%s13497_s1 + $0x78] sm:$0xff]  }
0x23d3   : > { %v5791_v20 = vmul.f32 %v5785_v17, %v5785_v17  ;;  %v5789_v22 = vpop.f32.mrb[99].mxu0 }
0x23d4   : > { %v5792_v24 = vmul.f32 %v5787_v18, %v5787_v18 }
0x23d5   : > { %v5793_v25 = vmul.f32 %v5791_v20, %v5785_v17 }
0x23d6   : > { %v5794_v26 = vmul.f32 %v5792_v24, %v5787_v18 }
0x23d7   : > { %v5795_v27 = vmul.f32 0.044715, %v5793_v25 }
0x23d8   : > { %v5796_v28 = vmul.f32 0.044715, %v5794_v26  ;;  %v9405_v26 = vld [vmem:[%s13501_s13] ss:$0 sm:$0xff] }
0x23d9   : > { %v5797_v29 = vadd.f32 %v5795_v27, %v5785_v17 }
0x23da   : > { %v5798_v31 = vadd.f32 %v5796_v28, %v5787_v18 }
0x23db   : > { %v5799_v32 = vmul.f32 0.7978846, %v5797_v29 }
0x23dc   : > { %v5800_v33 = vmul.f32 0.7978846, %v5798_v31 }
0x23dd   : > { %11667 = vtanh.f32 %v5799_v32 }
0x23de   : > { %11669 = vtanh.f32 %v5800_v33 }
0x23e7   : > { %v11668_v35 = vpop.eup %11667 }
0x23e8   : > { %v11670_v30 = vpop.eup %11669  ;;  %v5803_v36 = vadd.f32 1.0, %v11668_v35 }
0x23e9   : > { %v5804_v38 = vadd.f32 1.0, %v11670_v30 }
0x23ea   : > { %v5805_v39 = vmul.f32 0.5, %v5803_v36 }
0x23eb   : > { %v5806_v40 = vmul.f32 0.5, %v5804_v38  ;;  %v9459_v38 = vld [vmem:[%s13500_s9 + $0x1] ss:$0 sm:$0xff] }
0x23ec   : > { %v5807_v41 = vmul.f32 %v5805_v39, %v5785_v17  ;;  %v11511_v17 = vld [vmem:[%s13497_s1 + $0x70] sm:$0xff]  }
0x23ed   : > { %v5808_v34 = vmul.f32 %v5806_v40, %v5787_v18  ;;  %v9396_v18 = vld [vmem:[%s13500_s9] ss:$0 sm:$0xff] }
0x23ee   : > { %v5809_v44 = vpack.c.bf16 %v5807_v41, %v5807_v41 }
0x23ef   : > { %v5810_v42 = vpack.c.bf16 %v5808_v34, %v5808_v34 }
0x23f1   : > { %5978 = vmatprep.mubr.bf16.mxu1 %v5810_v42 }
0x23f2   : > { %5979 = vmatmul.mubr.bf16.vlgmr.msra.gmra.mrb[96].mxu1 %v5809_v44 }
0x23f3   : > { %10838 = vmatpush3.bf16.msra.mxu1 %v11490_v43  ;;  %10853 = vmatprep.mubr.msk.bf16.mxu1 %vm11863_vm0, %v11862_v2 }
0x23f4   : > { %10839 = vmatprep.subr.bf16.mxu1 %v11862_v2 }
0x23f7   : > { %10840 = vmatpush3.bf16.msra.mxu1 %v11492_v45  ;;  %v13021_v45 = vpop.trf.xlu0 }
0x23f8   : > { %10841 = vmatprep.subr.bf16.mxu1 %v11862_v2 }
0x23fb   : > { %10842 = vmatpush3.bf16.msra.mxu1 %v11494_v47  ;;  %v13023_v23 = vpop.trf.xlu0 }
0x23fc   : > { %10843 = vmatprep.subr.bf16.mxu1 %v11862_v2 }
0x23ff   : > { %10844 = vmatpush3.bf16.msra.mxu1 %v11496_v48 }
0x2400   : > { %10845 = vmatprep.subr.bf16.mxu1 %v11862_v2 }
0x2403   : > { %10846 = vmatpush3.bf16.msra.mxu1 %v11498_v49 }
0x2404   : > { %10847 = vmatprep.subr.bf16.mxu1 %v11862_v2 }
0x2407   : > { %10848 = vmatpush3.bf16.msra.mxu1 %v11500_v50 }
0x2408   : > { %10849 = vmatprep.subr.bf16.mxu1 %v11862_v2 }
0x240b   : > { %10850 = vmatpush3.bf16.msra.mxu1 %v11502_v51 }
0x240c   : > { %10851 = vmatprep.subr.bf16.mxu1 %v11862_v2 }
0x240f   : > { %10852 = vmatpush3.bf16.msra.mxu1 %v11504_v37 }
0x2410   : > { %10877 = vmatprep.subr.bf16.mxu1 %v11862_v2 }
0x2468   : > { %v6135_v56 = vpop.f32.mrb[100].mxu0 }
0x2469   : > { %v12967_v57 = vadd.f32 %v9387_v55, %v6135_v56  ;;  %v10835_v58 = vpop.f32.mrb[101].mxu0 }
0x246a   : > { %v6138_v59 = vpop.f32.mrb[102].mxu0 }
0x246b   : > { %v12969_v61 = vadd.f32 %v9387_v55, %v6138_v59  ;;  %v10836_v62 = vpop.f32.mrb[103].mxu0 }
0x246d   : > { %v6142_v63 = vpack.c.bf16 %v12969_v61, %v12967_v57 }
0x24c5   : > { %v10013_v0 = vpop.f32.mrb[96].mxu1 }
0x24c6   : > { %v10014_v1 = vpop.f32.mrb[97].mxu1 }
0x24c7   : > { %v10015_v53 = vadd.f32 %v10014_v1, %v10013_v0  ;;  %v10016_v6 = vpop.f32.mrb[98].mxu1 }
0x24c8   : > { %v10017_v21 = vpop.f32.mrb[99].mxu1 }
0x24c9   : > { %v5981_v7 = vadd.f32 %v10015_v53, %v9368_v60 }
0x24cb   : > { %v5986_v3 = vadd.f32 %v5981_v7, %v12844_v46  ;;  %v11507_v46 = vld [vmem:[%s13497_s1 + $0x50] sm:$0xff]  }
0x24cd   : > { %v12980_v9 = vpack.c.bf16 %v5986_v3, %v5986_v3  ;;  %5987 = vst [vmem:[%s12982_s14] sm:$0xff] %v5986_v3 }
0x24cf   : > { %10854 = vmatmul.mubr.bf16.vlgmr.msra.gmra.mrb[100].mxu1 %v12980_v9  ;;  %10874 = vmatmul.mubr.bf16.vlgmr.msra.gmra.mrb[104].mxu0 %v12980_v9 }
0x24d0   : > { %10910 = vmatpush3.bf16.msra.mxu0 %v11505_v8  ;;  %10925 = vmatprep.mubr.msk.bf16.mxu0 %vm11863_vm0, %v11862_v2 }
0x24d1   : > { %10911 = vmatprep.subr.bf16.mxu0 %v11862_v2  ;;  %10879 = vmatprep.mubr.msk.bf16.mxu1 %vm11863_vm0, %v11862_v2 }
0x24d4   : > { %10912 = vmatpush3.bf16.msra.mxu0 %v11506_v11 }
0x24d5   : > { %10913 = vmatprep.subr.bf16.mxu0 %v11862_v2 }
0x24d8   : > { %10914 = vmatpush3.bf16.msra.mxu0 %v11507_v46 }
0x24d9   : > { %10915 = vmatprep.subr.bf16.mxu0 %v11862_v2 }
0x24dc   : > { %10916 = vmatpush3.bf16.msra.mxu0 %v11508_v14  ;;  %v11513_v14 = vld [vmem:[%s13492_s5 + $0x40] sm:$0xff]  }
0x24dd   : > { %10917 = vmatprep.subr.bf16.mxu0 %v11862_v2 }
0x24e0   : > { %10918 = vmatpush3.bf16.msra.mxu0 %v11509_v15 }
0x24e1   : > { %10919 = vmatprep.subr.bf16.mxu0 %v11862_v2 }
0x24e4   : > { %10920 = vmatpush3.bf16.msra.mxu0 %v11510_v16  ;;  %v11514_v16 = vld [vmem:[%s13492_s5 + $0x48] sm:$0xff]  }
0x24e5   : > { %10921 = vmatprep.subr.bf16.mxu0 %v11862_v2 }
0x24e8   : > { %10922 = vmatpush3.bf16.msra.mxu0 %v11511_v17  ;;  %v11515_v17 = vld [vmem:[%s13492_s5 + $0x50] sm:$0xff]  }
0x24e9   : > { %10923 = vmatprep.subr.bf16.mxu0 %v11862_v2 }
0x24ec   : > { %10924 = vmatpush3.bf16.msra.mxu0 %v11512_v12  ;;  %v11516_v12 = vld [vmem:[%s13492_s5 + $0x58] sm:$0xff]  }
0x24ed   : > { %10949 = vmatprep.subr.bf16.mxu0 %v11862_v2 }
0x24ef   : > { %10926 = vmatmul.mubr.bf16.vlgmr.msra.gmra.mrb[108].mxu0 %v12980_v9 }
0x24f0   : > { %10951 = vmatprep.mubr.msk.bf16.mxu0 %vm11863_vm0, %v11862_v2 }
0x25a2   : > { %v6248_v19 = vpop.f32.mrb[100].mxu1  ;;  %v6360_v20 = vpop.f32.mrb[104].mxu0 }
0x25a3   : > { %v6249_v22 = vadd.f32 %v9396_v18, %v6248_v19  ;;  %v10855_v24 = vpop.f32.mrb[101].mxu1  ;;  %v10875_v25 = vpop.f32.mrb[105].mxu0  ;;  %v6361_v35 = vadd.f32 %v9405_v26, %v6360_v20  ;;  %v11517_v18 = vld [vmem:[%s13492_s5 + $0x60] sm:$0xff]   ;;  %v11518_v19 = vld [vmem:[%s13492_s5 + $0x68] sm:$0xff]   ;;  %v11519_v20 = vld [vmem:[%s13492_s5 + $0x70] sm:$0xff]  }
0x25a4   : > { %v6251_v27 = vpop.f32.mrb[102].mxu1  ;;  %v6363_v28 = vpop.f32.mrb[106].mxu0  ;;  %v11521_v24 = vld [vmem:[%s13495_s8 + $0x40] sm:$0xff]   ;;  %v11522_v25 = vld [vmem:[%s13495_s8 + $0x48] sm:$0xff]   ;;  %v11523_v26 = vld [vmem:[%s13495_s8 + $0x50] sm:$0xff]  }
0x25a5   : > { %v6254_v29 = vpack.c.bf16 %v6249_v22, %v6249_v22  ;;  %v10856_v31 = vpop.f32.mrb[103].mxu1  ;;  %v10876_v32 = vpop.f32.mrb[107].mxu0  ;;  %v6366_v30 = vpack.c.bf16 %v6361_v35, %v6361_v35  ;;  %v11520_v22 = vld [vmem:[%s13492_s5 + $0x78] sm:$0xff]   ;;  %v11525_v28 = vld [vmem:[%s13495_s8 + $0x60] sm:$0xff]   ;;  %v11530_v35 = vld [vmem:[%s13502_s17 + $0x8] sm:$0xff]  }
0x25a6   : > { %v11524_v27 = vld [vmem:[%s13495_s8 + $0x58] sm:$0xff]   ;;  %v11527_v31 = vld [vmem:[%s13495_s8 + $0x70] sm:$0xff]  }
0x25a7   : > { %v6371_v33 = vsel %vm1849_vm1, %v6254_v29, 0  ;;  %v6445_v36 = vsel %vm3975_vm8, %v6366_v30, 0  ;;  %v11526_v29 = vld [vmem:[%s13495_s8 + $0x68] sm:$0xff]   ;;  %v11528_v32 = vld [vmem:[%s13495_s8 + $0x78] sm:$0xff]  }
0x25a8   : > { %10878 = vmatpush3.bf16.xpose.msra.mxu1 %v6371_v33  ;;  %v11529_v33 = vld [vmem:[%s13502_s17] sm:$0xff]  }
0x25a9   : > { %10883 = vmatprep.subr.bf16.mxu1 %v11862_v2 }
0x25af   : > { %10880 = vmatmul.mubr.msk.bf16.vlgmr.msra.gmra.mrb[104].mxu1 %vm1849_vm1, %v6142_v63 }
0x25b0   : > { %10884 = vmatpush3.bf16.msra.mxu1 %v6445_v36  ;;  %10885 = vmatprep.mubr.msk.bf16.mxu1 %vm11863_vm0, %v11862_v2 }
0x25b1   : > { %10889 = vmatprep.subr.bf16.mxu1 %v11862_v2 }
0x25c2   : > { %v6715_v39 = vpop.f32.mrb[108].mxu0 }
0x25c3   : > { %v6716_v40 = vadd.f32 %v9459_v38, %v6715_v39  ;;  %v10927_v41 = vpop.f32.mrb[109].mxu0  ;;  %v11531_v39 = vld [vmem:[%s13497_s1 + $0x80] sm:$0xff]  }
0x25c4   : > { %v6718_v34 = vpop.f32.mrb[110].mxu0 }
0x25c5   : > { %v6721_v42 = vpack.c.bf16 %v6716_v40, %v6716_v40  ;;  %v10928_v43 = vpop.f32.mrb[111].mxu0  ;;  %v11532_v34 = vld [vmem:[%s13497_s1 + $0x88] sm:$0xff]  }
0x25c6   : > { %v11534_v43 = vld [vmem:[%s13497_s1 + $0x98] sm:$0xff]  }
0x25c7   : > { %v6840_v44 = vsel %vm1849_vm1, %v6721_v42, 0  ;;  %v11533_v42 = vld [vmem:[%s13497_s1 + $0x90] sm:$0xff]  }
0x25c8   : > { %10950 = vmatpush3.bf16.xpose.msra.mxu0 %v6840_v44  ;;  %v11535_v44 = vld [vmem:[%s13497_s1 + $0xa0] sm:$0xff]  }
0x25c9   : > { %10955 = vmatprep.subr.bf16.mxu0 %v11862_v2 }
0x2682   : > { %v6407_v47 = vpop.f32.mrb[104].mxu1 }
0x2683   : > { %v6414_v48 = vmul.f32 0.17677669, %v6407_v47  ;;  %v10881_v49 = vpop.f32.mrb[105].mxu1  ;;  %v11536_v47 = vld [vmem:[%s13497_s1 + $0xa8] sm:$0xff]  }
0x2684   : > { %v6410_v50 = vpop.f32.mrb[106].mxu1  ;;  %v11538_v49 = vld [vmem:[%s13497_s1 + $0xb8] sm:$0xff]  }
0x2685   : > { %v6415_v51 = vmul.f32 0.17677669, %v6410_v50  ;;  %v10882_v54 = vpop.f32.mrb[107].mxu1  ;;  %v6416_v37 = vadd.f32 %v6414_v48, %v13021_v45  ;;  %v11537_v48 = vld [vmem:[%s13497_s1 + $0xb0] sm:$0xff]   ;;  %v9433_v50 = vld [vmem:[%s13498_s3 + $0x1] ss:$0 sm:$0xff] }
0x2687   : > { %v6418_v55 = vsel %vm3959_vm9, %v6416_v37, -inf  ;;  %v6417_v56 = vadd.f32 %v6415_v51, %v13023_v23 }
0x2688   : > { %6419 = vmax.xlane.f32.xlu1 %v6418_v55 }
0x2689   : > { %v6421_v57 = vsel %vm3959_vm9, %v6417_v56, -inf }
0x268c   : > { %6422 = vmax.xlane.f32.xlu1 %v6421_v57 }
0x2715   : > { %v6420_v58 = vpop.xlane.xlu1 %6419 }
0x2716   : > { %v6424_v59 = vsub.f32 %v6416_v37, %v6420_v58 }
0x2718   : > { %v6426_v61 = vmul.f32 1.442695, %v6424_v59  ;;  %v9485_v59 = vld [vmem:[%s13501_s13 + $0x1] ss:$0 sm:$0xff] }
0x2719   : > { %v6423_v62 = vpop.xlane.xlu1 %6422 }
0x271a   : > { %11671 = vpow2.f32 %v6426_v61  ;;  %v6425_v63 = vsub.f32 %v6417_v56, %v6423_v62 }
0x271c   : > { %v6428_v0 = vmul.f32 1.442695, %v6425_v63 }
0x271e   : > { %11673 = vpow2.f32 %v6428_v0 }
0x2724   : > { %v11672_v60 = vpop.eup %11671 }
0x2725   : > { %v6430_v1 = vsel %vm3959_vm9, %v11672_v60, 0.0 }
0x2726   : > { %6431 = vadd.xlane.f32.xlu1 %v6430_v1 }
0x2728   : > { %v11674_v53 = vpop.eup %11673 }
0x2729   : > { %v6433_v6 = vsel %vm3959_vm9, %v11674_v53, 0.0 }
0x272a   : > { %6434 = vadd.xlane.f32.xlu1 %v6433_v6 }
0x27b3   : > { %v6432_v21 = vpop.xlane.xlu1 %6431 }
0x27b4   : > { %11675 = vrcp.f32 %v6432_v21 }
0x27b7   : > { %v6435_v7 = vpop.xlane.xlu1 %6434 }
0x27b8   : > { %11677 = vrcp.f32 %v6435_v7 }
0x27be   : > { %v11676_v3 = vpop.eup %11675 }
0x27bf   : > { %v6438_v11 = vmul.f32 %v11676_v3, %v11672_v60 }
0x27c2   : > { %v11678_v8 = vpop.eup %11677 }
0x27c3   : > { %v6439_v46 = vmul.f32 %v11678_v8, %v11674_v53  ;;  %v9549_v8 = vld [vmem:[%s13500_s9 + $0x2] ss:$0 sm:$0xff] }
0x27c5   : > { %v6440_v15 = vpack.c.bf16 %v6439_v46, %v6438_v11 }
0x27c7   : > { %10886 = vmatmul.mubr.msk.bf16.vlgmr.msra.gmra.mrb[108].mxu1 %vm3959_vm9, %v6440_v15 }
0x27c8   : > { %10890 = vmatpush3.bf16.msra.mxu1 %v11513_v14  ;;  %10905 = vmatprep.mubr.msk.bf16.mxu1 %vm11863_vm0, %v11862_v2 }
0x27c9   : > { %10891 = vmatprep.subr.bf16.mxu1 %v11862_v2 }
0x27cc   : > { %10892 = vmatpush3.bf16.msra.mxu1 %v11514_v16 }
0x27cd   : > { %10893 = vmatprep.subr.bf16.mxu1 %v11862_v2 }
0x27d0   : > { %10894 = vmatpush3.bf16.msra.mxu1 %v11515_v17 }
0x27d1   : > { %10895 = vmatprep.subr.bf16.mxu1 %v11862_v2 }
0x27d4   : > { %10896 = vmatpush3.bf16.msra.mxu1 %v11516_v12 }
0x27d5   : > { %10897 = vmatprep.subr.bf16.mxu1 %v11862_v2 }
0x27d8   : > { %10898 = vmatpush3.bf16.msra.mxu1 %v11517_v18 }
0x27d9   : > { %10899 = vmatprep.subr.bf16.mxu1 %v11862_v2 }
0x27dc   : > { %10900 = vmatpush3.bf16.msra.mxu1 %v11518_v19 }
0x27dd   : > { %10901 = vmatprep.subr.bf16.mxu1 %v11862_v2 }
0x27e0   : > { %10902 = vmatpush3.bf16.msra.mxu1 %v11519_v20 }
0x27e1   : > { %10903 = vmatprep.subr.bf16.mxu1 %v11862_v2 }
0x27e4   : > { %10904 = vmatpush3.bf16.msra.mxu1 %v11520_v22 }
0x27e5   : > { %10929 = vmatprep.subr.bf16.mxu1 %v11862_v2 }
0x27e7   : > { %10906 = vmatmul.mubr.bf16.vlgmr.msra.gmra.mrb[112].mxu1 %v12919_v4 }
0x27e8   : > { %10930 = vmatpush3.bf16.msra.mxu1 %v11521_v24  ;;  %10945 = vmatprep.mubr.msk.bf16.mxu1 %vm11863_vm0, %v11862_v2 }
0x27e9   : > { %10931 = vmatprep.subr.bf16.mxu1 %v11862_v2 }
0x27ec   : > { %10932 = vmatpush3.bf16.msra.mxu1 %v11522_v25 }
0x27ed   : > { %10933 = vmatprep.subr.bf16.mxu1 %v11862_v2 }
0x27f0   : > { %10934 = vmatpush3.bf16.msra.mxu1 %v11523_v26 }
0x27f1   : > { %10935 = vmatprep.subr.bf16.mxu1 %v11862_v2 }
0x27f4   : > { %10936 = vmatpush3.bf16.msra.mxu1 %v11524_v27 }
0x27f5   : > { %10937 = vmatprep.subr.bf16.mxu1 %v11862_v2 }
0x27f8   : > { %10938 = vmatpush3.bf16.msra.mxu1 %v11525_v28 }
0x27f9   : > { %10939 = vmatprep.subr.bf16.mxu1 %v11862_v2 }
0x27fc   : > { %10940 = vmatpush3.bf16.msra.mxu1 %v11526_v29 }
0x27fd   : > { %10941 = vmatprep.subr.bf16.mxu1 %v11862_v2 }
0x2800   : > { %10942 = vmatpush3.bf16.msra.mxu1 %v11527_v31 }
0x2801   : > { %10943 = vmatprep.subr.bf16.mxu1 %v11862_v2 }
0x2804   : > { %10944 = vmatpush3.bf16.msra.mxu1 %v11528_v32 }
0x2805   : > { %10969 = vmatprep.subr.bf16.mxu1 %v11862_v2 }
0x2807   : > { %10946 = vmatmul.mubr.bf16.vlgmr.msra.gmra.mrb[116].mxu1 %v12980_v9 }
0x2808   : > { %10970 = vmatpush3.bf16.msra.mxu1 %v11529_v33  ;;  %10973 = vmatprep.mubr.msk.bf16.mxu1 %vm11863_vm0, %v11862_v2 }
0x2809   : > { %10971 = vmatprep.subr.bf16.mxu1 %v11862_v2 }
0x280c   : > { %10972 = vmatpush3.bf16.msra.mxu1 %v11530_v35 }
0x280d   : > { %10997 = vmatprep.subr.bf16.mxu1 %v11862_v2 }
0x289a   : > { %v6481_v30 = vpop.f32.mrb[108].mxu1 }
0x289b   : > { %v10887_v36 = vpop.f32.mrb[109].mxu1 }
0x289c   : > { %v6484_v38 = vpop.f32.mrb[110].mxu1 }
0x289d   : > { %v6488_v40 = vpack.c.bf16 %v6484_v38, %v6481_v30  ;;  %v10888_v41 = vpop.f32.mrb[111].mxu1 }
0x289f   : > { %10974 = vmatmul.mubr.msk.bf16.vlgmr.msra.gmra.mrb[120].mxu1 %vm1849_vm1, %v6488_v40 }
0x28a0   : > { %10998 = vmatpush3.bf16.msra.mxu1 %v11531_v39  ;;  %11013 = vmatprep.mubr.msk.bf16.mxu1 %vm11863_vm0, %v11862_v2 }
0x28a1   : > { %10999 = vmatprep.subr.bf16.mxu1 %v11862_v2 }
0x28a4   : > { %11000 = vmatpush3.bf16.msra.mxu1 %v11532_v34 }
0x28a5   : > { %11001 = vmatprep.subr.bf16.mxu1 %v11862_v2 }
0x28a8   : > { %11002 = vmatpush3.bf16.msra.mxu1 %v11533_v42 }
0x28a9   : > { %11003 = vmatprep.subr.bf16.mxu1 %v11862_v2 }
0x28ac   : > { %11004 = vmatpush3.bf16.msra.mxu1 %v11534_v43 }
0x28ad   : > { %11005 = vmatprep.subr.bf16.mxu1 %v11862_v2 }
0x28b0   : > { %11006 = vmatpush3.bf16.msra.mxu1 %v11535_v44 }
0x28b1   : > { %11007 = vmatprep.subr.bf16.mxu1 %v11862_v2 }
0x28b4   : > { %11008 = vmatpush3.bf16.msra.mxu1 %v11536_v47 }
0x28b5   : > { %11009 = vmatprep.subr.bf16.mxu1 %v11862_v2 }
0x28b8   : > { %11010 = vmatpush3.bf16.msra.mxu1 %v11537_v48 }
0x28b9   : > { %11011 = vmatprep.subr.bf16.mxu1 %v11862_v2 }
0x28ba   : > { %v6600_v51 = vpop.f32.mrb[112].mxu1 }
0x28bb   : > { %v10907_v54 = vpop.f32.mrb[113].mxu1  ;;  %v6601_v55 = vadd.f32 %v9433_v50, %v6600_v51  ;;  %v11540_v51 = vld [vmem:[%s13502_s17 + $0x18] sm:$0xff]  }
0x28bc   : > { %v6603_v37 = vpop.f32.mrb[114].mxu1  ;;  %11012 = vmatpush3.bf16.msra.mxu1 %v11538_v49  ;;  %v11539_v49 = vld [vmem:[%s13502_s17 + $0x10] sm:$0xff]  }
0x28bd   : > { %v6604_v56 = vadd.f32 %v9433_v50, %v6603_v37  ;;  %v10908_v57 = vpop.f32.mrb[115].mxu1  ;;  %11037 = vmatprep.subr.bf16.mxu1 %v11862_v2 }
0x28bf   : > { %v6607_v58 = vpack.c.bf16 %v6604_v56, %v6601_v55  ;;  %11014 = vmatmul.mubr.bf16.vlgmr.msra.gmra.mrb[124].mxu1 %v12980_v9  ;;  %v11541_v56 = vld [vmem:[%s13492_s5 + $0x80] sm:$0xff]  }
0x28c0   : > { %11039 = vmatprep.mubr.msk.bf16.mxu1 %vm11863_vm0, %v11862_v2 }
0x28c1   : > { %10952 = vmatmul.mubr.msk.bf16.vlgmr.msra.gmra.mrb[112].mxu0 %vm1849_vm1, %v6607_v58 }
0x28c2   : > { %10957 = vmatprep.mubr.msk.bf16.mxu0 %vm11863_vm0, %v11862_v2 }
0x28da   : > { %v6829_v61 = vpop.f32.mrb[116].mxu1 }
0x28db   : > { %v6830_v62 = vadd.f32 %v9485_v59, %v6829_v61  ;;  %v10947_v63 = vpop.f32.mrb[117].mxu1  ;;  %v11542_v59 = vld [vmem:[%s13492_s5 + $0x88] sm:$0xff]   ;;  %v11543_v61 = vld [vmem:[%s13492_s5 + $0x90] sm:$0xff]  }
0x28dc   : > { %v6832_v0 = vpop.f32.mrb[118].mxu1  ;;  %v11545_v63 = vld [vmem:[%s13492_s5 + $0xa0] sm:$0xff]  }
0x28dd   : > { %v6835_v60 = vpack.c.bf16 %v6830_v62, %v6830_v62  ;;  %v10948_v1 = vpop.f32.mrb[119].mxu1  ;;  %v11544_v62 = vld [vmem:[%s13492_s5 + $0x98] sm:$0xff]   ;;  %v11546_v0 = vld [vmem:[%s13492_s5 + $0xa8] sm:$0xff]  }
0x28de   : > { %v11548_v1 = vld [vmem:[%s13492_s5 + $0xb8] sm:$0xff]  }
0x28df   : > { %v6914_v53 = vsel %vm3975_vm8, %v6835_v60, 0  ;;  %v11547_v60 = vld [vmem:[%s13492_s5 + $0xb0] sm:$0xff]  }
0x28e0   : > { %10956 = vmatpush3.bf16.msra.mxu0 %v6914_v53  ;;  %v11549_v53 = vld [vmem:[%s13495_s8 + $0x80] sm:$0xff]  }
0x28e1   : > { %10961 = vmatprep.subr.bf16.mxu0 %v11862_v2 }
0x2972   : > { %v13105_v6 = vpop.f32.mrb[120].mxu1 }
0x2973   : > { %v10975_v21 = vpop.f32.mrb[121].mxu1 }
0x2974   : > { %v13107_v7 = vpop.f32.mrb[122].mxu1  ;;  %v11550_v21 = vld [vmem:[%s13495_s8 + $0x88] sm:$0xff]  }
0x2975   : > { %v10976_v3 = vpop.f32.mrb[123].mxu1 }
0x2976   : > { %v11551_v3 = vld [vmem:[%s13495_s8 + $0x90] sm:$0xff]  }
0x2992   : > { %v7297_v11 = vpop.f32.mrb[124].mxu1 }
0x2993   : > { %v7298_v46 = vadd.f32 %v9549_v8, %v7297_v11  ;;  %v11015_v14 = vpop.f32.mrb[125].mxu1  ;;  %v11552_v8 = vld [vmem:[%s13495_s8 + $0x98] sm:$0xff]   ;;  %v11553_v11 = vld [vmem:[%s13495_s8 + $0xa0] sm:$0xff]  }
0x2994   : > { %v6876_v15 = vpop.f32.mrb[112].mxu0  ;;  %v7300_v16 = vpop.f32.mrb[126].mxu1  ;;  %v11555_v14 = vld [vmem:[%s13495_s8 + $0xb0] sm:$0xff]  }
0x2995   : > { %v7303_v17 = vpack.c.bf16 %v7298_v46, %v7298_v46  ;;  %v6883_v12 = vmul.f32 0.17677669, %v6876_v15  ;;  %v10953_v18 = vpop.f32.mrb[113].mxu0  ;;  %v11016_v19 = vpop.f32.mrb[127].mxu1  ;;  %v11554_v46 = vld [vmem:[%s13495_s8 + $0xa8] sm:$0xff]   ;;  %v11556_v15 = vld [vmem:[%s13495_s8 + $0xb8] sm:$0xff]  }
0x2996   : > { %v6879_v20 = vpop.f32.mrb[114].mxu0  ;;  %v11557_v16 = vld [vmem:[%s13497_s1 + $0xc0] sm:$0xff]   ;;  %v11560_v18 = vld [vmem:[%s13497_s1 + $0xd8] sm:$0xff]  }
0x2997   : > { %v7422_v22 = vsel %vm1849_vm1, %v7303_v17, 0  ;;  %v6884_v24 = vmul.f32 0.17677669, %v6879_v20  ;;  %v10954_v25 = vpop.f32.mrb[115].mxu0  ;;  %v6885_v26 = vadd.f32 %v6883_v12, %v13021_v45  ;;  %v11558_v17 = vld [vmem:[%s13497_s1 + $0xc8] sm:$0xff]   ;;  %v11559_v12 = vld [vmem:[%s13497_s1 + $0xd0] sm:$0xff]  }
0x2998   : > { %11038 = vmatpush3.bf16.xpose.msra.mxu1 %v7422_v22  ;;  %v11561_v19 = vld [vmem:[%s13497_s1 + $0xe0] sm:$0xff]   ;;  %v11562_v20 = vld [vmem:[%s13497_s1 + $0xe8] sm:$0xff]   ;;  %v11563_v22 = vld [vmem:[%s13497_s1 + $0xf0] sm:$0xff]  }
0x2999   : > { %v6887_v27 = vsel %vm3959_vm9, %v6885_v26, -inf  ;;  %v6886_v28 = vadd.f32 %v6884_v24, %v13023_v23  ;;  %11043 = vmatprep.subr.bf16.mxu1 %v11862_v2  ;;  %v11564_v24 = vld [vmem:[%s13497_s1 + $0xf8] sm:$0xff]   ;;  %s13503_s1 = sld [smem:[#allocation39_spill]] }
0x299a   : > { %6888 = vmax.xlane.f32.xlu1 %v6887_v27 }
0x299b   : > { %v6890_v29 = vsel %vm3959_vm9, %v6886_v28, -inf }
0x299e   : > { %6891 = vmax.xlane.f32.xlu1 %v6890_v29 }
0x2a27   : > { %v6889_v31 = vpop.xlane.xlu1 %6888 }
0x2a28   : > { %v6893_v32 = vsub.f32 %v6885_v26, %v6889_v31 }
0x2a2a   : > { %v6895_v33 = vmul.f32 1.442695, %v6893_v32  ;;  %v9523_v32 = vld [vmem:[%s13498_s3 + $0x2] ss:$0 sm:$0xff] }
0x2a2b   : > { %v6892_v35 = vpop.xlane.xlu1 %6891 }
0x2a2c   : > { %11679 = vpow2.f32 %v6895_v33  ;;  %v6894_v30 = vsub.f32 %v6886_v28, %v6892_v35 }
0x2a2e   : > { %v6897_v36 = vmul.f32 1.442695, %v6894_v30 }
0x2a30   : > { %11681 = vpow2.f32 %v6897_v36 }
0x2a36   : > { %v11680_v38 = vpop.eup %11679 }
0x2a37   : > { %v6899_v39 = vsel %vm3959_vm9, %v11680_v38, 0.0 }
0x2a38   : > { %6900 = vadd.xlane.f32.xlu1 %v6899_v39 }
0x2a3a   : > { %v11682_v40 = vpop.eup %11681 }
0x2a3b   : > { %v6902_v41 = vsel %vm3959_vm9, %v11682_v40, 0.0 }
0x2a3c   : > { %6903 = vadd.xlane.f32.xlu1 %v6902_v41 }
0x2ac5   : > { %v6901_v34 = vpop.xlane.xlu1 %6900 }
0x2ac6   : > { %11683 = vrcp.f32 %v6901_v34 }
0x2ac9   : > { %v6904_v42 = vpop.xlane.xlu1 %6903 }
0x2aca   : > { %11685 = vrcp.f32 %v6904_v42 }
0x2ad0   : > { %v11684_v43 = vpop.eup %11683 }
0x2ad1   : > { %v6907_v47 = vmul.f32 %v11684_v43, %v11680_v38 }
0x2ad4   : > { %v11686_v44 = vpop.eup %11685 }
0x2ad5   : > { %v6908_v48 = vmul.f32 %v11686_v44, %v11682_v40 }
0x2ad7   : > { %v6909_v50 = vpack.c.bf16 %v6908_v48, %v6907_v47  ;;  %v9636_v48 = vld [vmem:[%s13500_s9 + $0x3] ss:$0 sm:$0xff] }
0x2ad9   : > { %10958 = vmatmul.mubr.msk.bf16.vlgmr.msra.gmra.mrb[116].mxu0 %vm3959_vm9, %v6909_v50 }
0x2ada   : > { %10962 = vmatpush3.bf16.msra.mxu0 %v11539_v49  ;;  %10965 = vmatprep.mubr.msk.bf16.mxu0 %vm11863_vm0, %v11862_v2 }
0x2adb   : > { %10963 = vmatprep.subr.bf16.mxu0 %v11862_v2 }
0x2ade   : > { %10964 = vmatpush3.bf16.msra.mxu0 %v11540_v51 }
0x2adf   : > { %10977 = vmatprep.subr.bf16.mxu0 %v11862_v2 }
0x2bac   : > { %v6950_v54 = vpop.f32.mrb[116].mxu0 }
0x2bad   : > { %v10959_v37 = vpop.f32.mrb[117].mxu0 }
0x2bae   : > { %v6953_v55 = vpop.f32.mrb[118].mxu0 }
0x2baf   : > { %v6957_v57 = vpack.c.bf16 %v6953_v55, %v6950_v54  ;;  %v10960_v58 = vpop.f32.mrb[119].mxu0 }
0x2bb1   : > { %10966 = vmatmul.mubr.msk.bf16.vlgmr.msra.gmra.mrb[120].mxu0 %vm1849_vm1, %v6957_v57 }
0x2bb2   : > { %10978 = vmatpush3.bf16.msra.mxu0 %v11541_v56  ;;  %10993 = vmatprep.mubr.msk.bf16.mxu0 %vm11863_vm0, %v11862_v2 }
0x2bb3   : > { %10979 = vmatprep.subr.bf16.mxu0 %v11862_v2 }
0x2bb6   : > { %10980 = vmatpush3.bf16.msra.mxu0 %v11542_v59 }
0x2bb7   : > { %10981 = vmatprep.subr.bf16.mxu0 %v11862_v2 }
0x2bba   : > { %10982 = vmatpush3.bf16.msra.mxu0 %v11543_v61 }
0x2bbb   : > { %10983 = vmatprep.subr.bf16.mxu0 %v11862_v2 }
0x2bbe   : > { %10984 = vmatpush3.bf16.msra.mxu0 %v11544_v62 }
0x2bbf   : > { %10985 = vmatprep.subr.bf16.mxu0 %v11862_v2 }
0x2bc2   : > { %10986 = vmatpush3.bf16.msra.mxu0 %v11545_v63 }
0x2bc3   : > { %10987 = vmatprep.subr.bf16.mxu0 %v11862_v2 }
0x2bc6   : > { %10988 = vmatpush3.bf16.msra.mxu0 %v11546_v0 }
0x2bc7   : > { %10989 = vmatprep.subr.bf16.mxu0 %v11862_v2 }
0x2bca   : > { %10990 = vmatpush3.bf16.msra.mxu0 %v11547_v60 }
0x2bcb   : > { %10991 = vmatprep.subr.bf16.mxu0 %v11862_v2 }
0x2bce   : > { %10992 = vmatpush3.bf16.msra.mxu0 %v11548_v1 }
0x2bcf   : > { %11017 = vmatprep.subr.bf16.mxu0 %v11862_v2 }
0x2bd1   : > { %10994 = vmatmul.mubr.bf16.vlgmr.msra.gmra.mrb[124].mxu0 %v12919_v4 }
0x2bd2   : > { %11018 = vmatpush3.bf16.msra.mxu0 %v11549_v53  ;;  %11033 = vmatprep.mubr.msk.bf16.mxu0 %vm11863_vm0, %v11862_v2 }
0x2bd3   : > { %11019 = vmatprep.subr.bf16.mxu0 %v11862_v2 }
0x2bd6   : > { %11020 = vmatpush3.bf16.msra.mxu0 %v11550_v21 }
0x2bd7   : > { %11021 = vmatprep.subr.bf16.mxu0 %v11862_v2 }
0x2bda   : > { %11022 = vmatpush3.bf16.msra.mxu0 %v11551_v3 }
0x2bdb   : > { %11023 = vmatprep.subr.bf16.mxu0 %v11862_v2 }
0x2bde   : > { %11024 = vmatpush3.bf16.msra.mxu0 %v11552_v8 }
0x2bdf   : > { %11025 = vmatprep.subr.bf16.mxu0 %v11862_v2 }
0x2be2   : > { %11026 = vmatpush3.bf16.msra.mxu0 %v11553_v11 }
0x2be3   : > { %11027 = vmatprep.subr.bf16.mxu0 %v11862_v2 }
0x2be6   : > { %11028 = vmatpush3.bf16.msra.mxu0 %v11554_v46 }
0x2be7   : > { %11029 = vmatprep.subr.bf16.mxu0 %v11862_v2 }
0x2bea   : > { %11030 = vmatpush3.bf16.msra.mxu0 %v11555_v14 }
0x2beb   : > { %11031 = vmatprep.subr.bf16.mxu0 %v11862_v2 }
0x2bee   : > { %11032 = vmatpush3.bf16.msra.mxu0 %v11556_v15 }
0x2bef   : > { %11077 = vmatprep.subr.bf16.mxu0 %v11862_v2 }
0x2bf1   : > { %11034 = vmatmul.mubr.bf16.vlgmr.msra.gmra.mrb[128].mxu0 %v12980_v9 }
0x2bf2   : > { %11078 = vmatpush3.bf16.msra.mxu0 %v11557_v16  ;;  %11093 = vmatprep.mubr.msk.bf16.mxu0 %vm11863_vm0, %v11862_v2 }
0x2bf3   : > { %11079 = vmatprep.subr.bf16.mxu0 %v11862_v2 }
0x2bf6   : > { %11080 = vmatpush3.bf16.msra.mxu0 %v11558_v17 }
0x2bf7   : > { %11081 = vmatprep.subr.bf16.mxu0 %v11862_v2 }
0x2bfa   : > { %11082 = vmatpush3.bf16.msra.mxu0 %v11559_v12 }
0x2bfb   : > { %11083 = vmatprep.subr.bf16.mxu0 %v11862_v2 }
0x2bfe   : > { %11084 = vmatpush3.bf16.msra.mxu0 %v11560_v18 }
0x2bff   : > { %11085 = vmatprep.subr.bf16.mxu0 %v11862_v2 }
0x2c02   : > { %11086 = vmatpush3.bf16.msra.mxu0 %v11561_v19 }
0x2c03   : > { %11087 = vmatprep.subr.bf16.mxu0 %v11862_v2 }
0x2c06   : > { %11088 = vmatpush3.bf16.msra.mxu0 %v11562_v20 }
0x2c07   : > { %11089 = vmatprep.subr.bf16.mxu0 %v11862_v2 }
0x2c0a   : > { %11090 = vmatpush3.bf16.msra.mxu0 %v11563_v22 }
0x2c0b   : > { %11091 = vmatprep.subr.bf16.mxu0 %v11862_v2 }
0x2c0e   : > { %11092 = vmatpush3.bf16.msra.mxu0 %v11564_v24 }
0x2c0f   : > { %11117 = vmatprep.subr.bf16.mxu0 %v11862_v2 }
0x2c11   : > { %11094 = vmatmul.mubr.bf16.vlgmr.msra.gmra.mrb[132].mxu0 %v12980_v9 }
0x2c12   : > { %11119 = vmatprep.mubr.msk.bf16.mxu0 %vm11863_vm0, %v11862_v2 }
0x2c84   : > { %v7012_v25 = vpop.f32.mrb[120].mxu0 }
0x2c85   : > { %v13186_v26 = vadd.f32 %v13105_v6, %v7012_v25  ;;  %v10967_v27 = vpop.f32.mrb[121].mxu0  ;;  %v9575_v6 = vld [vmem:[%s13501_s13 + $0x2] ss:$0 sm:$0xff] }
0x2c86   : > { %v7015_v28 = vpop.f32.mrb[122].mxu0  ;;  %v11565_v27 = vld [vmem:[%s13502_s17 + $0x20] sm:$0xff]  }
0x2c87   : > { %v13189_v29 = vadd.f32 %v13107_v7, %v7015_v28  ;;  %v10968_v31 = vpop.f32.mrb[123].mxu0 }
0x2c88   : > { %v11566_v31 = vld [vmem:[%s13502_s17 + $0x28] sm:$0xff]  }
0x2ca4   : > { %v7182_v33 = vpop.f32.mrb[124].mxu0 }
0x2ca5   : > { %v10995_v35 = vpop.f32.mrb[125].mxu0  ;;  %v7183_v36 = vadd.f32 %v9523_v32, %v7182_v33 }
0x2ca6   : > { %v7185_v30 = vpop.f32.mrb[126].mxu0 }
0x2ca7   : > { %v7186_v38 = vadd.f32 %v9523_v32, %v7185_v30  ;;  %v10996_v39 = vpop.f32.mrb[127].mxu0  ;;  %v11567_v30 = vld [vmem:[%s13492_s5 + $0xc0] sm:$0xff]  }
0x2ca8   : > { %v11568_v39 = vld [vmem:[%s13492_s5 + $0xc8] sm:$0xff]  }
0x2ca9   : > { %v7189_v40 = vpack.c.bf16 %v7186_v38, %v7183_v36 }
0x2cab   : > { %11040 = vmatmul.mubr.msk.bf16.vlgmr.msra.gmra.mrb[128].mxu1 %vm1849_vm1, %v7189_v40  ;;  %v11569_v40 = vld [vmem:[%s13492_s5 + $0xd0] sm:$0xff]  }
0x2cac   : > { %11045 = vmatprep.mubr.msk.bf16.mxu1 %vm11863_vm0, %v11862_v2 }
0x2cc4   : > { %v7411_v41 = vpop.f32.mrb[128].mxu0 }
0x2cc5   : > { %v7412_v34 = vadd.f32 %v9575_v6, %v7411_v41  ;;  %v11035_v7 = vpop.f32.mrb[129].mxu0  ;;  %v11570_v6 = vld [vmem:[%s13492_s5 + $0xd8] sm:$0xff]   ;;  %v11571_v41 = vld [vmem:[%s13492_s5 + $0xe0] sm:$0xff]  }
0x2cc6   : > { %v7414_v42 = vpop.f32.mrb[130].mxu0  ;;  %v11573_v7 = vld [vmem:[%s13492_s5 + $0xf0] sm:$0xff]  }
0x2cc7   : > { %v7417_v43 = vpack.c.bf16 %v7412_v34, %v7412_v34  ;;  %v11036_v44 = vpop.f32.mrb[131].mxu0  ;;  %v11572_v34 = vld [vmem:[%s13492_s5 + $0xe8] sm:$0xff]   ;;  %v11574_v42 = vld [vmem:[%s13492_s5 + $0xf8] sm:$0xff]   ;;  %s8553_s5 = scalar_lea.sflag [#allocation3], %s12974_s11 }
0x2cc8   : > { %v11576_v44 = vld [vmem:[%s13495_s8 + $0xc8] sm:$0xff]  }
0x2cc9   : > { %v7496_v47 = vsel %vm3975_vm8, %v7417_v43, 0  ;;  %v11575_v43 = vld [vmem:[%s13495_s8 + $0xc0] sm:$0xff]  }
0x2cca   : > { %11044 = vmatpush3.bf16.msra.mxu1 %v7496_v47  ;;  %v11577_v47 = vld [vmem:[%s13495_s8 + $0xd0] sm:$0xff]  }
0x2ccb   : > { %11049 = vmatprep.subr.bf16.mxu1 %v11862_v2 }
0x2ce4   : > { %v7825_v49 = vpop.f32.mrb[132].mxu0 }
0x2ce5   : > { %v7826_v50 = vadd.f32 %v9636_v48, %v7825_v49  ;;  %v11095_v51 = vpop.f32.mrb[133].mxu0  ;;  %v11578_v48 = vld [vmem:[%s13495_s8 + $0xd8] sm:$0xff]   ;;  %v11579_v49 = vld [vmem:[%s13495_s8 + $0xe0] sm:$0xff]  }
0x2ce6   : > { %v7828_v54 = vpop.f32.mrb[134].mxu0  ;;  %v11582_v51 = vld [vmem:[%s13495_s8 + $0xf8] sm:$0xff]  }
0x2ce7   : > { %v7831_v37 = vpack.c.bf16 %v7826_v50, %v7826_v50  ;;  %v11096_v55 = vpop.f32.mrb[135].mxu0  ;;  %v11581_v50 = vld [vmem:[%s13495_s8 + $0xf0] sm:$0xff]  }
0x2ce9   : > { %v7950_v56 = vsel %vm1849_vm1, %v7831_v37, 0 }
0x2cea   : > { %11118 = vmatpush3.bf16.xpose.msra.mxu0 %v7950_v56 }
0x2ceb   : > { %11123 = vmatprep.subr.bf16.mxu0 %v11862_v2 }
0x2d7e   : > { %v7458_v57 = vpop.f32.mrb[128].mxu1 }
0x2d7f   : > { %v7465_v58 = vmul.f32 0.17677669, %v7458_v57  ;;  %v11041_v59 = vpop.f32.mrb[129].mxu1 }
0x2d80   : > { %v7461_v61 = vpop.f32.mrb[130].mxu1  ;;  %v9610_v59 = vld [vmem:[%s13498_s3 + $0x3] ss:$0 sm:$0xff]  ;;  %s13504_s3 = sld [smem:[#allocation42_spill]] }
0x2d81   : > { %v7466_v62 = vmul.f32 0.17677669, %v7461_v61  ;;  %v11042_v63 = vpop.f32.mrb[131].mxu1  ;;  %v7467_v0 = vadd.f32 %v7465_v58, %v13021_v45 }
0x2d83   : > { %v7469_v60 = vsel %vm3959_vm9, %v7467_v0, -inf  ;;  %v7468_v1 = vadd.f32 %v7466_v62, %v13023_v23 }
0x2d84   : > { %7470 = vmax.xlane.f32.xlu1 %v7469_v60 }
0x2d85   : > { %v7472_v53 = vsel %vm3959_vm9, %v7468_v1, -inf }
0x2d88   : > { %7473 = vmax.xlane.f32.xlu1 %v7472_v53 }
0x2e11   : > { %v7471_v21 = vpop.xlane.xlu1 %7470 }
0x2e12   : > { %v7475_v3 = vsub.f32 %v7467_v0, %v7471_v21 }
0x2e14   : > { %v7477_v8 = vmul.f32 1.442695, %v7475_v3 }
0x2e15   : > { %v7474_v11 = vpop.xlane.xlu1 %7473 }
0x2e16   : > { %11687 = vpow2.f32 %v7477_v8  ;;  %v7476_v46 = vsub.f32 %v7468_v1, %v7474_v11 }
0x2e18   : > { %v7479_v14 = vmul.f32 1.442695, %v7476_v46 }
0x2e1a   : > { %11689 = vpow2.f32 %v7479_v14 }
0x2e20   : > { %v11688_v15 = vpop.eup %11687 }
0x2e21   : > { %v7481_v16 = vsel %vm3959_vm9, %v11688_v15, 0.0 }
0x2e22   : > { %7482 = vadd.xlane.f32.xlu1 %v7481_v16 }
0x2e24   : > { %v11690_v17 = vpop.eup %11689 }
0x2e25   : > { %v7484_v12 = vsel %vm3959_vm9, %v11690_v17, 0.0 }
0x2e26   : > { %7485 = vadd.xlane.f32.xlu1 %v7484_v12 }
0x2eaf   : > { %v7483_v18 = vpop.xlane.xlu1 %7482 }
0x2eb0   : > { %11691 = vrcp.f32 %v7483_v18 }
0x2eb3   : > { %v7486_v19 = vpop.xlane.xlu1 %7485 }
0x2eb4   : > { %11693 = vrcp.f32 %v7486_v19 }
0x2eba   : > { %v11692_v20 = vpop.eup %11691 }
0x2ebb   : > { %v7489_v24 = vmul.f32 %v11692_v20, %v11688_v15 }
0x2ebe   : > { %v11694_v22 = vpop.eup %11693 }
0x2ebf   : > { %v7490_v25 = vmul.f32 %v11694_v22, %v11690_v17 }
0x2ec1   : > { %v7491_v28 = vpack.c.bf16 %v7490_v25, %v7489_v24 }
0x2ec3   : > { %11046 = vmatmul.mubr.msk.bf16.vlgmr.msra.gmra.mrb[132].mxu1 %vm3959_vm9, %v7491_v28 }
0x2ec4   : > { %11050 = vmatpush3.bf16.msra.mxu1 %v11565_v27  ;;  %11053 = vmatprep.mubr.msk.bf16.mxu1 %vm11863_vm0, %v11862_v2 }
0x2ec5   : > { %11051 = vmatprep.subr.bf16.mxu1 %v11862_v2 }
0x2ec8   : > { %11052 = vmatpush3.bf16.msra.mxu1 %v11566_v31 }
0x2ec9   : > { %11057 = vmatprep.subr.bf16.mxu1 %v11862_v2 }
0x2f96   : > { %v7532_v32 = vpop.f32.mrb[132].mxu1 }
0x2f97   : > { %v11047_v33 = vpop.f32.mrb[133].mxu1 }
0x2f98   : > { %v7535_v35 = vpop.f32.mrb[134].mxu1 }
0x2f99   : > { %v7539_v36 = vpack.c.bf16 %v7535_v35, %v7532_v32  ;;  %v11048_v38 = vpop.f32.mrb[135].mxu1 }
0x2f9b   : > { %11054 = vmatmul.mubr.msk.bf16.vlgmr.msra.gmra.mrb[136].mxu1 %vm1849_vm1, %v7539_v36 }
0x2f9c   : > { %11058 = vmatpush3.bf16.msra.mxu1 %v11567_v30  ;;  %11073 = vmatprep.mubr.msk.bf16.mxu1 %vm11863_vm0, %v11862_v2 }
0x2f9d   : > { %11059 = vmatprep.subr.bf16.mxu1 %v11862_v2 }
0x2fa0   : > { %11060 = vmatpush3.bf16.msra.mxu1 %v11568_v39 }
0x2fa1   : > { %11061 = vmatprep.subr.bf16.mxu1 %v11862_v2 }
0x2fa4   : > { %11062 = vmatpush3.bf16.msra.mxu1 %v11569_v40 }
0x2fa5   : > { %11063 = vmatprep.subr.bf16.mxu1 %v11862_v2 }
0x2fa8   : > { %11064 = vmatpush3.bf16.msra.mxu1 %v11570_v6 }
0x2fa9   : > { %11065 = vmatprep.subr.bf16.mxu1 %v11862_v2 }
0x2fac   : > { %11066 = vmatpush3.bf16.msra.mxu1 %v11571_v41 }
0x2fad   : > { %11067 = vmatprep.subr.bf16.mxu1 %v11862_v2 }
0x2fb0   : > { %11068 = vmatpush3.bf16.msra.mxu1 %v11572_v34  ;;  %v11583_v34 = vld [vmem:[%s13502_s17 + $0x30] sm:$0xff]  }
0x2fb1   : > { %11069 = vmatprep.subr.bf16.mxu1 %v11862_v2 }
0x2fb4   : > { %11070 = vmatpush3.bf16.msra.mxu1 %v11573_v7 }
0x2fb5   : > { %11071 = vmatprep.subr.bf16.mxu1 %v11862_v2 }
0x2fb8   : > { %11072 = vmatpush3.bf16.msra.mxu1 %v11574_v42  ;;  %v11584_v42 = vld [vmem:[%s13502_s17 + $0x38] sm:$0xff]  }
0x2fb9   : > { %11097 = vmatprep.subr.bf16.mxu1 %v11862_v2 }
0x2fbb   : > { %11074 = vmatmul.mubr.bf16.vlgmr.msra.gmra.mrb[140].mxu1 %v12919_v4  ;;  %v11580_v4 = vld [vmem:[%s13495_s8 + $0xe8] sm:$0xff]   ;;  %s11866_s8 = smov [#allocation2]  }
0x2fbc   : > { %11098 = vmatpush3.bf16.msra.mxu1 %v11575_v43  ;;  %11113 = vmatprep.mubr.msk.bf16.mxu1 %vm11863_vm0, %v11862_v2  ;;  %s11724_s9 = sshll.u32 %s11866_s8, 4  ;;  %s11725_s9 = int_to_ptr.vmem [resolvable:$false] %s11724_s9 }
0x2fbd   : > { %11099 = vmatprep.subr.bf16.mxu1 %v11862_v2 }
0x2fc0   : > { %11100 = vmatpush3.bf16.msra.mxu1 %v11576_v44 }
0x2fc1   : > { %11101 = vmatprep.subr.bf16.mxu1 %v11862_v2 }
0x2fc4   : > { %11102 = vmatpush3.bf16.msra.mxu1 %v11577_v47 }
0x2fc5   : > { %11103 = vmatprep.subr.bf16.mxu1 %v11862_v2 }
0x2fc8   : > { %11104 = vmatpush3.bf16.msra.mxu1 %v11578_v48 }
0x2fc9   : > { %11105 = vmatprep.subr.bf16.mxu1 %v11862_v2 }
0x2fcc   : > { %11106 = vmatpush3.bf16.msra.mxu1 %v11579_v49 }
0x2fcd   : > { %11107 = vmatprep.subr.bf16.mxu1 %v11862_v2 }
0x2fd0   : > { %11108 = vmatpush3.bf16.msra.mxu1 %v11580_v4 }
0x2fd1   : > { %11109 = vmatprep.subr.bf16.mxu1 %v11862_v2 }
0x2fd4   : > { %11110 = vmatpush3.bf16.msra.mxu1 %v11581_v50 }
0x2fd5   : > { %11111 = vmatprep.subr.bf16.mxu1 %v11862_v2 }
0x2fd8   : > { %11112 = vmatpush3.bf16.msra.mxu1 %v11582_v51 }
0x2fdb   : > { %11114 = vmatmul.mubr.bf16.vlgmr.msra.gmra.mrb[144].mxu1 %v12980_v9  ;;  %v9662_v9 = vld [vmem:[%s13501_s13 + $0x3] ss:$0 sm:$0xff]  ;;  %s11726_s13 = scalar_lea.vmem %s11725_s9, 256 }
0x306e   : > { %v7594_v54 = vpop.f32.mrb[136].mxu1 }
0x306f   : > { %v13253_v37 = vadd.f32 %v7594_v54, %v13186_v26  ;;  %v11055_v55 = vpop.f32.mrb[137].mxu1  ;;  %v9680_v54 = vld [vmem:[%s13503_s1] ss:$0 sm:$0xff]  ;;  %s13506_s1 = sld [smem:[#allocation41_spill]] }
0x3070   : > { %v7597_v56 = vpop.f32.mrb[138].mxu1  ;;  %v11718_v55 = vld [vmem:[%s12187_s23] sm:$0xff] }
0x3071   : > { %v13256_v57 = vadd.f32 %v7597_v56, %v13189_v29  ;;  %v11056_v58 = vpop.f32.mrb[139].mxu1 }
0x308e   : > { %v7710_v61 = vpop.f32.mrb[140].mxu1 }
0x308f   : > { %v11075_v62 = vpop.f32.mrb[141].mxu1  ;;  %v7711_v0 = vadd.f32 %v9610_v59, %v7710_v61  ;;  %v11719_v61 = vld [vmem:[%s12187_s23 + $0x8] sm:$0xff]  ;;  %s13505_s23 = sld [smem:[#allocation40_spill]] }
0x3090   : > { %v7713_v63 = vpop.f32.mrb[142].mxu1 }
0x3091   : > { %v7714_v60 = vadd.f32 %v9610_v59, %v7713_v63  ;;  %v11076_v1 = vpop.f32.mrb[143].mxu1 }
0x3092   : > { %v11588_v1 = vld [vmem:[%s13504_s3 + $0x10] ss:$8 sps:$4 sm:$0xff]  }
0x3093   : > { %v7717_v53 = vpack.c.bf16 %v7714_v60, %v7711_v0  ;;  %v11587_v0 = vld [vmem:[%s13504_s3 + $0x4] ss:$8 sps:$4 sm:$0xff]   ;;  %v11590_v60 = vld [vmem:[%s13504_s3 + $0x14] ss:$8 sps:$4 sm:$0xff]  }
0x3095   : > { %11120 = vmatmul.mubr.msk.bf16.vlgmr.msra.gmra.mrb[136].mxu0 %vm1849_vm1, %v7717_v53 }
0x3096   : > { %11125 = vmatprep.mubr.msk.bf16.mxu0 %vm11863_vm0, %v11862_v2 }
0x30ae   : > { %v7939_v26 = vpop.f32.mrb[144].mxu1 }
0x30af   : > { %v7940_v21 = vadd.f32 %v9662_v9, %v7939_v26  ;;  %v11115_v3 = vpop.f32.mrb[145].mxu1 }
0x30b0   : > { %v7942_v29 = vpop.f32.mrb[146].mxu1 }
0x30b1   : > { %v7945_v8 = vpack.c.bf16 %v7940_v21, %v7940_v21  ;;  %v11116_v11 = vpop.f32.mrb[147].mxu1 }
0x30b2   : > { %v11593_v11 = vld [vmem:[%s13504_s3 + $0x24] ss:$8 sps:$4 sm:$0xff]  }
0x30b3   : > { %v8024_v46 = vsel %vm3975_vm8, %v7945_v8, 0 }
0x30b4   : > { %11124 = vmatpush3.bf16.msra.mxu0 %v8024_v46  ;;  %v11591_v46 = vld [vmem:[%s13504_s3 + $0x20] ss:$8 sps:$4 sm:$0xff]  }
0x30b5   : > { %11129 = vmatprep.subr.bf16.mxu0 %v11862_v2 }
0x3168   : > { %v7986_v14 = vpop.f32.mrb[136].mxu0 }
0x3169   : > { %v7993_v15 = vmul.f32 0.17677669, %v7986_v14  ;;  %v11121_v16 = vpop.f32.mrb[137].mxu0  ;;  %v11596_v14 = vld [vmem:[%s13504_s3 + $0x34] ss:$8 sps:$4 sm:$0xff]  }
0x316a   : > { %v7989_v17 = vpop.f32.mrb[138].mxu0  ;;  %v11599_v16 = vld [vmem:[%s13504_s3 + $0x44] ss:$8 sps:$4 sm:$0xff]  }
0x316b   : > { %v7994_v12 = vmul.f32 0.17677669, %v7989_v17  ;;  %v11122_v18 = vpop.f32.mrb[139].mxu0  ;;  %v7995_v19 = vadd.f32 %v7993_v15, %v13021_v45  ;;  %v11594_v15 = vld [vmem:[%s13504_s3 + $0x30] ss:$8 sps:$4 sm:$0xff]  }
0x316c   : > { %v11597_v17 = vld [vmem:[%s13504_s3 + $0x40] ss:$8 sps:$4 sm:$0xff]   ;;  %v11600_v18 = vld [vmem:[%s13504_s3 + $0x50] ss:$8 sps:$4 sm:$0xff]  }
0x316d   : > { %v7997_v20 = vsel %vm3959_vm9, %v7995_v19, -inf  ;;  %v7996_v22 = vadd.f32 %v7994_v12, %v13023_v23  ;;  %v11602_v12 = vld [vmem:[%s13504_s3 + $0x54] ss:$8 sps:$4 sm:$0xff]  }
0x316e   : > { %7998 = vmax.xlane.f32.xlu0 %v7997_v20  ;;  %v11603_v20 = vld [vmem:[%s13504_s3 + $0x60] ss:$8 sps:$4 sm:$0xff]  }
0x316f   : > { %v8000_v24 = vsel %vm3959_vm9, %v7996_v22, -inf }
0x3170   : > { %8001 = vmax.xlane.f32.xlu1 %v8000_v24  ;;  %v11606_v24 = vld [vmem:[%s13504_s3 + $0x70] ss:$8 sps:$4 sm:$0xff]  }
0x31fb   : > { %v7999_v25 = vpop.xlane.xlu0 %7998 }
0x31fc   : > { %v8003_v27 = vsub.f32 %v7995_v19, %v7999_v25  ;;  %v11605_v19 = vld [vmem:[%s13504_s3 + $0x64] ss:$8 sps:$4 sm:$0xff]  }
0x31fd   : > { %v8002_v28 = vpop.xlane.xlu1 %8001 }
0x31fe   : > { %v8005_v31 = vmul.f32 1.442695, %v8003_v27  ;;  %v8004_v32 = vsub.f32 %v7996_v22, %v8002_v28  ;;  %v11608_v22 = vld [vmem:[%s13504_s3 + $0x74] ss:$8 sps:$4 sm:$0xff]  }
0x3200   : > { %11695 = vpow2.f32 %v8005_v31  ;;  %v8007_v33 = vmul.f32 1.442695, %v8004_v32 }
0x3202   : > { %11697 = vpow2.f32 %v8007_v33 }
0x320a   : > { %v11696_v35 = vpop.eup %11695 }
0x320b   : > { %v8009_v45 = vsel %vm3959_vm9, %v11696_v35, 0.0 }
0x320c   : > { %v11698_v30 = vpop.eup %11697  ;;  %8010 = vadd.xlane.f32.xlu1 %v8009_v45 }
0x320d   : > { %v8012_v23 = vsel %vm3959_vm9, %v11698_v30, 0.0 }
0x3210   : > { %8013 = vadd.xlane.f32.xlu1 %v8012_v23 }
0x3299   : > { %v8011_v36 = vpop.xlane.xlu1 %8010 }
0x329a   : > { %11699 = vrcp.f32 %v8011_v36 }
0x329d   : > { %v8014_v38 = vpop.xlane.xlu1 %8013 }
0x329e   : > { %11701 = vrcp.f32 %v8014_v38 }
0x32a4   : > { %v11700_v39 = vpop.eup %11699 }
0x32a5   : > { %v8017_v6 = vmul.f32 %v11700_v39, %v11696_v35  ;;  %v9682_v39 = vld [vmem:[%s13506_s1] ss:$0 sm:$0xff]  ;;  %s9718_s1 = sshll.u32 %s12131_s0, 7 }
0x32a8   : > { %v11702_v40 = vpop.eup %11701 }
0x32a9   : > { %v8018_v41 = vmul.f32 %v11702_v40, %v11698_v30  ;;  %v9681_v30 = vld [vmem:[%s13505_s23] ss:$0 sm:$0xff]  ;;  %s13507_s23 = sld [smem:[#allocation43_spill]] }
0x32ab   : > { %v8019_v7 = vpack.c.bf16 %v8018_v41, %v8017_v6 }
0x32ad   : > { %11126 = vmatmul.mubr.msk.bf16.vlgmr.msra.gmra.mrb[140].mxu0 %vm3959_vm9, %v8019_v7  ;;  %v11609_v7 = vld [vmem:[%s13469_s6 + $0x40] sm:$0xff]  }
0x32ae   : > { %11130 = vmatpush3.bf16.msra.mxu0 %v11583_v34  ;;  %11133 = vmatprep.mubr.msk.bf16.mxu0 %vm11863_vm0, %v11862_v2 }
0x32af   : > { %11131 = vmatprep.subr.bf16.mxu0 %v11862_v2  ;;  %10155 = vmatprep.subr.bf16.mxu1 %v11609_v7 }
0x32b2   : > { %11132 = vmatpush3.bf16.msra.mxu0 %v11584_v42  ;;  %v11610_v42 = vld [vmem:[%s13469_s6] sm:$0xff]  }
0x32b3   : > { %8291 = vmatprep.subr.bf16.mxu0 %v11587_v0  ;;  %10156 = vmatpush3.bf16.msra.mxu1 %v11610_v42 }
0x3380   : > { %v8060_v43 = vpop.f32.mrb[140].mxu0 }
0x3381   : > { %v11127_v44 = vpop.f32.mrb[141].mxu0 }
0x3382   : > { %v8063_v47 = vpop.f32.mrb[142].mxu0  ;;  %v11612_v44 = vld [vmem:[%s13469_s6 + $0x8] sm:$0xff]  }
0x3383   : > { %v8067_v48 = vpack.c.bf16 %v8063_v47, %v8060_v43  ;;  %v11128_v49 = vpop.f32.mrb[143].mxu0  ;;  %v11611_v43 = vld [vmem:[%s13469_s6 + $0x48] sm:$0xff]   ;;  %v11613_v47 = vld [vmem:[%s13469_s6 + $0x50] sm:$0xff]  }
0x3384   : > { %10157 = vmatprep.subr.bf16.mxu1 %v11611_v43  ;;  %v11615_v49 = vld [vmem:[%s13469_s6 + $0x58] sm:$0xff]  }
0x3385   : > { %11134 = vmatmul.mubr.msk.bf16.vlgmr.msra.gmra.mrb[144].mxu0 %vm1849_vm1, %v8067_v48  ;;  %10158 = vmatpush3.bf16.msra.mxu1 %v11612_v44  ;;  %v11614_v48 = vld [vmem:[%s13469_s6 + $0x10] sm:$0xff]  }
0x3386   : > { %8323 = vmatprep.mubr.bf16.mxu0 %v11865_v5  ;;  %10159 = vmatprep.subr.bf16.mxu1 %v11613_v47 }
0x3389   : > { %10160 = vmatpush3.bf16.msra.mxu1 %v11614_v48 }
0x338a   : > { %10161 = vmatprep.subr.bf16.mxu1 %v11615_v49 }
0x3458   : > { %v8122_v4 = vpop.f32.mrb[144].mxu0 }
0x3459   : > { %v8129_v50 = vadd.f32 %v8122_v4, %v13253_v37  ;;  %v11135_v51 = vpop.f32.mrb[145].mxu0  ;;  %v11585_v37 = vld [vmem:[%s13504_s3] ss:$8 sps:$4 sm:$0xff]   ;;  %v11616_v4 = vld [vmem:[%s13469_s6 + $0x18] sm:$0xff]   ;;  %s8571_s3 = sshll.u32 %s12982_s14, 4  ;;  %s8572_s3 = int_to_ptr.vmem [resolvable:$true] %s8571_s3 }
0x345a   : > { %v8125_v2 = vpop.f32.mrb[146].mxu0  ;;  %8292 = vmatpush1.bf16.msra.mxu0 %v11585_v37  ;;  %10162 = vmatpush3.bf16.msra.mxu1 %v11616_v4  ;;  %v11618_v51 = vld [vmem:[%s13469_s6 + $0x20] sm:$0xff]   ;;  %p11727_p0 = scmp.lt.s32.totalorder %s8572_s3, %s11725_s9 }
0x345b   : > { %v8131_v56 = vadd.f32 %v11718_v55, %v8129_v50  ;;  %v8130_v58 = vadd.f32 %v8125_v2, %v13256_v57  ;;  %v11136_v59 = vpop.f32.mrb[147].mxu0  ;;  %8293 = vmatprep.subr.bf16.mxu0 %v11590_v60  ;;  %v11617_v50 = vld [vmem:[%s13469_s6 + $0x60] sm:$0xff]   ;;  %v11619_v2 = vld [vmem:[%s13469_s6 + $0x68] sm:$0xff]   ;;  %v11621_v55 = vld [vmem:[%s13469_s6 + $0x70] sm:$0xff]  }
0x345c   : > { %10163 = vmatprep.subr.bf16.mxu1 %v11617_v50  ;;  %v11624_v59 = vld [vmem:[%s13469_s6 + $0x38] sm:$0xff]  }
0x345d   : > { %v8132_v62 = vadd.f32 %v11719_v61, %v8130_v58  ;;  %v13284_v63 = vadd.f32 %v9680_v54, %v8131_v56  ;;  %v11622_v56 = vld [vmem:[%s13469_s6 + $0x30] sm:$0xff]   ;;  %v11623_v58 = vld [vmem:[%s13469_s6 + $0x78] sm:$0xff]   ;;  %v8199_v61 = vld [vmem:[%s13507_s23] sm:$0x3]  ;;  %s13333_s23 = scalar_lea.hbm %s12103_s4, %s9718_s1 }
0x345e   : > { %8294 = vmatpush1.bf16.msra.mxu0 %v11588_v1  ;;  %10164 = vmatpush3.bf16.msra.mxu1 %v11618_v51  ;;  %v8208_v37 = vrot.slane %v8199_v61, %v5666_v13 }
0x345f   : > { %8144 = vadd.xlane.f32.xlu1 %v13284_v63  ;;  %v13287_v5 = vadd.f32 %v9680_v54, %v8132_v62  ;;  %8295 = vmatprep.subr.bf16.mxu0 %v11593_v11  ;;  %v11620_v54 = vld [vmem:[%s13469_s6 + $0x28] sm:$0xff]   ;;  %v8204_v62 = vrot.slane %v8199_v61, %v5662_v10  ;;  %s11720_s6 = scalar_lea.vmem %s8572_s3, 128 }
0x3460   : > { %10165 = vmatprep.subr.bf16.mxu1 %v11619_v2  ;;  %p11721_p11 = scmp.ne.s32.totalorder %s8572_s3, %s11720_s6  ;;  %p11728_p1 = scmp.lt.s32.totalorder %s11726_s13, %s11720_s6 }
0x3462   : > { %8296 = vmatpush1.bf16.msra.mxu0 %v11591_v46  ;;  %10166 = vmatpush3.bf16.msra.mxu1 %v11620_v54  ;;  %p11722_p12 = pnand %p11721_p11, %p12148_p5  ;;  %p11729_p2 = por %p11728_p1, %p11727_p0 }
0x3463   : > { %8146 = vadd.xlane.f32.xlu1 %v13287_v5  ;;  %8297 = vmatprep.subr.bf16.mxu0 %v11596_v14 }
0x3464   : > { %10167 = vmatprep.subr.bf16.mxu1 %v11621_v55  ;;  %p11723_p13 = pneg %p11722_p12 }
0x3466   : > { %8298 = vmatpush1.bf16.msra.mxu0 %v11594_v15  ;;  %10168 = vmatpush3.bf16.msra.mxu1 %v11622_v56  ;;  %p11730_p3 = pnand %p11729_p2, %p11723_p13 }
0x3467   : > { %8299 = vmatprep.subr.bf16.mxu0 %v11599_v16  ;;  %10169 = vmatprep.subr.bf16.mxu1 %v11623_v58 }
0x346a   : > { %8300 = vmatpush1.bf16.msra.mxu0 %v11597_v17  ;;  %10170 = vmatpush3.bf16.msra.mxu1 %v11624_v59 }
0x346b   : > { %8301 = vmatprep.subr.bf16.mxu0 %v11602_v12 }
0x346e   : > { %8302 = vmatpush1.bf16.msra.mxu0 %v11600_v18 }
0x346f   : > { %8303 = vmatprep.subr.bf16.mxu0 %v11605_v19 }
0x3472   : > { %8304 = vmatpush1.bf16.msra.mxu0 %v11603_v20 }
0x3473   : > { %8305 = vmatprep.subr.bf16.mxu0 %v11608_v22 }
0x3476   : > { %8306 = vmatpush1.bf16.msra.mxu0 %v11606_v24 }
0x34ec   : > { %v8145_v57 = vpop.xlane.xlu1 %8144 }
0x34ed   : > { %v8148_v53 = vmul.f32 0.0078125, %v8145_v57 }
0x34ef   : > { %v8150_v9 = vsub.f32 %v13284_v63, %v8148_v53 }
0x34f0   : > { %v8147_v26 = vpop.xlane.xlu1 %8146 }
0x34f1   : > { %v8149_v21 = vmul.f32 0.0078125, %v8147_v26  ;;  %v8152_v3 = vmul.f32 %v8150_v9, %v8150_v9 }
0x34f3   : > { %v8151_v29 = vsub.f32 %v13287_v5, %v8149_v21  ;;  %8154 = vadd.xlane.f32.xlu1 %v8152_v3 }
0x34f5   : > { %v8153_v8 = vmul.f32 %v8151_v29, %v8151_v29 }
0x34f7   : > { %8156 = vadd.xlane.f32.xlu1 %v8153_v8 }
0x3580   : > { %v8155_v25 = vpop.xlane.xlu1 %8154 }
0x3581   : > { %v8158_v27 = vmul.f32 0.0078125, %v8155_v25 }
0x3583   : > { %v8160_v28 = vadd.f32 1e-05, %v8158_v27 }
0x3584   : > { %v8157_v31 = vpop.xlane.xlu1 %8156 }
0x3585   : > { %11703 = vrsqrt.f32 %v8160_v28  ;;  %v8159_v32 = vmul.f32 0.0078125, %v8157_v31 }
0x3587   : > { %v8161_v33 = vadd.f32 1e-05, %v8159_v32 }
0x3589   : > { %11705 = vrsqrt.f32 %v8161_v33 }
0x358f   : > { %v11704_v35 = vpop.eup %11703 }
0x3590   : > { %v8164_v45 = vmul.f32 %v11704_v35, %v8150_v9 }
0x3592   : > { %v8172_v38 = vmul.f32 %v9681_v30, %v8164_v45 }
0x3593   : > { %v11706_v23 = vpop.eup %11705 }
0x3594   : > { %v8165_v36 = vmul.f32 %v11706_v23, %v8151_v29  ;;  %v8180_v6 = vadd.f32 %v9682_v39, %v8172_v38 }
0x3596   : > { %v8173_v40 = vmul.f32 %v9681_v30, %v8165_v36 }
0x3598   : > { %v8181_v41 = vadd.f32 %v9682_v39, %v8173_v40 }
0x359a   : > { %v8182_v34 = vpack.c.bf16 %v8181_v41, %v8180_v6 }
0x359c   : > { %8324 = vmatmul.mubr.bf16.vlgmr.msra.gmra.mrb[148].mxu0 %v8182_v34 }
0x366f   : > { %v8325_v0 = vpop.f32.mrb[148].mxu0 }
0x3670   : > { %v8326_v60 = vadd.f32 %v8325_v0, %v8204_v62  ;;  %v8327_v1 = vpop.f32.mrb[149].mxu0 }
0x3671   : > { %v8328_v57 = vadd.f32 %v8327_v1, %v8208_v37  ;;  %v8329_v53 = vpop.f32.mrb[150].mxu0 }
0x3672   : > { %v8334_v9 = vmul.f32 %v8326_v60, %v8326_v60  ;;  %v8330_v26 = vadd.f32 %v8329_v53, %v8204_v62  ;;  %v8331_v21 = vpop.f32.mrb[151].mxu0 }
0x3673   : > { %v8335_v3 = vmul.f32 %v8328_v57, %v8328_v57  ;;  %v8332_v29 = vadd.f32 %v8331_v21, %v8208_v37 }
0x3674   : > { %v8338_v8 = vmul.f32 %v8334_v9, %v8326_v60  ;;  %v8336_v11 = vmul.f32 %v8330_v26, %v8330_v26 }
0x3675   : > { %v8339_v46 = vmul.f32 %v8335_v3, %v8328_v57  ;;  %v8337_v14 = vmul.f32 %v8332_v29, %v8332_v29 }
0x3676   : > { %v8342_v15 = vmul.f32 0.044715, %v8338_v8  ;;  %v8340_v16 = vmul.f32 %v8336_v11, %v8330_v26 }
0x3677   : > { %v8343_v10 = vmul.f32 0.044715, %v8339_v46  ;;  %v8341_v17 = vmul.f32 %v8337_v14, %v8332_v29 }
0x3678   : > { %v8346_v52 = vadd.f32 %v8342_v15, %v8326_v60  ;;  %v8344_v13 = vmul.f32 0.044715, %v8340_v16 }
0x3679   : > { %v8347_v12 = vadd.f32 %v8343_v10, %v8328_v57  ;;  %v8345_v18 = vmul.f32 0.044715, %v8341_v17 }
0x367a   : > { %v8350_v19 = vmul.f32 0.7978846, %v8346_v52  ;;  %v8348_v20 = vadd.f32 %v8344_v13, %v8330_v26 }
0x367b   : > { %v8351_v22 = vmul.f32 0.7978846, %v8347_v12  ;;  %v8349_v24 = vadd.f32 %v8345_v18, %v8332_v29 }
0x367c   : > { %11707 = vtanh.f32 %v8350_v19  ;;  %v8352_v25 = vmul.f32 0.7978846, %v8348_v20 }
0x367d   : > { %11709 = vtanh.f32 %v8351_v22  ;;  %v8353_v27 = vmul.f32 0.7978846, %v8349_v24 }
0x367e   : > { %11711 = vtanh.f32 %v8352_v25 }
0x367f   : > { %11713 = vtanh.f32 %v8353_v27 }
0x3686   : > { %v11708_v28 = vpop.eup %11707 }
0x3687   : > { %v11710_v31 = vpop.eup %11709  ;;  %v8358_v32 = vadd.f32 1.0, %v11708_v28 }
0x3688   : > { %v11712_v33 = vpop.eup %11711  ;;  %v8359_v35 = vadd.f32 1.0, %v11710_v31 }
0x3689   : > { %v11714_v45 = vpop.eup %11713  ;;  %v8362_v30 = vmul.f32 0.5, %v8358_v32  ;;  %v8360_v23 = vadd.f32 1.0, %v11712_v33 }
0x368a   : > { %v8361_v36 = vadd.f32 1.0, %v11714_v45  ;;  %v8363_v38 = vmul.f32 0.5, %v8359_v35 }
0x368b   : > { %v8364_v39 = vmul.f32 0.5, %v8360_v23  ;;  %v8366_v6 = vmul.f32 %v8362_v30, %v8326_v60 }
0x368c   : > { %v8365_v40 = vmul.f32 0.5, %v8361_v36  ;;  %v8367_v34 = vmul.f32 %v8363_v38, %v8328_v57 }
0x368d   : > { %v8368_v41 = vmul.f32 %v8364_v39, %v8330_v26 }
0x368e   : > { %v8369_v7 = vmul.f32 %v8365_v40, %v8332_v29 }
0x368f   : > { %v8370_v42 = vpack.c.bf16 %v8368_v41, %v8366_v6 }
0x3690   : > { %v8371_v43 = vpack.c.bf16 %v8369_v7, %v8367_v34 }
0x3692   : > { %8539 = vmatprep.mubr.bf16.mxu1 %v8371_v43 }
0x3693   : > { %8540 = vmatmul.mubr.bf16.vlgmr.msra.gmra.mrb[148].mxu1 %v8370_v42 }
0x3694   : > { %11733 = shalt.err (!%p11730_p3)
}
0x3695   : > { %s11734_s14 = scalar_lea.hbm %s13333_s23, 128  ;;  %s11738_s8 = scalar_lea.hbm %s12103_s4, 256 }
0x3696   : > { %p11735_p4 = scmp.ne.s32.totalorder %s13333_s23, %s11734_s14  ;;  %p11739_p9 = scmp.lt.u32.totalorder %s13333_s23, %s12103_s4 }
0x3697   : > { %p11740_p10 = scmp.lt.u32.totalorder %s11738_s8, %s11734_s14  ;;  %p11742_p12 = scmp.lt.u32.totalorder %s11734_s14, %s13333_s23 }
0x3698   : > { %p11736_p7 = pnand %p11735_p4, %p12148_p5 }
0x3699   : > { %p11741_p11 = por %p11740_p10, %p11739_p9 }
0x369a   : > { %p11737_p8 = pneg %p11736_p7 }
0x369b   : > { %p11743_p0 = por %p11742_p12, %p11741_p11 }
0x369d   : > { %p11744_p13 = pnand %p11743_p0, %p11737_p8 }
0x369f   : > { %11747 = shalt.err (!%p11744_p13)
}
0x36a0   : > { %11137 = dma.vmem_to_hbm [thread:$0]  (%p12148_p5), %s8572_s3, 128, %s13333_s23, %s8553_s5   ;;  %v9699_v47 = vld [vmem:[%s12098_s27] ss:$0 sm:$0xff] }
0x36a1   : > { %s8753_s6 = sshll.u32 %s12974_s11, 4  ;;  %s9724_s1 = sshll.u32 %s12131_s0, 8 }
0x36a2   : > { %s1408_s9 = scalar_lea.vmem [#allocation4], %s8753_s6  ;;  %s13357_s5 = scalar_lea.hbm %s12108_s12, %s9724_s1 }
0x36a3   : > { %s8584_s13 = sshll.u32 %s1408_s9, 4  ;;  %s8558_s3 = scalar_lea.sflag [#allocation5], %s12974_s11  ;;  %s13354_s13 = int_to_ptr.vmem [resolvable:$true] %s8584_s13 }
0x36a4   : > { %s11748_s23 = scalar_lea.vmem %s13354_s13, 256  ;;  %s11867_s0 = smov [#allocation4]  }
0x36a5   : > { %p11749_p1 = scmp.ne.s32.totalorder %s13354_s13, %s11748_s23  ;;  %s11752_s14 = sshll.u32 %s11867_s0, 4  ;;  %s11753_s14 = int_to_ptr.vmem [resolvable:$false] %s11752_s14 }
0x36a6   : > { %s11754_s8 = scalar_lea.vmem %s11753_s14, 512  ;;  %p11755_p4 = scmp.lt.s32.totalorder %s13354_s13, %s11753_s14 }
0x36a7   : > { %p11750_p2 = pnand %p11749_p1, %p12148_p5  ;;  %p11756_p7 = scmp.lt.s32.totalorder %s11754_s8, %s11748_s23 }
0x36a9   : > { %p11751_p3 = pneg %p11750_p2  ;;  %p11757_p8 = por %p11756_p7, %p11755_p4 }
0x36ab   : > { %p11758_p9 = pnand %p11757_p8, %p11751_p3 }
0x3766   : > { %v10171_v44 = vpop.f32.mrb[148].mxu1 }
0x3767   : > { %v10172_v48 = vpop.f32.mrb[149].mxu1 }
0x3768   : > { %v10173_v49 = vadd.f32 %v10172_v48, %v10171_v44  ;;  %v10174_v4 = vpop.f32.mrb[150].mxu1 }
0x3769   : > { %v10175_v50 = vpop.f32.mrb[151].mxu1 }
0x376a   : > { %v8542_v51 = vadd.f32 %v10173_v49, %v9699_v47  ;;  %v10176_v2 = vadd.f32 %v10175_v50, %v10174_v4 }
0x376c   : > { %v8548_v54 = vadd.f32 %v8542_v51, %v13284_v63  ;;  %v8545_v55 = vadd.f32 %v10176_v2, %v9699_v47 }
0x376e   : > { %8550 = vst [vmem:[%s1408_s9] sm:$0xff] %v8548_v54  ;;  %v8549_v56 = vadd.f32 %v8545_v55, %v13287_v5 }
0x3770   : > { %8551 = vst [vmem:[%s1408_s9 + $0x8] sm:$0xff] %v8549_v56 }
0x3771   : > { %11761 = shalt.err (!%p11758_p9)
}
0x3772   : > { %s11762_s6 = scalar_lea.hbm %s13357_s5, 256  ;;  %s11766_s9 = scalar_lea.hbm %s12108_s12, 512 }
0x3773   : > { %p11763_p10 = scmp.ne.s32.totalorder %s13357_s5, %s11762_s6  ;;  %p11767_p0 = scmp.lt.u32.totalorder %s13357_s5, %s12108_s12 }
0x3774   : > { %p11768_p13 = scmp.lt.u32.totalorder %s11766_s9, %s11762_s6  ;;  %p11770_p2 = scmp.lt.u32.totalorder %s11762_s6, %s13357_s5 }
0x3775   : > { %p11764_p11 = pnand %p11763_p10, %p12148_p5 }
0x3776   : > { %p11769_p1 = por %p11768_p13, %p11767_p0 }
0x3777   : > { %p11765_p12 = pneg %p11764_p11 }
0x3778   : > { %p11771_p4 = por %p11770_p2, %p11769_p1 }
0x377a   : > { %p11772_p3 = pnand %p11771_p4, %p11765_p12 }
0x377c   : > { %11775 = shalt.err (!%p11772_p3)
}
0x377d   : > { %s11868_s1 = smov 128   ;;  %s11869_s23 = smov 8  }
0x377e   : > { %11138 = dma.vmem_to_hbm [thread:$0]  (%p12148_p5), %s13354_s13, 256, %s13357_s5, %s8558_s3, %s11868_s1, %s11868_s1, %s11869_s23  }
0x377f PF: > { %p11148_p7 = scmp.ge.s32.totalorder %s11814_s22, 2  ;;  %s8599_s0 = sand.u32 1, %s11802_s15  }
0x3780   : > { %s8600_s14 = scalar_lea.sflag [#allocation3], %s8599_s0 }
0x3781   : > { %p11142_p8 = pnand %p11148_p7, %p12152_p6 }
0x3783   : > { %11793 = dma.done.wait (!%p11142_p8), %s8600_s14, 128  }
0x3784   : > { %11795 = vsyncadd (!%p11142_p8), %s8600_s14, 4294967168  ;;  %s8609_s8 = scalar_lea.sflag [#allocation5], %s8599_s0 }
0x3785   : > { %11797 = dma.done.wait (!%p11142_p8), %s8609_s8, 256  }
0x3786   : > { %11799 = vsyncadd (!%p11142_p8), %s8609_s8, 4294967040  ;;  %p107_p5 = scmp.ge.s32.totalorder %s12135_s26, 4   ;;  %s13508_s15 = smov %s11806_s16 }
0x3787   : > { %s13509_s16 = smov %s11810_s18  ;;  %s13510_s18 = smov %s12146_s2 }
0x3788   : > { %s13511_s22 = smov %s12135_s26  ;;  %109 = sbr.rel (!%p107_p5) target bundleno = 97 (0x61), region = 367 }
0x378f   :  { %8614 = vsyncpa [#allocation3], 1 }
0x3790   :  { %8616 = vsyncpa [#allocation3 + $0x1], 1 }
0x3791   :  { %8617 = vsyncpa [#allocation5], 1 }
0x3792   :  { %8619 = vsyncpa [#allocation5 + $0x1], 1 }

</bundles_post_ra>
